<compile_context>
chip_gen: v5e
topology: v5e:2x2
jax: 0.10.0
libtpu: 0.0.40
codegen_flags: <defaults>
</compile_context>

<pallas_src>
import jax
import jax.numpy as jnp
import numpy as np
from jax import lax
from jax.experimental import pallas as pl
from jax.experimental.pallas import tpu as pltpu


def _make_kernel(H, W, L, C, Ch, Bb, acc_dtype=jnp.bfloat16):
    """Build the kernel closure for fixed spatial size / layer count / per-step batch."""
    Wp = W + 2                      # padded width (2 junk columns on the right)
    M = H * Wp                      # flattened lane-dense slab rows per image
    OFF = Wp + 1                    # flat offset of padded interior position (py=1, px=1)
    PAD_ROWS = (H + 2) * Wp + 2     # exactly bounds the largest tap window (offset 2*Wp+2)
    SCR_ROWS = ((PAD_ROWS + 15) // 16) * 16   # 16-row align per-image scratch base (bf16 pack)
    TAP_OFFS = tuple(ky * Wp + kx for ky in range(3) for kx in range(3))
    assert PAD_ROWS - OFF - M == OFF          # head and tail zero borders are both Wp+1 rows

    def kernel(x_ref, w1_ref, w2_ref, mask_ref, o_ref, hp_ref):
        # x_ref   : (Bb, M, C)        input slab(s), junk columns zeroed by the wrapper
        # w1_ref  : (1, 9*C, Ch)      this layer's 3x3 weights, tap-major (ky, kx, ci)
        # w2_ref  : (1, Ch, C)        this layer's 1x1 weights
        # mask_ref: (M, C)            1.0 on real columns, 0.0 on the 2 junk columns
        # o_ref   : (Bb, M, C)        resident residual accumulator / final output
        # hp_ref  : (Bb, SCR_ROWS, C) persistent flat zero-padded scratch (bf16)
        l = pl.program_id(1)

        @pl.when(l == 0)
        def _init():
            o_ref[...] = x_ref[...]                        # residual accumulator starts at x
            zb = jnp.zeros((OFF, C), acc_dtype)
            for bi in range(Bb):                           # zero only the pad border once
                hp_ref[bi, 0:OFF, :] = zb
                hp_ref[bi, OFF + M:PAD_ROWS, :] = zb

        mask = mask_ref[...]                               # (M, C) f32, resident

        for bi in range(Bb):                               # static unroll over folded batch
            x_cur = o_ref[bi]                              # (M, C) f32, resident across layers
            h = jnp.maximum(x_cur, 0.0)                    # ReLU in f32
            # One contiguous store places ReLU(x) into the padded interior; the two
            # (zero) junk columns land exactly on the left/right pad columns.
            hp_ref[bi, OFF:OFF + M, :] = h.astype(acc_dtype)

            # 3x3 conv: 9 accumulating K=128 bf16 dots straight from the padded scratch
            # windows (no materialized im2col slab).
            acc = jnp.dot(hp_ref[bi, TAP_OFFS[0]:TAP_OFFS[0] + M, :],
                          w1_ref[0, 0:C, :], preferred_element_type=jnp.float32)
            for t in range(1, 9):
                toff = TAP_OFFS[t]
                acc = acc + jnp.dot(hp_ref[bi, toff:toff + M, :],
                                    w1_ref[0, t * C:(t + 1) * C, :],
                                    preferred_element_type=jnp.float32)

            h2 = jnp.maximum(acc, 0.0).astype(acc_dtype)                     # ReLU -> bf16
            y = jnp.dot(h2, w2_ref[0], preferred_element_type=jnp.float32)   # 1x1 conv
            y = y * mask            # keep the zero pad columns valid for the next layer
            new_x = x_cur + y       # residual add (f32)
            o_ref[bi] = new_x

            @pl.when(l == L - 1)
            def _final():
                o_ref[bi] = jnp.maximum(new_x, 0.0)        # final ReLU of the stack

    return kernel, M, PAD_ROWS, SCR_ROWS


def _single_tensorcore_chip():
    """v5e / v6e have one TensorCore per chip; v4 / v5p / v7x have two."""
    try:
        kind = jax.devices()[0].device_kind.lower()
    except Exception:
        return True
    return not any(tag in kind for tag in ("v4", "v5p", "v7"))


def residual_stack(x_nchw, w1, w2, *, batch_fold=None):
    """x_nchw: (B, C, H, W) float32 like PyTorch.
    w1: (L, 3, 3, C, Ch) HWIO per layer; w2: (L, Ch, C) (in=Ch, out=C)."""
    B, C, H, W = x_nchw.shape
    L, Ch = w1.shape[0], w1.shape[-1]
    if batch_fold is None:
        batch_fold = _single_tensorcore_chip()
    Bb = B if batch_fold else 1        # images processed per grid step
    NBg = B // Bb                      # batch grid extent

    kernel, M, PAD_ROWS, SCR_ROWS = _make_kernel(H, W, L, C, Ch, Bb)
    Wp = W + 2

    # Layout plumbing at the XLA boundary (once, not per layer):
    # NCHW -> NHWC -> 2 zero junk columns on the right -> lane-dense (M, C) slab.
    x_nhwc = jnp.transpose(x_nchw, (0, 2, 3, 1))
    x_ext = jnp.pad(x_nhwc, ((0, 0), (0, 0), (0, 2), (0, 0))).reshape(B, M, C)

    w1_flat = w1.reshape(L, 9 * C, Ch).astype(jnp.bfloat16)   # tap-major (ky,kx,ci) flattened
    w2_bf16 = w2.astype(jnp.bfloat16)

    col = jnp.arange(M, dtype=jnp.int32) % Wp
    mask = jnp.broadcast_to((col < W)[:, None], (M, C)).astype(x_ext.dtype)

    out_ext = pl.pallas_call(
        kernel,
        out_shape=jax.ShapeDtypeStruct((B, M, C), x_ext.dtype),
        grid_spec=pltpu.PrefetchScalarGridSpec(
            num_scalar_prefetch=0,
            grid=(NBg, L),
            in_specs=[
                pl.BlockSpec((Bb, M, C), lambda b, l: (b, 0, 0)),        # input slab(s)
                pl.BlockSpec((1, 9 * C, Ch), lambda b, l: (l, 0, 0)),    # per-layer 3x3 weights
                pl.BlockSpec((1, Ch, C), lambda b, l: (l, 0, 0)),        # per-layer 1x1 weights
                pl.BlockSpec((M, C), lambda b, l: (0, 0)),               # resident junk-col mask
            ],
            out_specs=pl.BlockSpec((Bb, M, C), lambda b, l: (b, 0, 0)),  # resident residual
            scratch_shapes=[pltpu.VMEM((Bb, SCR_ROWS, C), jnp.bfloat16)],
        ),
        compiler_params=pltpu.CompilerParams(
            dimension_semantics=("parallel", "arbitrary"),
            vmem_limit_bytes=32 * 1024 * 1024,
        ),
    )(x_ext, w1_flat, w2_bf16, mask)

    out = out_ext.reshape(B, H, Wp, C)[:, :, :W, :]   # drop junk columns
    return jnp.transpose(out, (0, 3, 1, 2))           # NHWC -> NCHW


def ref_forward(x, w1, w2):
    """Pure-JAX f32 reference matching the PyTorch module (NCHW)."""
    L = w1.shape[0]
    for l in range(L):
        h = jax.nn.relu(x)
        k1 = jnp.transpose(w1[l], (3, 2, 0, 1))               # HWIO -> OIHW
        h = lax.conv_general_dilated(
            h, k1, (1, 1), "SAME",
            dimension_numbers=("NCHW", "OIHW", "NCHW"),
            precision=lax.Precision.HIGHEST)
        h = jax.nn.relu(h)
        k2 = jnp.transpose(w2[l], (1, 0))[:, :, None, None]   # (C, Ch, 1, 1) OIHW
        h = lax.conv_general_dilated(
            h, k2, (1, 1), "VALID",
            dimension_numbers=("NCHW", "OIHW", "NCHW"),
            precision=lax.Precision.HIGHEST)
        x = x + h
    return jax.nn.relu(x)


if __name__ == "__main__":
    # Standard VQ-VAE residual-stack config at a small latent spatial size:
    # in_channels = num_hiddens = 128 (lane-dense on TPU), num_residual_hiddens = 32.
    B, C, H, W = 2, 128, 16, 16
    L, Ch = 2, 32

    key = jax.random.PRNGKey(0)
    kx_, k1, k2 = jax.random.split(key, 3)
    x = jax.random.normal(kx_, (B, C, H, W), dtype=jnp.float32)
    w1 = jax.random.normal(k1, (L, 3, 3, C, Ch), dtype=jnp.float32) * 0.05
    w2 = jax.random.normal(k2, (L, Ch, C), dtype=jnp.float32) * 0.05

    out = residual_stack(x, w1, w2)
    jax.block_until_ready(out)

    ref = ref_forward(x, w1, w2)
    assert out.shape == ref.shape == (B, C, H, W)
    # bf16 MXU operands (f32 accumulation): tolerance loosened vs the all-f32 version.
    np.testing.assert_allclose(np.asarray(out), np.asarray(ref), atol=3e-2, rtol=3e-2)
    print("KERNEL_OK")
</pallas_src>

<mosaic_0001>
module attributes {stable_mosaic.version = 11 : i64} {
  func.func @kernel(%arg0: i32, %arg1: i32, %arg2: memref<2x288x128xf32, #tpu.memory_space<vmem>>, %arg3: memref<1x1152x32xbf16, #tpu.memory_space<vmem>>, %arg4: memref<1x32x128xbf16, #tpu.memory_space<vmem>>, %arg5: memref<288x128xf32, #tpu.memory_space<vmem>>, %arg6: memref<2x288x128xf32, #tpu.memory_space<vmem>>, %arg7: memref<2x336x128xbf16, #tpu.memory_space<vmem>>) attributes {dimension_semantics = [#tpu.dimension_semantics<parallel>, #tpu.dimension_semantics<arbitrary>], iteration_bounds = array<i64: 1, 2>, scalar_prefetch = 0 : i64, scratch_operands = 1 : i64, tpu.core_type = #tpu.core_type<tc>, window_params = [{transform_indices = @transform_0, window_bounds = array<i64: 2, 288, 128>}, {transform_indices = @transform_1, window_bounds = array<i64: 1, 1152, 32>}, {transform_indices = @transform_2, window_bounds = array<i64: 1, 32, 128>}, {pipeline_mode = #tpu.pipeline_mode<synchronous>, transform_indices = @transform_3, window_bounds = array<i64: 288, 128>}, {transform_indices = @transform_4, window_bounds = array<i64: 2, 288, 128>}]} {
    %c0_i32 = arith.constant 0 : i32
    %0 = arith.cmpi eq, %arg1, %c0_i32 : i32
    %1 = arith.extui %0 : i1 to i32
    %c0_i32_0 = arith.constant 0 : i32
    %2 = arith.cmpi ne, %1, %c0_i32_0 : i32
    scf.if %2 {
      %c0_144 = arith.constant 0 : index
      %c0_145 = arith.constant 0 : index
      %c0_146 = arith.constant 0 : index
      %154 = vector.load %arg2[%c0_144, %c0_145, %c0_146] : memref<2x288x128xf32, #tpu.memory_space<vmem>>, vector<2x288x128xf32>
      %c0_147 = arith.constant 0 : index
      %c0_148 = arith.constant 0 : index
      %c0_149 = arith.constant 0 : index
      %155 = vector.load %arg6[%c0_147, %c0_148, %c0_149] : memref<2x288x128xf32, #tpu.memory_space<vmem>>, vector<2x288x128xf32>
      tpu.vector_store %arg6[%c0_147, %c0_148, %c0_149], %154 {strides = array<i32>} : memref<2x288x128xf32, #tpu.memory_space<vmem>>, vector<2x288x128xf32>,
      %cst_150 = arith.constant 0.000000e+00 : bf16
      %156 = vector.broadcast %cst_150 : bf16 to vector<19x128xbf16>
      %c0_151 = arith.constant 0 : index
      %c0_152 = arith.constant 0 : index
      %c0_153 = arith.constant 0 : index
      %157 = vector.load %arg7[%c0_151, %c0_152, %c0_153] : memref<2x336x128xbf16, #tpu.memory_space<vmem>>, vector<1x19x128xbf16>
      %158 = vector.shape_cast %157 : vector<1x19x128xbf16> to vector<19x128xbf16>
      %159 = vector.shape_cast %156 : vector<19x128xbf16> to vector<1x19x128xbf16>
      tpu.vector_store %arg7[%c0_151, %c0_152, %c0_153], %159 {strides = array<i32>} : memref<2x336x128xbf16, #tpu.memory_space<vmem>>, vector<1x19x128xbf16>,
      %c0_154 = arith.constant 0 : index
      %c307 = arith.constant 307 : index
      %c0_155 = arith.constant 0 : index
      %160 = vector.load %arg7[%c0_154, %c307, %c0_155] : memref<2x336x128xbf16, #tpu.memory_space<vmem>>, vector<1x19x128xbf16>
      %161 = vector.shape_cast %160 : vector<1x19x128xbf16> to vector<19x128xbf16>
      %162 = vector.shape_cast %156 : vector<19x128xbf16> to vector<1x19x128xbf16>
      tpu.vector_store %arg7[%c0_154, %c307, %c0_155], %162 {strides = array<i32>} : memref<2x336x128xbf16, #tpu.memory_space<vmem>>, vector<1x19x128xbf16>,
      %c1_156 = arith.constant 1 : index
      %c0_157 = arith.constant 0 : index
      %c0_158 = arith.constant 0 : index
      %163 = vector.load %arg7[%c1_156, %c0_157, %c0_158] : memref<2x336x128xbf16, #tpu.memory_space<vmem>>, vector<1x19x128xbf16>
      %164 = vector.shape_cast %163 : vector<1x19x128xbf16> to vector<19x128xbf16>
      %165 = vector.shape_cast %156 : vector<19x128xbf16> to vector<1x19x128xbf16>
      tpu.vector_store %arg7[%c1_156, %c0_157, %c0_158], %165 {strides = array<i32>} : memref<2x336x128xbf16, #tpu.memory_space<vmem>>, vector<1x19x128xbf16>,
      %c1_159 = arith.constant 1 : index
      %c307_160 = arith.constant 307 : index
      %c0_161 = arith.constant 0 : index
      %166 = vector.load %arg7[%c1_159, %c307_160, %c0_161] : memref<2x336x128xbf16, #tpu.memory_space<vmem>>, vector<1x19x128xbf16>
      %167 = vector.shape_cast %166 : vector<1x19x128xbf16> to vector<19x128xbf16>
      %168 = vector.shape_cast %156 : vector<19x128xbf16> to vector<1x19x128xbf16>
      tpu.vector_store %arg7[%c1_159, %c307_160, %c0_161], %168 {strides = array<i32>} : memref<2x336x128xbf16, #tpu.memory_space<vmem>>, vector<1x19x128xbf16>,
    } else {
    }
    %c0 = arith.constant 0 : index
    %c0_1 = arith.constant 0 : index
    %3 = vector.load %arg5[%c0, %c0_1] : memref<288x128xf32, #tpu.memory_space<vmem>>, vector<288x128xf32>
    %c0_2 = arith.constant 0 : index
    %c0_3 = arith.constant 0 : index
    %c0_4 = arith.constant 0 : index
    %4 = vector.load %arg6[%c0_2, %c0_3, %c0_4] : memref<2x288x128xf32, #tpu.memory_space<vmem>>, vector<1x288x128xf32>
    %5 = vector.shape_cast %4 : vector<1x288x128xf32> to vector<288x128xf32>
    %cst = arith.constant 0.000000e+00 : f32
    %6 = vector.broadcast %cst : f32 to vector<288x128xf32>
    %7 = arith.maximumf %5, %6 : vector<288x128xf32>
    %8 = arith.truncf %7 : vector<288x128xf32> to vector<288x128xbf16>
    %c0_5 = arith.constant 0 : index
    %c19 = arith.constant 19 : index
    %c0_6 = arith.constant 0 : index
    %9 = vector.load %arg7[%c0_5, %c19, %c0_6] : memref<2x336x128xbf16, #tpu.memory_space<vmem>>, vector<1x288x128xbf16>
    %10 = vector.shape_cast %9 : vector<1x288x128xbf16> to vector<288x128xbf16>
    %11 = vector.shape_cast %8 : vector<288x128xbf16> to vector<1x288x128xbf16>
    tpu.vector_store %arg7[%c0_5, %c19, %c0_6], %11 {strides = array<i32>} : memref<2x336x128xbf16, #tpu.memory_space<vmem>>, vector<1x288x128xbf16>,
    %c0_7 = arith.constant 0 : index
    %c0_8 = arith.constant 0 : index
    %c0_9 = arith.constant 0 : index
    %12 = vector.load %arg7[%c0_7, %c0_8, %c0_9] : memref<2x336x128xbf16, #tpu.memory_space<vmem>>, vector<1x288x128xbf16>
    %13 = vector.shape_cast %12 : vector<1x288x128xbf16> to vector<288x128xbf16>
    %c0_10 = arith.constant 0 : index
    %c0_11 = arith.constant 0 : index
    %c0_12 = arith.constant 0 : index
    %14 = vector.load %arg3[%c0_10, %c0_11, %c0_12] : memref<1x1152x32xbf16, #tpu.memory_space<vmem>>, vector<1x128x32xbf16>
    %15 = vector.shape_cast %14 : vector<1x128x32xbf16> to vector<128x32xbf16>
    %cst_13 = arith.constant dense<0.000000e+00> : vector<288x32xf32>
    %16 = tpu.matmul %13, %15, %cst_13 {dimension_numbers = #tpu.dot_dimension_numbers<[1], [0], [0], [1], [0, 0, 1, 1], [], []>} : vector<288x128xbf16>, vector<128x32xbf16>, vector<288x32xf32> -> vector<288x32xf32>
    %c0_14 = arith.constant 0 : index
    %c1 = arith.constant 1 : index
    %c0_15 = arith.constant 0 : index
    %17 = vector.load %arg7[%c0_14, %c1, %c0_15] : memref<2x336x128xbf16, #tpu.memory_space<vmem>>, vector<1x288x128xbf16>
    %18 = vector.shape_cast %17 : vector<1x288x128xbf16> to vector<288x128xbf16>
    %c0_16 = arith.constant 0 : index
    %c128 = arith.constant 128 : index
    %c0_17 = arith.constant 0 : index
    %19 = vector.load %arg3[%c0_16, %c128, %c0_17] : memref<1x1152x32xbf16, #tpu.memory_space<vmem>>, vector<1x128x32xbf16>
    %20 = vector.shape_cast %19 : vector<1x128x32xbf16> to vector<128x32xbf16>
    %cst_18 = arith.constant dense<0.000000e+00> : vector<288x32xf32>
    %21 = tpu.matmul %18, %20, %cst_18 {dimension_numbers = #tpu.dot_dimension_numbers<[1], [0], [0], [1], [0, 0, 1, 1], [], []>} : vector<288x128xbf16>, vector<128x32xbf16>, vector<288x32xf32> -> vector<288x32xf32>
    %22 = arith.addf %16, %21 : vector<288x32xf32>
    %c0_19 = arith.constant 0 : index
    %c2 = arith.constant 2 : index
    %c0_20 = arith.constant 0 : index
    %23 = vector.load %arg7[%c0_19, %c2, %c0_20] : memref<2x336x128xbf16, #tpu.memory_space<vmem>>, vector<1x288x128xbf16>
    %24 = vector.shape_cast %23 : vector<1x288x128xbf16> to vector<288x128xbf16>
    %c0_21 = arith.constant 0 : index
    %c256 = arith.constant 256 : index
    %c0_22 = arith.constant 0 : index
    %25 = vector.load %arg3[%c0_21, %c256, %c0_22] : memref<1x1152x32xbf16, #tpu.memory_space<vmem>>, vector<1x128x32xbf16>
    %26 = vector.shape_cast %25 : vector<1x128x32xbf16> to vector<128x32xbf16>
    %cst_23 = arith.constant dense<0.000000e+00> : vector<288x32xf32>
    %27 = tpu.matmul %24, %26, %cst_23 {dimension_numbers = #tpu.dot_dimension_numbers<[1], [0], [0], [1], [0, 0, 1, 1], [], []>} : vector<288x128xbf16>, vector<128x32xbf16>, vector<288x32xf32> -> vector<288x32xf32>
    %28 = arith.addf %22, %27 : vector<288x32xf32>
    %c0_24 = arith.constant 0 : index
    %c18 = arith.constant 18 : index
    %c0_25 = arith.constant 0 : index
    %29 = vector.load %arg7[%c0_24, %c18, %c0_25] : memref<2x336x128xbf16, #tpu.memory_space<vmem>>, vector<1x288x128xbf16>
    %30 = vector.shape_cast %29 : vector<1x288x128xbf16> to vector<288x128xbf16>
    %c0_26 = arith.constant 0 : index
    %c384 = arith.constant 384 : index
    %c0_27 = arith.constant 0 : index
    %31 = vector.load %arg3[%c0_26, %c384, %c0_27] : memref<1x1152x32xbf16, #tpu.memory_space<vmem>>, vector<1x128x32xbf16>
    %32 = vector.shape_cast %31 : vector<1x128x32xbf16> to vector<128x32xbf16>
    %cst_28 = arith.constant dense<0.000000e+00> : vector<288x32xf32>
    %33 = tpu.matmul %30, %32, %cst_28 {dimension_numbers = #tpu.dot_dimension_numbers<[1], [0], [0], [1], [0, 0, 1, 1], [], []>} : vector<288x128xbf16>, vector<128x32xbf16>, vector<288x32xf32> -> vector<288x32xf32>
    %34 = arith.addf %28, %33 : vector<288x32xf32>
    %c0_29 = arith.constant 0 : index
    %c19_30 = arith.constant 19 : index
    %c0_31 = arith.constant 0 : index
    %35 = vector.load %arg7[%c0_29, %c19_30, %c0_31] : memref<2x336x128xbf16, #tpu.memory_space<vmem>>, vector<1x288x128xbf16>
    %36 = vector.shape_cast %35 : vector<1x288x128xbf16> to vector<288x128xbf16>
    %c0_32 = arith.constant 0 : index
    %c512 = arith.constant 512 : index
    %c0_33 = arith.constant 0 : index
    %37 = vector.load %arg3[%c0_32, %c512, %c0_33] : memref<1x1152x32xbf16, #tpu.memory_space<vmem>>, vector<1x128x32xbf16>
    %38 = vector.shape_cast %37 : vector<1x128x32xbf16> to vector<128x32xbf16>
    %cst_34 = arith.constant dense<0.000000e+00> : vector<288x32xf32>
    %39 = tpu.matmul %36, %38, %cst_34 {dimension_numbers = #tpu.dot_dimension_numbers<[1], [0], [0], [1], [0, 0, 1, 1], [], []>} : vector<288x128xbf16>, vector<128x32xbf16>, vector<288x32xf32> -> vector<288x32xf32>
    %40 = arith.addf %34, %39 : vector<288x32xf32>
    %c0_35 = arith.constant 0 : index
    %c20 = arith.constant 20 : index
    %c0_36 = arith.constant 0 : index
    %41 = vector.load %arg7[%c0_35, %c20, %c0_36] : memref<2x336x128xbf16, #tpu.memory_space<vmem>>, vector<1x288x128xbf16>
    %42 = vector.shape_cast %41 : vector<1x288x128xbf16> to vector<288x128xbf16>
    %c0_37 = arith.constant 0 : index
    %c640 = arith.constant 640 : index
    %c0_38 = arith.constant 0 : index
    %43 = vector.load %arg3[%c0_37, %c640, %c0_38] : memref<1x1152x32xbf16, #tpu.memory_space<vmem>>, vector<1x128x32xbf16>
    %44 = vector.shape_cast %43 : vector<1x128x32xbf16> to vector<128x32xbf16>
    %cst_39 = arith.constant dense<0.000000e+00> : vector<288x32xf32>
    %45 = tpu.matmul %42, %44, %cst_39 {dimension_numbers = #tpu.dot_dimension_numbers<[1], [0], [0], [1], [0, 0, 1, 1], [], []>} : vector<288x128xbf16>, vector<128x32xbf16>, vector<288x32xf32> -> vector<288x32xf32>
    %46 = arith.addf %40, %45 : vector<288x32xf32>
    %c0_40 = arith.constant 0 : index
    %c36 = arith.constant 36 : index
    %c0_41 = arith.constant 0 : index
    %47 = vector.load %arg7[%c0_40, %c36, %c0_41] : memref<2x336x128xbf16, #tpu.memory_space<vmem>>, vector<1x288x128xbf16>
    %48 = vector.shape_cast %47 : vector<1x288x128xbf16> to vector<288x128xbf16>
    %c0_42 = arith.constant 0 : index
    %c768 = arith.constant 768 : index
    %c0_43 = arith.constant 0 : index
    %49 = vector.load %arg3[%c0_42, %c768, %c0_43] : memref<1x1152x32xbf16, #tpu.memory_space<vmem>>, vector<1x128x32xbf16>
    %50 = vector.shape_cast %49 : vector<1x128x32xbf16> to vector<128x32xbf16>
    %cst_44 = arith.constant dense<0.000000e+00> : vector<288x32xf32>
    %51 = tpu.matmul %48, %50, %cst_44 {dimension_numbers = #tpu.dot_dimension_numbers<[1], [0], [0], [1], [0, 0, 1, 1], [], []>} : vector<288x128xbf16>, vector<128x32xbf16>, vector<288x32xf32> -> vector<288x32xf32>
    %52 = arith.addf %46, %51 : vector<288x32xf32>
    %c0_45 = arith.constant 0 : index
    %c37 = arith.constant 37 : index
    %c0_46 = arith.constant 0 : index
    %53 = vector.load %arg7[%c0_45, %c37, %c0_46] : memref<2x336x128xbf16, #tpu.memory_space<vmem>>, vector<1x288x128xbf16>
    %54 = vector.shape_cast %53 : vector<1x288x128xbf16> to vector<288x128xbf16>
    %c0_47 = arith.constant 0 : index
    %c896 = arith.constant 896 : index
    %c0_48 = arith.constant 0 : index
    %55 = vector.load %arg3[%c0_47, %c896, %c0_48] : memref<1x1152x32xbf16, #tpu.memory_space<vmem>>, vector<1x128x32xbf16>
    %56 = vector.shape_cast %55 : vector<1x128x32xbf16> to vector<128x32xbf16>
    %cst_49 = arith.constant dense<0.000000e+00> : vector<288x32xf32>
    %57 = tpu.matmul %54, %56, %cst_49 {dimension_numbers = #tpu.dot_dimension_numbers<[1], [0], [0], [1], [0, 0, 1, 1], [], []>} : vector<288x128xbf16>, vector<128x32xbf16>, vector<288x32xf32> -> vector<288x32xf32>
    %58 = arith.addf %52, %57 : vector<288x32xf32>
    %c0_50 = arith.constant 0 : index
    %c38 = arith.constant 38 : index
    %c0_51 = arith.constant 0 : index
    %59 = vector.load %arg7[%c0_50, %c38, %c0_51] : memref<2x336x128xbf16, #tpu.memory_space<vmem>>, vector<1x288x128xbf16>
    %60 = vector.shape_cast %59 : vector<1x288x128xbf16> to vector<288x128xbf16>
    %c0_52 = arith.constant 0 : index
    %c1024 = arith.constant 1024 : index
    %c0_53 = arith.constant 0 : index
    %61 = vector.load %arg3[%c0_52, %c1024, %c0_53] : memref<1x1152x32xbf16, #tpu.memory_space<vmem>>, vector<1x128x32xbf16>
    %62 = vector.shape_cast %61 : vector<1x128x32xbf16> to vector<128x32xbf16>
    %cst_54 = arith.constant dense<0.000000e+00> : vector<288x32xf32>
    %63 = tpu.matmul %60, %62, %cst_54 {dimension_numbers = #tpu.dot_dimension_numbers<[1], [0], [0], [1], [0, 0, 1, 1], [], []>} : vector<288x128xbf16>, vector<128x32xbf16>, vector<288x32xf32> -> vector<288x32xf32>
    %64 = arith.addf %58, %63 : vector<288x32xf32>
    %cst_55 = arith.constant 0.000000e+00 : f32
    %65 = vector.broadcast %cst_55 : f32 to vector<288x32xf32>
    %66 = arith.maximumf %64, %65 : vector<288x32xf32>
    %67 = arith.truncf %66 : vector<288x32xf32> to vector<288x32xbf16>
    %c0_56 = arith.constant 0 : index
    %c0_57 = arith.constant 0 : index
    %c0_58 = arith.constant 0 : index
    %68 = vector.load %arg4[%c0_56, %c0_57, %c0_58] : memref<1x32x128xbf16, #tpu.memory_space<vmem>>, vector<1x32x128xbf16>
    %69 = vector.shape_cast %68 : vector<1x32x128xbf16> to vector<32x128xbf16>
    %cst_59 = arith.constant dense<0.000000e+00> : vector<288x128xf32>
    %70 = tpu.matmul %67, %69, %cst_59 {dimension_numbers = #tpu.dot_dimension_numbers<[1], [0], [0], [1], [0, 0, 1, 1], [], []>} : vector<288x32xbf16>, vector<32x128xbf16>, vector<288x128xf32> -> vector<288x128xf32>
    %71 = arith.mulf %70, %3 : vector<288x128xf32>
    %72 = arith.addf %5, %71 : vector<288x128xf32>
    %c0_60 = arith.constant 0 : index
    %c0_61 = arith.constant 0 : index
    %c0_62 = arith.constant 0 : index
    %73 = vector.load %arg6[%c0_60, %c0_61, %c0_62] : memref<2x288x128xf32, #tpu.memory_space<vmem>>, vector<1x288x128xf32>
    %74 = vector.shape_cast %73 : vector<1x288x128xf32> to vector<288x128xf32>
    %75 = vector.shape_cast %72 : vector<288x128xf32> to vector<1x288x128xf32>
    tpu.vector_store %arg6[%c0_60, %c0_61, %c0_62], %75 {strides = array<i32>} : memref<2x288x128xf32, #tpu.memory_space<vmem>>, vector<1x288x128xf32>,
    %c1_i32 = arith.constant 1 : i32
    %76 = arith.cmpi eq, %arg1, %c1_i32 : i32
    %77 = arith.extui %76 : i1 to i32
    %c0_i32_63 = arith.constant 0 : i32
    %78 = arith.cmpi ne, %77, %c0_i32_63 : i32
    scf.if %78 {
      %cst_144 = arith.constant 0.000000e+00 : f32
      %154 = vector.broadcast %cst_144 : f32 to vector<288x128xf32>
      %155 = arith.maximumf %72, %154 : vector<288x128xf32>
      %c0_145 = arith.constant 0 : index
      %c0_146 = arith.constant 0 : index
      %c0_147 = arith.constant 0 : index
      %156 = vector.load %arg6[%c0_145, %c0_146, %c0_147] : memref<2x288x128xf32, #tpu.memory_space<vmem>>, vector<1x288x128xf32>
      %157 = vector.shape_cast %156 : vector<1x288x128xf32> to vector<288x128xf32>
      %158 = vector.shape_cast %155 : vector<288x128xf32> to vector<1x288x128xf32>
      tpu.vector_store %arg6[%c0_145, %c0_146, %c0_147], %158 {strides = array<i32>} : memref<2x288x128xf32, #tpu.memory_space<vmem>>, vector<1x288x128xf32>,
    } else {
    }
    %c1_64 = arith.constant 1 : index
    %c0_65 = arith.constant 0 : index
    %c0_66 = arith.constant 0 : index
    %79 = vector.load %arg6[%c1_64, %c0_65, %c0_66] : memref<2x288x128xf32, #tpu.memory_space<vmem>>, vector<1x288x128xf32>
    %80 = vector.shape_cast %79 : vector<1x288x128xf32> to vector<288x128xf32>
    %cst_67 = arith.constant 0.000000e+00 : f32
    %81 = vector.broadcast %cst_67 : f32 to vector<288x128xf32>
    %82 = arith.maximumf %80, %81 : vector<288x128xf32>
    %83 = arith.truncf %82 : vector<288x128xf32> to vector<288x128xbf16>
    %c1_68 = arith.constant 1 : index
    %c19_69 = arith.constant 19 : index
    %c0_70 = arith.constant 0 : index
    %84 = vector.load %arg7[%c1_68, %c19_69, %c0_70] : memref<2x336x128xbf16, #tpu.memory_space<vmem>>, vector<1x288x128xbf16>
    %85 = vector.shape_cast %84 : vector<1x288x128xbf16> to vector<288x128xbf16>
    %86 = vector.shape_cast %83 : vector<288x128xbf16> to vector<1x288x128xbf16>
    tpu.vector_store %arg7[%c1_68, %c19_69, %c0_70], %86 {strides = array<i32>} : memref<2x336x128xbf16, #tpu.memory_space<vmem>>, vector<1x288x128xbf16>,
    %c1_71 = arith.constant 1 : index
    %c0_72 = arith.constant 0 : index
    %c0_73 = arith.constant 0 : index
    %87 = vector.load %arg7[%c1_71, %c0_72, %c0_73] : memref<2x336x128xbf16, #tpu.memory_space<vmem>>, vector<1x288x128xbf16>
    %88 = vector.shape_cast %87 : vector<1x288x128xbf16> to vector<288x128xbf16>
    %c0_74 = arith.constant 0 : index
    %c0_75 = arith.constant 0 : index
    %c0_76 = arith.constant 0 : index
    %89 = vector.load %arg3[%c0_74, %c0_75, %c0_76] : memref<1x1152x32xbf16, #tpu.memory_space<vmem>>, vector<1x128x32xbf16>
    %90 = vector.shape_cast %89 : vector<1x128x32xbf16> to vector<128x32xbf16>
    %cst_77 = arith.constant dense<0.000000e+00> : vector<288x32xf32>
    %91 = tpu.matmul %88, %90, %cst_77 {dimension_numbers = #tpu.dot_dimension_numbers<[1], [0], [0], [1], [0, 0, 1, 1], [], []>} : vector<288x128xbf16>, vector<128x32xbf16>, vector<288x32xf32> -> vector<288x32xf32>
    %c1_78 = arith.constant 1 : index
    %c1_79 = arith.constant 1 : index
    %c0_80 = arith.constant 0 : index
    %92 = vector.load %arg7[%c1_78, %c1_79, %c0_80] : memref<2x336x128xbf16, #tpu.memory_space<vmem>>, vector<1x288x128xbf16>
    %93 = vector.shape_cast %92 : vector<1x288x128xbf16> to vector<288x128xbf16>
    %c0_81 = arith.constant 0 : index
    %c128_82 = arith.constant 128 : index
    %c0_83 = arith.constant 0 : index
    %94 = vector.load %arg3[%c0_81, %c128_82, %c0_83] : memref<1x1152x32xbf16, #tpu.memory_space<vmem>>, vector<1x128x32xbf16>
    %95 = vector.shape_cast %94 : vector<1x128x32xbf16> to vector<128x32xbf16>
    %cst_84 = arith.constant dense<0.000000e+00> : vector<288x32xf32>
    %96 = tpu.matmul %93, %95, %cst_84 {dimension_numbers = #tpu.dot_dimension_numbers<[1], [0], [0], [1], [0, 0, 1, 1], [], []>} : vector<288x128xbf16>, vector<128x32xbf16>, vector<288x32xf32> -> vector<288x32xf32>
    %97 = arith.addf %91, %96 : vector<288x32xf32>
    %c1_85 = arith.constant 1 : index
    %c2_86 = arith.constant 2 : index
    %c0_87 = arith.constant 0 : index
    %98 = vector.load %arg7[%c1_85, %c2_86, %c0_87] : memref<2x336x128xbf16, #tpu.memory_space<vmem>>, vector<1x288x128xbf16>
    %99 = vector.shape_cast %98 : vector<1x288x128xbf16> to vector<288x128xbf16>
    %c0_88 = arith.constant 0 : index
    %c256_89 = arith.constant 256 : index
    %c0_90 = arith.constant 0 : index
    %100 = vector.load %arg3[%c0_88, %c256_89, %c0_90] : memref<1x1152x32xbf16, #tpu.memory_space<vmem>>, vector<1x128x32xbf16>
    %101 = vector.shape_cast %100 : vector<1x128x32xbf16> to vector<128x32xbf16>
    %cst_91 = arith.constant dense<0.000000e+00> : vector<288x32xf32>
    %102 = tpu.matmul %99, %101, %cst_91 {dimension_numbers = #tpu.dot_dimension_numbers<[1], [0], [0], [1], [0, 0, 1, 1], [], []>} : vector<288x128xbf16>, vector<128x32xbf16>, vector<288x32xf32> -> vector<288x32xf32>
    %103 = arith.addf %97, %102 : vector<288x32xf32>
    %c1_92 = arith.constant 1 : index
    %c18_93 = arith.constant 18 : index
    %c0_94 = arith.constant 0 : index
    %104 = vector.load %arg7[%c1_92, %c18_93, %c0_94] : memref<2x336x128xbf16, #tpu.memory_space<vmem>>, vector<1x288x128xbf16>
    %105 = vector.shape_cast %104 : vector<1x288x128xbf16> to vector<288x128xbf16>
    %c0_95 = arith.constant 0 : index
    %c384_96 = arith.constant 384 : index
    %c0_97 = arith.constant 0 : index
    %106 = vector.load %arg3[%c0_95, %c384_96, %c0_97] : memref<1x1152x32xbf16, #tpu.memory_space<vmem>>, vector<1x128x32xbf16>
    %107 = vector.shape_cast %106 : vector<1x128x32xbf16> to vector<128x32xbf16>
    %cst_98 = arith.constant dense<0.000000e+00> : vector<288x32xf32>
    %108 = tpu.matmul %105, %107, %cst_98 {dimension_numbers = #tpu.dot_dimension_numbers<[1], [0], [0], [1], [0, 0, 1, 1], [], []>} : vector<288x128xbf16>, vector<128x32xbf16>, vector<288x32xf32> -> vector<288x32xf32>
    %109 = arith.addf %103, %108 : vector<288x32xf32>
    %c1_99 = arith.constant 1 : index
    %c19_100 = arith.constant 19 : index
    %c0_101 = arith.constant 0 : index
    %110 = vector.load %arg7[%c1_99, %c19_100, %c0_101] : memref<2x336x128xbf16, #tpu.memory_space<vmem>>, vector<1x288x128xbf16>
    %111 = vector.shape_cast %110 : vector<1x288x128xbf16> to vector<288x128xbf16>
    %c0_102 = arith.constant 0 : index
    %c512_103 = arith.constant 512 : index
    %c0_104 = arith.constant 0 : index
    %112 = vector.load %arg3[%c0_102, %c512_103, %c0_104] : memref<1x1152x32xbf16, #tpu.memory_space<vmem>>, vector<1x128x32xbf16>
    %113 = vector.shape_cast %112 : vector<1x128x32xbf16> to vector<128x32xbf16>
    %cst_105 = arith.constant dense<0.000000e+00> : vector<288x32xf32>
    %114 = tpu.matmul %111, %113, %cst_105 {dimension_numbers = #tpu.dot_dimension_numbers<[1], [0], [0], [1], [0, 0, 1, 1], [], []>} : vector<288x128xbf16>, vector<128x32xbf16>, vector<288x32xf32> -> vector<288x32xf32>
    %115 = arith.addf %109, %114 : vector<288x32xf32>
    %c1_106 = arith.constant 1 : index
    %c20_107 = arith.constant 20 : index
    %c0_108 = arith.constant 0 : index
    %116 = vector.load %arg7[%c1_106, %c20_107, %c0_108] : memref<2x336x128xbf16, #tpu.memory_space<vmem>>, vector<1x288x128xbf16>
    %117 = vector.shape_cast %116 : vector<1x288x128xbf16> to vector<288x128xbf16>
    %c0_109 = arith.constant 0 : index
    %c640_110 = arith.constant 640 : index
    %c0_111 = arith.constant 0 : index
    %118 = vector.load %arg3[%c0_109, %c640_110, %c0_111] : memref<1x1152x32xbf16, #tpu.memory_space<vmem>>, vector<1x128x32xbf16>
    %119 = vector.shape_cast %118 : vector<1x128x32xbf16> to vector<128x32xbf16>
    %cst_112 = arith.constant dense<0.000000e+00> : vector<288x32xf32>
    %120 = tpu.matmul %117, %119, %cst_112 {dimension_numbers = #tpu.dot_dimension_numbers<[1], [0], [0], [1], [0, 0, 1, 1], [], []>} : vector<288x128xbf16>, vector<128x32xbf16>, vector<288x32xf32> -> vector<288x32xf32>
    %121 = arith.addf %115, %120 : vector<288x32xf32>
    %c1_113 = arith.constant 1 : index
    %c36_114 = arith.constant 36 : index
    %c0_115 = arith.constant 0 : index
    %122 = vector.load %arg7[%c1_113, %c36_114, %c0_115] : memref<2x336x128xbf16, #tpu.memory_space<vmem>>, vector<1x288x128xbf16>
    %123 = vector.shape_cast %122 : vector<1x288x128xbf16> to vector<288x128xbf16>
    %c0_116 = arith.constant 0 : index
    %c768_117 = arith.constant 768 : index
    %c0_118 = arith.constant 0 : index
    %124 = vector.load %arg3[%c0_116, %c768_117, %c0_118] : memref<1x1152x32xbf16, #tpu.memory_space<vmem>>, vector<1x128x32xbf16>
    %125 = vector.shape_cast %124 : vector<1x128x32xbf16> to vector<128x32xbf16>
    %cst_119 = arith.constant dense<0.000000e+00> : vector<288x32xf32>
    %126 = tpu.matmul %123, %125, %cst_119 {dimension_numbers = #tpu.dot_dimension_numbers<[1], [0], [0], [1], [0, 0, 1, 1], [], []>} : vector<288x128xbf16>, vector<128x32xbf16>, vector<288x32xf32> -> vector<288x32xf32>
    %127 = arith.addf %121, %126 : vector<288x32xf32>
    %c1_120 = arith.constant 1 : index
    %c37_121 = arith.constant 37 : index
    %c0_122 = arith.constant 0 : index
    %128 = vector.load %arg7[%c1_120, %c37_121, %c0_122] : memref<2x336x128xbf16, #tpu.memory_space<vmem>>, vector<1x288x128xbf16>
    %129 = vector.shape_cast %128 : vector<1x288x128xbf16> to vector<288x128xbf16>
    %c0_123 = arith.constant 0 : index
    %c896_124 = arith.constant 896 : index
    %c0_125 = arith.constant 0 : index
    %130 = vector.load %arg3[%c0_123, %c896_124, %c0_125] : memref<1x1152x32xbf16, #tpu.memory_space<vmem>>, vector<1x128x32xbf16>
    %131 = vector.shape_cast %130 : vector<1x128x32xbf16> to vector<128x32xbf16>
    %cst_126 = arith.constant dense<0.000000e+00> : vector<288x32xf32>
    %132 = tpu.matmul %129, %131, %cst_126 {dimension_numbers = #tpu.dot_dimension_numbers<[1], [0], [0], [1], [0, 0, 1, 1], [], []>} : vector<288x128xbf16>, vector<128x32xbf16>, vector<288x32xf32> -> vector<288x32xf32>
    %133 = arith.addf %127, %132 : vector<288x32xf32>
    %c1_127 = arith.constant 1 : index
    %c38_128 = arith.constant 38 : index
    %c0_129 = arith.constant 0 : index
    %134 = vector.load %arg7[%c1_127, %c38_128, %c0_129] : memref<2x336x128xbf16, #tpu.memory_space<vmem>>, vector<1x288x128xbf16>
    %135 = vector.shape_cast %134 : vector<1x288x128xbf16> to vector<288x128xbf16>
    %c0_130 = arith.constant 0 : index
    %c1024_131 = arith.constant 1024 : index
    %c0_132 = arith.constant 0 : index
    %136 = vector.load %arg3[%c0_130, %c1024_131, %c0_132] : memref<1x1152x32xbf16, #tpu.memory_space<vmem>>, vector<1x128x32xbf16>
    %137 = vector.shape_cast %136 : vector<1x128x32xbf16> to vector<128x32xbf16>
    %cst_133 = arith.constant dense<0.000000e+00> : vector<288x32xf32>
    %138 = tpu.matmul %135, %137, %cst_133 {dimension_numbers = #tpu.dot_dimension_numbers<[1], [0], [0], [1], [0, 0, 1, 1], [], []>} : vector<288x128xbf16>, vector<128x32xbf16>, vector<288x32xf32> -> vector<288x32xf32>
    %139 = arith.addf %133, %138 : vector<288x32xf32>
    %cst_134 = arith.constant 0.000000e+00 : f32
    %140 = vector.broadcast %cst_134 : f32 to vector<288x32xf32>
    %141 = arith.maximumf %139, %140 : vector<288x32xf32>
    %142 = arith.truncf %141 : vector<288x32xf32> to vector<288x32xbf16>
    %c0_135 = arith.constant 0 : index
    %c0_136 = arith.constant 0 : index
    %c0_137 = arith.constant 0 : index
    %143 = vector.load %arg4[%c0_135, %c0_136, %c0_137] : memref<1x32x128xbf16, #tpu.memory_space<vmem>>, vector<1x32x128xbf16>
    %144 = vector.shape_cast %143 : vector<1x32x128xbf16> to vector<32x128xbf16>
    %cst_138 = arith.constant dense<0.000000e+00> : vector<288x128xf32>
    %145 = tpu.matmul %142, %144, %cst_138 {dimension_numbers = #tpu.dot_dimension_numbers<[1], [0], [0], [1], [0, 0, 1, 1], [], []>} : vector<288x32xbf16>, vector<32x128xbf16>, vector<288x128xf32> -> vector<288x128xf32>
    %146 = arith.mulf %145, %3 : vector<288x128xf32>
    %147 = arith.addf %80, %146 : vector<288x128xf32>
    %c1_139 = arith.constant 1 : index
    %c0_140 = arith.constant 0 : index
    %c0_141 = arith.constant 0 : index
    %148 = vector.load %arg6[%c1_139, %c0_140, %c0_141] : memref<2x288x128xf32, #tpu.memory_space<vmem>>, vector<1x288x128xf32>
    %149 = vector.shape_cast %148 : vector<1x288x128xf32> to vector<288x128xf32>
    %150 = vector.shape_cast %147 : vector<288x128xf32> to vector<1x288x128xf32>
    tpu.vector_store %arg6[%c1_139, %c0_140, %c0_141], %150 {strides = array<i32>} : memref<2x288x128xf32, #tpu.memory_space<vmem>>, vector<1x288x128xf32>,
    %c1_i32_142 = arith.constant 1 : i32
    %151 = arith.cmpi eq, %arg1, %c1_i32_142 : i32
    %152 = arith.extui %151 : i1 to i32
    %c0_i32_143 = arith.constant 0 : i32
    %153 = arith.cmpi ne, %152, %c0_i32_143 : i32
    scf.if %153 {
      %cst_144 = arith.constant 0.000000e+00 : f32
      %154 = vector.broadcast %cst_144 : f32 to vector<288x128xf32>
      %155 = arith.maximumf %147, %154 : vector<288x128xf32>
      %c1_145 = arith.constant 1 : index
      %c0_146 = arith.constant 0 : index
      %c0_147 = arith.constant 0 : index
      %156 = vector.load %arg6[%c1_145, %c0_146, %c0_147] : memref<2x288x128xf32, #tpu.memory_space<vmem>>, vector<1x288x128xf32>
      %157 = vector.shape_cast %156 : vector<1x288x128xf32> to vector<288x128xf32>
      %158 = vector.shape_cast %155 : vector<288x128xf32> to vector<1x288x128xf32>
      tpu.vector_store %arg6[%c1_145, %c0_146, %c0_147], %158 {strides = array<i32>} : memref<2x288x128xf32, #tpu.memory_space<vmem>>, vector<1x288x128xf32>,
    } else {
    }
    return
  }
  func.func @transform_0(%arg0: i32, %arg1: i32) -> (i32, i32, i32) {
    %c0_i32 = arith.constant 0 : i32
    %c0_i32_0 = arith.constant 0 : i32
    %c0_i32_1 = arith.constant 0 : i32
    return %arg0, %c0_i32, %c0_i32_0 : i32, i32, i32
  }
  func.func @transform_1(%arg0: i32, %arg1: i32) -> (i32, i32, i32) {
    %c0_i32 = arith.constant 0 : i32
    %c0_i32_0 = arith.constant 0 : i32
    %c0_i32_1 = arith.constant 0 : i32
    return %arg1, %c0_i32, %c0_i32_0 : i32, i32, i32
  }
  func.func @transform_2(%arg0: i32, %arg1: i32) -> (i32, i32, i32) {
    %c0_i32 = arith.constant 0 : i32
    %c0_i32_0 = arith.constant 0 : i32
    %c0_i32_1 = arith.constant 0 : i32
    return %arg1, %c0_i32, %c0_i32_0 : i32, i32, i32
  }
  func.func @transform_3(%arg0: i32, %arg1: i32) -> (i32, i32) {
    %c0_i32 = arith.constant 0 : i32
    %c0_i32_0 = arith.constant 0 : i32
    %c0_i32_1 = arith.constant 0 : i32
    return %c0_i32, %c0_i32_0 : i32, i32
  }
  func.func @transform_4(%arg0: i32, %arg1: i32) -> (i32, i32, i32) {
    %c0_i32 = arith.constant 0 : i32
    %c0_i32_0 = arith.constant 0 : i32
    %c0_i32_1 = arith.constant 0 : i32
    return %arg0, %c0_i32, %c0_i32_0 : i32, i32, i32
  }
}

</mosaic_0001>

<bundles_post_ra>
// kernel: tpu_custom_call.1
= control target key start
LH: loop header
LB: loop body
LE: loop exit
PB: predicated region body
PF: predicated region fallthrough
CT: control target
= control target key end

     0   :  { %9 = vsyncpa [#allocation4], 0  ;;  %s9953_s15 = smov 0   ;;  %s9955_s16 = smov 0   ;;  %s12557_s0 = inlined_call_operand.vmem [shape: f32[2,288,128], index: 0, kind: input, shape index: {}]   ;;  %s12558_s1 = inlined_call_operand.vmem [shape: bf16[2,1152,32], index: 1, kind: input, shape index: {}]   ;;  %s12559_s2 = inlined_call_operand.vmem [shape: bf16[2,32,128], index: 2, kind: input, shape index: {}]   ;;  %s12560_s3 = inlined_call_operand.vmem [shape: f32[288,128], index: 3, kind: input, shape index: {}]   ;;  %s12561_s4 = inlined_call_operand.hbm [shape: f32[2,288,128], index: 4, kind: output, shape index: {}]  }
   0x1   :  { %s9957_s17 = smov 0  }
   0x2 LB: > { %s8399_s18 = sadd.s32 4294967295, %s9922_s17   ;;  %s24_s19 = sadd.s32 1, %s9918_s16  ;;  %s9922_s17 = sphi %s9957_s17, %s15_s17   ;;  %s9918_s16 = sphi %s9955_s16, %s12768_s16   ;;  %s9914_s15 = sphi %s9953_s15, %s12767_s15  }
   0x3   : > { %p25_p0 = scmp.ge.s32.totalorder %s24_s19, 2  ;;  %p8403_p1 = scmp.ge.s32.totalorder %s9922_s17, 1 }
   0x4   : > { %p197_p2 = scmp.lt.s32.totalorder %s9922_s17, 3 }
   0x5   : > { %s12770_s19 = smov (%p25_p0, %s24_s19), 0 }
   0x6   : > { %p198_p3 = pnand %p8403_p1, %p197_p2 }
   0x8   : > { %201 = sbr.rel (%p198_p3) target bundleno = 2520 (0x9d8), region = 36 }
   0xd   : > { %p236_p4 = scmp.lt.s32.totalorder %s9914_s15, 1  ;;  %p8407_p5 = scmp.ne.s32.totalorder %s9914_s15, 0 }
   0xf   : > { %s237_s20 = scalar_select %p236_p4, %s9914_s15, 1 }
  0x10   : > { %251 = sbr.rel (%p8407_p5) target bundleno = 106 (0x6a), region = 40 }
  0x11   : > { %s9715_s21 = smul.u32 576, %s237_s20  ;;  %s9450_s22 = sshll.u32 %s237_s20, 4 }
  0x12   : > { %s9979_s25 = scalar_lea.vmem %s12559_s2, %s9450_s22 }
  0x13   : > { %s9984_s28 = scalar_lea.vmem %s12558_s1, %s9715_s21 }
  0x15   : > { %v252_v0 = vld [vmem:[%s12557_s0] sm:$0xff]  ;;  %v253_v1 = vld [vmem:[%s12557_s0 + $0x8] sm:$0xff]  ;;  %v254_v2 = vld [vmem:[%s12557_s0 + $0x10] sm:$0xff]  ;;  %vm398_vm0 = vcmask 1041408   ;;  %vm399_vm1 = vsmask.f32 1280 }
  0x16   : > { %324 = vst [vmem:[#allocation3] sm:$0xff] %v252_v0  ;;  %v255_v3 = vld [vmem:[%s12557_s0 + $0x18] sm:$0xff]  ;;  %v256_v4 = vld [vmem:[%s12557_s0 + $0x20] sm:$0xff]  ;;  %v257_v5 = vld [vmem:[%s12557_s0 + $0x28] sm:$0xff]  ;;  %vm404_vm2 = vcmask 1043457  }
  0x17   : > { %325 = vst [vmem:[#allocation3 + $0x8] sm:$0xff] %v253_v1  ;;  %v258_v6 = vld [vmem:[%s12557_s0 + $0x30] sm:$0xff]  ;;  %v259_v7 = vld [vmem:[%s12557_s0 + $0x38] sm:$0xff]  ;;  %v260_v8 = vld [vmem:[%s12557_s0 + $0x40] sm:$0xff]  ;;  %vm405_vm3 = vsmask.f32 7942 }
  0x18   : > { %326 = vst [vmem:[#allocation3 + $0x10] sm:$0xff] %v254_v2  ;;  %v261_v9 = vld [vmem:[%s12557_s0 + $0x48] sm:$0xff]  ;;  %v262_v10 = vld [vmem:[%s12557_s0 + $0x50] sm:$0xff]  ;;  %v263_v11 = vld [vmem:[%s12557_s0 + $0x58] sm:$0xff] }
  0x19   : > { %327 = vst [vmem:[#allocation3 + $0x18] sm:$0xff] %v255_v3  ;;  %v264_v12 = vld [vmem:[%s12557_s0 + $0x60] sm:$0xff]  ;;  %v265_v13 = vld [vmem:[%s12557_s0 + $0x68] sm:$0xff]  ;;  %v266_v14 = vld [vmem:[%s12557_s0 + $0x70] sm:$0xff] }
  0x1a   : > { %328 = vst [vmem:[#allocation3 + $0x20] sm:$0xff] %v256_v4  ;;  %v267_v15 = vld [vmem:[%s12557_s0 + $0x78] sm:$0xff]  ;;  %v268_v16 = vld [vmem:[%s12557_s0 + $0x80] sm:$0xff]  ;;  %v269_v17 = vld [vmem:[%s12557_s0 + $0x88] sm:$0xff] }
  0x1b   : > { %329 = vst [vmem:[#allocation3 + $0x28] sm:$0xff] %v257_v5  ;;  %v270_v18 = vld [vmem:[%s12557_s0 + $0x90] sm:$0xff]  ;;  %v271_v19 = vld [vmem:[%s12557_s0 + $0x98] sm:$0xff]  ;;  %v272_v20 = vld [vmem:[%s12557_s0 + $0xa0] sm:$0xff] }
  0x1c   : > { %330 = vst [vmem:[#allocation3 + $0x30] sm:$0xff] %v258_v6  ;;  %v273_v21 = vld [vmem:[%s12557_s0 + $0xa8] sm:$0xff]  ;;  %v274_v22 = vld [vmem:[%s12557_s0 + $0xb0] sm:$0xff]  ;;  %v275_v23 = vld [vmem:[%s12557_s0 + $0xb8] sm:$0xff] }
  0x1d   : > { %331 = vst [vmem:[#allocation3 + $0x38] sm:$0xff] %v259_v7  ;;  %v276_v24 = vld [vmem:[%s12557_s0 + $0xc0] sm:$0xff]  ;;  %v277_v25 = vld [vmem:[%s12557_s0 + $0xc8] sm:$0xff]  ;;  %v278_v26 = vld [vmem:[%s12557_s0 + $0xd0] sm:$0xff] }
  0x1e   : > { %332 = vst [vmem:[#allocation3 + $0x40] sm:$0xff] %v260_v8  ;;  %v279_v27 = vld [vmem:[%s12557_s0 + $0xd8] sm:$0xff]  ;;  %v280_v28 = vld [vmem:[%s12557_s0 + $0xe0] sm:$0xff]  ;;  %v281_v29 = vld [vmem:[%s12557_s0 + $0xe8] sm:$0xff]  ;;  %v9924_v8 = vmov 0  }
  0x1f   : > { %333 = vst [vmem:[#allocation3 + $0x48] sm:$0xff] %v261_v9  ;;  %v282_v30 = vld [vmem:[%s12557_s0 + $0xf0] sm:$0xff]  ;;  %v283_v31 = vld [vmem:[%s12557_s0 + $0xf8] sm:$0xff]  ;;  %v284_v32 = vld [vmem:[%s12557_s0 + $0x100] sm:$0xff] }
  0x20   : > { %334 = vst [vmem:[#allocation3 + $0x50] sm:$0xff] %v262_v10  ;;  %v285_v33 = vld [vmem:[%s12557_s0 + $0x108] sm:$0xff]  ;;  %v286_v34 = vld [vmem:[%s12557_s0 + $0x110] sm:$0xff]  ;;  %v287_v35 = vld [vmem:[%s12557_s0 + $0x118] sm:$0xff] }
  0x21   : > { %335 = vst [vmem:[#allocation3 + $0x58] sm:$0xff] %v263_v11  ;;  %v288_v36 = vld [vmem:[%s12557_s0 + $0x120] sm:$0xff]  ;;  %v289_v37 = vld [vmem:[%s12557_s0 + $0x128] sm:$0xff]  ;;  %v290_v38 = vld [vmem:[%s12557_s0 + $0x130] sm:$0xff] }
  0x22   : > { %336 = vst [vmem:[#allocation3 + $0x60] sm:$0xff] %v264_v12  ;;  %v291_v39 = vld [vmem:[%s12557_s0 + $0x138] sm:$0xff]  ;;  %v292_v40 = vld [vmem:[%s12557_s0 + $0x140] sm:$0xff]  ;;  %v293_v41 = vld [vmem:[%s12557_s0 + $0x148] sm:$0xff] }
  0x23   : > { %337 = vst [vmem:[#allocation3 + $0x68] sm:$0xff] %v265_v13  ;;  %v294_v42 = vld [vmem:[%s12557_s0 + $0x150] sm:$0xff]  ;;  %v295_v43 = vld [vmem:[%s12557_s0 + $0x158] sm:$0xff]  ;;  %v296_v44 = vld [vmem:[%s12557_s0 + $0x160] sm:$0xff] }
  0x24   : > { %338 = vst [vmem:[#allocation3 + $0x70] sm:$0xff] %v266_v14  ;;  %v297_v45 = vld [vmem:[%s12557_s0 + $0x168] sm:$0xff]  ;;  %v298_v46 = vld [vmem:[%s12557_s0 + $0x170] sm:$0xff]  ;;  %v299_v47 = vld [vmem:[%s12557_s0 + $0x178] sm:$0xff] }
  0x25   : > { %339 = vst [vmem:[#allocation3 + $0x78] sm:$0xff] %v267_v15  ;;  %v300_v48 = vld [vmem:[%s12557_s0 + $0x180] sm:$0xff]  ;;  %v301_v49 = vld [vmem:[%s12557_s0 + $0x188] sm:$0xff]  ;;  %v302_v50 = vld [vmem:[%s12557_s0 + $0x190] sm:$0xff] }
  0x26   : > { %340 = vst [vmem:[#allocation3 + $0x80] sm:$0xff] %v268_v16  ;;  %v303_v51 = vld [vmem:[%s12557_s0 + $0x198] sm:$0xff]  ;;  %v304_v52 = vld [vmem:[%s12557_s0 + $0x1a0] sm:$0xff]  ;;  %v305_v53 = vld [vmem:[%s12557_s0 + $0x1a8] sm:$0xff] }
  0x27   : > { %341 = vst [vmem:[#allocation3 + $0x88] sm:$0xff] %v269_v17  ;;  %v306_v54 = vld [vmem:[%s12557_s0 + $0x1b0] sm:$0xff]  ;;  %v307_v55 = vld [vmem:[%s12557_s0 + $0x1b8] sm:$0xff]  ;;  %v308_v56 = vld [vmem:[%s12557_s0 + $0x1c0] sm:$0xff] }
  0x28   : > { %342 = vst [vmem:[#allocation3 + $0x90] sm:$0xff] %v270_v18  ;;  %v309_v57 = vld [vmem:[%s12557_s0 + $0x1c8] sm:$0xff]  ;;  %v310_v58 = vld [vmem:[%s12557_s0 + $0x1d0] sm:$0xff]  ;;  %v311_v59 = vld [vmem:[%s12557_s0 + $0x1d8] sm:$0xff] }
  0x29   : > { %343 = vst [vmem:[#allocation3 + $0x98] sm:$0xff] %v271_v19  ;;  %v312_v60 = vld [vmem:[%s12557_s0 + $0x1e0] sm:$0xff]  ;;  %v313_v61 = vld [vmem:[%s12557_s0 + $0x1e8] sm:$0xff]  ;;  %v314_v62 = vld [vmem:[%s12557_s0 + $0x1f0] sm:$0xff] }
  0x2a   : > { %344 = vst [vmem:[#allocation3 + $0xa0] sm:$0xff] %v272_v20  ;;  %v315_v63 = vld [vmem:[%s12557_s0 + $0x1f8] sm:$0xff]  ;;  %v316_v0 = vld [vmem:[%s12557_s0 + $0x200] sm:$0xff]  ;;  %v317_v1 = vld [vmem:[%s12557_s0 + $0x208] sm:$0xff] }
  0x2b   : > { %345 = vst [vmem:[#allocation3 + $0xa8] sm:$0xff] %v273_v21  ;;  %v318_v2 = vld [vmem:[%s12557_s0 + $0x210] sm:$0xff]  ;;  %v319_v3 = vld [vmem:[%s12557_s0 + $0x218] sm:$0xff]  ;;  %v320_v4 = vld [vmem:[%s12557_s0 + $0x220] sm:$0xff] }
  0x2c   : > { %346 = vst [vmem:[#allocation3 + $0xb0] sm:$0xff] %v274_v22  ;;  %v321_v5 = vld [vmem:[%s12557_s0 + $0x228] sm:$0xff]  ;;  %v322_v6 = vld [vmem:[%s12557_s0 + $0x230] sm:$0xff]  ;;  %v323_v7 = vld [vmem:[%s12557_s0 + $0x238] sm:$0xff] }
  0x2d   : > { %347 = vst [vmem:[#allocation3 + $0xb8] sm:$0xff] %v275_v23  ;;  %vm10203_vm4 = vmand %vm398_vm0, %vm399_vm1  ;;  %v401_v10 = vld [vmem:[#allocation2 + $0x8] sm:$0x3]  ;;  %v407_v11 = vld [vmem:[#allocation2 + $0x98] sm:$0xe] }
  0x2e   : > { %348 = vst [vmem:[#allocation3 + $0xc0] sm:$0xff] %v276_v24  ;;  %vm406_vm5 = vmand %vm404_vm2, %vm405_vm3  ;;  %v415_v12 = vld [vmem:[#allocation2 + $0xb0] sm:$0x3]  ;;  %v402_v13 = vsel %vm10203_vm4, 0, %v401_v10  ;;  %v418_v14 = vld [vmem:[#allocation2 + $0x140] sm:$0xe] }
  0x2f   : > { %349 = vst [vmem:[#allocation3 + $0xc8] sm:$0xff] %v277_v25  ;;  %v408_v15 = vsel %vm406_vm5, 0, %v407_v11  ;;  %v416_v16 = vsel %vm10203_vm4, 0, %v415_v12  ;;  %v419_v17 = vsel %vm406_vm5, 0, %v418_v14 }
  0x30   : > { %350 = vst [vmem:[#allocation3 + $0xd0] sm:$0xff] %v278_v26 }
  0x31   : > { %351 = vst [vmem:[#allocation3 + $0xd8] sm:$0xff] %v279_v27 }
  0x32   : > { %352 = vst [vmem:[#allocation3 + $0xe0] sm:$0xff] %v280_v28 }
  0x33   : > { %353 = vst [vmem:[#allocation3 + $0xe8] sm:$0xff] %v281_v29 }
  0x34   : > { %354 = vst [vmem:[#allocation3 + $0xf0] sm:$0xff] %v282_v30 }
  0x35   : > { %355 = vst [vmem:[#allocation3 + $0xf8] sm:$0xff] %v283_v31 }
  0x36   : > { %356 = vst [vmem:[#allocation3 + $0x100] sm:$0xff] %v284_v32 }
  0x37   : > { %357 = vst [vmem:[#allocation3 + $0x108] sm:$0xff] %v285_v33 }
  0x38   : > { %358 = vst [vmem:[#allocation3 + $0x110] sm:$0xff] %v286_v34 }
  0x39   : > { %359 = vst [vmem:[#allocation3 + $0x118] sm:$0xff] %v287_v35 }
  0x3a   : > { %360 = vst [vmem:[#allocation3 + $0x120] sm:$0xff] %v288_v36 }
  0x3b   : > { %361 = vst [vmem:[#allocation3 + $0x128] sm:$0xff] %v289_v37 }
  0x3c   : > { %362 = vst [vmem:[#allocation3 + $0x130] sm:$0xff] %v290_v38 }
  0x3d   : > { %363 = vst [vmem:[#allocation3 + $0x138] sm:$0xff] %v291_v39 }
  0x3e   : > { %364 = vst [vmem:[#allocation3 + $0x140] sm:$0xff] %v292_v40 }
  0x3f   : > { %365 = vst [vmem:[#allocation3 + $0x148] sm:$0xff] %v293_v41 }
  0x40   : > { %366 = vst [vmem:[#allocation3 + $0x150] sm:$0xff] %v294_v42 }
  0x41   : > { %367 = vst [vmem:[#allocation3 + $0x158] sm:$0xff] %v295_v43 }
  0x42   : > { %368 = vst [vmem:[#allocation3 + $0x160] sm:$0xff] %v296_v44 }
  0x43   : > { %369 = vst [vmem:[#allocation3 + $0x168] sm:$0xff] %v297_v45 }
  0x44   : > { %370 = vst [vmem:[#allocation3 + $0x170] sm:$0xff] %v298_v46 }
  0x45   : > { %371 = vst [vmem:[#allocation3 + $0x178] sm:$0xff] %v299_v47 }
  0x46   : > { %372 = vst [vmem:[#allocation3 + $0x180] sm:$0xff] %v300_v48 }
  0x47   : > { %373 = vst [vmem:[#allocation3 + $0x188] sm:$0xff] %v301_v49 }
  0x48   : > { %374 = vst [vmem:[#allocation3 + $0x190] sm:$0xff] %v302_v50 }
  0x49   : > { %375 = vst [vmem:[#allocation3 + $0x198] sm:$0xff] %v303_v51 }
  0x4a   : > { %376 = vst [vmem:[#allocation3 + $0x1a0] sm:$0xff] %v304_v52 }
  0x4b   : > { %377 = vst [vmem:[#allocation3 + $0x1a8] sm:$0xff] %v305_v53 }
  0x4c   : > { %378 = vst [vmem:[#allocation3 + $0x1b0] sm:$0xff] %v306_v54 }
  0x4d   : > { %379 = vst [vmem:[#allocation3 + $0x1b8] sm:$0xff] %v307_v55 }
  0x4e   : > { %380 = vst [vmem:[#allocation3 + $0x1c0] sm:$0xff] %v308_v56 }
  0x4f   : > { %381 = vst [vmem:[#allocation3 + $0x1c8] sm:$0xff] %v309_v57 }
  0x50   : > { %382 = vst [vmem:[#allocation3 + $0x1d0] sm:$0xff] %v310_v58 }
  0x51   : > { %383 = vst [vmem:[#allocation3 + $0x1d8] sm:$0xff] %v311_v59 }
  0x52   : > { %384 = vst [vmem:[#allocation3 + $0x1e0] sm:$0xff] %v312_v60 }
  0x53   : > { %385 = vst [vmem:[#allocation3 + $0x1e8] sm:$0xff] %v313_v61 }
  0x54   : > { %386 = vst [vmem:[#allocation3 + $0x1f0] sm:$0xff] %v314_v62 }
  0x55   : > { %387 = vst [vmem:[#allocation3 + $0x1f8] sm:$0xff] %v315_v63 }
  0x56   : > { %388 = vst [vmem:[#allocation3 + $0x200] sm:$0xff] %v316_v0 }
  0x57   : > { %389 = vst [vmem:[#allocation3 + $0x208] sm:$0xff] %v317_v1 }
  0x58   : > { %390 = vst [vmem:[#allocation3 + $0x210] sm:$0xff] %v318_v2 }
  0x59   : > { %391 = vst [vmem:[#allocation3 + $0x218] sm:$0xff] %v319_v3 }
  0x5a   : > { %392 = vst [vmem:[#allocation3 + $0x220] sm:$0xff] %v320_v4 }
  0x5b   : > { %393 = vst [vmem:[#allocation3 + $0x228] sm:$0xff] %v321_v5 }
  0x5c   : > { %394 = vst [vmem:[#allocation3 + $0x230] sm:$0xff] %v322_v6 }
  0x5d   : > { %395 = vst [vmem:[#allocation3 + $0x238] sm:$0xff] %v323_v7 }
  0x5e   : > { %396 = vst [vmem:[#allocation2] sm:$0xf] %v9924_v8 }
  0x5f   : > { %397 = vst [vmem:[#allocation2 + $0x4] sm:$0xf] %v9924_v8 }
  0x60   : > { %410 = vst [vmem:[#allocation2 + $0x9c] sm:$0xf] %v9924_v8 }
  0x61   : > { %411 = vst [vmem:[#allocation2 + $0xa0] sm:$0x7] %v9924_v8 }
  0x62   : > { %413 = vst [vmem:[#allocation2 + $0xa8] sm:$0xf] %v9924_v8 }
  0x63   : > { %414 = vst [vmem:[#allocation2 + $0xac] sm:$0xf] %v9924_v8 }
  0x64   : > { %421 = vst [vmem:[#allocation2 + $0x144] sm:$0xf] %v9924_v8 }
  0x65   : > { %422 = vst [vmem:[#allocation2 + $0x148] sm:$0x7] %v9924_v8 }
  0x66   : > { %403 = vst [vmem:[#allocation2 + $0x8] sm:$0x3] %v402_v13 }
  0x67   : > { %409 = vst [vmem:[#allocation2 + $0x98] sm:$0xe] %v408_v15 }
  0x68   : > { %417 = vst [vmem:[#allocation2 + $0xb0] sm:$0x3] %v416_v16 }
  0x69   : > { %420 = vst [vmem:[#allocation2 + $0x140] sm:$0xe] %v419_v17 }
  0x6a PF: > { %v9483_v18 = vld [vmem:[%s9984_s28 + $0x78] sm:$0xff]  ;;  %v9482_v22 = vld [vmem:[%s9984_s28 + $0x70] sm:$0xff]  ;;  %v9481_v26 = vld [vmem:[%s9984_s28 + $0x68] sm:$0xff]  ;;  %vm567_vm6 = vsmask.f32 1280  ;;  %vm966_vm8 = vcmask 1043457  }
  0x6b   : > { %v9475_v19 = vld [vmem:[%s9984_s28 + $0x38] sm:$0xff]  ;;  %1389 = vmatpush.bf16.msra.mxu0 %v9483_v18  ;;  %v9474_v23 = vld [vmem:[%s9984_s28 + $0x30] sm:$0xff]  ;;  %v9473_v27 = vld [vmem:[%s9984_s28 + $0x28] sm:$0xff]  ;;  %vm568_vm7 = vsmask.f32 5392  ;;  %v12623_v4 = vmov 0 }
  0x6c   : > { %v9491_v20 = vld [vmem:[%s9984_s28 + $0xb8] sm:$0xff]  ;;  %1554 = vmatpush.bf16.msra.mxu1 %v9475_v19  ;;  %v9490_v24 = vld [vmem:[%s9984_s28 + $0xb0] sm:$0xff]  ;;  %v9489_v28 = vld [vmem:[%s9984_s28 + $0xa8] sm:$0xff]  ;;  %vm967_vm9 = vsmask.f32 7942  ;;  %v12626_v15 = vmov 0 }
  0x6d   : > { %v9516_v21 = vld [vmem:[%s9984_s28 + $0xf8] sm:$0xff]  ;;  %1777 = vmatpush.bf16.msra.mxu2 %v9491_v20  ;;  %v9515_v25 = vld [vmem:[%s9984_s28 + $0xf0] sm:$0xff]  ;;  %v9514_v29 = vld [vmem:[%s9984_s28 + $0xe8] sm:$0xff]  ;;  %vm1673_vm12 = vcmask 1046528   ;;  %vm1174_vm13 = vsmask.f32 7424 }
  0x6e   : > { %2161 = vmatpush.bf16.msra.mxu3 %v9516_v21  ;;  %v9480_v30 = vld [vmem:[%s9984_s28 + $0x60] sm:$0xff]  ;;  %v459_v32 = vld [vmem:[#allocation3] sm:$0xff]  ;;  %v460_v35 = vld [vmem:[#allocation3 + $0x8] sm:$0xff]  ;;  %vm1007_vm14 = vcmask 1041408   ;;  %vm2708_vm0 = vcmask 1045504   ;;  %vm3743_vm3 = vcmask 1044480  }
  0x6f   : > { %1390 = vmatpush.bf16.msra.mxu0 %v9482_v22  ;;  %v9472_v31 = vld [vmem:[%s9984_s28 + $0x20] sm:$0xff]  ;;  %v495_v36 = vmax.f32 %v459_v32, 0.0  ;;  %v9479_v37 = vld [vmem:[%s9984_s28 + $0x58] sm:$0xff]  ;;  %v496_v38 = vmax.f32 %v460_v35, 0.0  ;;  %v462_v46 = vld [vmem:[#allocation3 + $0x18] sm:$0xff]  ;;  %vm4052_vm4 = vcmask 261120  }
  0x70   : > { %1555 = vmatpush.bf16.msra.mxu1 %v9474_v23  ;;  %v9488_v33 = vld [vmem:[%s9984_s28 + $0xa0] sm:$0xff]  ;;  %v9471_v39 = vld [vmem:[%s9984_s28 + $0x18] sm:$0xff]  ;;  %v498_v53 = vmax.f32 %v462_v46, 0.0  ;;  %v463_v58 = vld [vmem:[#allocation3 + $0x20] sm:$0xff]  ;;  %vm2316_vm1 = vsmask.f32 6400 }
  0x71   : > { %1778 = vmatpush.bf16.msra.mxu2 %v9490_v24  ;;  %v9513_v34 = vld [vmem:[%s9984_s28 + $0xe0] sm:$0xff]  ;;  %v531_v40 = vpack.c.bf16 %v495_v36, %v495_v36  ;;  %v532_v43 = vpack.c.bf16 %v496_v38, %v496_v38  ;;  %v9487_v48 = vld [vmem:[%s9984_s28 + $0x98] sm:$0xff]  ;;  %v9478_v59 = vld [vmem:[%s9984_s28 + $0x50] sm:$0xff]  ;;  %v499_v13 = vmax.f32 %v463_v58, 0.0  ;;  %vm3351_vm2 = vsmask.f32 5376 }
  0x72   : > { %2162 = vmatpush.bf16.msra.mxu3 %v9515_v25  ;;  %v10229_v41 = vld [vmem:[#allocation2] sm:$0xff]   ;;  %v9512_v49 = vld [vmem:[%s9984_s28 + $0xd8] sm:$0xff]  ;;  %v9470_v60 = vld [vmem:[%s9984_s28 + $0x10] sm:$0xff]  ;;  %v534_v0 = vpack.c.bf16 %v498_v53, %v498_v53  ;;  %p8926_p6 = scmp.ne.s32.totalorder %s9914_s15, 1 }
  0x73   : > { %1391 = vmatpush.bf16.msra.mxu0 %v9481_v26  ;;  %v461_v42 = vld [vmem:[#allocation3 + $0x10] sm:$0xff]  ;;  %v571_v50 = vshrl.u32 %v531_v40, 16  ;;  %v574_v51 = vshll.u32 %v531_v40, 16  ;;  %v1176_v52 = vshrl.u32 %v10229_v41, 16  ;;  %v580_v54 = vshrl.u32 %v532_v43, 16  ;;  %v464_v1 = vld [vmem:[#allocation3 + $0x28] sm:$0xff]  ;;  %vm10245_vm10 = vmand %vm966_vm8, %vm967_vm9 }
  0x74   : > { %1556 = vmatpush.bf16.msra.mxu1 %v9473_v27  ;;  %v10231_v44 = vld [vmem:[#allocation2] sm:$0xf0]  ;;  %v10233_v45 = vld [vmem:[#allocation2] sm:$0xe]  ;;  %v497_v47 = vmax.f32 %v461_v42, 0.0  ;;  %v583_v55 = vshll.u32 %v532_v43, 16  ;;  %vm10253_vm11 = vmor %vm567_vm6, %vm568_vm7 }
  0x75   : > { %1779 = vmatpush.bf16.msra.mxu2 %v9489_v28  ;;  %v1178_v56 = vshll.u32 %v10229_v41, 16  ;;  %v573_v61 = vrot.slane %v571_v50, 6  ;;  %v576_v62 = vrot.slane %v574_v51, 7  ;;  %v9711_v63 = vor.u32 %v10233_v45, %v10231_v44  ;;  %v969_v5 = vld [vmem:[#allocation2 + $0x8] sm:$0xe]  ;;  %v9486_v8 = vld [vmem:[%s9984_s28 + $0x90] sm:$0xff]  ;;  %vm10589_vm15 = vmand %vm1007_vm14, %vm567_vm6 }
  0x76   : > { %2163 = vmatpush.bf16.msra.mxu3 %v9514_v29  ;;  %v533_v57 = vpack.c.bf16 %v497_v47, %v497_v47  ;;  %v582_v2 = vrot.slane %v580_v54, 6  ;;  %v585_v3 = vrot.slane %v583_v55, 7  ;;  %v12624_v4 = vsel %vm10245_vm10, 4294967295, %v12623_v4  ;;  %v9511_v9 = vld [vmem:[%s9984_s28 + $0xd0] sm:$0xff]  ;;  %v465_v14 = vld [vmem:[#allocation3 + $0x30] sm:$0xff]  ;;  %v466_v20 = vld [vmem:[#allocation3 + $0x38] sm:$0xff] }
  0x77   : > { %1392 = vmatpush.bf16.msra.mxu0 %v9480_v30  ;;  %12625 = vst [vmem:[#allocation6_spill] sm:$0xff] %v12624_v4  ;;  %v577_v10 = vor.u32 %v576_v62, %v573_v61  ;;  %v600_v11 = vshrl.u32 %v534_v0, 16  ;;  %v603_v12 = vshll.u32 %v534_v0, 16  ;;  %v12627_v15 = vsel %vm10253_vm11, 4294967295, %v12626_v15  ;;  %v9477_v25 = vld [vmem:[%s9984_s28 + $0x48] sm:$0xff]  ;;  %v9476_v42 = vld [vmem:[%s9984_s28 + $0x40] sm:$0xff] }
  0x78   : > { %1557 = vmatpush.bf16.msra.mxu1 %v9472_v31  ;;  %v590_v6 = vshrl.u32 %v533_v57, 16  ;;  %v593_v7 = vshll.u32 %v533_v57, 16  ;;  %12628 = vst [vmem:[#allocation7_spill] sm:$0xff] %v12627_v15  ;;  %v586_v16 = vor.u32 %v585_v3, %v582_v2  ;;  %v500_v19 = vmax.f32 %v464_v1, 0.0  ;;  %v9469_v26 = vld [vmem:[%s9984_s28 + $0x8] sm:$0xff]  ;;  %v9484_v50 = vld [vmem:[%s9984_s28 + $0x80] sm:$0xff] }
  0x79   : > { %1780 = vmatpush.bf16.msra.mxu2 %v9488_v33  ;;  %v578_v21 = vrot.slane %v577_v10, 4  ;;  %v970_v22 = vsel %vm10245_vm10, %v577_v10, %v969_v5  ;;  %v602_v23 = vrot.slane %v600_v11, 6  ;;  %v605_v24 = vrot.slane %v603_v12, 7  ;;  %v9485_v31 = vld [vmem:[%s9984_s28 + $0x88] sm:$0xff]  ;;  %v9509_v51 = vld [vmem:[%s9984_s28 + $0xc0] sm:$0xff]  ;;  %v9524_v0 = vld [vmem:[%s9984_s28 + $0x138] sm:$0xff] }
  0x7a   : > { %2164 = vmatpush.bf16.msra.mxu3 %v9513_v34  ;;  %v592_v17 = vrot.slane %v590_v6, 6  ;;  %v595_v18 = vrot.slane %v593_v7, 7  ;;  %971 = vst [vmem:[#allocation2 + $0x8] sm:$0xe] %v970_v22  ;;  %v588_v27 = vrot.slane %v586_v16, 4  ;;  %v535_v29 = vpack.c.bf16 %v499_v13, %v499_v13  ;;  %v9510_v32 = vld [vmem:[%s9984_s28 + $0xc8] sm:$0xff] }
  0x7b   : > { %1393 = vmatpush.bf16.msra.mxu0 %v9479_v37  ;;  %v501_v30 = vmax.f32 %v465_v14, 0.0  ;;  %v587_v33 = vsel %vm10253_vm11, %v578_v21, %v586_v16  ;;  %v606_v34 = vor.u32 %v605_v24, %v602_v23  ;;  %v536_v35 = vpack.c.bf16 %v500_v19, %v500_v19  ;;  %v467_v13 = vld [vmem:[#allocation3 + $0x40] sm:$0xff]  ;;  %v468_v19 = vld [vmem:[#allocation3 + $0x48] sm:$0xff]  ;;  %v9575_v15 = vld [vmem:[%s9979_s25 + $0x8] sm:$0xff] }
  0x7c   : > { %1558 = vmatpush.bf16.msra.mxu1 %v9471_v39  ;;  %v596_v28 = vor.u32 %v595_v18, %v592_v17  ;;  %v502_v36 = vmax.f32 %v466_v20, 0.0  ;;  %972 = vst [vmem:[#allocation2 + $0xc] sm:$0xf] %v587_v33  ;;  %v610_v39 = vshrl.u32 %v535_v29, 16  ;;  %v613_v40 = vshll.u32 %v535_v29, 16 }
  0x7d   : > { %1781 = vmatpush.bf16.msra.mxu2 %v9487_v48  ;;  %v608_v43 = vrot.slane %v606_v34, 4  ;;  %v620_v46 = vshrl.u32 %v536_v35, 16  ;;  %v623_v47 = vshll.u32 %v536_v35, 16  ;;  %v537_v48 = vpack.c.bf16 %v501_v30, %v501_v30 }
  0x7e   : > { %2165 = vmatpush.bf16.msra.mxu3 %v9512_v49  ;;  %v597_v37 = vsel %vm10253_vm11, %v588_v27, %v596_v28  ;;  %v598_v38 = vrot.slane %v596_v28, 4  ;;  %v9468_v49 = vld [vmem:[%s9984_s28] sm:$0xff]  ;;  %v612_v54 = vrot.slane %v610_v39, 6  ;;  %v615_v55 = vrot.slane %v613_v40, 7 }
  0x7f   : > { %1394 = vmatpush.bf16.msra.mxu0 %v9478_v59  ;;  %973 = vst [vmem:[#allocation2 + $0x10] sm:$0xf] %v597_v37  ;;  %v538_v57 = vpack.c.bf16 %v502_v36, %v502_v36  ;;  %v622_v58 = vrot.slane %v620_v46, 6  ;;  %v625_v59 = vrot.slane %v623_v47, 7  ;;  %v633_v61 = vshll.u32 %v537_v48, 16 }
  0x80   : > { %1559 = vmatpush.bf16.msra.mxu1 %v9470_v60  ;;  %v607_v53 = vsel %vm10253_vm11, %v598_v38, %v606_v34  ;;  %v630_v60 = vshrl.u32 %v537_v48, 16  ;;  %v1180_v62 = vrot.slane %v1178_v56, 1  ;;  %v616_v1 = vor.u32 %v615_v55, %v612_v54  ;;  %v9523_v38 = vld [vmem:[%s9984_s28 + $0x130] sm:$0xff] }
  0x81   : > { %1782 = vmatpush.bf16.msra.mxu2 %v9486_v8  ;;  %974 = vst [vmem:[#allocation2 + $0x14] sm:$0xf] %v607_v53  ;;  %v640_v2 = vshrl.u32 %v538_v57, 16  ;;  %v643_v3 = vshll.u32 %v538_v57, 16  ;;  %v1674_v5 = vrot.slane %v9711_v63, 1  ;;  %v626_v7 = vor.u32 %v625_v59, %v622_v58 }
  0x82   : > { %2166 = vmatpush.bf16.msra.mxu3 %v9511_v9  ;;  %v1912_v6 = vld [vmem:[#allocation2 + $0x8] sm:$0xe]  ;;  %v632_v8 = vrot.slane %v630_v60, 6  ;;  %v635_v9 = vrot.slane %v633_v61, 7  ;;  %v617_v11 = vsel %vm10253_vm11, %v608_v43, %v616_v1  ;;  %v618_v12 = vrot.slane %v616_v1, 4  ;;  %v469_v61 = vld [vmem:[#allocation3 + $0x50] sm:$0xff] }
  0x83   : > { %1395 = vmatpush.bf16.msra.mxu0 %v9477_v25  ;;  %v2002_v10 = vunpack.c.l.b16 %v1912_v6  ;;  %v642_v56 = vrot.slane %v640_v2, 6  ;;  %v10281_v14 = vld [vmem:[#allocation2 + $0x8] sm:$0xff]  ;;  %975 = vst [vmem:[#allocation2 + $0x18] sm:$0xf] %v617_v11  ;;  %v628_v44 = vrot.slane %v626_v7, 4  ;;  %v645_v18 = vrot.slane %v643_v3, 7 }
  0x84   : > { %1560 = vmatpush.bf16.msra.mxu1 %v9469_v26  ;;  %v10283_v16 = vld [vmem:[#allocation2 + $0xc] sm:$0xf]  ;;  %v636_v45 = vor.u32 %v635_v9, %v632_v8  ;;  %v627_v17 = vsel %vm10253_vm11, %v618_v12, %v626_v7  ;;  %v503_v20 = vmax.f32 %v467_v13, 0.0  ;;  %v1181_v21 = vor.u32 %v1180_v62, %v1176_v52 }
  0x85   : > { %1783 = vmatpush.bf16.msra.mxu2 %v9485_v31  ;;  %v2003_v63 = vunpack.c.l.b16 %v10283_v16  ;;  %v1183_v22 = vshll.u32 %v10281_v14, 16  ;;  %v1675_v23 = vrot.slane %v10281_v14, 1  ;;  %976 = vst [vmem:[#allocation2 + $0x1c] sm:$0xf] %v627_v17  ;;  %v646_v28 = vor.u32 %v645_v18, %v642_v56 }
  0x86   : > { %2167 = vmatpush.bf16.msra.mxu3 %v9510_v32  ;;  %v637_v24 = vsel %vm10253_vm11, %v628_v44, %v636_v45  ;;  %v638_v27 = vrot.slane %v636_v45, 4  ;;  %v504_v52 = vmax.f32 %v468_v19, 0.0  ;;  %v505_v2 = vmax.f32 %v469_v61, 0.0 }
  0x87   : > { %1396 = vmatpush.bf16.msra.mxu0 %v9476_v42  ;;  %v10297_v26 = vpack.c.b16 %v2003_v63, %v2002_v10  ;;  %977 = vst [vmem:[#allocation2 + $0x20] sm:$0xf] %v637_v24  ;;  %v1185_v29 = vrot.slane %v1183_v22, 1  ;;  %v1676_v30 = vsel %vm1673_vm12, %v1674_v5, %v1675_v23  ;;  %v648_v46 = vrot.slane %v646_v28, 4  ;;  %v470_v5 = vld [vmem:[#allocation3 + $0x58] sm:$0xff] }
  0x88   : > { %1561 = vmatpush.bf16.msra.mxu1 %v9468_v49  ;;  %v9492_v25 = vld [vmem:[#allocation2 + $0x10] sm:$0xff]  ;;  %v647_v34 = vsel %vm10253_vm11, %v638_v27, %v646_v28  ;;  %v540_v36 = vpack.c.bf16 %v504_v52, %v504_v52  ;;  %v1187_v49 = vshrl.u32 %v10281_v14, 16  ;;  %v506_v7 = vmax.f32 %v470_v5, 0.0 }
  0x89   : > { %1784 = vmatpush.bf16.msra.mxu2 %v9484_v50  ;;  %v2058_v31 = vrot.slane %v10297_v26, 1  ;;  %v2059_v32 = vrot.slane %v9492_v25, 1  ;;  %v1186_v33 = vsel %vm1174_vm13, %v1181_v21, %v1185_v29  ;;  %978 = vst [vmem:[#allocation2 + $0x24] sm:$0xf] %v647_v34  ;;  %v10305_v37 = vld [vmem:[#allocation2 + $0x10] sm:$0xff]  ;;  %v541_v8 = vpack.c.bf16 %v505_v2, %v505_v2  ;;  %v472_v34 = vld [vmem:[#allocation3 + $0x68] sm:$0xff] }
  0x8a   : > { %2168 = vmatpush.bf16.msra.mxu3 %v9509_v51  ;;  %1397 = vmatmul.bf16.vlgmr.msra.gmra.mxu0 %v1186_v33  ;;  %v660_v42 = vshrl.u32 %v540_v36, 16  ;;  %v663_v43 = vshll.u32 %v540_v36, 16  ;;  %v1191_v50 = vshll.u32 %v10305_v37, 16  ;;  %v1677_v57 = vrot.slane %v10305_v37, 1 }
  0x8b   : > { %2553 = vmatpush.bf16.msrb.mxu0 %v9524_v0  ;;  %1562 = vmatmul.bf16.vlgmr.msra.gmra.mxu1 %v10229_v41  ;;  %v539_v41 = vpack.c.bf16 %v503_v20, %v503_v20  ;;  %v2060_v35 = vsel %vm1673_vm12, %v2058_v31, %v2059_v32  ;;  %v1189_v62 = vor.u32 %v1187_v49, %v1185_v29  ;;  %v670_v11 = vshrl.u32 %v541_v8, 16 }
  0x8c   : > { %1785 = vmatmul.bf16.vlgmr.msra.gmra.mxu2 %v1676_v30  ;;  %v662_v53 = vrot.slane %v660_v42, 6  ;;  %v665_v54 = vrot.slane %v663_v43, 7  ;;  %v9493_v55 = vld [vmem:[#allocation2 + $0x18] sm:$0xff]  ;;  %v1193_v0 = vrot.slane %v1191_v50, 1  ;;  %v1678_v6 = vsel %vm1673_vm12, %v1675_v23, %v1677_v57  ;;  %v471_v30 = vld [vmem:[#allocation3 + $0x60] sm:$0xff] }
  0x8d   : > { %2169 = vmatmul.bf16.vlgmr.msra.gmra.mxu3 %v2060_v35  ;;  %v650_v39 = vshrl.u32 %v539_v41, 16  ;;  %v653_v40 = vshll.u32 %v539_v41, 16  ;;  %v2061_v3 = vrot.slane %v9493_v55, 1  ;;  %v542_v10 = vpack.c.bf16 %v506_v7, %v506_v7  ;;  %v10319_v18 = vld [vmem:[#allocation2 + $0x18] sm:$0xff] }
  0x8e   : > { %v666_v60 = vor.u32 %v665_v54, %v662_v53  ;;  %v1194_v9 = vsel %vm1174_vm13, %v1189_v62, %v1193_v0  ;;  %v673_v56 = vshll.u32 %v541_v8, 16  ;;  %v672_v13 = vrot.slane %v670_v11, 6 }
  0x8f   : > { %2554 = vmatpush.bf16.msrb.mxu0 %v9523_v38  ;;  %v652_v47 = vrot.slane %v650_v39, 6  ;;  %v655_v48 = vrot.slane %v653_v40, 7  ;;  %v2062_v12 = vsel %vm1673_vm12, %v2059_v32, %v2061_v3  ;;  %v680_v44 = vshrl.u32 %v542_v10, 16 }
  0x90   : > { %v683_v45 = vshll.u32 %v542_v10, 16  ;;  %v675_v17 = vrot.slane %v673_v56, 7  ;;  %v668_v21 = vrot.slane %v666_v60, 4  ;;  %v1195_v24 = vshrl.u32 %v10305_v37, 16  ;;  %v9494_v28 = vld [vmem:[#allocation2 + $0x20] sm:$0xff] }
  0x91   : > { %v656_v51 = vor.u32 %v655_v48, %v652_v47  ;;  %v1199_v25 = vshll.u32 %v10319_v18, 16  ;;  %v1679_v29 = vrot.slane %v10319_v18, 1  ;;  %v507_v32 = vmax.f32 %v471_v30, 0.0 }
  0x92   : > { %v685_v19 = vrot.slane %v683_v45, 7  ;;  %v676_v20 = vor.u32 %v675_v17, %v672_v13  ;;  %v1197_v41 = vor.u32 %v1195_v24, %v1193_v0  ;;  %v2063_v33 = vrot.slane %v9494_v28, 1 }
  0x93   : > { %v657_v58 = vsel %vm10253_vm11, %v648_v46, %v656_v51  ;;  %v658_v59 = vrot.slane %v656_v51, 4  ;;  %v1201_v31 = vrot.slane %v1199_v25, 1  ;;  %v1680_v35 = vsel %vm1673_vm12, %v1677_v57, %v1679_v29  ;;  %v9522_v51 = vld [vmem:[%s9984_s28 + $0x128] sm:$0xff] }
  0x94   : > { %979 = vst [vmem:[#allocation2 + $0x28] sm:$0xf] %v657_v58  ;;  %v678_v22 = vrot.slane %v676_v20, 4  ;;  %v677_v27 = vsel %vm10253_vm11, %v668_v21, %v676_v20  ;;  %v508_v36 = vmax.f32 %v472_v34, 0.0  ;;  %v543_v38 = vpack.c.bf16 %v507_v32, %v507_v32  ;;  %2555 = vmatpush.bf16.msrb.mxu0 %v9522_v51 }
  0x95   : > { %v667_v1 = vsel %vm10253_vm11, %v658_v59, %v666_v60  ;;  %981 = vst [vmem:[#allocation2 + $0x30] sm:$0xf] %v677_v27  ;;  %v1202_v39 = vsel %vm1174_vm13, %v1197_v41, %v1201_v31  ;;  %v2064_v46 = vsel %vm1673_vm12, %v2061_v3, %v2063_v33  ;;  %v1203_v60 = vshrl.u32 %v10319_v18, 16  ;;  %v473_v3 = vld [vmem:[#allocation3 + $0x70] sm:$0xff] }
  0x96   : > { %980 = vst [vmem:[#allocation2 + $0x2c] sm:$0xf] %v667_v1  ;;  %v544_v40 = vpack.c.bf16 %v508_v36, %v508_v36  ;;  %v690_v42 = vshrl.u32 %v543_v38, 16  ;;  %v693_v43 = vshll.u32 %v543_v38, 16  ;;  %v509_v7 = vmax.f32 %v473_v3, 0.0 }
  0x97   : > { %v1205_v5 = vor.u32 %v1203_v60, %v1201_v31 }
  0x98   : > { %v692_v47 = vrot.slane %v690_v42, 6  ;;  %v695_v48 = vrot.slane %v693_v43, 7  ;;  %v700_v49 = vshrl.u32 %v544_v40, 16  ;;  %v703_v50 = vshll.u32 %v544_v40, 16 }
  0x9a   : > { %1402 = vmatmul.bf16.gmra.mxu0 %v1194_v9  ;;  %v696_v53 = vor.u32 %v695_v48, %v692_v47  ;;  %v702_v54 = vrot.slane %v700_v49, 6  ;;  %v705_v55 = vrot.slane %v703_v50, 7  ;;  %v474_v9 = vld [vmem:[#allocation3 + $0x78] sm:$0xff] }
  0x9b   : > { %1567 = vmatmul.bf16.gmra.mxu1 %v10281_v14  ;;  %v682_v14 = vrot.slane %v680_v44, 6  ;;  %v510_v11 = vmax.f32 %v474_v9, 0.0 }
  0x9c   : > { %1790 = vmatmul.bf16.gmra.mxu2 %v1678_v6  ;;  %v698_v58 = vrot.slane %v696_v53, 4  ;;  %v706_v59 = vor.u32 %v705_v55, %v702_v54 }
  0x9d   : > { %2174 = vmatmul.bf16.gmra.mxu3 %v2062_v12  ;;  %v686_v23 = vor.u32 %v685_v19, %v682_v14  ;;  %v9495_v0 = vld [vmem:[#allocation2 + $0x28] sm:$0xff]  ;;  %v545_v12 = vpack.c.bf16 %v509_v7, %v509_v7  ;;  %v546_v13 = vpack.c.bf16 %v510_v11, %v510_v11 }
  0x9e   : > { %v707_v1 = vsel %vm10253_vm11, %v698_v58, %v706_v59  ;;  %v2065_v8 = vrot.slane %v9495_v0, 1  ;;  %v708_v25 = vrot.slane %v706_v59, 4 }
  0x9f   : > { %v687_v52 = vsel %vm10253_vm11, %v678_v22, %v686_v23  ;;  %v688_v57 = vrot.slane %v686_v23, 4  ;;  %984 = vst [vmem:[#allocation2 + $0x3c] sm:$0xf] %v707_v1  ;;  %v710_v44 = vshrl.u32 %v545_v12, 16  ;;  %v713_v45 = vshll.u32 %v545_v12, 16  ;;  %v10346_v22 = vld [vmem:[#allocation2 + $0x28] sm:$0xff] }
  0xa0   : > { %982 = vst [vmem:[#allocation2 + $0x34] sm:$0xf] %v687_v52  ;;  %v2066_v17 = vsel %vm1673_vm12, %v2063_v33, %v2065_v8  ;;  %v720_v20 = vshrl.u32 %v546_v13, 16  ;;  %v723_v21 = vshll.u32 %v546_v13, 16  ;;  %v1683_v32 = vrot.slane %v10346_v22, 1  ;;  %v475_v33 = vld [vmem:[#allocation3 + $0x80] sm:$0xff] }
  0xa1   : > { %v697_v62 = vsel %vm10253_vm11, %v688_v57, %v696_v53  ;;  %v712_v14 = vrot.slane %v710_v44, 6  ;;  %v715_v19 = vrot.slane %v713_v45, 7  ;;  %v511_v36 = vmax.f32 %v475_v33, 0.0  ;;  %v9521_v57 = vld [vmem:[%s9984_s28 + $0x120] sm:$0xff] }
  0xa2   : > { %983 = vst [vmem:[#allocation2 + $0x38] sm:$0xf] %v697_v62  ;;  %v722_v23 = vrot.slane %v720_v20, 6  ;;  %v725_v24 = vrot.slane %v723_v21, 7  ;;  %2556 = vmatpush.bf16.msrb.mxu0 %v9521_v57  ;;  %v1219_v1 = vshrl.u32 %v10346_v22, 16 }
  0xa3   : > { %v547_v43 = vpack.c.bf16 %v511_v36, %v511_v36 }
  0xa4   : > { %v726_v28 = vor.u32 %v725_v24, %v722_v23 }
  0xa5   : > { %v730_v48 = vshrl.u32 %v547_v43, 16  ;;  %v733_v49 = vshll.u32 %v547_v43, 16 }
  0xa7   : > { %v9496_v41 = vld [vmem:[#allocation2 + $0x30] sm:$0xff]  ;;  %v732_v51 = vrot.slane %v730_v48, 6  ;;  %v735_v53 = vrot.slane %v733_v49, 7 }
  0xa8   : > { %v2067_v38 = vrot.slane %v9496_v41, 1 }
  0xa9   : > { %v736_v58 = vor.u32 %v735_v53, %v732_v51 }
  0xaa   : > { %1407 = vmatmul.bf16.gmra.mxu0 %v1202_v39  ;;  %v476_v39 = vld [vmem:[#allocation3 + $0x88] sm:$0xff]  ;;  %v2068_v50 = vsel %vm1673_vm12, %v2065_v8, %v2067_v38  ;;  %v477_v8 = vld [vmem:[#allocation3 + $0x90] sm:$0xff] }
  0xab   : > { %1572 = vmatmul.bf16.gmra.mxu1 %v10305_v37  ;;  %v10332_v37 = vld [vmem:[#allocation2 + $0x20] sm:$0xff]  ;;  %v512_v42 = vmax.f32 %v476_v39, 0.0  ;;  %v738_v62 = vrot.slane %v736_v58, 4  ;;  %v513_v11 = vmax.f32 %v477_v8, 0.0 }
  0xac   : > { %1795 = vmatmul.bf16.gmra.mxu2 %v1680_v35  ;;  %v1207_v61 = vshll.u32 %v10332_v37, 16  ;;  %v1681_v2 = vrot.slane %v10332_v37, 1  ;;  %v1211_v52 = vshrl.u32 %v10332_v37, 16 }
  0xad   : > { %2179 = vmatmul.bf16.gmra.mxu3 %v2064_v46  ;;  %v548_v47 = vpack.c.bf16 %v512_v42, %v512_v42  ;;  %v549_v45 = vpack.c.bf16 %v513_v11, %v513_v11  ;;  %v481_v11 = vld [vmem:[#allocation3 + $0xb0] sm:$0xff] }
  0xae   : > { %v1209_v6 = vrot.slane %v1207_v61, 1  ;;  %v1682_v10 = vsel %vm1673_vm12, %v1679_v29, %v1681_v2  ;;  %v1215_v29 = vshll.u32 %v10346_v22, 16  ;;  %v1684_v40 = vsel %vm1673_vm12, %v1681_v2, %v1683_v32 }
  0xaf   : > { %v740_v54 = vshrl.u32 %v548_v47, 16  ;;  %v743_v55 = vshll.u32 %v548_v47, 16  ;;  %v728_v61 = vrot.slane %v726_v28, 4  ;;  %v753_v20 = vshll.u32 %v549_v45, 16 }
  0xb0   : > { %v1210_v56 = vsel %vm1174_vm13, %v1205_v5, %v1209_v6  ;;  %v1213_v34 = vor.u32 %v1211_v52, %v1209_v6  ;;  %v1217_v35 = vrot.slane %v1215_v29, 1  ;;  %v9497_v5 = vld [vmem:[#allocation2 + $0x38] sm:$0xff] }
  0xb1   : > { %v742_v59 = vrot.slane %v740_v54, 6  ;;  %v745_v60 = vrot.slane %v743_v55, 7  ;;  %v737_v3 = vsel %vm10253_vm11, %v728_v61, %v736_v58  ;;  %v2069_v12 = vrot.slane %v9497_v5, 1 }
  0xb2   : > { %v1218_v46 = vsel %vm1174_vm13, %v1213_v34, %v1217_v35  ;;  %987 = vst [vmem:[#allocation2 + $0x48] sm:$0xf] %v737_v3  ;;  %v1221_v9 = vor.u32 %v1219_v1, %v1217_v35  ;;  %v755_v23 = vrot.slane %v753_v20, 7 }
  0xb3   : > { %v746_v0 = vor.u32 %v745_v60, %v742_v59  ;;  %v2070_v21 = vsel %vm1673_vm12, %v2067_v38, %v2069_v12  ;;  %v479_v38 = vld [vmem:[#allocation3 + $0xa0] sm:$0xff] }
  0xb4   : > { %v515_v42 = vmax.f32 %v479_v38, 0.0 }
  0xb5   : > { %v747_v6 = vsel %vm10253_vm11, %v738_v62, %v746_v0  ;;  %v748_v29 = vrot.slane %v746_v0, 4 }
  0xb6   : > { %988 = vst [vmem:[#allocation2 + $0x4c] sm:$0xf] %v747_v6  ;;  %v551_v49 = vpack.c.bf16 %v515_v42, %v515_v42 }
  0xb8   : > { %v770_v54 = vshrl.u32 %v551_v49, 16  ;;  %v773_v55 = vshll.u32 %v551_v49, 16 }
  0xba   : > { %1412 = vmatmul.bf16.gmra.mxu0 %v1210_v56  ;;  %v478_v56 = vld [vmem:[#allocation3 + $0x98] sm:$0xff]  ;;  %v772_v59 = vrot.slane %v770_v54, 6  ;;  %v775_v60 = vrot.slane %v773_v55, 7 }
  0xbb   : > { %1577 = vmatmul.bf16.gmra.mxu1 %v10319_v18  ;;  %v716_v18 = vor.u32 %v715_v19, %v712_v14  ;;  %v514_v44 = vmax.f32 %v478_v56, 0.0  ;;  %v750_v19 = vshrl.u32 %v549_v45, 16  ;;  %v9532_v45 = vld [vmem:[%s9984_s28 + $0x178] sm:$0xff] }
  0xbc   : > { %1800 = vmatmul.bf16.gmra.mxu2 %v1682_v10  ;;  %v776_v0 = vor.u32 %v775_v60, %v772_v59  ;;  %2812 = vmatpush.bf16.msrb.mxu1 %v9532_v45 }
  0xbd   : > { %2184 = vmatmul.bf16.gmra.mxu3 %v2066_v17  ;;  %v718_v27 = vrot.slane %v716_v18, 4  ;;  %v717_v30 = vsel %vm10253_vm11, %v708_v25, %v716_v18  ;;  %v550_v14 = vpack.c.bf16 %v514_v44, %v514_v44  ;;  %v752_v18 = vrot.slane %v750_v19, 6  ;;  %v10387_v8 = vld [vmem:[#allocation2 + $0x48] sm:$0xff] }
  0xbe   : > { %985 = vst [vmem:[#allocation2 + $0x40] sm:$0xf] %v717_v30  ;;  %v778_v3 = vrot.slane %v776_v0, 4  ;;  %v2073_v44 = vrot.slane %v10387_v8, 1 }
  0xbf   : > { %v727_v31 = vsel %vm10253_vm11, %v718_v27, %v726_v28  ;;  %v760_v24 = vshrl.u32 %v550_v14, 16  ;;  %v763_v25 = vshll.u32 %v550_v14, 16  ;;  %v9457_v27 = vld [vmem:[#allocation2 + $0x38] sm:$0xff] }
  0xc0   : > { %986 = vst [vmem:[#allocation2 + $0x44] sm:$0xf] %v727_v31  ;;  %v1687_v36 = vrot.slane %v9457_v27, 1  ;;  %v1235_v5 = vshrl.u32 %v9457_v27, 16 }
  0xc1   : > { %v762_v28 = vrot.slane %v760_v24, 6  ;;  %v765_v52 = vrot.slane %v763_v25, 7 }
  0xc3   : > { %v766_v41 = vor.u32 %v765_v52, %v762_v28  ;;  %v9520_v52 = vld [vmem:[%s9984_s28 + $0x118] sm:$0xff] }
  0xc4   : > { %2557 = vmatpush.bf16.msrb.mxu0 %v9520_v52 }
  0xc5   : > { %v768_v1 = vrot.slane %v766_v41, 4 }
  0xc7   : > { %v9498_v34 = vld [vmem:[#allocation2 + $0x40] sm:$0xff] }
  0xc8   : > { %v2071_v43 = vrot.slane %v9498_v34, 1  ;;  %v10382_v61 = vld [vmem:[#allocation2 + $0x40] sm:$0xff] }
  0xc9   : > { %v1239_v6 = vshll.u32 %v10382_v61, 16 }
  0xca   : > { %1417 = vmatmul.bf16.gmra.mxu0 %v1218_v46  ;;  %v480_v46 = vld [vmem:[#allocation3 + $0xa8] sm:$0xff]  ;;  %v2072_v53 = vsel %vm1673_vm12, %v2069_v12, %v2071_v43 }
  0xcb   : > { %1582 = vmatmul.bf16.gmra.mxu1 %v10332_v37  ;;  %v10359_v37 = vld [vmem:[#allocation2 + $0x30] sm:$0xff]  ;;  %v516_v48 = vmax.f32 %v480_v46, 0.0  ;;  %v1241_v56 = vrot.slane %v1239_v6, 1 }
  0xcc   : > { %1805 = vmatmul.bf16.gmra.mxu2 %v1684_v40  ;;  %v1223_v2 = vshll.u32 %v10359_v37, 16  ;;  %v1685_v7 = vrot.slane %v10359_v37, 1  ;;  %v1227_v31 = vshrl.u32 %v10359_v37, 16 }
  0xcd   : > { %2189 = vmatmul.bf16.gmra.mxu3 %v2068_v50  ;;  %v552_v51 = vpack.c.bf16 %v516_v48, %v516_v48 }
  0xce   : > { %v1225_v10 = vrot.slane %v1223_v2, 1  ;;  %v1686_v13 = vsel %vm1673_vm12, %v1683_v32, %v1685_v7  ;;  %v1231_v32 = vshll.u32 %v9457_v27, 16  ;;  %v1688_v47 = vsel %vm1673_vm12, %v1685_v7, %v1687_v36 }
  0xcf   : > { %v780_v57 = vshrl.u32 %v552_v51, 16  ;;  %v783_v58 = vshll.u32 %v552_v51, 16  ;;  %v777_v7 = vsel %vm10253_vm11, %v768_v1, %v776_v0 }
  0xd0   : > { %v1226_v17 = vsel %vm1174_vm13, %v1221_v9, %v1225_v10  ;;  %v1229_v39 = vor.u32 %v1227_v31, %v1225_v10  ;;  %v1233_v40 = vrot.slane %v1231_v32, 1  ;;  %991 = vst [vmem:[#allocation2 + $0x58] sm:$0xf] %v777_v7  ;;  %v1689_v10 = vrot.slane %v10382_v61, 1 }
  0xd1   : > { %v785_v62 = vrot.slane %v783_v58, 7 }
  0xd2   : > { %v1234_v50 = vsel %vm1174_vm13, %v1229_v39, %v1233_v40  ;;  %v1237_v12 = vor.u32 %v1235_v5, %v1233_v40  ;;  %v1690_v14 = vsel %vm1673_vm12, %v1687_v36, %v1689_v10  ;;  %v1243_v36 = vshrl.u32 %v10382_v61, 16 }
  0xd4   : > { %v1245_v48 = vor.u32 %v1243_v36, %v1241_v56 }
  0xda   : > { %1422 = vmatmul.bf16.gmra.mxu0 %v1226_v17  ;;  %v482_v17 = vld [vmem:[#allocation3 + $0xb8] sm:$0xff] }
  0xdb   : > { %1587 = vmatmul.bf16.gmra.mxu1 %v10346_v22  ;;  %v756_v22 = vor.u32 %v755_v23, %v752_v18  ;;  %v518_v19 = vmax.f32 %v482_v17, 0.0  ;;  %v2074_v23 = vsel %vm1673_vm12, %v2071_v43, %v2073_v44 }
  0xdc   : > { %1810 = vmatmul.bf16.gmra.mxu2 %v1686_v13  ;;  %v517_v13 = vmax.f32 %v481_v11, 0.0 }
  0xdd   : > { %2194 = vmatmul.bf16.gmra.mxu3 %v2070_v21  ;;  %v758_v30 = vrot.slane %v756_v22, 4  ;;  %v757_v33 = vsel %vm10253_vm11, %v748_v29, %v756_v22  ;;  %v1242_v21 = vsel %vm1174_vm13, %v1237_v12, %v1241_v56  ;;  %v554_v18 = vpack.c.bf16 %v518_v19, %v518_v19 }
  0xde   : > { %989 = vst [vmem:[#allocation2 + $0x50] sm:$0xf] %v757_v33  ;;  %v553_v20 = vpack.c.bf16 %v517_v13, %v517_v13 }
  0xdf   : > { %v767_v35 = vsel %vm10253_vm11, %v758_v30, %v766_v41  ;;  %v800_v22 = vshrl.u32 %v554_v18, 16  ;;  %v803_v28 = vshll.u32 %v554_v18, 16 }
  0xe0   : > { %990 = vst [vmem:[#allocation2 + $0x54] sm:$0xf] %v767_v35  ;;  %v790_v24 = vshrl.u32 %v553_v20, 16  ;;  %v793_v25 = vshll.u32 %v553_v20, 16 }
  0xe1   : > { %v802_v41 = vrot.slane %v800_v22, 6  ;;  %v805_v31 = vrot.slane %v803_v28, 7  ;;  %v485_v28 = vld [vmem:[#allocation3 + $0xd0] sm:$0xff] }
  0xe2   : > { %v792_v29 = vrot.slane %v790_v24, 6  ;;  %v795_v30 = vrot.slane %v793_v25, 7 }
  0xe3   : > { %v806_v34 = vor.u32 %v805_v31, %v802_v41  ;;  %v521_v31 = vmax.f32 %v485_v28, 0.0 }
  0xe4   : > { %v796_v32 = vor.u32 %v795_v30, %v792_v29 }
  0xe5   : > { %v808_v56 = vrot.slane %v806_v34, 4  ;;  %v557_v36 = vpack.c.bf16 %v521_v31, %v521_v31 }
  0xe6   : > { %v798_v35 = vrot.slane %v796_v32, 4 }
  0xe7   : > { %v10404_v40 = vld [vmem:[#allocation2 + $0x50] sm:$0xff] }
  0xe8   : > { %v807_v42 = vsel %vm10253_vm11, %v798_v35, %v806_v34  ;;  %v2075_v51 = vrot.slane %v10404_v40, 1  ;;  %v10414_v8 = vld [vmem:[#allocation2 + $0x50] sm:$0xff] }
  0xe9   : > { %994 = vst [vmem:[#allocation2 + $0x64] sm:$0xf] %v807_v42  ;;  %v1255_v20 = vshll.u32 %v10414_v8, 16  ;;  %v1693_v25 = vrot.slane %v10414_v8, 1 }
  0xea   : > { %1427 = vmatmul.bf16.gmra.mxu0 %v1234_v50 }
  0xeb   : > { %1592 = vmatmul.bf16.gmra.mxu1 %v10359_v37  ;;  %v782_v37 = vrot.slane %v780_v57, 6  ;;  %v1257_v30 = vrot.slane %v1255_v20, 1 }
  0xec   : > { %1815 = vmatmul.bf16.gmra.mxu2 %v1688_v47  ;;  %v483_v47 = vld [vmem:[#allocation3 + $0xc0] sm:$0xff] }
  0xed   : > { %2199 = vmatmul.bf16.gmra.mxu3 %v2072_v53  ;;  %v786_v2 = vor.u32 %v785_v62, %v782_v37  ;;  %v519_v50 = vmax.f32 %v483_v47, 0.0  ;;  %v484_v53 = vld [vmem:[#allocation3 + $0xc8] sm:$0xff]  ;;  %v2076_v62 = vsel %vm1673_vm12, %v2073_v44, %v2075_v51 }
  0xee   : > { %v520_v55 = vmax.f32 %v484_v53, 0.0 }
  0xef   : > { %v787_v9 = vsel %vm10253_vm11, %v778_v3, %v786_v2  ;;  %v788_v33 = vrot.slane %v786_v2, 4  ;;  %v555_v57 = vpack.c.bf16 %v519_v50, %v519_v50  ;;  %v9531_v50 = vld [vmem:[%s9984_s28 + $0x170] sm:$0xff] }
  0xf0   : > { %992 = vst [vmem:[#allocation2 + $0x5c] sm:$0xf] %v787_v9  ;;  %v556_v60 = vpack.c.bf16 %v520_v55, %v520_v55  ;;  %2813 = vmatpush.bf16.msrb.mxu1 %v9531_v50 }
  0xf1   : > { %v797_v39 = vsel %vm10253_vm11, %v788_v33, %v796_v32  ;;  %v810_v0 = vshrl.u32 %v555_v57, 16  ;;  %v813_v1 = vshll.u32 %v555_v57, 16  ;;  %v486_v33 = vld [vmem:[#allocation3 + $0xd8] sm:$0xff] }
  0xf2   : > { %993 = vst [vmem:[#allocation2 + $0x60] sm:$0xf] %v797_v39  ;;  %v820_v2 = vshrl.u32 %v556_v60, 16  ;;  %v823_v3 = vshll.u32 %v556_v60, 16  ;;  %v522_v35 = vmax.f32 %v486_v33, 0.0 }
  0xf3   : > { %v812_v6 = vrot.slane %v810_v0, 6 }
  0xf4   : > { %v822_v9 = vrot.slane %v820_v2, 6 }
  0xfa   : > { %1432 = vmatmul.bf16.gmra.mxu0 %v1242_v21  ;;  %v10422_v21 = vld [vmem:[#allocation2 + $0x58] sm:$0xff] }
  0xfb   : > { %1597 = vmatmul.bf16.gmra.mxu1 %v9457_v27  ;;  %v10398_v27 = vld [vmem:[#allocation2 + $0x48] sm:$0xff]  ;;  %v2077_v41 = vrot.slane %v10422_v21, 1 }
  0xfc   : > { %1820 = vmatmul.bf16.gmra.mxu2 %v1690_v14  ;;  %v1247_v38 = vshll.u32 %v10398_v27, 16  ;;  %v1691_v43 = vrot.slane %v10398_v27, 1  ;;  %v1251_v19 = vshrl.u32 %v10398_v27, 16 }
  0xfd   : > { %2204 = vmatmul.bf16.gmra.mxu3 %v2074_v23 }
  0xfe   : > { %v1249_v49 = vrot.slane %v1247_v38, 1  ;;  %v1692_v54 = vsel %vm1673_vm12, %v1689_v10, %v1691_v43  ;;  %v825_v10 = vrot.slane %v823_v3, 7  ;;  %v1694_v34 = vsel %vm1673_vm12, %v1691_v43, %v1693_v25 }
  0xff   : > { %v1259_v3 = vshrl.u32 %v10414_v8, 16 }
 0x100   : > { %v1250_v59 = vsel %vm1174_vm13, %v1245_v48, %v1249_v49  ;;  %v10416_v13 = vor.u32 %v825_v10, %v822_v9  ;;  %v1253_v29 = vor.u32 %v1251_v19, %v1249_v49  ;;  %v830_v48 = vshrl.u32 %v557_v36, 16  ;;  %v10450_v9 = vld [vmem:[#allocation2 + $0x60] sm:$0xff] }
 0x101   : > { %v833_v49 = vshll.u32 %v557_v36, 16  ;;  %v1261_v19 = vor.u32 %v1259_v3, %v1257_v30 }
 0x102   : > { %v1258_v42 = vsel %vm1174_vm13, %v1253_v29, %v1257_v30  ;;  %v832_v53 = vrot.slane %v830_v48, 6  ;;  %v828_v0 = vrot.slane %v10416_v13, 4  ;;  %v10472_v48 = vld [vmem:[#allocation2 + $0x60] sm:$0xff] }
 0x107   : > { %v1398_v58 = vpop.f32.mrf.mxu0 }
 0x108   : > { %v1563_v46 = vpop.f32.mrf.mxu1 }
 0x109   : > { %v1564_v37 = vadd.f32 %v1563_v46, %v1398_v58  ;;  %v2078_v46 = vsel %vm1673_vm12, %v2075_v51, %v2077_v41  ;;  %v10442_v58 = vld [vmem:[#allocation2 + $0x58] sm:$0xff]  ;;  %v9519_v51 = vld [vmem:[%s9984_s28 + $0x110] sm:$0xff] }
 0x10a   : > { %1437 = vmatmul.bf16.gmra.mxu0 %v1250_v59 }
 0x10b   : > { %1602 = vmatmul.bf16.gmra.mxu1 %v10382_v61  ;;  %v815_v61 = vrot.slane %v813_v1, 7  ;;  %2558 = vmatpush.bf16.msrb.mxu0 %v9519_v51  ;;  %v1271_v51 = vshll.u32 %v10472_v48, 16 }
 0x10c   : > { %1825 = vmatmul.bf16.gmra.mxu2 %v1692_v54  ;;  %v835_v54 = vrot.slane %v833_v49, 7 }
 0x10d   : > { %2209 = vmatmul.bf16.gmra.mxu3 %v2076_v62  ;;  %v816_v12 = vor.u32 %v815_v61, %v812_v6 }
 0x10f   : > { %v1786_v7 = vpop.f32.mrf.mxu2  ;;  %v818_v45 = vrot.slane %v816_v12, 4  ;;  %v1400_v17 = vpop.f32.mrf.mxu0  ;;  %v817_v18 = vsel %vm10253_vm11, %v808_v56, %v816_v12  ;;  %v1695_v56 = vrot.slane %v10442_v58, 1 }
 0x110   : > { %v1565_v5 = vpop.f32.mrf.mxu1  ;;  %v1876_v11 = vadd.f32 %v1786_v7, %v1564_v37  ;;  %v2170_v44 = vpop.f32.mrf.mxu3  ;;  %995 = vst [vmem:[#allocation2 + $0x68] sm:$0xf] %v817_v18  ;;  %v836_v37 = vor.u32 %v835_v54, %v832_v53  ;;  %v1263_v7 = vshll.u32 %v10442_v58, 16  ;;  %v2079_v18 = vrot.slane %v10450_v9, 1  ;;  %v9530_v9 = vld [vmem:[%s9984_s28 + $0x168] sm:$0xff] }
 0x111   : > { %v1566_v23 = vadd.f32 %v1565_v5, %v1400_v17  ;;  %v827_v24 = vsel %vm10253_vm11, %v818_v45, %v10416_v13  ;;  %v487_v45 = vld [vmem:[#allocation3 + $0xe0] sm:$0xff]  ;;  %v1696_v28 = vsel %vm1673_vm12, %v1693_v25, %v1695_v56  ;;  %2814 = vmatpush.bf16.msrb.mxu1 %v9530_v9 }
 0x112   : > { %v10418_v14 = vadd.f32 %v2170_v44, %v1876_v11  ;;  %996 = vst [vmem:[#allocation2 + $0x6c] sm:$0xf] %v827_v24  ;;  %v838_v5 = vrot.slane %v836_v37, 4  ;;  %v837_v10 = vsel %vm10253_vm11, %v828_v0, %v836_v37  ;;  %v1265_v20 = vrot.slane %v1263_v7, 1 }
 0x113   : > { %997 = vst [vmem:[#allocation2 + $0x70] sm:$0xf] %v837_v10  ;;  %v1273_v10 = vrot.slane %v1271_v51, 1 }
 0x114   : > { %v1266_v30 = vsel %vm1174_vm13, %v1261_v19, %v1265_v20 }
 0x117   : > { %v1788_v52 = vpop.f32.mrf.mxu2  ;;  %v1403_v39 = vpop.f32.mrf.mxu0 }
 0x118   : > { %v1568_v22 = vpop.f32.mrf.mxu1  ;;  %v1877_v32 = vadd.f32 %v1788_v52, %v1566_v23  ;;  %v2172_v38 = vpop.f32.mrf.mxu3  ;;  %v523_v23 = vmax.f32 %v487_v45, 0.0 }
 0x119   : > { %v1569_v47 = vadd.f32 %v1568_v22, %v1403_v39  ;;  %v488_v22 = vld [vmem:[#allocation3 + $0xe8] sm:$0xff]  ;;  %v10478_v37 = vld [vmem:[#allocation2 + $0x68] sm:$0xff] }
 0x11a   : > { %v10435_v40 = vadd.f32 %v2172_v38, %v1877_v32  ;;  %1442 = vmatmul.bf16.gmra.mxu0 %v1258_v42  ;;  %v524_v52 = vmax.f32 %v488_v22, 0.0  ;;  %v559_v29 = vpack.c.bf16 %v523_v23, %v523_v23 }
 0x11b   : > { %1607 = vmatmul.bf16.gmra.mxu1 %v10398_v27  ;;  %v558_v27 = vpack.c.bf16 %v522_v35, %v522_v35 }
 0x11c   : > { %1830 = vmatmul.bf16.gmra.mxu2 %v1694_v34  ;;  %v2080_v34 = vsel %vm1673_vm12, %v2077_v41, %v2079_v18  ;;  %v560_v36 = vpack.c.bf16 %v524_v52, %v524_v52  ;;  %v853_v38 = vshll.u32 %v559_v29, 16 }
 0x11d   : > { %v840_v55 = vshrl.u32 %v558_v27, 16  ;;  %2214 = vmatmul.bf16.gmra.mxu3 %v2078_v46  ;;  %v843_v59 = vshll.u32 %v558_v27, 16 }
 0x11e   : > { %v855_v42 = vrot.slane %v853_v38, 7  ;;  %v860_v46 = vshrl.u32 %v560_v36, 16 }
 0x11f   : > { %v1791_v57 = vpop.f32.mrf.mxu2  ;;  %v842_v62 = vrot.slane %v840_v55, 6  ;;  %v845_v1 = vrot.slane %v843_v59, 7  ;;  %v1405_v6 = vpop.f32.mrf.mxu0 }
 0x120   : > { %v1570_v43 = vpop.f32.mrf.mxu1  ;;  %v1878_v60 = vadd.f32 %v1791_v57, %v1569_v47  ;;  %v2175_v2 = vpop.f32.mrf.mxu3  ;;  %v863_v47 = vshll.u32 %v560_v36, 16  ;;  %v862_v21 = vrot.slane %v860_v46, 6  ;;  %v10500_v36 = vld [vmem:[#allocation2 + $0x68] sm:$0xff] }
 0x121   : > { %v846_v11 = vor.u32 %v845_v1, %v842_v62  ;;  %v1571_v12 = vadd.f32 %v1570_v43, %v1405_v6 }
 0x122   : > { %v10447_v61 = vadd.f32 %v2175_v2, %v1878_v60  ;;  %v865_v50 = vrot.slane %v863_v47, 7  ;;  %v1267_v60 = vshrl.u32 %v10442_v58, 16  ;;  %v1697_v2 = vrot.slane %v10472_v48, 1 }
 0x123   : > { %v847_v13 = vsel %vm10253_vm11, %v838_v5, %v846_v11  ;;  %v848_v41 = vrot.slane %v846_v11, 4  ;;  %v489_v5 = vld [vmem:[#allocation3 + $0xf0] sm:$0xff]  ;;  %v2081_v11 = vrot.slane %v10478_v37, 1  ;;  %v1275_v47 = vshrl.u32 %v10472_v48, 16 }
 0x124   : > { %998 = vst [vmem:[#allocation2 + $0x74] sm:$0xf] %v847_v13  ;;  %v866_v55 = vor.u32 %v865_v50, %v862_v21  ;;  %v1269_v7 = vor.u32 %v1267_v60, %v1265_v20  ;;  %v1698_v45 = vsel %vm1673_vm12, %v1695_v56, %v1697_v2  ;;  %v1279_v21 = vshll.u32 %v10500_v36, 16 }
 0x126   : > { %v1274_v20 = vsel %vm1174_vm13, %v1269_v7, %v1273_v10 }
 0x127   : > { %v1793_v17 = vpop.f32.mrf.mxu2  ;;  %v1408_v32 = vpop.f32.mrf.mxu0 }
 0x128   : > { %v1573_v44 = vpop.f32.mrf.mxu1  ;;  %v1879_v24 = vadd.f32 %v1793_v17, %v1571_v12  ;;  %v2177_v31 = vpop.f32.mrf.mxu3  ;;  %v525_v12 = vmax.f32 %v489_v5, 0.0 }
 0x129   : > { %v1574_v35 = vadd.f32 %v1573_v44, %v1408_v32  ;;  %v490_v44 = vld [vmem:[#allocation3 + $0xf8] sm:$0xff] }
 0x12a   : > { %v10464_v33 = vadd.f32 %v2177_v31, %v1879_v24  ;;  %1447 = vmatmul.bf16.gmra.mxu0 %v1266_v30  ;;  %v526_v17 = vmax.f32 %v490_v44, 0.0  ;;  %v561_v19 = vpack.c.bf16 %v525_v12, %v525_v12  ;;  %v492_v12 = vld [vmem:[#allocation3 + $0x108] sm:$0xff] }
 0x12b   : > { %1612 = vmatmul.bf16.gmra.mxu1 %v10414_v8  ;;  %v850_v8 = vshrl.u32 %v559_v29, 16  ;;  %v10507_v50 = vld [vmem:[#allocation2 + $0x70] sm:$0xff]  ;;  %v528_v44 = vmax.f32 %v492_v12, 0.0 }
 0x12c   : > { %1835 = vmatmul.bf16.gmra.mxu2 %v1696_v28  ;;  %v2082_v28 = vsel %vm1673_vm12, %v2079_v18, %v2081_v11  ;;  %v870_v29 = vshrl.u32 %v561_v19, 16  ;;  %v873_v56 = vshll.u32 %v561_v19, 16  ;;  %v2083_v5 = vrot.slane %v10507_v50, 1 }
 0x12d   : > { %v852_v39 = vrot.slane %v850_v8, 6  ;;  %2219 = vmatmul.bf16.gmra.mxu3 %v2080_v34 }
 0x12e   : > { %v872_v32 = vrot.slane %v870_v29, 6  ;;  %v875_v30 = vrot.slane %v873_v56, 7 }
 0x12f   : > { %v1796_v27 = vpop.f32.mrf.mxu2  ;;  %v856_v43 = vor.u32 %v855_v42, %v852_v39  ;;  %v1410_v57 = vpop.f32.mrf.mxu0  ;;  %v868_v39 = vrot.slane %v866_v55, 4 }
 0x130   : > { %v1575_v25 = vpop.f32.mrf.mxu1  ;;  %v1880_v49 = vadd.f32 %v1796_v27, %v1574_v35  ;;  %v2180_v53 = vpop.f32.mrf.mxu3  ;;  %v876_v18 = vor.u32 %v875_v30, %v872_v32  ;;  %v10530_v30 = vld [vmem:[#allocation2 + $0x70] sm:$0xff] }
 0x131   : > { %v858_v54 = vrot.slane %v856_v43, 4  ;;  %v857_v62 = vsel %vm10253_vm11, %v848_v41, %v856_v43  ;;  %v1576_v0 = vadd.f32 %v1575_v25, %v1410_v57  ;;  %v9518_v57 = vld [vmem:[%s9984_s28 + $0x108] sm:$0xff] }
 0x132   : > { %v10474_v59 = vadd.f32 %v2180_v53, %v1880_v49  ;;  %999 = vst [vmem:[#allocation2 + $0x78] sm:$0xf] %v857_v62  ;;  %v878_v27 = vrot.slane %v876_v18, 4  ;;  %v877_v41 = vsel %vm10253_vm11, %v868_v39, %v876_v18  ;;  %2559 = vmatpush.bf16.msrb.mxu0 %v9518_v57  ;;  %v491_v62 = vld [vmem:[#allocation3 + $0x100] sm:$0xff] }
 0x133   : > { %v867_v1 = vsel %vm10253_vm11, %v858_v54, %v866_v55  ;;  %1001 = vst [vmem:[#allocation2 + $0x80] sm:$0xf] %v877_v41  ;;  %v1699_v55 = vrot.slane %v10500_v36, 1  ;;  %v1701_v41 = vrot.slane %v10530_v30, 1 }
 0x134   : > { %1000 = vst [vmem:[#allocation2 + $0x7c] sm:$0xf] %v867_v1  ;;  %v1277_v1 = vor.u32 %v1275_v47, %v1273_v10 }
 0x137   : > { %v1798_v6 = vpop.f32.mrf.mxu2  ;;  %v1413_v24 = vpop.f32.mrf.mxu0 }
 0x138   : > { %v1578_v3 = vpop.f32.mrf.mxu1  ;;  %v1881_v13 = vadd.f32 %v1798_v6, %v1576_v0  ;;  %v2182_v23 = vpop.f32.mrf.mxu3  ;;  %v527_v6 = vmax.f32 %v491_v62, 0.0 }
 0x139   : > { %v1579_v52 = vadd.f32 %v1578_v3, %v1413_v24  ;;  %v1281_v3 = vrot.slane %v1279_v21, 1  ;;  %v2084_v24 = vsel %vm1673_vm12, %v2081_v11, %v2083_v5 }
 0x13a   : > { %v10492_v22 = vadd.f32 %v2182_v23, %v1881_v13  ;;  %1452 = vmatmul.bf16.gmra.mxu0 %v1274_v20  ;;  %v1700_v13 = vsel %vm1673_vm12, %v1697_v2, %v1699_v55 }
 0x13b   : > { %1617 = vmatmul.bf16.gmra.mxu1 %v10442_v58  ;;  %v562_v58 = vpack.c.bf16 %v526_v17, %v526_v17  ;;  %v1282_v10 = vsel %vm1174_vm13, %v1277_v1, %v1281_v3  ;;  %v10536_v47 = vld [vmem:[#allocation2 + $0x78] sm:$0xff] }
 0x13c   : > { %1840 = vmatmul.bf16.gmra.mxu2 %v1698_v45  ;;  %v563_v45 = vpack.c.bf16 %v527_v6, %v527_v6  ;;  %v2085_v62 = vrot.slane %v10536_v47, 1  ;;  %v494_v6 = vld [vmem:[#allocation3 + $0x118] sm:$0xff]  ;;  %v1009_v47 = vld [vmem:[#allocation2 + $0x98] sm:$0x3] }
 0x13d   : > { %v880_v34 = vshrl.u32 %v562_v58, 16  ;;  %2224 = vmatmul.bf16.gmra.mxu3 %v2082_v28  ;;  %v883_v8 = vshll.u32 %v562_v58, 16  ;;  %v564_v28 = vpack.c.bf16 %v528_v44, %v528_v44  ;;  %v530_v12 = vmax.f32 %v494_v6, 0.0 }
 0x13f   : > { %v1801_v35 = vpop.f32.mrf.mxu2  ;;  %v882_v25 = vrot.slane %v880_v34, 6  ;;  %v885_v42 = vrot.slane %v883_v8, 7  ;;  %v1415_v49 = vpop.f32.mrf.mxu0  ;;  %v900_v56 = vshrl.u32 %v564_v28, 16 }
 0x140   : > { %v1580_v31 = vpop.f32.mrf.mxu1  ;;  %v1882_v38 = vadd.f32 %v1801_v35, %v1579_v52  ;;  %v2185_v46 = vpop.f32.mrf.mxu3  ;;  %v893_v52 = vshll.u32 %v563_v45, 16 }
 0x141   : > { %v886_v53 = vor.u32 %v885_v42, %v882_v25  ;;  %v1581_v54 = vadd.f32 %v1580_v31, %v1415_v49  ;;  %v903_v31 = vshll.u32 %v564_v28, 16  ;;  %v902_v37 = vrot.slane %v900_v56, 6 }
 0x142   : > { %v10504_v43 = vadd.f32 %v2185_v46, %v1882_v38  ;;  %v895_v29 = vrot.slane %v893_v52, 7  ;;  %v1283_v42 = vshrl.u32 %v10500_v36, 16  ;;  %v1287_v46 = vshll.u32 %v10530_v30, 16 }
 0x143   : > { %v887_v60 = vsel %vm10253_vm11, %v878_v27, %v886_v53  ;;  %v905_v8 = vrot.slane %v903_v31, 7  ;;  %v888_v11 = vrot.slane %v886_v53, 4 }
 0x144   : > { %1002 = vst [vmem:[#allocation2 + $0x84] sm:$0xf] %v887_v60  ;;  %v1285_v60 = vor.u32 %v1283_v42, %v1281_v3 }
 0x145   : > { %v906_v18 = vor.u32 %v905_v8, %v902_v37 }
 0x147   : > { %v1803_v0 = vpop.f32.mrf.mxu2  ;;  %v1418_v19 = vpop.f32.mrf.mxu0 }
 0x148   : > { %v1583_v51 = vpop.f32.mrf.mxu1  ;;  %v1883_v7 = vadd.f32 %v1803_v0, %v1581_v54  ;;  %v2187_v17 = vpop.f32.mrf.mxu3  ;;  %v493_v54 = vld [vmem:[#allocation3 + $0x110] sm:$0xff] }
 0x149   : > { %v1584_v20 = vadd.f32 %v1583_v51, %v1418_v19  ;;  %v1289_v51 = vrot.slane %v1287_v46, 1  ;;  %v529_v0 = vmax.f32 %v493_v54, 0.0  ;;  %v2086_v19 = vsel %vm1673_vm12, %v2083_v5, %v2085_v62 }
 0x14a   : > { %v10522_v23 = vadd.f32 %v2187_v17, %v1883_v7  ;;  %1457 = vmatmul.bf16.gmra.mxu0 %v1282_v10  ;;  %v1702_v7 = vsel %vm1673_vm12, %v1699_v55, %v1701_v41  ;;  %v908_v5 = vrot.slane %v906_v18, 4 }
 0x14b   : > { %1622 = vmatmul.bf16.gmra.mxu1 %v10472_v48  ;;  %v890_v48 = vshrl.u32 %v563_v45, 16  ;;  %v1290_v3 = vsel %vm1174_vm13, %v1285_v60, %v1289_v51  ;;  %v10566_v46 = vld [vmem:[#allocation2 + $0x80] sm:$0xff] }
 0x14c   : > { %1845 = vmatmul.bf16.gmra.mxu2 %v1700_v13  ;;  %v565_v13 = vpack.c.bf16 %v529_v0, %v529_v0  ;;  %v2087_v0 = vrot.slane %v10566_v46, 1  ;;  %v9554_v46 = vld [vmem:[%s9984_s28 + $0x1a0] sm:$0xff] }
 0x14d   : > { %v892_v58 = vrot.slane %v890_v48, 6  ;;  %2229 = vmatmul.bf16.gmra.mxu3 %v2084_v24  ;;  %v566_v24 = vpack.c.bf16 %v530_v12, %v530_v12 }
 0x14f   : > { %v1806_v32 = vpop.f32.mrf.mxu2  ;;  %v896_v35 = vor.u32 %v895_v29, %v892_v58  ;;  %v1420_v25 = vpop.f32.mrf.mxu0  ;;  %v920_v52 = vshrl.u32 %v566_v24, 16  ;;  %v10558_v58 = vld [vmem:[#allocation2 + $0x78] sm:$0xff]  ;;  %v923_v29 = vshll.u32 %v566_v24, 16 }
 0x150   : > { %v1585_v2 = vpop.f32.mrf.mxu1  ;;  %v1884_v34 = vadd.f32 %v1806_v32, %v1584_v20  ;;  %v2190_v38 = vpop.f32.mrf.mxu3  ;;  %v913_v20 = vshll.u32 %v565_v13, 16  ;;  %v9565_v24 = vld [vmem:[%s9984_s28 + $0x1f8] sm:$0xff] }
 0x151   : > { %v898_v9 = vrot.slane %v896_v35, 4  ;;  %v897_v27 = vsel %vm10253_vm11, %v888_v11, %v896_v35  ;;  %v1586_v49 = vadd.f32 %v1585_v2, %v1420_v25  ;;  %v922_v31 = vrot.slane %v920_v52, 6  ;;  %3588 = vmatpush.bf16.msrb.mxu3 %v9565_v24  ;;  %v9560_v24 = vld [vmem:[%s9984_s28 + $0x1d0] sm:$0xff] }
 0x152   : > { %v10532_v39 = vadd.f32 %v2190_v38, %v1884_v34  ;;  %1003 = vst [vmem:[#allocation2 + $0x88] sm:$0xf] %v897_v27  ;;  %v915_v48 = vrot.slane %v913_v20, 7  ;;  %v925_v32 = vrot.slane %v923_v29, 7  ;;  %v1291_v35 = vshrl.u32 %v10530_v30, 16  ;;  %v9529_v27 = vld [vmem:[%s9984_s28 + $0x160] sm:$0xff] }
 0x153   : > { %v907_v21 = vsel %vm10253_vm11, %v898_v9, %v906_v18  ;;  %v1295_v38 = vshll.u32 %v10558_v58, 16  ;;  %v1703_v18 = vrot.slane %v10558_v58, 1  ;;  %2815 = vmatpush.bf16.msrb.mxu1 %v9529_v27 }
 0x154   : > { %1004 = vst [vmem:[#allocation2 + $0x8c] sm:$0xf] %v907_v21  ;;  %v926_v25 = vor.u32 %v925_v32, %v922_v31  ;;  %v1293_v54 = vor.u32 %v1291_v35, %v1289_v51 }
 0x155   : > { %v1704_v6 = vsel %vm1673_vm12, %v1701_v41, %v1703_v18 }
 0x156   : > { %v928_v41 = vrot.slane %v926_v25, 4 }
 0x157   : > { %v1808_v57 = vpop.f32.mrf.mxu2  ;;  %v1423_v45 = vpop.f32.mrf.mxu0 }
 0x158   : > { %v1588_v53 = vpop.f32.mrf.mxu1  ;;  %v1885_v1 = vadd.f32 %v1808_v57, %v1586_v49  ;;  %v2192_v44 = vpop.f32.mrf.mxu3  ;;  %v1297_v57 = vrot.slane %v1295_v38, 1  ;;  %v1010_v20 = vsel %vm10589_vm15, %v928_v41, %v1009_v47  ;;  %v9563_v38 = vld [vmem:[%s9984_s28 + $0x1e8] sm:$0xff] }
 0x159   : > { %v1589_v10 = vadd.f32 %v1588_v53, %v1423_v45  ;;  %v2088_v45 = vsel %vm1673_vm12, %v2085_v62, %v2087_v0  ;;  %1011 = vst [vmem:[#allocation2 + $0x98] sm:$0x3] %v1010_v20  ;;  %v9551_v20 = vld [vmem:[%s9984_s28 + $0x188] sm:$0xff] }
 0x15a   : > { %v10550_v17 = vadd.f32 %v2192_v44, %v1885_v1  ;;  %1462 = vmatmul.bf16.gmra.mxu0 %v1290_v3  ;;  %v9517_v1 = vld [vmem:[%s9984_s28 + $0x100] sm:$0xff]  ;;  %v1298_v44 = vsel %vm1174_vm13, %v1293_v54, %v1297_v57  ;;  %v9557_v3 = vld [vmem:[%s9984_s28 + $0x1b8] sm:$0xff] }
 0x15b   : > { %1627 = vmatmul.bf16.gmra.mxu1 %v10500_v36  ;;  %v910_v36 = vshrl.u32 %v565_v13, 16  ;;  %2560 = vmatpush.bf16.msrb.mxu0 %v9517_v1  ;;  %v10601_v31 = vld [vmem:[#allocation2 + $0x88] sm:$0xff]  ;;  %v9562_v54 = vld [vmem:[%s9984_s28 + $0x1e0] sm:$0xff] }
 0x15c   : > { %1850 = vmatmul.bf16.gmra.mxu2 %v1702_v7 }
 0x15d   : > { %v912_v28 = vrot.slane %v910_v36, 6  ;;  %2234 = vmatmul.bf16.gmra.mxu3 %v2086_v19  ;;  %v10585_v19 = vld [vmem:[#allocation2 + $0x80] sm:$0xff]  ;;  %3196 = vmatpush.bf16.msrb.mxu2 %v9557_v3  ;;  %v12629_v36 = vmov 0 }
 0x15e   : > { %v12630_v36 = vsel %vm10589_vm15, 4294967295, %v12629_v36  ;;  %v1303_v29 = vshll.u32 %v10585_v19, 16  ;;  %v1705_v32 = vrot.slane %v10585_v19, 1 }
 0x15f   : > { %v1811_v2 = vpop.f32.mrf.mxu2  ;;  %v916_v50 = vor.u32 %v915_v48, %v912_v28  ;;  %v1425_v8 = vpop.f32.mrf.mxu0  ;;  %12631 = vst [vmem:[#allocation8_spill] sm:$0xff] %v12630_v36 }
 0x160   : > { %v1590_v55 = vpop.f32.mrf.mxu1  ;;  %v1886_v56 = vadd.f32 %v1811_v2, %v1589_v10  ;;  %v2195_v34 = vpop.f32.mrf.mxu3  ;;  %v1299_v2 = vshrl.u32 %v10558_v58, 16 }
 0x161   : > { %v918_v37 = vrot.slane %v916_v50, 4  ;;  %v917_v9 = vsel %vm10253_vm11, %v908_v5, %v916_v50  ;;  %v1591_v42 = vadd.f32 %v1590_v55, %v1425_v8  ;;  %v9556_v55 = vld [vmem:[%s9984_s28 + $0x1b0] sm:$0xff]  ;;  %v9555_v5 = vld [vmem:[%s9984_s28 + $0x1a8] sm:$0xff]  ;;  %v1305_v8 = vrot.slane %v1303_v29, 1 }
 0x162   : > { %v10561_v11 = vadd.f32 %v2195_v34, %v1886_v56  ;;  %1005 = vst [vmem:[#allocation2 + $0x90] sm:$0xf] %v917_v9  ;;  %3197 = vmatpush.bf16.msrb.mxu2 %v9556_v55  ;;  %v9564_v56 = vld [vmem:[%s9984_s28 + $0x1f0] sm:$0xff] }
 0x163   : > { %v927_v49 = vsel %vm10253_vm11, %v918_v37, %v926_v25  ;;  %3589 = vmatpush.bf16.msrb.mxu3 %v9564_v56  ;;  %v1301_v37 = vor.u32 %v1299_v2, %v1297_v57  ;;  %v2089_v25 = vrot.slane %v10601_v31, 1  ;;  %v9526_v56 = vld [vmem:[%s9984_s28 + $0x148] sm:$0xff] }
 0x164   : > { %1006 = vst [vmem:[#allocation2 + $0x94] sm:$0xf] %v927_v49 }
 0x166   : > { %3198 = vmatpush.bf16.msrb.mxu2 %v9555_v5 }
 0x167   : > { %v1813_v53 = vpop.f32.mrf.mxu2  ;;  %v1428_v12 = vpop.f32.mrf.mxu0  ;;  %3590 = vmatpush.bf16.msrb.mxu3 %v9563_v38  ;;  %v9550_v38 = vld [vmem:[%s9984_s28 + $0x180] sm:$0xff] }
 0x168   : > { %v1593_v21 = vpop.f32.mrf.mxu1  ;;  %v1887_v60 = vadd.f32 %v1813_v53, %v1591_v42  ;;  %v2197_v7 = vpop.f32.mrf.mxu3  ;;  %v1706_v42 = vsel %vm1673_vm12, %v1703_v18, %v1705_v32  ;;  %v1306_v53 = vsel %vm1174_vm13, %v1301_v37, %v1305_v8  ;;  %v9553_v18 = vld [vmem:[%s9984_s28 + $0x198] sm:$0xff] }
 0x169   : > { %v1594_v51 = vadd.f32 %v1593_v21, %v1428_v12  ;;  %v9561_v12 = vld [vmem:[%s9984_s28 + $0x1d8] sm:$0xff] }
 0x16a   : > { %v10578_v13 = vadd.f32 %v2197_v7, %v1887_v60  ;;  %1467 = vmatmul.bf16.gmra.mxu0 %v1298_v44  ;;  %3199 = vmatpush.bf16.msrb.mxu2 %v9554_v46  ;;  %v9528_v7 = vld [vmem:[%s9984_s28 + $0x158] sm:$0xff] }
 0x16b   : > { %1632 = vmatmul.bf16.gmra.mxu1 %v10530_v30  ;;  %3591 = vmatpush.bf16.msrb.mxu3 %v9562_v54 }
 0x16c   : > { %1855 = vmatmul.bf16.gmra.mxu2 %v1704_v6  ;;  %v10620_v6 = vld [vmem:[#allocation2 + $0x88] sm:$0xff]  ;;  %2816 = vmatpush.bf16.msrb.mxu1 %v9528_v7 }
 0x16d   : > { %2239 = vmatmul.bf16.gmra.mxu3 %v2088_v45  ;;  %v1311_v41 = vshll.u32 %v10620_v6, 16  ;;  %v1707_v55 = vrot.slane %v10620_v6, 1  ;;  %v1315_v31 = vshrl.u32 %v10620_v6, 16 }
 0x16e   : > { %3200 = vmatpush.bf16.msrb.mxu2 %v9553_v18 }
 0x16f   : > { %v1816_v10 = vpop.f32.mrf.mxu2  ;;  %v1430_v48 = vpop.f32.mrf.mxu0  ;;  %3592 = vmatpush.bf16.msrb.mxu3 %v9561_v12  ;;  %v1313_v29 = vrot.slane %v1311_v41, 1  ;;  %v1708_v37 = vsel %vm1673_vm12, %v1705_v32, %v1707_v55  ;;  %v1948_v32 = vld [vmem:[#allocation2 + $0x98] sm:$0x1]  ;;  %v10655_v41 = vld [vmem:[#allocation2 + $0x14] sm:$0xf] }
 0x170   : > { %v1595_v30 = vpop.f32.mrf.mxu1  ;;  %v1888_v62 = vadd.f32 %v1816_v10, %v1594_v51  ;;  %v2200_v28 = vpop.f32.mrf.mxu3  ;;  %v9552_v51 = vld [vmem:[%s9984_s28 + $0x190] sm:$0xff]  ;;  %v2038_v7 = vunpack.c.l.b16 %v1948_v32 }
 0x171   : > { %v1596_v50 = vadd.f32 %v1595_v30, %v1430_v48  ;;  %v1307_v30 = vshrl.u32 %v10585_v19, 16  ;;  %v9527_v10 = vld [vmem:[%s9984_s28 + $0x150] sm:$0xff] }
 0x172   : > { %v10596_v52 = vadd.f32 %v2200_v28, %v1888_v62  ;;  %3201 = vmatpush.bf16.msrb.mxu2 %v9552_v51  ;;  %v10631_v62 = vld [vmem:[#allocation2 + $0x90] sm:$0xff]  ;;  %2817 = vmatpush.bf16.msrb.mxu1 %v9527_v10 }
 0x173   : > { %3593 = vmatpush.bf16.msrb.mxu3 %v9560_v24  ;;  %v1309_v2 = vor.u32 %v1307_v30, %v1305_v8  ;;  %v2947_v30 = vld [vmem:[#allocation2 + $0x10] sm:$0xc] }
 0x174   : > { %v10672_v32 = vld [vmem:[#allocation2 + $0x10] sm:$0xff] }
 0x175   : > { %v1314_v46 = vsel %vm1174_vm13, %v1309_v2, %v1313_v29  ;;  %v2688_v2 = vld [vmem:[#allocation2 + $0x8] sm:$0xc] }
 0x176   : > { %3202 = vmatpush.bf16.msrb.mxu2 %v9551_v20  ;;  %2818 = vmatpush.bf16.msrb.mxu1 %v9526_v56 }
 0x177   : > { %v1818_v35 = vpop.f32.mrf.mxu2  ;;  %v1433_v49 = vpop.f32.mrf.mxu0 }
 0x178   : > { %v1598_v34 = vpop.f32.mrf.mxu1  ;;  %v1889_v9 = vadd.f32 %v1818_v35, %v1596_v50  ;;  %v2202_v27 = vpop.f32.mrf.mxu3  ;;  %v9559_v50 = vld [vmem:[%s9984_s28 + $0x1c8] sm:$0xff]  ;;  %v1064_v35 = vld [vmem:[#allocation2 + $0x90] sm:$0x1] }
 0x179   : > { %v1599_v57 = vadd.f32 %v1598_v34, %v1433_v49  ;;  %v2091_v34 = vrot.slane %v10631_v62, 1  ;;  %3594 = vmatpush.bf16.msrb.mxu3 %v9559_v50  ;;  %v9525_v49 = vld [vmem:[%s9984_s28 + $0x140] sm:$0xff]  ;;  %v1317_v62 = vor.u32 %v1315_v31, %v1313_v29 }
 0x17a   : > { %v10612_v21 = vadd.f32 %v2202_v27, %v1889_v9  ;;  %1472 = vmatmul.bf16.gmra.mxu0 %v1306_v53  ;;  %v1154_v27 = vunpack.c.l.b16 %v1064_v35  ;;  %3203 = vmatpush.bf16.msrb.mxu2 %v9550_v38  ;;  %v9558_v53 = vld [vmem:[%s9984_s28 + $0x1c0] sm:$0xff] }
 0x17b   : > { %1637 = vmatmul.bf16.gmra.mxu1 %v10558_v58  ;;  %v2090_v58 = vsel %vm1673_vm12, %v2087_v0, %v2089_v25 }
 0x17c   : > { %1860 = vmatmul.bf16.gmra.mxu2 %v1706_v42  ;;  %2819 = vmatpush.bf16.msrb.mxu1 %v9525_v49  ;;  %v10666_v49 = vld [vmem:[#allocation2 + $0x18] sm:$0xff] }
 0x17d   : > { %2244 = vmatmul.bf16.gmra.mxu3 %v2090_v58  ;;  %v9573_v58 = vld [vmem:[%s9984_s28 + $0x238] sm:$0xff] }
 0x17e   : > { %3595 = vmatpush.bf16.msrb.mxu3 %v9558_v53  ;;  %3847 = vmatpush.bf16.msra.mxu0 %v9573_v58  ;;  %v2321_v53 = vshll.u32 %v10297_v26, 16  ;;  %v2329_v58 = vshll.u32 %v10672_v32, 16 }
 0x17f   : > { %v1821_v1 = vpop.f32.mrf.mxu2  ;;  %v1435_v0 = vpop.f32.mrf.mxu0 }
 0x180   : > { %v1600_v60 = vpop.f32.mrf.mxu1  ;;  %v1890_v44 = vadd.f32 %v1821_v1, %v1599_v57  ;;  %v2205_v45 = vpop.f32.mrf.mxu3  ;;  %4113 = vmatpush.bf16.msra.mxu1 %v9575_v15 }
 0x181   : > { %v1601_v47 = vadd.f32 %v1600_v60, %v1435_v0  ;;  %v1173_v60 = vpack.c.b16 %v1154_v27, %v1154_v27  ;;  %v2057_v0 = vpack.c.b16 %v2038_v7, %v2038_v7  ;;  %v3364_v7 = vshll.u32 %v10666_v49, 16 }
 0x182   : > { %v10625_v3 = vadd.f32 %v2205_v45, %v1890_v44 }
 0x183   : > { %v1319_v45 = vshll.u32 %v1173_v60, 16  ;;  %v1709_v10 = vrot.slane %v1173_v60, 1  ;;  %v2093_v50 = vrot.slane %v2057_v0, 1  ;;  %v2331_v0 = vrot.slane %v2329_v58, 2 }
 0x185   : > { %v1321_v20 = vrot.slane %v1319_v45, 1  ;;  %v2094_v27 = vsel %vm1673_vm12, %v2091_v34, %v2093_v50 }
 0x187   : > { %v1823_v48 = vpop.f32.mrf.mxu2  ;;  %v1438_v8 = vpop.f32.mrf.mxu0 }
 0x188   : > { %v1603_v28 = vpop.f32.mrf.mxu1  ;;  %v1891_v5 = vadd.f32 %v1823_v48, %v1601_v47  ;;  %v2207_v9 = vpop.f32.mrf.mxu3  ;;  %v12562_v48 = vunpack.c.l.b16 %v10655_v41 }
 0x189   : > { %v1604_v54 = vadd.f32 %v1603_v28, %v1438_v8  ;;  %v3037_v28 = vunpack.c.l.b16 %v2947_v30  ;;  %v1322_v8 = vsel %vm1174_vm13, %v1317_v62, %v1321_v20  ;;  %v3366_v62 = vrot.slane %v3364_v7, 3  ;;  %v9572_v7 = vld [vmem:[%s9984_s28 + $0x230] sm:$0xff] }
 0x18a   : > { %v10643_v42 = vadd.f32 %v2207_v9, %v1891_v5  ;;  %1477 = vmatmul.bf16.gmra.mxu0 %v1314_v46  ;;  %v1710_v5 = vsel %vm1673_vm12, %v1707_v55, %v1709_v10  ;;  %v2318_v55 = vshrl.u32 %v10297_v26, 16 }
 0x18b   : > { %1642 = vmatmul.bf16.gmra.mxu1 %v10585_v19  ;;  %v2092_v19 = vsel %vm1673_vm12, %v2089_v25, %v2091_v34  ;;  %v3074_v29 = vpack.c.b16 %v12562_v48, %v3037_v28  ;;  %v3094_v28 = vrot.slane %v10666_v49, 2  ;;  %3848 = vmatpush.bf16.msra.mxu0 %v9572_v7 }
 0x18c   : > { %1865 = vmatmul.bf16.gmra.mxu2 %v1708_v37  ;;  %v2706_v37 = vunpack.c.l.b16 %v2688_v2  ;;  %v2320_v26 = vrot.slane %v2318_v55, 1 }
 0x18d   : > { %2249 = vmatmul.bf16.gmra.mxu3 %v2092_v19  ;;  %v3353_v34 = vshrl.u32 %v3074_v29, 16  ;;  %v3356_v60 = vshll.u32 %v3074_v29, 16  ;;  %v3093_v20 = vrot.slane %v3074_v29, 2 }
 0x18f   : > { %v1826_v18 = vpop.f32.mrf.mxu2  ;;  %v1440_v44 = vpop.f32.mrf.mxu0  ;;  %v3355_v30 = vrot.slane %v3353_v34, 2 }
 0x190   : > { %v1605_v57 = vpop.f32.mrf.mxu1  ;;  %v1892_v1 = vadd.f32 %v1826_v18, %v1604_v54  ;;  %v2210_v12 = vpop.f32.mrf.mxu3  ;;  %v2707_v54 = vpack.c.b16 %v2003_v63, %v2706_v37  ;;  %v2710_v63 = vrot.slane %v10672_v32, 2 }
 0x191   : > { %v1606_v25 = vadd.f32 %v1605_v57, %v1440_v44  ;;  %v2326_v57 = vshrl.u32 %v10672_v32, 16  ;;  %v2323_v44 = vrot.slane %v2321_v53, 2 }
 0x192   : > { %v10652_v51 = vadd.f32 %v2210_v12, %v1892_v1  ;;  %v3361_v1 = vshrl.u32 %v10666_v49, 16  ;;  %v2709_v16 = vrot.slane %v2707_v54, 2  ;;  %v10688_v54 = vld [vmem:[#allocation2 + $0x20] sm:$0xff] }
 0x197   : > { %v1828_v47 = vpop.f32.mrf.mxu2  ;;  %v1443_v38 = vpop.f32.mrf.mxu0 }
 0x198   : > { %v1608_v24 = vpop.f32.mrf.mxu1  ;;  %v1893_v56 = vadd.f32 %v1828_v47, %v1606_v25  ;;  %v2212_v35 = vpop.f32.mrf.mxu3  ;;  %v2328_v25 = vrot.slane %v2326_v57, 1  ;;  %v3363_v47 = vrot.slane %v3361_v1, 2  ;;  %v9751_v57 = vld [vmem:[#allocation2 + $0x18] sm:$0xff]  ;;  %v3373_v1 = vshll.u32 %v10688_v54, 16 }
 0x199   : > { %v1609_v46 = vadd.f32 %v1608_v24, %v1443_v38  ;;  %v3358_v24 = vrot.slane %v3356_v60, 3  ;;  %v2335_v58 = vshrl.u32 %v9751_v57, 16  ;;  %v2338_v34 = vshll.u32 %v9751_v57, 16 }
 0x19a   : > { %v10660_v9 = vadd.f32 %v2212_v35, %v1893_v56  ;;  %1482 = vmatmul.bf16.gmra.mxu0 %v1322_v8  ;;  %v2711_v56 = vsel %vm2708_vm0, %v2709_v16, %v2710_v63  ;;  %v2332_v35 = vor.u32 %v2331_v0, %v2328_v25  ;;  %v3367_v8 = vor.u32 %v3366_v62, %v3363_v47 }
 0x19b   : > { %1647 = vmatmul.bf16.gmra.mxu1 %v10620_v6  ;;  %v3359_v38 = vor.u32 %v3358_v24, %v3355_v30  ;;  %v3370_v60 = vshrl.u32 %v10688_v54, 16  ;;  %v2340_v25 = vrot.slane %v2338_v34, 2  ;;  %v3096_v24 = vrot.slane %v10688_v54, 2  ;;  %v9752_v54 = vld [vmem:[#allocation2 + $0x20] sm:$0xff] }
 0x19c   : > { %1870 = vmatmul.bf16.gmra.mxu2 %v1710_v5  ;;  %v2324_v5 = vor.u32 %v2323_v44, %v2320_v26  ;;  %v2712_v26 = vrot.slane %v9751_v57, 2 }
 0x19d   : > { %2254 = vmatmul.bf16.gmra.mxu3 %v2094_v27  ;;  %v3368_v53 = vsel %vm3351_vm2, %v3359_v38, %v3367_v8  ;;  %v3372_v30 = vrot.slane %v3370_v60, 2 }
 0x19e   : > { %v2333_v29 = vsel %vm2316_vm1, %v2324_v5, %v2332_v35  ;;  %v2713_v62 = vsel %vm2708_vm0, %v2710_v63, %v2712_v26  ;;  %v3097_v5 = vsel %vm2708_vm0, %v3094_v28, %v3096_v24 }
 0x19f   : > { %v1831_v19 = vpop.f32.mrf.mxu2  ;;  %v1445_v31 = vpop.f32.mrf.mxu0 }
 0x1a0   : > { %v1610_v6 = vpop.f32.mrf.mxu1  ;;  %v1894_v18 = vadd.f32 %v1831_v19, %v1609_v46  ;;  %v2215_v12 = vpop.f32.mrf.mxu3  ;;  %v3095_v46 = vsel %vm2708_vm0, %v3093_v20, %v3094_v28  ;;  %v2347_v28 = vshll.u32 %v9752_v54, 16 }
 0x1a1   : > { %v1611_v10 = vadd.f32 %v1610_v6, %v1445_v31  ;;  %v2337_v31 = vrot.slane %v2335_v58, 1 }
 0x1a2   : > { %v10679_v45 = vadd.f32 %v2215_v12, %v1894_v18 }
 0x1a7   : > { %v1833_v50 = vpop.f32.mrf.mxu2  ;;  %v1448_v6 = vpop.f32.mrf.mxu0 }
 0x1a8   : > { %v1613_v2 = vpop.f32.mrf.mxu1  ;;  %v1895_v37 = vadd.f32 %v1833_v50, %v1611_v10  ;;  %v2217_v27 = vpop.f32.mrf.mxu3  ;;  %v3375_v10 = vrot.slane %v3373_v1, 3  ;;  %v2349_v1 = vrot.slane %v2347_v28, 2 }
 0x1a9   : > { %v1614_v49 = vadd.f32 %v1613_v2, %v1448_v6  ;;  %v2341_v2 = vor.u32 %v2340_v25, %v2337_v31 }
 0x1aa   : > { %v10684_v55 = vadd.f32 %v2217_v27, %v1895_v37  ;;  %2561 = vmatmul.bf16.vlgmr.msrb.gmra.mxu0 %v2333_v29  ;;  %v3376_v50 = vor.u32 %v3375_v10, %v3372_v30 }
 0x1ab   : > { %2820 = vmatmul.bf16.vlgmr.msrb.gmra.mxu1 %v2711_v56  ;;  %v2342_v27 = vsel %vm2316_vm1, %v2332_v35, %v2341_v2  ;;  %v2714_v35 = vrot.slane %v9752_v54, 2 }
 0x1ac   : > { %3204 = vmatmul.bf16.vlgmr.msrb.gmra.mxu2 %v3095_v46  ;;  %v3377_v29 = vsel %vm3351_vm2, %v3367_v8, %v3376_v50 }
 0x1ad   : > { %3596 = vmatmul.bf16.vlgmr.msrb.gmra.mxu3 %v3368_v53 }
 0x1af   : > { %v1836_v32 = vpop.f32.mrf.mxu2  ;;  %v1450_v44 = vpop.f32.mrf.mxu0 }
 0x1b0   : > { %v1615_v19 = vpop.f32.mrf.mxu1  ;;  %v1896_v18 = vadd.f32 %v1836_v32, %v1614_v49  ;;  %v2220_v12 = vpop.f32.mrf.mxu3  ;;  %v10702_v49 = vld [vmem:[#allocation2 + $0x28] sm:$0xff] }
 0x1b1   : > { %v1616_v0 = vadd.f32 %v1615_v19, %v1450_v44  ;;  %v2344_v19 = vshrl.u32 %v9752_v54, 16  ;;  %v3379_v57 = vshrl.u32 %v10702_v49, 16  ;;  %v3382_v58 = vshll.u32 %v10702_v49, 16 }
 0x1b2   : > { %v10693_v16 = vadd.f32 %v2220_v12, %v1896_v18  ;;  %v3098_v31 = vrot.slane %v10702_v49, 2 }
 0x1b3   : > { %v2346_v8 = vrot.slane %v2344_v19, 1  ;;  %v3381_v12 = vrot.slane %v3379_v57, 2  ;;  %v3384_v44 = vrot.slane %v3382_v58, 3 }
 0x1b5   : > { %v2350_v10 = vor.u32 %v2349_v1, %v2346_v8 }
 0x1b7   : > { %v1838_v20 = vpop.f32.mrf.mxu2  ;;  %v1453_v38 = vpop.f32.mrf.mxu0 }
 0x1b8   : > { %v1618_v47 = vpop.f32.mrf.mxu1  ;;  %v1897_v56 = vadd.f32 %v1838_v20, %v1616_v0  ;;  %v2222_v37 = vpop.f32.mrf.mxu3  ;;  %v2715_v0 = vsel %vm2708_vm0, %v2712_v26, %v2714_v35  ;;  %v3099_v20 = vsel %vm2708_vm0, %v3096_v24, %v3098_v31 }
 0x1b9   : > { %v1619_v6 = vadd.f32 %v1618_v47, %v1453_v38  ;;  %v2351_v38 = vsel %vm2316_vm1, %v2341_v2, %v2350_v10 }
 0x1ba   : > { %v10698_v46 = vadd.f32 %v2222_v37, %v1897_v56  ;;  %2566 = vmatmul.bf16.gmra.mxu0 %v2342_v27 }
 0x1bb   : > { %2825 = vmatmul.bf16.gmra.mxu1 %v2713_v62  ;;  %v3385_v62 = vor.u32 %v3384_v44, %v3381_v12 }
 0x1bc   : > { %3209 = vmatmul.bf16.gmra.mxu2 %v3097_v5 }
 0x1bd   : > { %3601 = vmatmul.bf16.gmra.mxu3 %v3377_v29  ;;  %v10715_v29 = vld [vmem:[#allocation2 + $0x30] sm:$0xff] }
 0x1be   : > { %v3388_v19 = vshrl.u32 %v10715_v29, 16  ;;  %v3391_v28 = vshll.u32 %v10715_v29, 16  ;;  %v3100_v12 = vrot.slane %v10715_v29, 2 }
 0x1bf   : > { %v1841_v53 = vpop.f32.mrf.mxu2  ;;  %v1455_v18 = vpop.f32.mrf.mxu0 }
 0x1c0   : > { %v1620_v63 = vpop.f32.mrf.mxu1  ;;  %v1898_v32 = vadd.f32 %v1841_v53, %v1619_v6  ;;  %v2225_v34 = vpop.f32.mrf.mxu3  ;;  %v3386_v6 = vsel %vm3351_vm2, %v3376_v50, %v3385_v62  ;;  %v3390_v8 = vrot.slane %v3388_v19, 2  ;;  %v3393_v1 = vrot.slane %v3391_v28, 3 }
 0x1c1   : > { %v1621_v7 = vadd.f32 %v1620_v63, %v1455_v18  ;;  %v9753_v63 = vld [vmem:[#allocation2 + $0x28] sm:$0xff] }
 0x1c2   : > { %v10706_v60 = vadd.f32 %v2225_v34, %v1898_v32  ;;  %v2353_v24 = vshrl.u32 %v9753_v63, 16  ;;  %v2356_v53 = vshll.u32 %v9753_v63, 16  ;;  %v2716_v32 = vrot.slane %v9753_v63, 2 }
 0x1c4   : > { %v2355_v50 = vrot.slane %v2353_v24, 1  ;;  %v2358_v34 = vrot.slane %v2356_v53, 2  ;;  %v9754_v24 = vld [vmem:[#allocation2 + $0x30] sm:$0xff] }
 0x1c5   : > { %v2362_v53 = vshrl.u32 %v9754_v24, 16 }
 0x1c7   : > { %v1843_v30 = vpop.f32.mrf.mxu2  ;;  %v1458_v5 = vpop.f32.mrf.mxu0 }
 0x1c8   : > { %v1623_v25 = vpop.f32.mrf.mxu1  ;;  %v1899_v47 = vadd.f32 %v1843_v30, %v1621_v7  ;;  %v2227_v56 = vpop.f32.mrf.mxu3  ;;  %v9571_v7 = vld [vmem:[%s9984_s28 + $0x228] sm:$0xff]  ;;  %v2359_v30 = vor.u32 %v2358_v34, %v2355_v50 }
 0x1c9   : > { %v1624_v27 = vadd.f32 %v1623_v25, %v1458_v5  ;;  %v2717_v25 = vsel %vm2708_vm0, %v2714_v35, %v2716_v32  ;;  %3849 = vmatpush.bf16.msra.mxu0 %v9571_v7 }
 0x1ca   : > { %v10711_v37 = vadd.f32 %v2227_v56, %v1899_v47  ;;  %2571 = vmatmul.bf16.gmra.mxu0 %v2351_v38  ;;  %v3101_v56 = vsel %vm2708_vm0, %v3098_v31, %v3100_v12  ;;  %v2365_v31 = vshll.u32 %v9754_v24, 16 }
 0x1cb   : > { %2830 = vmatmul.bf16.gmra.mxu1 %v2715_v0 }
 0x1cc   : > { %3214 = vmatmul.bf16.gmra.mxu2 %v3099_v20  ;;  %v3394_v20 = vor.u32 %v3393_v1, %v3390_v8  ;;  %v2367_v34 = vrot.slane %v2365_v31, 2  ;;  %v9755_v31 = vld [vmem:[#allocation2 + $0x38] sm:$0xff] }
 0x1cd   : > { %3606 = vmatmul.bf16.gmra.mxu3 %v3386_v6  ;;  %v2360_v6 = vsel %vm2316_vm1, %v2350_v10, %v2359_v30  ;;  %v2718_v10 = vrot.slane %v9754_v24, 2  ;;  %v10742_v24 = vld [vmem:[#allocation2 + $0x40] sm:$0xff] }
 0x1ce   : > { %v3395_v29 = vsel %vm3351_vm2, %v3385_v62, %v3394_v20  ;;  %v2364_v62 = vrot.slane %v2362_v53, 1 }
 0x1cf   : > { %v1846_v49 = vpop.f32.mrf.mxu2  ;;  %v1460_v57 = vpop.f32.mrf.mxu0 }
 0x1d0   : > { %v1625_v26 = vpop.f32.mrf.mxu1  ;;  %v1900_v54 = vadd.f32 %v1846_v49, %v1624_v27  ;;  %v2230_v2 = vpop.f32.mrf.mxu3  ;;  %v10729_v49 = vld [vmem:[#allocation2 + $0x38] sm:$0xff] }
 0x1d1   : > { %v1626_v18 = vadd.f32 %v1625_v26, %v1460_v57  ;;  %v3397_v19 = vshrl.u32 %v10729_v49, 16  ;;  %v3400_v28 = vshll.u32 %v10729_v49, 16  ;;  %v3102_v7 = vrot.slane %v10729_v49, 2 }
 0x1d2   : > { %v10719_v58 = vadd.f32 %v2230_v2, %v1900_v54 }
 0x1d3   : > { %v3399_v8 = vrot.slane %v3397_v19, 2  ;;  %v3402_v1 = vrot.slane %v3400_v28, 3  ;;  %v3406_v28 = vshrl.u32 %v10742_v24, 16 }
 0x1d7   : > { %v1848_v0 = vpop.f32.mrf.mxu2  ;;  %v1463_v38 = vpop.f32.mrf.mxu0 }
 0x1d8   : > { %v1628_v44 = vpop.f32.mrf.mxu1  ;;  %v1901_v47 = vadd.f32 %v1848_v0, %v1626_v18  ;;  %v2232_v5 = vpop.f32.mrf.mxu3 }
 0x1d9   : > { %v1629_v26 = vadd.f32 %v1628_v44, %v1463_v38  ;;  %v3103_v38 = vsel %vm2708_vm0, %v3100_v12, %v3102_v7  ;;  %v2374_v12 = vshll.u32 %v9755_v31, 16 }
 0x1da   : > { %v10725_v27 = vadd.f32 %v2232_v5, %v1901_v47  ;;  %2576 = vmatmul.bf16.gmra.mxu0 %v2360_v6  ;;  %v2368_v47 = vor.u32 %v2367_v34, %v2364_v62  ;;  %v3403_v5 = vor.u32 %v3402_v1, %v3399_v8  ;;  %v3408_v1 = vrot.slane %v3406_v28, 2 }
 0x1db   : > { %2835 = vmatmul.bf16.gmra.mxu1 %v2717_v25  ;;  %v2719_v25 = vsel %vm2708_vm0, %v2716_v32, %v2718_v10 }
 0x1dc   : > { %3219 = vmatmul.bf16.gmra.mxu2 %v3101_v56  ;;  %v3404_v49 = vsel %vm3351_vm2, %v3394_v20, %v3403_v5 }
 0x1dd   : > { %3611 = vmatmul.bf16.gmra.mxu3 %v3395_v29 }
 0x1df   : > { %v1851_v63 = vpop.f32.mrf.mxu2  ;;  %v1465_v57 = vpop.f32.mrf.mxu0 }
 0x1e0   : > { %v1630_v35 = vpop.f32.mrf.mxu1  ;;  %v1902_v54 = vadd.f32 %v1851_v63, %v1629_v26  ;;  %v2235_v2 = vpop.f32.mrf.mxu3 }
 0x1e1   : > { %v1631_v18 = vadd.f32 %v1630_v35, %v1465_v57  ;;  %v2369_v35 = vsel %vm2316_vm1, %v2359_v30, %v2368_v47  ;;  %v2720_v30 = vrot.slane %v9755_v31, 2 }
 0x1e2   : > { %v10733_v50 = vadd.f32 %v2235_v2, %v1902_v54  ;;  %v2371_v54 = vshrl.u32 %v9755_v31, 16  ;;  %v3409_v2 = vshll.u32 %v10742_v24, 16 }
 0x1e4   : > { %v2373_v20 = vrot.slane %v2371_v54, 1 }
 0x1e7   : > { %v1853_v0 = vpop.f32.mrf.mxu2  ;;  %v1468_v26 = vpop.f32.mrf.mxu0 }
 0x1e8   : > { %v1633_v44 = vpop.f32.mrf.mxu1  ;;  %v1903_v56 = vadd.f32 %v1853_v0, %v1631_v18  ;;  %v2237_v6 = vpop.f32.mrf.mxu3  ;;  %v2376_v18 = vrot.slane %v2374_v12, 2 }
 0x1e9   : > { %v1634_v63 = vadd.f32 %v1633_v44, %v1468_v26  ;;  %v3411_v44 = vrot.slane %v3409_v2, 3  ;;  %v9756_v2 = vld [vmem:[#allocation2 + $0x40] sm:$0xff] }
 0x1ea   : > { %v10738_v29 = vadd.f32 %v2237_v6, %v1903_v56  ;;  %2581 = vmatmul.bf16.gmra.mxu0 %v2369_v35  ;;  %v2721_v56 = vsel %vm2708_vm0, %v2718_v10, %v2720_v30  ;;  %v2377_v6 = vor.u32 %v2376_v18, %v2373_v20  ;;  %v10756_v10 = vld [vmem:[#allocation2 + $0x48] sm:$0xff] }
 0x1eb   : > { %2840 = vmatmul.bf16.gmra.mxu1 %v2719_v25  ;;  %v3104_v25 = vrot.slane %v10742_v24, 2  ;;  %v3412_v35 = vor.u32 %v3411_v44, %v3408_v1  ;;  %v3415_v20 = vshrl.u32 %v10756_v10, 16  ;;  %v3418_v18 = vshll.u32 %v10756_v10, 16 }
 0x1ec   : > { %3224 = vmatmul.bf16.gmra.mxu2 %v3103_v38 }
 0x1ed   : > { %3616 = vmatmul.bf16.gmra.mxu3 %v3404_v49  ;;  %v3105_v49 = vsel %vm2708_vm0, %v3102_v7, %v3104_v25  ;;  %v3413_v24 = vsel %vm3351_vm2, %v3403_v5, %v3412_v35  ;;  %v2380_v7 = vshrl.u32 %v9756_v2, 16 }
 0x1ef   : > { %v1856_v53 = vpop.f32.mrf.mxu2  ;;  %v1470_v62 = vpop.f32.mrf.mxu0  ;;  %v2382_v5 = vrot.slane %v2380_v7, 1 }
 0x1f0   : > { %v1635_v32 = vpop.f32.mrf.mxu1  ;;  %v1904_v19 = vadd.f32 %v1856_v53, %v1634_v63  ;;  %v2240_v57 = vpop.f32.mrf.mxu3  ;;  %v9570_v63 = vld [vmem:[%s9984_s28 + $0x220] sm:$0xff] }
 0x1f1   : > { %v1636_v8 = vadd.f32 %v1635_v32, %v1470_v62  ;;  %3850 = vmatpush.bf16.msra.mxu0 %v9570_v63  ;;  %v2378_v32 = vsel %vm2316_vm1, %v2368_v47, %v2377_v6  ;;  %v2722_v47 = vrot.slane %v9756_v2, 2  ;;  %v3106_v63 = vrot.slane %v10756_v10, 2 }
 0x1f2   : > { %v10746_v34 = vadd.f32 %v2240_v57, %v1904_v19  ;;  %v2383_v57 = vshll.u32 %v9756_v2, 16 }
 0x1f7   : > { %v1858_v38 = vpop.f32.mrf.mxu2  ;;  %v1473_v31 = vpop.f32.mrf.mxu0 }
 0x1f8   : > { %v1638_v0 = vpop.f32.mrf.mxu1  ;;  %v1905_v26 = vadd.f32 %v1858_v38, %v1636_v8  ;;  %v2242_v53 = vpop.f32.mrf.mxu3  ;;  %v3417_v38 = vrot.slane %v3415_v20, 2  ;;  %v10769_v20 = vld [vmem:[#allocation2 + $0x50] sm:$0xff] }
 0x1f9   : > { %v1639_v12 = vadd.f32 %v1638_v0, %v1473_v31  ;;  %v2385_v0 = vrot.slane %v2383_v57, 2  ;;  %12632 = vst [vmem:[#allocation9_spill] sm:$0xff] %v10769_v20 }
 0x1fa   : > { %v10752_v54 = vadd.f32 %v2242_v53, %v1905_v26  ;;  %2586 = vmatmul.bf16.gmra.mxu0 %v2378_v32  ;;  %v3420_v26 = vrot.slane %v3418_v18, 3  ;;  %v2723_v53 = vsel %vm2708_vm0, %v2720_v30, %v2722_v47 }
 0x1fb   : > { %2845 = vmatmul.bf16.gmra.mxu1 %v2721_v56  ;;  %v2386_v32 = vor.u32 %v2385_v0, %v2382_v5 }
 0x1fc   : > { %3229 = vmatmul.bf16.gmra.mxu2 %v3105_v49 }
 0x1fd   : > { %3621 = vmatmul.bf16.gmra.mxu3 %v3413_v24  ;;  %v3421_v24 = vor.u32 %v3420_v26, %v3417_v38  ;;  %v3427_v38 = vshll.u32 %v10769_v20, 16 }
 0x1ff   : > { %v1861_v28 = vpop.f32.mrf.mxu2  ;;  %v1475_v1 = vpop.f32.mrf.mxu0  ;;  %v3422_v57 = vsel %vm3351_vm2, %v3412_v35, %v3421_v24 }
 0x200   : > { %v1640_v19 = vpop.f32.mrf.mxu1  ;;  %v1906_v62 = vadd.f32 %v1861_v28, %v1639_v12  ;;  %v2245_v8 = vpop.f32.mrf.mxu3  ;;  %v3107_v28 = vsel %vm2708_vm0, %v3104_v25, %v3106_v63 }
 0x201   : > { %v1641_v56 = vadd.f32 %v1640_v19, %v1475_v1  ;;  %v2387_v19 = vsel %vm2316_vm1, %v2377_v6, %v2386_v32  ;;  %v9757_v1 = vld [vmem:[#allocation2 + $0x48] sm:$0xff] }
 0x202   : > { %v10760_v44 = vadd.f32 %v2245_v8, %v1906_v62  ;;  %v2389_v5 = vshrl.u32 %v9757_v1, 16  ;;  %v2392_v25 = vshll.u32 %v9757_v1, 16  ;;  %v2724_v6 = vrot.slane %v9757_v1, 2 }
 0x204   : > { %v2391_v35 = vrot.slane %v2389_v5, 1 }
 0x207   : > { %v1863_v31 = vpop.f32.mrf.mxu2  ;;  %v1478_v62 = vpop.f32.mrf.mxu0 }
 0x208   : > { %v1643_v49 = vpop.f32.mrf.mxu1  ;;  %v1907_v12 = vadd.f32 %v1863_v31, %v1641_v56  ;;  %v2247_v2 = vpop.f32.mrf.mxu3  ;;  %v3424_v56 = vshrl.u32 %v10769_v20, 16  ;;  %v2394_v31 = vrot.slane %v2392_v25, 2 }
 0x209   : > { %v1644_v7 = vadd.f32 %v1643_v49, %v1478_v62  ;;  %v3108_v62 = vrot.slane %v10769_v20, 2 }
 0x20a   : > { %v10765_v8 = vadd.f32 %v2247_v2, %v1907_v12  ;;  %2591 = vmatmul.bf16.gmra.mxu0 %v2387_v19  ;;  %v3429_v2 = vrot.slane %v3427_v38, 3  ;;  %v10783_v38 = vld [vmem:[#allocation2 + $0x58] sm:$0xff] }
 0x20b   : > { %2850 = vmatmul.bf16.gmra.mxu1 %v2723_v53  ;;  %v3109_v1 = vsel %vm2708_vm0, %v3106_v63, %v3108_v62  ;;  %12634 = vst [vmem:[#allocation11_spill] sm:$0xff] %v10783_v38  ;;  %v9758_v63 = vld [vmem:[#allocation2 + $0x50] sm:$0xff] }
 0x20c   : > { %3234 = vmatmul.bf16.gmra.mxu2 %v3107_v28  ;;  %v3426_v28 = vrot.slane %v3424_v56, 2 }
 0x20d   : > { %3626 = vmatmul.bf16.gmra.mxu3 %v3422_v57 }
 0x20e   : > { %v3430_v36 = vor.u32 %v3429_v2, %v3426_v28  ;;  %v3436_v28 = vshll.u32 %v10783_v38, 16  ;;  %v2726_v2 = vrot.slane %v9758_v63, 2 }
 0x20f   : > { %v1866_v18 = vpop.f32.mrf.mxu2  ;;  %v1480_v49 = vpop.f32.mrf.mxu0 }
 0x210   : > { %v1645_v30 = vpop.f32.mrf.mxu1  ;;  %v1908_v0 = vadd.f32 %v1866_v18, %v1644_v7  ;;  %v2250_v26 = vpop.f32.mrf.mxu3  ;;  %v2725_v7 = vsel %vm2708_vm0, %v2722_v47, %v2724_v6  ;;  %v2395_v18 = vor.u32 %v2394_v31, %v2391_v35  ;;  %v3431_v47 = vsel %vm3351_vm2, %v3421_v24, %v3430_v36 }
 0x211   : > { %v1646_v12 = vadd.f32 %v1645_v30, %v1480_v49  ;;  %v9569_v49 = vld [vmem:[%s9984_s28 + $0x218] sm:$0xff]  ;;  %v2398_v31 = vshrl.u32 %v9758_v63, 16 }
 0x212   : > { %v10773_v53 = vadd.f32 %v2250_v26, %v1908_v0  ;;  %v2396_v25 = vsel %vm2316_vm1, %v2386_v32, %v2395_v18  ;;  %3851 = vmatpush.bf16.msra.mxu0 %v9569_v49 }
 0x217   : > { %v1868_v57 = vpop.f32.mrf.mxu2  ;;  %v1483_v5 = vpop.f32.mrf.mxu0 }
 0x218   : > { %v1648_v19 = vpop.f32.mrf.mxu1  ;;  %v1909_v48 = vadd.f32 %v1868_v57, %v1646_v12  ;;  %v2252_v0 = vpop.f32.mrf.mxu3  ;;  %v2401_v12 = vshll.u32 %v9758_v63, 16 }
 0x219   : > { %v1649_v56 = vadd.f32 %v1648_v19, %v1483_v5  ;;  %v3438_v5 = vrot.slane %v3436_v28, 3  ;;  %v10798_v28 = vld [vmem:[#allocation2 + $0x60] sm:$0xff] }
 0x21a   : > { %v10779_v30 = vadd.f32 %v2252_v0, %v1909_v48  ;;  %2596 = vmatmul.bf16.gmra.mxu0 %v2396_v25  ;;  %v3433_v48 = vshrl.u32 %v10783_v38, 16  ;;  %v2403_v57 = vrot.slane %v2401_v12, 2  ;;  %v3110_v25 = vrot.slane %v10783_v38, 2  ;;  %12636 = vst [vmem:[#allocation13_spill] sm:$0xff] %v10798_v28 }
 0x21b   : > { %2855 = vmatmul.bf16.gmra.mxu1 %v2725_v7  ;;  %v2400_v7 = vrot.slane %v2398_v31, 1 }
 0x21c   : > { %12633 = vst [vmem:[#allocation10_spill] sm:$0xff] %v10779_v30  ;;  %3239 = vmatmul.bf16.gmra.mxu2 %v3109_v1  ;;  %v3435_v0 = vrot.slane %v3433_v48, 2  ;;  %v3111_v49 = vsel %vm2708_vm0, %v3108_v62, %v3110_v25  ;;  %v9759_v62 = vld [vmem:[#allocation2 + $0x58] sm:$0xff] }
 0x21d   : > { %3631 = vmatmul.bf16.gmra.mxu3 %v3431_v47  ;;  %v2404_v4 = vor.u32 %v2403_v57, %v2400_v7  ;;  %v2407_v7 = vshrl.u32 %v9759_v62, 16  ;;  %v2410_v57 = vshll.u32 %v9759_v62, 16 }
 0x21e   : > { %v3439_v30 = vor.u32 %v3438_v5, %v3435_v0 }
 0x21f   : > { %v1871_v35 = vpop.f32.mrf.mxu2  ;;  %v1485_v19 = vpop.f32.mrf.mxu0 }
 0x220   : > { %v1650_v26 = vpop.f32.mrf.mxu1  ;;  %v1910_v15 = vadd.f32 %v1871_v35, %v1649_v56  ;;  %v2255_v32 = vpop.f32.mrf.mxu3  ;;  %v2727_v56 = vsel %vm2708_vm0, %v2724_v6, %v2726_v2  ;;  %v3440_v48 = vsel %vm3351_vm2, %v3430_v36, %v3439_v30  ;;  %v2409_v36 = vrot.slane %v2407_v7, 1 }
 0x221   : > { %v1651_v1 = vadd.f32 %v1650_v26, %v1485_v19  ;;  %v2405_v26 = vsel %vm2316_vm1, %v2395_v18, %v2404_v4  ;;  %v3445_v18 = vshll.u32 %v10798_v28, 16 }
 0x222   : > { %v10788_v24 = vadd.f32 %v2255_v32, %v1910_v15 }
 0x227   : > { %v1873_v35 = vpop.f32.mrf.mxu2  ;;  %v2562_v31 = vpop.f32.mrf.mxu0 }
 0x228   : > { %v2821_v47 = vpop.f32.mrf.mxu1  ;;  %v1911_v20 = vadd.f32 %v1873_v35, %v1651_v1  ;;  %v2257_v63 = vpop.f32.mrf.mxu3  ;;  %v2652_v12 = vadd.f32 %v2562_v31, %v10418_v14  ;;  %v3442_v1 = vshrl.u32 %v10798_v28, 16  ;;  %v2728_v14 = vrot.slane %v9759_v62, 2 }
 0x229   : > { %v2412_v35 = vrot.slane %v2410_v57, 2  ;;  %v3112_v31 = vrot.slane %v10798_v28, 2 }
 0x22a   : > { %v10793_v15 = vadd.f32 %v2257_v63, %v1911_v20  ;;  %v2911_v6 = vadd.f32 %v2821_v47, %v2652_v12  ;;  %2601 = vmatmul.bf16.gmra.mxu0 %v2405_v26  ;;  %v3447_v63 = vrot.slane %v3445_v18, 3 }
 0x22b   : > { %2860 = vmatmul.bf16.gmra.mxu1 %v2727_v56  ;;  %v3113_v62 = vsel %vm2708_vm0, %v3110_v25, %v3112_v31 }
 0x22c   : > { %12635 = vst [vmem:[#allocation12_spill] sm:$0xff] %v10793_v15  ;;  %3244 = vmatmul.bf16.gmra.mxu2 %v3111_v49  ;;  %v3444_v49 = vrot.slane %v3442_v1, 2 }
 0x22d   : > { %3636 = vmatmul.bf16.gmra.mxu3 %v3440_v48  ;;  %v2729_v48 = vsel %vm2708_vm0, %v2726_v2, %v2728_v14  ;;  %v10813_v2 = vld [vmem:[#allocation2 + $0x68] sm:$0xff] }
 0x22e   : > { %v3448_v15 = vor.u32 %v3447_v63, %v3444_v49  ;;  %12637 = vst [vmem:[#allocation14_spill] sm:$0xff] %v10813_v2  ;;  %v9568_v49 = vld [vmem:[%s9984_s28 + $0x210] sm:$0xff] }
 0x22f   : > { %v3205_v19 = vpop.f32.mrf.mxu2  ;;  %v2564_v5 = vpop.f32.mrf.mxu0  ;;  %3852 = vmatpush.bf16.msra.mxu0 %v9568_v49 }
 0x230   : > { %v2823_v32 = vpop.f32.mrf.mxu1  ;;  %v3295_v20 = vadd.f32 %v3205_v19, %v2911_v6  ;;  %v3597_v0 = vpop.f32.mrf.mxu3  ;;  %v2653_v47 = vadd.f32 %v2564_v5, %v10435_v40  ;;  %v2413_v19 = vor.u32 %v2412_v35, %v2409_v36  ;;  %v9760_v5 = vld [vmem:[#allocation2 + $0x60] sm:$0xff] }
 0x231   : > { %v2416_v36 = vshrl.u32 %v9760_v5, 16  ;;  %v2419_v35 = vshll.u32 %v9760_v5, 16  ;;  %v2730_v63 = vrot.slane %v9760_v5, 2 }
 0x232   : > { %v10802_v56 = vadd.f32 %v3597_v0, %v3295_v20  ;;  %v2912_v26 = vadd.f32 %v2823_v32, %v2653_v47  ;;  %v2414_v40 = vsel %vm2316_vm1, %v2404_v4, %v2413_v19  ;;  %v3449_v32 = vsel %vm3351_vm2, %v3439_v30, %v3448_v15 }
 0x233   : > { %v3451_v47 = vshrl.u32 %v10813_v2, 16  ;;  %v3454_v4 = vshll.u32 %v10813_v2, 16 }
 0x237   : > { %v3207_v6 = vpop.f32.mrf.mxu2  ;;  %v2567_v7 = vpop.f32.mrf.mxu0 }
 0x238   : > { %v2826_v12 = vpop.f32.mrf.mxu1  ;;  %v3296_v38 = vadd.f32 %v3207_v6, %v2912_v26  ;;  %v3599_v20 = vpop.f32.mrf.mxu3  ;;  %v2654_v1 = vadd.f32 %v2567_v7, %v10447_v61  ;;  %v3114_v7 = vrot.slane %v10813_v2, 2 }
 0x23a   : > { %v10808_v57 = vadd.f32 %v3599_v20, %v3296_v38  ;;  %v2913_v18 = vadd.f32 %v2826_v12, %v2654_v1  ;;  %2606 = vmatmul.bf16.gmra.mxu0 %v2414_v40  ;;  %v2418_v12 = vrot.slane %v2416_v36, 1  ;;  %v3456_v20 = vrot.slane %v3454_v4, 3  ;;  %v10829_v4 = vld [vmem:[#allocation2 + $0x70] sm:$0xff] }
 0x23b   : > { %2865 = vmatmul.bf16.gmra.mxu1 %v2729_v48  ;;  %v2421_v48 = vrot.slane %v2419_v35, 2  ;;  %v3115_v49 = vsel %vm2708_vm0, %v3112_v31, %v3114_v7  ;;  %12638 = vst [vmem:[#allocation15_spill] sm:$0xff] %v10829_v4  ;;  %v9761_v31 = vld [vmem:[#allocation2 + $0x68] sm:$0xff] }
 0x23c   : > { %3249 = vmatmul.bf16.gmra.mxu2 %v3113_v62  ;;  %v3453_v62 = vrot.slane %v3451_v47, 2 }
 0x23d   : > { %3641 = vmatmul.bf16.gmra.mxu3 %v3449_v32  ;;  %v2731_v32 = vsel %vm2708_vm0, %v2728_v14, %v2730_v63 }
 0x23e   : > { %v3457_v5 = vor.u32 %v3456_v20, %v3453_v62 }
 0x23f   : > { %v3210_v25 = vpop.f32.mrf.mxu2  ;;  %v2569_v30 = vpop.f32.mrf.mxu0 }
 0x240   : > { %v2828_v0 = vpop.f32.mrf.mxu1  ;;  %v3297_v38 = vadd.f32 %v3210_v25, %v2913_v18  ;;  %v3602_v61 = vpop.f32.mrf.mxu3  ;;  %v2655_v6 = vadd.f32 %v2569_v30, %v10464_v33  ;;  %v2422_v25 = vor.u32 %v2421_v48, %v2418_v12  ;;  %v2425_v12 = vshrl.u32 %v9761_v31, 16 }
 0x241   : > { %v2428_v48 = vshll.u32 %v9761_v31, 16 }
 0x242   : > { %v10818_v26 = vadd.f32 %v3602_v61, %v3297_v38  ;;  %v2914_v40 = vadd.f32 %v2828_v0, %v2655_v6  ;;  %v2423_v33 = vsel %vm2316_vm1, %v2413_v19, %v2422_v25  ;;  %v3458_v0 = vsel %vm3351_vm2, %v3448_v15, %v3457_v5 }
 0x243   : > { %v3463_v19 = vshll.u32 %v10829_v4, 16  ;;  %v2427_v15 = vrot.slane %v2425_v12, 1 }
 0x247   : > { %v3212_v18 = vpop.f32.mrf.mxu2  ;;  %v2572_v36 = vpop.f32.mrf.mxu0 }
 0x248   : > { %v2831_v1 = vpop.f32.mrf.mxu1  ;;  %v3298_v28 = vadd.f32 %v3212_v18, %v2914_v40  ;;  %v3604_v38 = vpop.f32.mrf.mxu3  ;;  %v2656_v47 = vadd.f32 %v2572_v36, %v10474_v59  ;;  %v2732_v59 = vrot.slane %v9761_v31, 2 }
 0x24a   : > { %v10824_v35 = vadd.f32 %v3604_v38, %v3298_v28  ;;  %v2915_v14 = vadd.f32 %v2831_v1, %v2656_v47  ;;  %2611 = vmatmul.bf16.gmra.mxu0 %v2423_v33  ;;  %v3460_v28 = vshrl.u32 %v10829_v4, 16  ;;  %v3116_v38 = vrot.slane %v10829_v4, 2 }
 0x24b   : > { %2870 = vmatmul.bf16.gmra.mxu1 %v2731_v32  ;;  %v2430_v32 = vrot.slane %v2428_v48, 2  ;;  %v2733_v47 = vsel %vm2708_vm0, %v2730_v63, %v2732_v59 }
 0x24c   : > { %3254 = vmatmul.bf16.gmra.mxu2 %v3115_v49  ;;  %v3462_v18 = vrot.slane %v3460_v28, 2  ;;  %v3465_v49 = vrot.slane %v3463_v19, 3  ;;  %v3117_v31 = vsel %vm2708_vm0, %v3114_v7, %v3116_v38  ;;  %v10844_v19 = vld [vmem:[#allocation2 + $0x78] sm:$0xff]  ;;  %v9762_v7 = vld [vmem:[#allocation2 + $0x70] sm:$0xff] }
 0x24d   : > { %3646 = vmatmul.bf16.gmra.mxu3 %v3458_v0  ;;  %12639 = vst [vmem:[#allocation16_spill] sm:$0xff] %v10844_v19 }
 0x24e   : > { %v3466_v2 = vor.u32 %v3465_v49, %v3462_v18  ;;  %v3469_v18 = vshrl.u32 %v10844_v19, 16  ;;  %v2734_v49 = vrot.slane %v9762_v7, 2 }
 0x24f   : > { %v3215_v30 = vpop.f32.mrf.mxu2  ;;  %v2574_v20 = vpop.f32.mrf.mxu0 }
 0x250   : > { %v2833_v61 = vpop.f32.mrf.mxu1  ;;  %v3299_v6 = vadd.f32 %v3215_v30, %v2915_v14  ;;  %v3607_v62 = vpop.f32.mrf.mxu3  ;;  %v2657_v1 = vadd.f32 %v2574_v20, %v10492_v22  ;;  %v2431_v14 = vor.u32 %v2430_v32, %v2427_v15  ;;  %v2434_v15 = vshrl.u32 %v9762_v7, 16 }
 0x251   : > { %v2437_v32 = vshll.u32 %v9762_v7, 16 }
 0x252   : > { %v10833_v40 = vadd.f32 %v3607_v62, %v3299_v6  ;;  %v2916_v36 = vadd.f32 %v2833_v61, %v2657_v1  ;;  %v2432_v22 = vsel %vm2316_vm1, %v2422_v25, %v2431_v14  ;;  %v3467_v61 = vsel %vm3351_vm2, %v3457_v5, %v3466_v2 }
 0x253   : > { %v3472_v25 = vshll.u32 %v10844_v19, 16 }
 0x257   : > { %v3217_v0 = vpop.f32.mrf.mxu2  ;;  %v2577_v12 = vpop.f32.mrf.mxu0 }
 0x258   : > { %v2836_v33 = vpop.f32.mrf.mxu1  ;;  %v3300_v30 = vadd.f32 %v3217_v0, %v2916_v36  ;;  %v3609_v6 = vpop.f32.mrf.mxu3  ;;  %v2658_v28 = vadd.f32 %v2577_v12, %v10504_v43 }
 0x25a   : > { %v10839_v48 = vadd.f32 %v3609_v6, %v3300_v30  ;;  %v2917_v63 = vadd.f32 %v2836_v33, %v2658_v28  ;;  %2616 = vmatmul.bf16.gmra.mxu0 %v2432_v22  ;;  %v2439_v33 = vrot.slane %v2437_v32, 2  ;;  %v3471_v30 = vrot.slane %v3469_v18, 2 }
 0x25b   : > { %2875 = vmatmul.bf16.gmra.mxu1 %v2733_v47  ;;  %v2436_v47 = vrot.slane %v2434_v15, 1  ;;  %v3118_v6 = vrot.slane %v10844_v19, 2  ;;  %v2735_v28 = vsel %vm2708_vm0, %v2732_v59, %v2734_v49 }
 0x25c   : > { %3259 = vmatmul.bf16.gmra.mxu2 %v3117_v31  ;;  %v3474_v31 = vrot.slane %v3472_v25, 3  ;;  %v10860_v25 = vld [vmem:[#allocation2 + $0x80] sm:$0xff] }
 0x25d   : > { %3651 = vmatmul.bf16.gmra.mxu3 %v3467_v61  ;;  %v9567_v61 = vld [vmem:[%s9984_s28 + $0x208] sm:$0xff]  ;;  %12640 = vst [vmem:[#allocation17_spill] sm:$0xff] %v10860_v25 }
 0x25e   : > { %v3475_v7 = vor.u32 %v3474_v31, %v3471_v30  ;;  %3853 = vmatpush.bf16.msra.mxu0 %v9567_v61 }
 0x25f   : > { %v3220_v20 = vpop.f32.mrf.mxu2  ;;  %v2579_v36 = vpop.f32.mrf.mxu0 }
 0x260   : > { %v2838_v62 = vpop.f32.mrf.mxu1  ;;  %v3301_v1 = vadd.f32 %v3220_v20, %v2917_v63  ;;  %v3612_v43 = vpop.f32.mrf.mxu3  ;;  %v2659_v0 = vadd.f32 %v2579_v36, %v10522_v23  ;;  %v2440_v20 = vor.u32 %v2439_v33, %v2436_v47  ;;  %v3476_v59 = vsel %vm3351_vm2, %v3466_v2, %v3475_v7 }
 0x262   : > { %v10848_v5 = vadd.f32 %v3612_v43, %v3301_v1  ;;  %v2918_v12 = vadd.f32 %v2838_v62, %v2659_v0  ;;  %v3119_v1 = vsel %vm2708_vm0, %v3116_v38, %v3118_v6  ;;  %v2441_v18 = vsel %vm2316_vm1, %v2431_v14, %v2440_v20  ;;  %v9763_v38 = vld [vmem:[#allocation2 + $0x78] sm:$0xff] }
 0x263   : > { %v2443_v33 = vshrl.u32 %v9763_v38, 16  ;;  %v2446_v0 = vshll.u32 %v9763_v38, 16  ;;  %v3481_v14 = vshll.u32 %v10860_v25, 16 }
 0x265   : > { %v2445_v2 = vrot.slane %v2443_v33, 1  ;;  %v2448_v61 = vrot.slane %v2446_v0, 2 }
 0x267   : > { %v3222_v63 = vpop.f32.mrf.mxu2  ;;  %v2582_v32 = vpop.f32.mrf.mxu0 }
 0x268   : > { %v2841_v22 = vpop.f32.mrf.mxu1  ;;  %v3302_v4 = vadd.f32 %v3222_v63, %v2918_v12  ;;  %v3614_v15 = vpop.f32.mrf.mxu3  ;;  %v2660_v62 = vadd.f32 %v2582_v32, %v10532_v39  ;;  %v2736_v39 = vrot.slane %v9763_v38, 2 }
 0x26a   : > { %v10855_v23 = vadd.f32 %v3614_v15, %v3302_v4  ;;  %v2919_v43 = vadd.f32 %v2841_v22, %v2660_v62  ;;  %2621 = vmatmul.bf16.gmra.mxu0 %v2441_v18  ;;  %v3478_v4 = vshrl.u32 %v10860_v25, 16  ;;  %v3120_v15 = vrot.slane %v10860_v25, 2  ;;  %v9566_v25 = vld [vmem:[%s9984_s28 + $0x200] sm:$0xff] }
 0x26b   : > { %2880 = vmatmul.bf16.gmra.mxu1 %v2735_v28  ;;  %v2737_v62 = vsel %vm2708_vm0, %v2734_v49, %v2736_v39  ;;  %3854 = vmatpush.bf16.msra.mxu0 %v9566_v25 }
 0x26c   : > { %3264 = vmatmul.bf16.gmra.mxu2 %v3119_v1  ;;  %v3480_v63 = vrot.slane %v3478_v4, 2  ;;  %v3483_v1 = vrot.slane %v3481_v14, 3  ;;  %v3121_v38 = vsel %vm2708_vm0, %v3118_v6, %v3120_v15  ;;  %v10875_v14 = vld [vmem:[#allocation2 + $0x88] sm:$0xff]  ;;  %v9764_v6 = vld [vmem:[#allocation2 + $0x80] sm:$0xff] }
 0x26d   : > { %3656 = vmatmul.bf16.gmra.mxu3 %v3476_v59 }
 0x26e   : > { %v3484_v19 = vor.u32 %v3483_v1, %v3480_v63  ;;  %v3487_v63 = vshrl.u32 %v10875_v14, 16 }
 0x26f   : > { %v3225_v47 = vpop.f32.mrf.mxu2  ;;  %v2584_v12 = vpop.f32.mrf.mxu0 }
 0x270   : > { %v2843_v36 = vpop.f32.mrf.mxu1  ;;  %v3303_v30 = vadd.f32 %v3225_v47, %v2919_v43  ;;  %v3617_v31 = vpop.f32.mrf.mxu3  ;;  %v2661_v22 = vadd.f32 %v2584_v12, %v10550_v17  ;;  %v2449_v43 = vor.u32 %v2448_v61, %v2445_v2  ;;  %v2452_v2 = vshrl.u32 %v9764_v6, 16 }
 0x271   : > { %v2455_v61 = vshll.u32 %v9764_v6, 16 }
 0x272   : > { %v10864_v28 = vadd.f32 %v3617_v31, %v3303_v30  ;;  %v2920_v32 = vadd.f32 %v2843_v36, %v2661_v22  ;;  %v2450_v17 = vsel %vm2316_vm1, %v2440_v20, %v2449_v43  ;;  %v3485_v36 = vsel %vm3351_vm2, %v3475_v7, %v3484_v19 }
 0x273   : > { %v3490_v20 = vshll.u32 %v10875_v14, 16 }
 0x277   : > { %v3227_v59 = vpop.f32.mrf.mxu2  ;;  %v2587_v33 = vpop.f32.mrf.mxu0 }
 0x278   : > { %v2846_v18 = vpop.f32.mrf.mxu1  ;;  %v3304_v47 = vadd.f32 %v3227_v59, %v2920_v32  ;;  %v3619_v30 = vpop.f32.mrf.mxu3  ;;  %v2662_v4 = vadd.f32 %v2587_v33, %v10561_v11  ;;  %v2738_v11 = vrot.slane %v9764_v6, 2 }
 0x27a   : > { %v10870_v0 = vadd.f32 %v3619_v30, %v3304_v47  ;;  %v2921_v49 = vadd.f32 %v2846_v18, %v2662_v4  ;;  %2626 = vmatmul.bf16.gmra.mxu0 %v2450_v17  ;;  %v2457_v18 = vrot.slane %v2455_v61, 2  ;;  %v3489_v47 = vrot.slane %v3487_v63, 2 }
 0x27b   : > { %2885 = vmatmul.bf16.gmra.mxu1 %v2737_v62  ;;  %v2454_v62 = vrot.slane %v2452_v2, 1  ;;  %v3122_v30 = vrot.slane %v10875_v14, 2  ;;  %v2739_v4 = vsel %vm2708_vm0, %v2736_v39, %v2738_v11 }
 0x27c   : > { %3269 = vmatmul.bf16.gmra.mxu2 %v3121_v38  ;;  %v3492_v38 = vrot.slane %v3490_v20, 3  ;;  %v10891_v20 = vld [vmem:[#allocation2 + $0x90] sm:$0xff] }
 0x27d   : > { %3661 = vmatmul.bf16.gmra.mxu3 %v3485_v36 }
 0x27e   : > { %v3493_v6 = vor.u32 %v3492_v38, %v3489_v47 }
 0x27f   : > { %v3230_v12 = vpop.f32.mrf.mxu2  ;;  %v2589_v32 = vpop.f32.mrf.mxu0 }
 0x280   : > { %v2848_v31 = vpop.f32.mrf.mxu1  ;;  %v3305_v22 = vadd.f32 %v3230_v12, %v2921_v49  ;;  %v3622_v1 = vpop.f32.mrf.mxu3  ;;  %v2663_v59 = vadd.f32 %v2589_v32, %v10578_v13  ;;  %v2458_v49 = vor.u32 %v2457_v18, %v2454_v62  ;;  %v3494_v39 = vsel %vm3351_vm2, %v3484_v19, %v3493_v6 }
 0x281   : > { %v3496_v18 = vshrl.u32 %v10891_v20, 16 }
 0x282   : > { %v10879_v7 = vadd.f32 %v3622_v1, %v3305_v22  ;;  %v2922_v33 = vadd.f32 %v2848_v31, %v2663_v59  ;;  %v3123_v22 = vsel %vm2708_vm0, %v3120_v15, %v3122_v30  ;;  %v2459_v63 = vsel %vm2316_vm1, %v2449_v43, %v2458_v49  ;;  %v9765_v15 = vld [vmem:[#allocation2 + $0x88] sm:$0xff] }
 0x283   : > { %v2461_v25 = vshrl.u32 %v9765_v15, 16  ;;  %v2464_v62 = vshll.u32 %v9765_v15, 16  ;;  %v3499_v43 = vshll.u32 %v10891_v20, 16  ;;  %v2740_v59 = vrot.slane %v9765_v15, 2  ;;  %v10908_v15 = vld [vmem:[#allocation2 + $0x98] sm:$0xff] }
 0x284   : > { %12641 = vst [vmem:[#allocation18_spill] sm:$0xff] %v10908_v15 }
 0x285   : > { %v2463_v47 = vrot.slane %v2461_v25, 1  ;;  %v2466_v38 = vrot.slane %v2464_v62, 2 }
 0x287   : > { %v3232_v36 = vpop.f32.mrf.mxu2  ;;  %v2592_v61 = vpop.f32.mrf.mxu0 }
 0x288   : > { %v2851_v17 = vpop.f32.mrf.mxu1  ;;  %v3306_v12 = vadd.f32 %v3232_v36, %v2922_v33  ;;  %v3624_v2 = vpop.f32.mrf.mxu3  ;;  %v2664_v31 = vadd.f32 %v2592_v61, %v10596_v52  ;;  %v3498_v33 = vrot.slane %v3496_v18, 2 }
 0x28a   : > { %v10886_v13 = vadd.f32 %v3624_v2, %v3306_v12  ;;  %v10893_v1 = vadd.f32 %v2851_v17, %v2664_v31  ;;  %2631 = vmatmul.bf16.gmra.mxu0 %v2459_v63  ;;  %v3501_v17 = vrot.slane %v3499_v43, 3  ;;  %v2741_v12 = vsel %vm2708_vm0, %v2738_v11, %v2740_v59  ;;  %v9766_v11 = vld [vmem:[#allocation2 + $0x90] sm:$0xff] }
 0x28b   : > { %2890 = vmatmul.bf16.gmra.mxu1 %v2739_v4  ;;  %v3124_v4 = vrot.slane %v10891_v20, 2  ;;  %v2470_v18 = vshrl.u32 %v9766_v11, 16  ;;  %v3505_v43 = vshrl.u32 %v10908_v15, 16 }
 0x28c   : > { %3274 = vmatmul.bf16.gmra.mxu2 %v3123_v22  ;;  %v2467_v22 = vor.u32 %v2466_v38, %v2463_v47  ;;  %v3502_v2 = vor.u32 %v3501_v17, %v3498_v33 }
 0x28d   : > { %3666 = vmatmul.bf16.gmra.mxu3 %v3494_v39  ;;  %v3125_v61 = vsel %vm2708_vm0, %v3122_v30, %v3124_v4  ;;  %v2473_v30 = vshll.u32 %v9766_v11, 16  ;;  %v2472_v47 = vrot.slane %v2470_v18, 1  ;;  %v3507_v33 = vrot.slane %v3505_v43, 2 }
 0x28e   : > { %v2468_v31 = vsel %vm2316_vm1, %v2458_v49, %v2467_v22  ;;  %v3508_v49 = vshll.u32 %v10908_v15, 16 }
 0x28f   : > { %v2594_v52 = vpop.f32.mrf.mxu0 }
 0x290   : > { %v10895_v32 = vpop.f32.mrf.mxu1  ;;  %v10900_v19 = vadd.f32 %v2594_v52, %v10612_v21  ;;  %v3503_v21 = vsel %vm3351_vm2, %v3493_v6, %v3502_v2  ;;  %v2742_v52 = vrot.slane %v9766_v11, 2  ;;  %v2475_v6 = vrot.slane %v2473_v30, 2  ;;  %v2983_v30 = vld [vmem:[#allocation2 + $0xa0] sm:$0x3] }
 0x291   : > { %v3510_v17 = vrot.slane %v3508_v49, 3 }
 0x297   : > { %v2597_v63 = vpop.f32.mrf.mxu0 }
 0x298   : > { %v2856_v36 = vpop.f32.mrf.mxu1  ;;  %v2666_v39 = vadd.f32 %v2597_v63, %v10625_v3 }
 0x29a   : > { %v10910_v25 = vadd.f32 %v2856_v36, %v2666_v39  ;;  %2636 = vmatmul.bf16.gmra.mxu0 %v2468_v31  ;;  %v2296_v36 = vld [vmem:[#allocation2 + $0x98] sm:$0x3]  ;;  %v2743_v31 = vsel %vm2708_vm0, %v2740_v59, %v2742_v52  ;;  %v2476_v39 = vor.u32 %v2475_v6, %v2472_v47  ;;  %v3073_v47 = vunpack.c.l.b16 %v2983_v30 }
 0x29b   : > { %2895 = vmatmul.bf16.gmra.mxu1 %v2741_v12  ;;  %v3126_v12 = vrot.slane %v10908_v15, 2 }
 0x29c   : > { %3279 = vmatmul.bf16.gmra.mxu2 %v3125_v61  ;;  %12642 = vst [vmem:[#allocation19_spill] sm:$0xff] %v10910_v25  ;;  %v3331_v61 = vld [vmem:[#allocation2 + $0xa0] sm:$0x7]  ;;  %v2477_v43 = vsel %vm2316_vm1, %v2467_v22, %v2476_v39 }
 0x29d   : > { %3671 = vmatmul.bf16.gmra.mxu3 %v3503_v21  ;;  %v2314_v21 = vunpack.c.l.b16 %v2296_v36  ;;  %v3349_v11 = vunpack.c.l.b16 %v3331_v61  ;;  %v9574_v25 = vld [vmem:[%s9979_s25] sm:$0xff]  ;;  %v3127_v18 = vsel %vm2708_vm0, %v3124_v4, %v3126_v12  ;;  %v3092_v36 = vpack.c.b16 %v3073_v47, %v3073_v47 }
 0x29e   : > { %4114 = vmatpush.bf16.msra.mxu1 %v9574_v25 }
 0x29f   : > { %v2599_v3 = vpop.f32.mrf.mxu0  ;;  %v2315_v49 = vpack.c.b16 %v2314_v21, %v2314_v21  ;;  %v10926_v59 = vpack.c.b16 %v3349_v11, %v3349_v11 }
 0x2a0   : > { %v10912_v62 = vpop.f32.mrf.mxu1  ;;  %v10917_v38 = vadd.f32 %v2599_v3, %v10643_v42 }
 0x2a1   : > { %12643 = vst [vmem:[#allocation20_spill] sm:$0xff] %v10912_v62  ;;  %v3511_v62 = vor.u32 %v3510_v17, %v3507_v33  ;;  %v2479_v4 = vshrl.u32 %v2315_v49, 16  ;;  %v2482_v25 = vshll.u32 %v2315_v49, 16  ;;  %v3514_v17 = vshrl.u32 %v10926_v59, 16 }
 0x2a2   : > { %12644 = vst [vmem:[#allocation21_spill] sm:$0xff] %v10926_v59  ;;  %v3517_v22 = vshll.u32 %v10926_v59, 16 }
 0x2a3   : > { %v3512_v15 = vsel %vm3351_vm2, %v3502_v2, %v3511_v62  ;;  %v2484_v2 = vrot.slane %v2482_v25, 2 }
 0x2a4   : > { %v3519_v11 = vrot.slane %v3517_v22, 3 }
 0x2a7   : > { %v2602_v42 = vpop.f32.mrf.mxu0 }
 0x2a8   : > { %v2861_v63 = vpop.f32.mrf.mxu1  ;;  %v2668_v3 = vadd.f32 %v2602_v42, %v10652_v51  ;;  %v2744_v51 = vrot.slane %v2315_v49, 2 }
 0x2aa   : > { %v10928_v6 = vadd.f32 %v2861_v63, %v2668_v3  ;;  %2641 = vmatmul.bf16.gmra.mxu0 %v2477_v43  ;;  %v3516_v63 = vrot.slane %v3514_v17, 2 }
 0x2ab   : > { %2900 = vmatmul.bf16.gmra.mxu1 %v2743_v31  ;;  %v2481_v31 = vrot.slane %v2479_v4, 1  ;;  %v3723_v4 = vld [vmem:[#allocation2 + $0x10] sm:$0x8] }
 0x2ac   : > { %3284 = vmatmul.bf16.gmra.mxu2 %v3127_v18  ;;  %v3128_v18 = vrot.slane %v3092_v36, 2  ;;  %v3520_v43 = vor.u32 %v3519_v11, %v3516_v63 }
 0x2ad   : > { %3676 = vmatmul.bf16.gmra.mxu3 %v3512_v15  ;;  %v2745_v15 = vsel %vm2708_vm0, %v2742_v52, %v2744_v51  ;;  %v2485_v42 = vor.u32 %v2484_v2, %v2481_v31  ;;  %v3741_v52 = vunpack.c.l.b16 %v3723_v4 }
 0x2ae   : > { %v3129_v3 = vsel %vm2708_vm0, %v3126_v12, %v3128_v18  ;;  %v12645_v12 = vunpack.c.l.b16 %v10655_v41 }
 0x2af   : > { %v2604_v61 = vpop.f32.mrf.mxu0  ;;  %v2486_v49 = vsel %vm2316_vm1, %v2476_v39, %v2485_v42 }
 0x2b0   : > { %v10930_v33 = vpop.f32.mrf.mxu1  ;;  %v10935_v21 = vadd.f32 %v2604_v61, %v10660_v9  ;;  %v3521_v9 = vsel %vm3351_vm2, %v3511_v62, %v3520_v43  ;;  %v3742_v36 = vpack.c.b16 %v12645_v12, %v3741_v52 }
 0x2b7   : > { %v2607_v59 = vpop.f32.mrf.mxu0 }
 0x2b8   : > { %v2866_v30 = vpop.f32.mrf.mxu1  ;;  %v2670_v47 = vadd.f32 %v2607_v59, %v10679_v45  ;;  %v3744_v45 = vrot.slane %v3742_v36, 3  ;;  %v9767_v59 = vld [vmem:[#allocation2 + $0x18] sm:$0xff] }
 0x2b9   : > { %v3745_v61 = vrot.slane %v9767_v59, 3 }
 0x2ba   : > { %v10942_v25 = vadd.f32 %v2866_v30, %v2670_v47  ;;  %2646 = vmatmul.bf16.gmra.mxu0 %v2486_v49  ;;  %v9768_v30 = vld [vmem:[#allocation2 + $0x20] sm:$0xff] }
 0x2bb   : > { %2905 = vmatmul.bf16.gmra.mxu1 %v2745_v15  ;;  %v3746_v31 = vsel %vm3743_vm3, %v3744_v45, %v3745_v61  ;;  %v3747_v15 = vrot.slane %v9768_v30, 3 }
 0x2bc   : > { %3289 = vmatmul.bf16.gmra.mxu2 %v3129_v3 }
 0x2bd   : > { %3681 = vmatmul.bf16.gmra.mxu3 %v3521_v9  ;;  %v3748_v43 = vsel %vm3743_vm3, %v3745_v61, %v3747_v15 }
 0x2bf   : > { %v2609_v22 = vpop.f32.mrf.mxu0 }
 0x2c0   : > { %v10944_v17 = vpop.f32.mrf.mxu1  ;;  %v10949_v51 = vadd.f32 %v2609_v22, %v10684_v55 }
 0x2c7   : > { %v2612_v62 = vpop.f32.mrf.mxu0 }
 0x2c8   : > { %v2871_v39 = vpop.f32.mrf.mxu1  ;;  %v2672_v2 = vadd.f32 %v2612_v62, %v10693_v16 }
 0x2ca   : > { %v10953_v63 = vadd.f32 %v2871_v39, %v2672_v2  ;;  %3855 = vmatmul.bf16.vlgmr.msra.gmra.mxu0 %v3746_v31 }
 0x2cf   : > { %v2614_v41 = vpop.f32.mrf.mxu0 }
 0x2d0   : > { %v10955_v11 = vpop.f32.mrf.mxu1  ;;  %v10958_v18 = vadd.f32 %v2614_v41, %v10698_v46  ;;  %v9769_v46 = vld [vmem:[#allocation2 + $0x28] sm:$0xff] }
 0x2d1   : > { %v3749_v52 = vrot.slane %v9769_v46, 3 }
 0x2d3   : > { %v3750_v12 = vsel %vm3743_vm3, %v3747_v15, %v3749_v52 }
 0x2d7   : > { %v2617_v42 = vpop.f32.mrf.mxu0 }
 0x2d8   : > { %v2876_v55 = vpop.f32.mrf.mxu1  ;;  %v2674_v3 = vadd.f32 %v2617_v42, %v10706_v60 }
 0x2da   : > { %v10962_v49 = vadd.f32 %v2876_v55, %v2674_v3  ;;  %3860 = vmatmul.bf16.gmra.mxu0 %v3748_v43 }
 0x2df   : > { %v2619_v47 = vpop.f32.mrf.mxu0 }
 0x2e0   : > { %v10964_v16 = vpop.f32.mrf.mxu1  ;;  %v10967_v9 = vadd.f32 %v2619_v47, %v10711_v37  ;;  %v9770_v37 = vld [vmem:[#allocation2 + $0x30] sm:$0xff] }
 0x2e1   : > { %v3751_v62 = vrot.slane %v9770_v37, 3 }
 0x2e3   : > { %v3752_v2 = vsel %vm3743_vm3, %v3749_v52, %v3751_v62 }
 0x2e7   : > { %v2622_v22 = vpop.f32.mrf.mxu0 }
 0x2e8   : > { %v2881_v4 = vpop.f32.mrf.mxu1  ;;  %v2676_v36 = vadd.f32 %v2622_v22, %v10719_v58 }
 0x2ea   : > { %v10971_v39 = vadd.f32 %v2881_v4, %v2676_v36  ;;  %3865 = vmatmul.bf16.gmra.mxu0 %v3750_v12 }
 0x2ef   : > { %v2624_v45 = vpop.f32.mrf.mxu0 }
 0x2f0   : > { %v10973_v60 = vpop.f32.mrf.mxu1  ;;  %v10976_v59 = vadd.f32 %v2624_v45, %v10725_v27  ;;  %v9771_v27 = vld [vmem:[#allocation2 + $0x38] sm:$0xff] }
 0x2f1   : > { %v3753_v43 = vrot.slane %v9771_v27, 3 }
 0x2f3   : > { %v3754_v47 = vsel %vm3743_vm3, %v3751_v62, %v3753_v43 }
 0x2f7   : > { %v2627_v31 = vpop.f32.mrf.mxu0 }
 0x2f8   : > { %v2886_v61 = vpop.f32.mrf.mxu1  ;;  %v2678_v41 = vadd.f32 %v2627_v31, %v10733_v50 }
 0x2fa   : > { %v10980_v55 = vadd.f32 %v2886_v61, %v2678_v41  ;;  %3870 = vmatmul.bf16.gmra.mxu0 %v3752_v2 }
 0x2ff   : > { %v2629_v30 = vpop.f32.mrf.mxu0 }
 0x300   : > { %v10982_v58 = vpop.f32.mrf.mxu1  ;;  %v10985_v15 = vadd.f32 %v2629_v30, %v10738_v29  ;;  %v9772_v29 = vld [vmem:[#allocation2 + $0x40] sm:$0xff] }
 0x301   : > { %v3755_v36 = vrot.slane %v9772_v29, 3 }
 0x303   : > { %v3756_v61 = vsel %vm3743_vm3, %v3753_v43, %v3755_v36 }
 0x307   : > { %v2632_v3 = vpop.f32.mrf.mxu0 }
 0x308   : > { %v2891_v42 = vpop.f32.mrf.mxu1  ;;  %v2680_v4 = vadd.f32 %v2632_v3, %v10746_v34 }
 0x30a   : > { %v10989_v46 = vadd.f32 %v2891_v42, %v2680_v4  ;;  %3875 = vmatmul.bf16.gmra.mxu0 %v3754_v47  ;;  %v12646_v47 = vld [vmem:[#allocation10_spill] sm:$0xff] }
 0x30f   : > { %v2634_v52 = vpop.f32.mrf.mxu0 }
 0x310   : > { %v10991_v50 = vpop.f32.mrf.mxu1  ;;  %v10994_v22 = vadd.f32 %v2634_v52, %v10752_v54  ;;  %v3757_v54 = vrot.slane %v10756_v10, 3  ;;  %v12647_v52 = vld [vmem:[#allocation9_spill] sm:$0xff] }
 0x312   : > { %v3758_v42 = vsel %vm3743_vm3, %v3755_v36, %v3757_v54 }
 0x317   : > { %v2637_v45 = vpop.f32.mrf.mxu0 }
 0x318   : > { %v2896_v12 = vpop.f32.mrf.mxu1  ;;  %v2682_v37 = vadd.f32 %v2637_v45, %v10760_v44 }
 0x31a   : > { %v10998_v62 = vadd.f32 %v2896_v12, %v2682_v37  ;;  %3880 = vmatmul.bf16.gmra.mxu0 %v3756_v61  ;;  %v12648_v61 = vld [vmem:[#allocation12_spill] sm:$0xff] }
 0x31f   : > { %v2639_v31 = vpop.f32.mrf.mxu0 }
 0x320   : > { %v11000_v34 = vpop.f32.mrf.mxu1  ;;  %v11003_v2 = vadd.f32 %v2639_v31, %v10765_v8  ;;  %v3759_v8 = vrot.slane %v12647_v52, 3  ;;  %v12649_v31 = vld [vmem:[#allocation11_spill] sm:$0xff]  ;;  %v12650_v52 = vld [vmem:[#allocation13_spill] sm:$0xff] }
 0x322   : > { %v3760_v10 = vsel %vm3743_vm3, %v3757_v54, %v3759_v8 }
 0x327   : > { %v2642_v30 = vpop.f32.mrf.mxu0 }
 0x328   : > { %v2901_v41 = vpop.f32.mrf.mxu1  ;;  %v2684_v27 = vadd.f32 %v2642_v30, %v10773_v53 }
 0x32a   : > { %v11008_v43 = vadd.f32 %v2901_v41, %v2684_v27  ;;  %3885 = vmatmul.bf16.gmra.mxu0 %v3758_v42  ;;  %v3761_v41 = vrot.slane %v12649_v31, 3 }
 0x32c   : > { %v3762_v42 = vsel %vm3743_vm3, %v3759_v8, %v3761_v41 }
 0x32f   : > { %v2644_v3 = vpop.f32.mrf.mxu0 }
 0x330   : > { %v11010_v44 = vpop.f32.mrf.mxu1  ;;  %v11013_v4 = vadd.f32 %v2644_v3, %v12646_v47 }
 0x337   : > { %v2647_v12 = vpop.f32.mrf.mxu0 }
 0x338   : > { %v2906_v29 = vpop.f32.mrf.mxu1  ;;  %v2686_v45 = vadd.f32 %v2647_v12, %v10788_v24  ;;  %v3763_v12 = vrot.slane %v12650_v52, 3 }
 0x33a   : > { %v11018_v36 = vadd.f32 %v2906_v29, %v2686_v45  ;;  %3890 = vmatmul.bf16.gmra.mxu0 %v3760_v10  ;;  %v3764_v45 = vsel %vm3743_vm3, %v3761_v41, %v3763_v12 }
 0x33f   : > { %v2649_v53 = vpop.f32.mrf.mxu0 }
 0x340   : > { %v11021_v37 = vadd.f32 %v2649_v53, %v12648_v61 }
 0x347   : > { %v3856_v30 = vpop.f32.mrf.mxu0 }
 0x348   : > { %v3946_v27 = vadd.f32 %v3856_v30, %v10802_v56 }
 0x34a   : > { %3895 = vmatmul.bf16.gmra.mxu0 %v3762_v42  ;;  %v3982_v47 = vmax.f32 %v3946_v27, 0.0 }
 0x34f   : > { %v3858_v3 = vpop.f32.mrf.mxu0 }
 0x350   : > { %v3947_v54 = vadd.f32 %v3858_v3, %v10808_v57  ;;  %v12651_v57 = vld [vmem:[#allocation14_spill] sm:$0xff] }
 0x351   : > { %v3765_v30 = vrot.slane %v12651_v57, 3 }
 0x352   : > { %v3983_v24 = vmax.f32 %v3947_v54, 0.0 }
 0x353   : > { %v3766_v3 = vsel %vm3743_vm3, %v3763_v12, %v3765_v30 }
 0x354   : > { %v4018_v29 = vpack.c.bf16 %v3983_v24, %v3982_v47 }
 0x356   : > { %8908 = vmatmul.msk.bf16.vlgmr.msra.gmra.mxu1 %vm4052_vm4, %v4018_v29 }
 0x357   : > { %v3861_v10 = vpop.f32.mrf.mxu0 }
 0x358   : > { %v3948_v8 = vadd.f32 %v3861_v10, %v10818_v26  ;;  %v3235_v26 = vpop.f32.mrf.mxu2 }
 0x35a   : > { %3900 = vmatmul.bf16.gmra.mxu0 %v3764_v45  ;;  %v3984_v61 = vmax.f32 %v3948_v8, 0.0  ;;  %v3627_v45 = vpop.f32.mrf.mxu3 }
 0x35f   : > { %v3863_v53 = vpop.f32.mrf.mxu0 }
 0x360   : > { %v3949_v56 = vadd.f32 %v3863_v53, %v10824_v35  ;;  %v12652_v35 = vld [vmem:[#allocation15_spill] sm:$0xff]  ;;  %v3237_v12 = vpop.f32.mrf.mxu2 }
 0x361   : > { %v3767_v29 = vrot.slane %v12652_v35, 3 }
 0x362   : > { %v3985_v31 = vmax.f32 %v3949_v56, 0.0 }
 0x363   : > { %v3768_v53 = vsel %vm3743_vm3, %v3765_v30, %v3767_v29 }
 0x364   : > { %v4019_v42 = vpack.c.bf16 %v3985_v31, %v3984_v61 }
 0x366   : > { %8909 = vmatmul.msk.bf16.gmra.mxu1 %vm4052_vm4, %v4019_v42  ;;  %v12653_v42 = vld [vmem:[#allocation16_spill] sm:$0xff] }
 0x367   : > { %v3866_v27 = vpop.f32.mrf.mxu0 }
 0x368   : > { %v3950_v54 = vadd.f32 %v3866_v27, %v10833_v40  ;;  %v3629_v40 = vpop.f32.mrf.mxu3  ;;  %v3769_v27 = vrot.slane %v12653_v42, 3 }
 0x36a   : > { %3905 = vmatmul.bf16.gmra.mxu0 %v3766_v3  ;;  %v3986_v24 = vmax.f32 %v3950_v54, 0.0  ;;  %v3240_v54 = vpop.f32.mrf.mxu2 }
 0x36f   : > { %v3868_v41 = vpop.f32.mrf.mxu0 }
 0x370   : > { %v3951_v47 = vadd.f32 %v3868_v41, %v10839_v48  ;;  %v3632_v30 = vpop.f32.mrf.mxu3 }
 0x372   : > { %v3987_v52 = vmax.f32 %v3951_v47, 0.0  ;;  %v3770_v47 = vsel %vm3743_vm3, %v3767_v29, %v3769_v27 }
 0x374   : > { %v4020_v10 = vpack.c.bf16 %v3987_v52, %v3986_v24 }
 0x376   : > { %8910 = vmatmul.msk.bf16.gmra.mxu1 %vm4052_vm4, %v4020_v10 }
 0x377   : > { %v3871_v8 = vpop.f32.mrf.mxu0 }
 0x378   : > { %v3952_v56 = vadd.f32 %v3871_v8, %v10848_v5  ;;  %v3242_v5 = vpop.f32.mrf.mxu2  ;;  %v3634_v8 = vpop.f32.mrf.mxu3 }
 0x37a   : > { %3910 = vmatmul.bf16.gmra.mxu0 %v3768_v53  ;;  %v3988_v31 = vmax.f32 %v3952_v56, 0.0  ;;  %v12654_v53 = vld [vmem:[#allocation17_spill] sm:$0xff] }
 0x37b   : > { %v3771_v56 = vrot.slane %v12654_v53, 3 }
 0x37f   : > { %v3873_v61 = vpop.f32.mrf.mxu0 }
 0x380   : > { %v3953_v48 = vadd.f32 %v3873_v61, %v10855_v23  ;;  %v3245_v29 = vpop.f32.mrf.mxu2 }
 0x382   : > { %v3989_v57 = vmax.f32 %v3953_v48, 0.0 }
 0x384   : > { %v4021_v3 = vpack.c.bf16 %v3989_v57, %v3988_v31  ;;  %v3772_v31 = vsel %vm3743_vm3, %v3769_v27, %v3771_v56  ;;  %v3637_v57 = vpop.f32.mrf.mxu3 }
 0x386   : > { %8911 = vmatmul.msk.bf16.gmra.mxu1 %vm4052_vm4, %v4021_v3 }
 0x387   : > { %v3876_v41 = vpop.f32.mrf.mxu0 }
 0x388   : > { %v3954_v24 = vadd.f32 %v3876_v41, %v10864_v28 }
 0x38a   : > { %3915 = vmatmul.bf16.gmra.mxu0 %v3770_v47  ;;  %v3990_v23 = vmax.f32 %v3954_v24, 0.0  ;;  %v3247_v47 = vpop.f32.mrf.mxu2  ;;  %v3773_v24 = vrot.slane %v10875_v14, 3 }
 0x38c   : > { %v3774_v27 = vsel %vm3743_vm3, %v3771_v56, %v3773_v24 }
 0x38f   : > { %v3878_v52 = vpop.f32.mrf.mxu0 }
 0x390   : > { %v3955_v35 = vadd.f32 %v3878_v52, %v10870_v0 }
 0x392   : > { %v3991_v10 = vmax.f32 %v3955_v35, 0.0  ;;  %v3639_v35 = vpop.f32.mrf.mxu3 }
 0x394   : > { %v4022_v61 = vpack.c.bf16 %v3991_v10, %v3990_v23  ;;  %v3307_v10 = vadd.f32 %v3235_v26, %v10893_v1 }
 0x396   : > { %8912 = vmatmul.msk.bf16.gmra.mxu1 %vm4052_vm4, %v4022_v61  ;;  %v3250_v61 = vpop.f32.mrf.mxu2 }
 0x397   : > { %v3881_v48 = vpop.f32.mrf.mxu0 }
 0x398   : > { %v3956_v28 = vadd.f32 %v3881_v48, %v10879_v7  ;;  %v2924_v7 = vadd.f32 %v10895_v32, %v10900_v19  ;;  %v12655_v19 = vld [vmem:[#allocation19_spill] sm:$0xff] }
 0x39a   : > { %3920 = vmatmul.bf16.gmra.mxu0 %v3772_v31  ;;  %v3992_v0 = vmax.f32 %v3956_v28, 0.0  ;;  %v3308_v53 = vadd.f32 %v3237_v12, %v2924_v7  ;;  %v3309_v12 = vadd.f32 %v3240_v54, %v12655_v19 }
 0x39c   : > { %v3700_v48 = vadd.f32 %v3629_v40, %v3308_v53 }
 0x39e   : > { %v3252_v1 = vpop.f32.mrf.mxu2 }
 0x39f   : > { %v3883_v42 = vpop.f32.mrf.mxu0 }
 0x3a0   : > { %v3957_v3 = vadd.f32 %v3883_v42, %v10886_v13  ;;  %v3699_v13 = vadd.f32 %v3627_v45, %v3307_v10  ;;  %v3642_v42 = vpop.f32.mrf.mxu3  ;;  %v12656_v45 = vld [vmem:[#allocation20_spill] sm:$0xff] }
 0x3a1   : > { %v2926_v40 = vadd.f32 %v12656_v45, %v10917_v38 }
 0x3a2   : > { %v3993_v41 = vmax.f32 %v3957_v3, 0.0 }
 0x3a3   : > { %v3310_v56 = vadd.f32 %v3242_v5, %v2926_v40  ;;  %v2928_v5 = vadd.f32 %v10930_v33, %v10935_v21  ;;  %v12659_v33 = vld [vmem:[#allocation21_spill] sm:$0xff] }
 0x3a4   : > { %v4023_v52 = vpack.c.bf16 %v3993_v41, %v3992_v0  ;;  %v3775_v41 = vrot.slane %v10891_v20, 3  ;;  %v3779_v21 = vrot.slane %v12659_v33, 3  ;;  %v2932_v33 = vadd.f32 %v10955_v11, %v10958_v18 }
 0x3a5   : > { %v3702_v10 = vadd.f32 %v3634_v8, %v3310_v56  ;;  %v3312_v8 = vadd.f32 %v3247_v47, %v2928_v5 }
 0x3a6   : > { %8913 = vmatmul.msk.bf16.gmra.mxu1 %vm4052_vm4, %v4023_v52  ;;  %v3776_v32 = vsel %vm3743_vm3, %v3773_v24, %v3775_v41 }
 0x3a7   : > { %v3886_v23 = vpop.f32.mrf.mxu0 }
 0x3a8   : > { %v3958_v31 = vadd.f32 %v3886_v23, %v3699_v13  ;;  %v3644_v23 = vpop.f32.mrf.mxu3  ;;  %v11064_v13 = vpop.f32.mrf.mxu2 }
 0x3aa   : > { %3925 = vmatmul.bf16.gmra.mxu0 %v3774_v27  ;;  %v3994_v3 = vmax.f32 %v3958_v31, 0.0  ;;  %v3701_v27 = vadd.f32 %v3632_v30, %v3309_v12  ;;  %v3311_v30 = vadd.f32 %v3245_v29, %v10928_v6 }
 0x3af   : > { %v3888_v28 = vpop.f32.mrf.mxu0 }
 0x3b0   : > { %v3959_v14 = vadd.f32 %v3888_v28, %v3700_v48  ;;  %v12657_v28 = vld [vmem:[#allocation18_spill] sm:$0xff] }
 0x3b2   : > { %v3995_v0 = vmax.f32 %v3959_v14, 0.0  ;;  %v3777_v14 = vrot.slane %v12657_v28, 3  ;;  %v11096_v28 = vld [vmem:[%s12560_s3 + $0x8] sm:$0xff] }
 0x3b3   : > { %12660 = vst [vmem:[#allocation9_spill] sm:$0xff] %v11096_v28 }
 0x3b4   : > { %v4024_v52 = vpack.c.bf16 %v3995_v0, %v3994_v3  ;;  %v11067_v3 = vpop.f32.mrf.mxu3  ;;  %v3778_v54 = vsel %vm3743_vm3, %v3775_v41, %v3777_v14  ;;  %v3257_v0 = vpop.f32.mrf.mxu2  ;;  %v11079_v41 = vld [vmem:[%s12560_s3] sm:$0xff] }
 0x3b5   : > { %12658 = vst [vmem:[#allocation10_spill] sm:$0xff] %v11079_v41 }
 0x3b6   : > { %8914 = vmatmul.msk.bf16.gmra.mxu1 %vm4052_vm4, %v4024_v52  ;;  %v11074_v52 = vpop.f32.mrf.mxu1 }
 0x3b7   : > { %v3891_v26 = vpop.f32.mrf.mxu0 }
 0x3b8   : > { %v3960_v7 = vadd.f32 %v3891_v26, %v3701_v27  ;;  %v3703_v26 = vadd.f32 %v3637_v57, %v3311_v30  ;;  %v9773_v57 = vld [vmem:[#allocation3] sm:$0xff] }
 0x3ba   : > { %3930 = vmatmul.bf16.gmra.mxu0 %v3776_v32  ;;  %v3996_v48 = vmax.f32 %v3960_v7, 0.0  ;;  %v3704_v32 = vadd.f32 %v3639_v35, %v3312_v8 }
 0x3bc   : > { %v3649_v12 = vpop.f32.mrf.mxu3 }
 0x3bf   : > { %v3893_v53 = vpop.f32.mrf.mxu0 }
 0x3c0   : > { %v3961_v20 = vadd.f32 %v3893_v53, %v3702_v10  ;;  %v11083_v10 = vpop.f32.mrf.mxu2  ;;  %v3780_v53 = vsel %vm3743_vm3, %v3777_v14, %v3779_v21 }
 0x3c2   : > { %v3997_v31 = vmax.f32 %v3961_v20, 0.0  ;;  %v3313_v20 = vadd.f32 %v3250_v61, %v10942_v25  ;;  %v9774_v25 = vld [vmem:[#allocation3 + $0x8] sm:$0xff] }
 0x3c4   : > { %v4025_v24 = vpack.c.bf16 %v3997_v31, %v3996_v48  ;;  %v2930_v48 = vadd.f32 %v10944_v17, %v10949_v51  ;;  %v3652_v31 = vpop.f32.mrf.mxu3 }
 0x3c6   : > { %8915 = vmatmul.msk.bf16.gmra.mxu1 %vm4052_vm4, %v4025_v24  ;;  %v3314_v24 = vadd.f32 %v3252_v1, %v2930_v48 }
 0x3c7   : > { %v3896_v38 = vpop.f32.mrf.mxu0 }
 0x3c8   : > { %v3962_v19 = vadd.f32 %v3896_v38, %v3703_v26  ;;  %v3706_v14 = vadd.f32 %v3644_v23, %v3314_v24  ;;  %v3262_v17 = vpop.f32.mrf.mxu2  ;;  %v11105_v26 = vld [vmem:[%s12560_s3 + $0x10] sm:$0xff] }
 0x3c9   : > { %12661 = vst [vmem:[#allocation12_spill] sm:$0xff] %v11105_v26 }
 0x3ca   : > { %3935 = vmatmul.bf16.gmra.mxu0 %v3778_v54  ;;  %v3998_v6 = vmax.f32 %v3962_v19, 0.0  ;;  %v3705_v54 = vadd.f32 %v3642_v42, %v3313_v20 }
 0x3cc   : > { %v3654_v42 = vpop.f32.mrf.mxu3 }
 0x3cf   : > { %v3898_v45 = vpop.f32.mrf.mxu0 }
 0x3d0   : > { %v3963_v40 = vadd.f32 %v3898_v45, %v3704_v32  ;;  %v3265_v21 = vpop.f32.mrf.mxu2 }
 0x3d2   : > { %v3999_v29 = vmax.f32 %v3963_v40, 0.0  ;;  %v9775_v40 = vld [vmem:[#allocation3 + $0x10] sm:$0xff] }
 0x3d3   : > { %v4116_v56 = vpop.f32.mrf.mxu1 }
 0x3d4   : > { %v4026_v47 = vpack.c.bf16 %v3999_v29, %v3998_v6  ;;  %v4206_v27 = vmul.f32 %v4116_v56, %v11079_v41  ;;  %v3315_v56 = vadd.f32 %v11064_v13, %v10953_v63  ;;  %v3657_v20 = vpop.f32.mrf.mxu3  ;;  %v9776_v13 = vld [vmem:[#allocation3 + $0x18] sm:$0xff] }
 0x3d6   : > { %v11085_v35 = vadd.f32 %v9773_v57, %v4206_v27  ;;  %8916 = vmatmul.msk.bf16.gmra.mxu1 %vm4052_vm4, %v4026_v47  ;;  %v11119_v47 = vld [vmem:[%s12560_s3 + $0x18] sm:$0xff]  ;;  %v3316_v27 = vadd.f32 %v3257_v0, %v2932_v33 }
 0x3d7   : > { %v3901_v7 = vpop.f32.mrf.mxu0  ;;  %12662 = vst [vmem:[#allocation11_spill] sm:$0xff] %v11119_v47 }
 0x3d8   : > { %4278 = vst [vmem:[#allocation3] sm:$0xff] %v11085_v35  ;;  %v3964_v5 = vadd.f32 %v3901_v7, %v3705_v54  ;;  %v3707_v7 = vadd.f32 %v11067_v3, %v3315_v56  ;;  %v3708_v48 = vadd.f32 %v3649_v12, %v3316_v27  ;;  %v3267_v3 = vpop.f32.mrf.mxu2 }
 0x3da   : > { %3940 = vmatmul.bf16.gmra.mxu0 %v3780_v53  ;;  %v4000_v1 = vmax.f32 %v3964_v5, 0.0  ;;  %v9777_v5 = vld [vmem:[#allocation3 + $0x20] sm:$0xff] }
 0x3db   : > { %v4118_v38 = vpop.f32.mrf.mxu1 }
 0x3dc   : > { %v4207_v30 = vmul.f32 %v4118_v38, %v11096_v28  ;;  %v11129_v38 = vld [vmem:[%s12560_s3 + $0x20] sm:$0xff] }
 0x3dd   : > { %12663 = vst [vmem:[#allocation13_spill] sm:$0xff] %v11129_v38 }
 0x3de   : > { %v11099_v61 = vadd.f32 %v9774_v25, %v4207_v30 }
 0x3df   : > { %v3903_v51 = vpop.f32.mrf.mxu0 }
 0x3e0   : > { %4279 = vst [vmem:[#allocation3 + $0x8] sm:$0xff] %v11099_v61  ;;  %v3965_v8 = vadd.f32 %v3903_v51, %v3706_v14  ;;  %v3659_v51 = vpop.f32.mrf.mxu3  ;;  %v3270_v56 = vpop.f32.mrf.mxu2 }
 0x3e2   : > { %v4001_v32 = vmax.f32 %v3965_v8, 0.0 }
 0x3e3   : > { %v4121_v19 = vpop.f32.mrf.mxu1 }
 0x3e4   : > { %v4027_v45 = vpack.c.bf16 %v4001_v32, %v4000_v1  ;;  %v4208_v23 = vmul.f32 %v4121_v19, %v11105_v26  ;;  %v3317_v1 = vadd.f32 %v11083_v10, %v10962_v49  ;;  %v2934_v32 = vadd.f32 %v10964_v16, %v10967_v9  ;;  %v11143_v19 = vld [vmem:[%s12560_s3 + $0x28] sm:$0xff] }
 0x3e5   : > { %12664 = vst [vmem:[#allocation14_spill] sm:$0xff] %v11143_v19 }
 0x3e6   : > { %v11108_v6 = vadd.f32 %v9775_v40, %v4208_v23  ;;  %8917 = vmatmul.msk.bf16.gmra.mxu1 %vm4052_vm4, %v4027_v45  ;;  %v3318_v45 = vadd.f32 %v3262_v17, %v2934_v32  ;;  %v3709_v40 = vadd.f32 %v3652_v31, %v3317_v1 }
 0x3e7   : > { %v3906_v29 = vpop.f32.mrf.mxu0 }
 0x3e8   : > { %4280 = vst [vmem:[#allocation3 + $0x10] sm:$0xff] %v11108_v6  ;;  %v3966_v63 = vadd.f32 %v3906_v29, %v3707_v7  ;;  %v3710_v33 = vadd.f32 %v3654_v42, %v3318_v45  ;;  %v3662_v9 = vpop.f32.mrf.mxu3  ;;  %v11152_v7 = vld [vmem:[%s12560_s3 + $0x30] sm:$0xff] }
 0x3e9   : > { %12665 = vst [vmem:[#allocation15_spill] sm:$0xff] %v11152_v7 }
 0x3ea   : > { %v4002_v0 = vmax.f32 %v3966_v63, 0.0  ;;  %v9779_v63 = vld [vmem:[#allocation3 + $0x30] sm:$0xff] }
 0x3eb   : > { %v4123_v57 = vpop.f32.mrf.mxu1 }
 0x3ec   : > { %v4209_v53 = vmul.f32 %v4123_v57, %v11119_v47  ;;  %v9778_v57 = vld [vmem:[#allocation3 + $0x28] sm:$0xff] }
 0x3ee   : > { %v11123_v24 = vadd.f32 %v9776_v13, %v4209_v53 }
 0x3ef   : > { %v3908_v11 = vpop.f32.mrf.mxu0 }
 0x3f0   : > { %4281 = vst [vmem:[#allocation3 + $0x18] sm:$0xff] %v11123_v24  ;;  %v3967_v18 = vadd.f32 %v3908_v11, %v3708_v48  ;;  %v3272_v11 = vpop.f32.mrf.mxu2 }
 0x3f2   : > { %v4003_v54 = vmax.f32 %v3967_v18, 0.0 }
 0x3f3   : > { %v4126_v30 = vpop.f32.mrf.mxu1 }
 0x3f4   : > { %v4028_v14 = vpack.c.bf16 %v4003_v54, %v4002_v0  ;;  %v4210_v12 = vmul.f32 %v4126_v30, %v11129_v38  ;;  %v3319_v0 = vadd.f32 %v3265_v21, %v10971_v39  ;;  %v2936_v54 = vadd.f32 %v10973_v60, %v10976_v59  ;;  %v11165_v30 = vld [vmem:[%s12560_s3 + $0x38] sm:$0xff] }
 0x3f5   : > { %12666 = vst [vmem:[#allocation16_spill] sm:$0xff] %v11165_v30 }
 0x3f6   : > { %v11132_v25 = vadd.f32 %v9777_v5, %v4210_v12  ;;  %8918 = vmatmul.msk.bf16.gmra.mxu1 %vm4052_vm4, %v4028_v14  ;;  %v3320_v14 = vadd.f32 %v3267_v3, %v2936_v54  ;;  %v3664_v12 = vpop.f32.mrf.mxu3 }
 0x3f7   : > { %v3911_v8 = vpop.f32.mrf.mxu0 }
 0x3f8   : > { %4282 = vst [vmem:[#allocation3 + $0x20] sm:$0xff] %v11132_v25  ;;  %v3968_v27 = vadd.f32 %v3911_v8, %v3709_v40  ;;  %v3711_v8 = vadd.f32 %v3657_v20, %v3319_v0  ;;  %v3712_v32 = vadd.f32 %v3659_v51, %v3320_v14  ;;  %v3275_v59 = vpop.f32.mrf.mxu2  ;;  %v11174_v40 = vld [vmem:[%s12560_s3 + $0x40] sm:$0xff] }
 0x3f9   : > { %12667 = vst [vmem:[#allocation17_spill] sm:$0xff] %v11174_v40 }
 0x3fa   : > { %v4004_v17 = vmax.f32 %v3968_v27, 0.0 }
 0x3fb   : > { %v4128_v23 = vpop.f32.mrf.mxu1 }
 0x3fc   : > { %v4211_v29 = vmul.f32 %v4128_v23, %v11143_v19  ;;  %v9780_v23 = vld [vmem:[#allocation3 + $0x38] sm:$0xff] }
 0x3fe   : > { %v11146_v49 = vadd.f32 %v9778_v57, %v4211_v29  ;;  %v3667_v27 = vpop.f32.mrf.mxu3  ;;  %v9781_v57 = vld [vmem:[#allocation3 + $0x40] sm:$0xff] }
 0x3ff   : > { %v3913_v10 = vpop.f32.mrf.mxu0 }
 0x400   : > { %4283 = vst [vmem:[#allocation3 + $0x28] sm:$0xff] %v11146_v49  ;;  %v3969_v16 = vadd.f32 %v3913_v10, %v3710_v33 }
 0x402   : > { %v4005_v31 = vmax.f32 %v3969_v16, 0.0 }
 0x403   : > { %v4131_v53 = vpop.f32.mrf.mxu1 }
 0x404   : > { %v4029_v48 = vpack.c.bf16 %v4005_v31, %v4004_v17  ;;  %v4212_v42 = vmul.f32 %v4131_v53, %v11152_v7  ;;  %v3321_v17 = vadd.f32 %v3270_v56, %v10980_v55  ;;  %v2938_v31 = vadd.f32 %v10982_v58, %v10985_v15  ;;  %v11187_v53 = vld [vmem:[%s12560_s3 + $0x48] sm:$0xff] }
 0x405   : > { %12668 = vst [vmem:[#allocation19_spill] sm:$0xff] %v11187_v53 }
 0x406   : > { %v11155_v13 = vadd.f32 %v9779_v63, %v4212_v42  ;;  %8919 = vmatmul.msk.bf16.gmra.mxu1 %vm4052_vm4, %v4029_v48  ;;  %v3322_v48 = vadd.f32 %v3272_v11, %v2938_v31  ;;  %v3277_v42 = vpop.f32.mrf.mxu2  ;;  %v3669_v56 = vpop.f32.mrf.mxu3 }
 0x407   : > { %v3916_v18 = vpop.f32.mrf.mxu0 }
 0x408   : > { %4284 = vst [vmem:[#allocation3 + $0x30] sm:$0xff] %v11155_v13  ;;  %v3970_v45 = vadd.f32 %v3916_v18, %v3711_v8  ;;  %v3713_v18 = vadd.f32 %v3662_v9, %v3321_v17  ;;  %v3714_v54 = vadd.f32 %v3664_v12, %v3322_v48  ;;  %v11196_v8 = vld [vmem:[%s12560_s3 + $0x50] sm:$0xff] }
 0x409   : > { %12669 = vst [vmem:[#allocation20_spill] sm:$0xff] %v11196_v8 }
 0x40a   : > { %v4006_v3 = vmax.f32 %v3970_v45, 0.0 }
 0x40b   : > { %v4133_v5 = vpop.f32.mrf.mxu1 }
 0x40c   : > { %v4213_v1 = vmul.f32 %v4133_v5, %v11165_v30  ;;  %v9782_v5 = vld [vmem:[#allocation3 + $0x48] sm:$0xff] }
 0x40e   : > { %v11168_v39 = vadd.f32 %v9780_v23, %v4213_v1  ;;  %v3280_v45 = vpop.f32.mrf.mxu2  ;;  %v9783_v23 = vld [vmem:[#allocation3 + $0x50] sm:$0xff] }
 0x40f   : > { %v3918_v21 = vpop.f32.mrf.mxu0 }
 0x410   : > { %4285 = vst [vmem:[#allocation3 + $0x38] sm:$0xff] %v11168_v39  ;;  %v3971_v60 = vadd.f32 %v3918_v21, %v3712_v32 }
 0x412   : > { %v4007_v29 = vmax.f32 %v3971_v60, 0.0 }
 0x413   : > { %v4136_v20 = vpop.f32.mrf.mxu1 }
 0x414   : > { %v4030_v33 = vpack.c.bf16 %v4007_v29, %v4006_v3  ;;  %v4214_v51 = vmul.f32 %v4136_v20, %v11174_v40  ;;  %v3323_v3 = vadd.f32 %v3275_v59, %v10989_v46  ;;  %v2940_v29 = vadd.f32 %v10991_v50, %v10994_v22  ;;  %v3672_v20 = vpop.f32.mrf.mxu3 }
 0x416   : > { %v11177_v10 = vadd.f32 %v9781_v57, %v4214_v51  ;;  %8920 = vmatmul.msk.bf16.gmra.mxu1 %vm4052_vm4, %v4030_v33  ;;  %v11209_v33 = vld [vmem:[%s12560_s3 + $0x58] sm:$0xff]  ;;  %v3324_v51 = vadd.f32 %v3277_v42, %v2940_v29  ;;  %v3282_v59 = vpop.f32.mrf.mxu2 }
 0x417   : > { %v3921_v16 = vpop.f32.mrf.mxu0  ;;  %12670 = vst [vmem:[#allocation18_spill] sm:$0xff] %v11209_v33 }
 0x418   : > { %4286 = vst [vmem:[#allocation3 + $0x40] sm:$0xff] %v11177_v10  ;;  %v3972_v14 = vadd.f32 %v3921_v16, %v3713_v18  ;;  %v3715_v16 = vadd.f32 %v3667_v27, %v3323_v3  ;;  %v3716_v31 = vadd.f32 %v3669_v56, %v3324_v51  ;;  %v11218_v18 = vld [vmem:[%s12560_s3 + $0x60] sm:$0xff]  ;;  %v9785_v56 = vld [vmem:[#allocation3 + $0x60] sm:$0xff] }
 0x419   : > { %12671 = vst [vmem:[#allocation21_spill] sm:$0xff] %v11218_v18 }
 0x41a   : > { %v4008_v11 = vmax.f32 %v3972_v14, 0.0 }
 0x41b   : > { %v4138_v63 = vpop.f32.mrf.mxu1 }
 0x41c   : > { %v4215_v0 = vmul.f32 %v4138_v63, %v11187_v53  ;;  %v9784_v63 = vld [vmem:[#allocation3 + $0x58] sm:$0xff]  ;;  %v3674_v27 = vpop.f32.mrf.mxu3 }
 0x41e   : > { %v11190_v55 = vadd.f32 %v9782_v5, %v4215_v0 }
 0x41f   : > { %v3923_v58 = vpop.f32.mrf.mxu0 }
 0x420   : > { %4287 = vst [vmem:[#allocation3 + $0x48] sm:$0xff] %v11190_v55  ;;  %v3973_v15 = vadd.f32 %v3923_v58, %v3714_v54 }
 0x422   : > { %v4009_v1 = vmax.f32 %v3973_v15, 0.0 }
 0x423   : > { %v4141_v9 = vpop.f32.mrf.mxu1 }
 0x424   : > { %v4031_v32 = vpack.c.bf16 %v4009_v1, %v4008_v11  ;;  %v4216_v12 = vmul.f32 %v4141_v9, %v11196_v8  ;;  %v3325_v11 = vadd.f32 %v3280_v45, %v10998_v62  ;;  %v2942_v1 = vadd.f32 %v11000_v34, %v11003_v2  ;;  %v3285_v9 = vpop.f32.mrf.mxu2  ;;  %v3677_v29 = vpop.f32.mrf.mxu3  ;;  %v9786_v62 = vld [vmem:[#allocation3 + $0x68] sm:$0xff] }
 0x426   : > { %v11199_v21 = vadd.f32 %v9783_v23, %v4216_v12  ;;  %8921 = vmatmul.msk.bf16.gmra.mxu1 %vm4052_vm4, %v4031_v32  ;;  %v11231_v32 = vld [vmem:[%s12560_s3 + $0x68] sm:$0xff]  ;;  %v3326_v12 = vadd.f32 %v3282_v59, %v2942_v1 }
 0x427   : > { %v3926_v60 = vpop.f32.mrf.mxu0  ;;  %12672 = vst [vmem:[#allocation22_spill] sm:$0xff] %v11231_v32 }
 0x428   : > { %4288 = vst [vmem:[#allocation3 + $0x50] sm:$0xff] %v11199_v21  ;;  %v3974_v48 = vadd.f32 %v3926_v60, %v3715_v16  ;;  %v3717_v60 = vadd.f32 %v3672_v20, %v3325_v11  ;;  %v3718_v51 = vadd.f32 %v3674_v27, %v3326_v12  ;;  %v11240_v16 = vld [vmem:[%s12560_s3 + $0x70] sm:$0xff]  ;;  %v3327_v27 = vadd.f32 %v3285_v9, %v11008_v43 }
 0x429   : > { %12673 = vst [vmem:[#allocation23_spill] sm:$0xff] %v11240_v16 }
 0x42a   : > { %v4010_v42 = vmax.f32 %v3974_v48, 0.0 }
 0x42b   : > { %v4143_v57 = vpop.f32.mrf.mxu1 }
 0x42c   : > { %v4217_v17 = vmul.f32 %v4143_v57, %v11209_v33  ;;  %v3287_v20 = vpop.f32.mrf.mxu2 }
 0x42e   : > { %v11212_v46 = vadd.f32 %v9784_v63, %v4217_v17 }
 0x42f   : > { %v3928_v50 = vpop.f32.mrf.mxu0 }
 0x430   : > { %4289 = vst [vmem:[#allocation3 + $0x58] sm:$0xff] %v11212_v46  ;;  %v3975_v22 = vadd.f32 %v3928_v50, %v3716_v31  ;;  %v9787_v50 = vld [vmem:[#allocation3 + $0x70] sm:$0xff] }
 0x432   : > { %v4011_v0 = vmax.f32 %v3975_v22, 0.0 }
 0x433   : > { %v4146_v54 = vpop.f32.mrf.mxu1 }
 0x434   : > { %v4032_v14 = vpack.c.bf16 %v4011_v0, %v4010_v42  ;;  %v4218_v5 = vmul.f32 %v4146_v54, %v11218_v18  ;;  %v3679_v42 = vpop.f32.mrf.mxu3  ;;  %v2944_v54 = vadd.f32 %v11010_v44, %v11013_v4  ;;  %v3290_v1 = vpop.f32.mrf.mxu2 }
 0x436   : > { %v11221_v58 = vadd.f32 %v9785_v56, %v4218_v5  ;;  %8922 = vmatmul.msk.bf16.gmra.mxu1 %vm4052_vm4, %v4032_v14  ;;  %v11253_v14 = vld [vmem:[%s12560_s3 + $0x78] sm:$0xff]  ;;  %v3328_v5 = vadd.f32 %v3287_v20, %v2944_v54 }
 0x437   : > { %v3931_v15 = vpop.f32.mrf.mxu0  ;;  %12674 = vst [vmem:[#allocation24_spill] sm:$0xff] %v11253_v14 }
 0x438   : > { %4290 = vst [vmem:[#allocation3 + $0x60] sm:$0xff] %v11221_v58  ;;  %v3976_v57 = vadd.f32 %v3931_v15, %v3717_v60  ;;  %v3719_v15 = vadd.f32 %v3677_v29, %v3327_v27  ;;  %v3720_v12 = vadd.f32 %v3679_v42, %v3328_v5  ;;  %v9788_v60 = vld [vmem:[#allocation3 + $0x78] sm:$0xff] }
 0x43a   : > { %v4012_v17 = vmax.f32 %v3976_v57, 0.0 }
 0x43b   : > { %v4148_v23 = vpop.f32.mrf.mxu1 }
 0x43c   : > { %v4219_v3 = vmul.f32 %v4148_v23, %v11231_v32  ;;  %v3682_v4 = vpop.f32.mrf.mxu3 }
 0x43e   : > { %v11234_v45 = vadd.f32 %v9786_v62, %v4219_v3  ;;  %v11262_v3 = vld [vmem:[%s12560_s3 + $0x80] sm:$0xff] }
 0x43f   : > { %v3933_v34 = vpop.f32.mrf.mxu0  ;;  %12675 = vst [vmem:[#allocation25_spill] sm:$0xff] %v11262_v3 }
 0x440   : > { %4291 = vst [vmem:[#allocation3 + $0x68] sm:$0xff] %v11234_v45  ;;  %v3977_v2 = vadd.f32 %v3933_v34, %v3718_v51 }
 0x442   : > { %v4013_v31 = vmax.f32 %v3977_v2, 0.0  ;;  %v9789_v2 = vld [vmem:[#allocation3 + $0x80] sm:$0xff] }
 0x443   : > { %v4151_v48 = vpop.f32.mrf.mxu1 }
 0x444   : > { %v4033_v63 = vpack.c.bf16 %v4013_v31, %v4012_v17  ;;  %v4220_v59 = vmul.f32 %v4151_v48, %v11240_v16  ;;  %v3292_v31 = vpop.f32.mrf.mxu2  ;;  %v3329_v48 = vadd.f32 %v3290_v1, %v11018_v36  ;;  %v3684_v42 = vpop.f32.mrf.mxu3 }
 0x446   : > { %v11243_v22 = vadd.f32 %v9787_v50, %v4220_v59  ;;  %8923 = vmatmul.msk.bf16.gmra.mxu1 %vm4052_vm4, %v4033_v63  ;;  %v2946_v63 = vadd.f32 %v11074_v52, %v11021_v37  ;;  %v11275_v59 = vld [vmem:[%s12560_s3 + $0x88] sm:$0xff]  ;;  %v3721_v27 = vadd.f32 %v3682_v4, %v3329_v48  ;;  %v11284_v52 = vld [vmem:[%s12560_s3 + $0x90] sm:$0xff] }
 0x447   : > { %v3936_v0 = vpop.f32.mrf.mxu0  ;;  %12676 = vst [vmem:[#allocation26_spill] sm:$0xff] %v11275_v59  ;;  %v9793_v48 = vld [vmem:[#allocation3 + $0xa0] sm:$0xff] }
 0x448   : > { %4292 = vst [vmem:[#allocation3 + $0x70] sm:$0xff] %v11243_v22  ;;  %v3978_v23 = vadd.f32 %v3936_v0, %v3719_v15  ;;  %v3330_v50 = vadd.f32 %v3292_v31, %v2946_v63  ;;  %v9790_v15 = vld [vmem:[#allocation3 + $0x88] sm:$0xff] }
 0x449   : > { %12677 = vst [vmem:[#allocation27_spill] sm:$0xff] %v11284_v52 }
 0x44a   : > { %v4014_v51 = vmax.f32 %v3978_v23, 0.0  ;;  %v3722_v5 = vadd.f32 %v3684_v42, %v3330_v50  ;;  %v11312_v50 = vld [vmem:[%s12560_s3 + $0xa8] sm:$0xff] }
 0x44b   : > { %v4153_v56 = vpop.f32.mrf.mxu1  ;;  %12680 = vst [vmem:[#allocation30_spill] sm:$0xff] %v11312_v50 }
 0x44c   : > { %v4221_v11 = vmul.f32 %v4153_v56, %v11253_v14 }
 0x44e   : > { %v11256_v43 = vadd.f32 %v9788_v60, %v4221_v11 }
 0x44f   : > { %v3938_v9 = vpop.f32.mrf.mxu0 }
 0x450   : > { %4293 = vst [vmem:[#allocation3 + $0x78] sm:$0xff] %v11256_v43  ;;  %v3979_v44 = vadd.f32 %v3938_v9, %v3720_v12 }
 0x452   : > { %v4015_v29 = vmax.f32 %v3979_v44, 0.0  ;;  %v9791_v44 = vld [vmem:[#allocation3 + $0x90] sm:$0xff] }
 0x453   : > { %v4156_v57 = vpop.f32.mrf.mxu1 }
 0x454   : > { %v4034_v62 = vpack.c.bf16 %v4015_v29, %v4014_v51  ;;  %v4222_v34 = vmul.f32 %v4156_v57, %v11262_v3  ;;  %v11294_v51 = vld [vmem:[%s12560_s3 + $0x98] sm:$0xff] }
 0x455   : > { %12678 = vst [vmem:[#allocation28_spill] sm:$0xff] %v11294_v51 }
 0x456   : > { %v11265_v17 = vadd.f32 %v9789_v2, %v4222_v34  ;;  %8924 = vmatmul.msk.bf16.gmra.mxu1 %vm4052_vm4, %v4034_v62  ;;  %v9792_v62 = vld [vmem:[#allocation3 + $0x98] sm:$0xff]  ;;  %v11303_v2 = vld [vmem:[%s12560_s3 + $0xa0] sm:$0xff] }
 0x457   : > { %v3941_v20 = vpop.f32.mrf.mxu0  ;;  %12679 = vst [vmem:[#allocation29_spill] sm:$0xff] %v11303_v2 }
 0x458   : > { %4294 = vst [vmem:[#allocation3 + $0x80] sm:$0xff] %v11265_v17  ;;  %v3980_v56 = vadd.f32 %v3941_v20, %v3721_v27  ;;  %v9794_v27 = vld [vmem:[#allocation3 + $0xa8] sm:$0xff] }
 0x45a   : > { %v4016_v1 = vmax.f32 %v3980_v56, 0.0 }
 0x45b   : > { %v4158_v0 = vpop.f32.mrf.mxu1 }
 0x45c   : > { %v4223_v54 = vmul.f32 %v4158_v0, %v11275_v59 }
 0x45e   : > { %v11278_v36 = vadd.f32 %v9790_v15, %v4223_v54 }
 0x45f   : > { %v3943_v11 = vpop.f32.mrf.mxu0 }
 0x460   : > { %4295 = vst [vmem:[#allocation3 + $0x88] sm:$0xff] %v11278_v36  ;;  %v3981_v37 = vadd.f32 %v3943_v11, %v3722_v5  ;;  %v11321_v5 = vld [vmem:[%s12560_s3 + $0xb0] sm:$0xff]  ;;  %v9795_v11 = vld [vmem:[#allocation3 + $0xb0] sm:$0xff] }
 0x461   : > { %12681 = vst [vmem:[#allocation31_spill] sm:$0xff] %v11321_v5 }
 0x462   : > { %v4017_v12 = vmax.f32 %v3981_v37, 0.0 }
 0x463   : > { %v4161_v23 = vpop.f32.mrf.mxu1 }
 0x464   : > { %v4035_v60 = vpack.c.bf16 %v4017_v12, %v4016_v1  ;;  %v4224_v9 = vmul.f32 %v4161_v23, %v11284_v52  ;;  %v11330_v1 = vld [vmem:[%s12560_s3 + $0xb8] sm:$0xff] }
 0x465   : > { %12682 = vst [vmem:[#allocation32_spill] sm:$0xff] %v11330_v1 }
 0x466   : > { %v11287_v4 = vadd.f32 %v9791_v44, %v4224_v9  ;;  %8925 = vmatmul.msk.bf16.gmra.mxu1 %vm4052_vm4, %v4035_v60  ;;  %v9796_v60 = vld [vmem:[#allocation3 + $0xb8] sm:$0xff]  ;;  %v11339_v44 = vld [vmem:[%s12560_s3 + $0xc0] sm:$0xff] }
 0x467   : > { %12683 = vst [vmem:[#allocation33_spill] sm:$0xff] %v11339_v44 }
 0x468   : > { %4296 = vst [vmem:[#allocation3 + $0x90] sm:$0xff] %v11287_v4 }
 0x46b   : > { %v4163_v29 = vpop.f32.mrf.mxu1 }
 0x46c   : > { %v4225_v57 = vmul.f32 %v4163_v29, %v11294_v51 }
 0x46e   : > { %v11297_v34 = vadd.f32 %v9792_v62, %v4225_v57  ;;  %v9797_v62 = vld [vmem:[#allocation3 + $0xc0] sm:$0xff] }
 0x470   : > { %4297 = vst [vmem:[#allocation3 + $0x98] sm:$0xff] %v11297_v34 }
 0x473   : > { %v4166_v31 = vpop.f32.mrf.mxu1 }
 0x474   : > { %v4226_v20 = vmul.f32 %v4166_v31, %v11303_v2 }
 0x476   : > { %v11306_v63 = vadd.f32 %v9793_v48, %v4226_v20  ;;  %v11348_v20 = vld [vmem:[%s12560_s3 + $0xc8] sm:$0xff] }
 0x477   : > { %12684 = vst [vmem:[#allocation34_spill] sm:$0xff] %v11348_v20 }
 0x478   : > { %4298 = vst [vmem:[#allocation3 + $0xa0] sm:$0xff] %v11306_v63 }
 0x47b   : > { %v4168_v42 = vpop.f32.mrf.mxu1 }
 0x47c   : > { %v4227_v0 = vmul.f32 %v4168_v42, %v11312_v50 }
 0x47e   : > { %v11315_v54 = vadd.f32 %v9794_v27, %v4227_v0  ;;  %v9798_v0 = vld [vmem:[#allocation3 + $0xc8] sm:$0xff] }
 0x480   : > { %4299 = vst [vmem:[#allocation3 + $0xa8] sm:$0xff] %v11315_v54 }
 0x483   : > { %v4171_v56 = vpop.f32.mrf.mxu1 }
 0x484   : > { %v4228_v15 = vmul.f32 %v4171_v56, %v11321_v5  ;;  %v11357_v56 = vld [vmem:[%s12560_s3 + $0xd0] sm:$0xff] }
 0x485   : > { %12685 = vst [vmem:[#allocation35_spill] sm:$0xff] %v11357_v56 }
 0x486   : > { %v11324_v37 = vadd.f32 %v9795_v11, %v4228_v15 }
 0x488   : > { %4300 = vst [vmem:[#allocation3 + $0xb0] sm:$0xff] %v11324_v37 }
 0x48b   : > { %v4173_v12 = vpop.f32.mrf.mxu1 }
 0x48c   : > { %v4229_v23 = vmul.f32 %v4173_v12, %v11330_v1  ;;  %v9799_v12 = vld [vmem:[#allocation3 + $0xd0] sm:$0xff] }
 0x48e   : > { %v11333_v9 = vadd.f32 %v9796_v60, %v4229_v23  ;;  %v11366_v60 = vld [vmem:[%s12560_s3 + $0xd8] sm:$0xff] }
 0x48f   : > { %12686 = vst [vmem:[#allocation36_spill] sm:$0xff] %v11366_v60 }
 0x490   : > { %4301 = vst [vmem:[#allocation3 + $0xb8] sm:$0xff] %v11333_v9 }
 0x493   : > { %v4176_v29 = vpop.f32.mrf.mxu1 }
 0x494   : > { %v4230_v57 = vmul.f32 %v4176_v29, %v11339_v44 }
 0x496   : > { %v11342_v31 = vadd.f32 %v9797_v62, %v4230_v57  ;;  %v9800_v62 = vld [vmem:[#allocation3 + $0xd8] sm:$0xff] }
 0x498   : > { %4302 = vst [vmem:[#allocation3 + $0xc0] sm:$0xff] %v11342_v31 }
 0x49b   : > { %v4178_v48 = vpop.f32.mrf.mxu1 }
 0x49c   : > { %v4231_v42 = vmul.f32 %v4178_v48, %v11348_v20 }
 0x49e   : > { %v11351_v27 = vadd.f32 %v9798_v0, %v4231_v42  ;;  %v11375_v42 = vld [vmem:[%s12560_s3 + $0xe0] sm:$0xff] }
 0x49f   : > { %12687 = vst [vmem:[#allocation37_spill] sm:$0xff] %v11375_v42 }
 0x4a0   : > { %4303 = vst [vmem:[#allocation3 + $0xc8] sm:$0xff] %v11351_v27 }
 0x4a3   : > { %v4181_v15 = vpop.f32.mrf.mxu1 }
 0x4a4   : > { %v4232_v11 = vmul.f32 %v4181_v15, %v11357_v56 }
 0x4a6   : > { %v11360_v23 = vadd.f32 %v9799_v12, %v4232_v11  ;;  %v9801_v11 = vld [vmem:[#allocation3 + $0xe0] sm:$0xff] }
 0x4a8   : > { %4304 = vst [vmem:[#allocation3 + $0xd0] sm:$0xff] %v11360_v23 }
 0x4ab   : > { %v4183_v29 = vpop.f32.mrf.mxu1 }
 0x4ac   : > { %v4233_v57 = vmul.f32 %v4183_v29, %v11366_v60  ;;  %v11384_v29 = vld [vmem:[%s12560_s3 + $0xe8] sm:$0xff]  ;;  %v9802_v60 = vld [vmem:[#allocation3 + $0xe8] sm:$0xff] }
 0x4ad   : > { %12688 = vst [vmem:[#allocation38_spill] sm:$0xff] %v11384_v29 }
 0x4ae   : > { %v11369_v48 = vadd.f32 %v9800_v62, %v4233_v57 }
 0x4b0   : > { %4305 = vst [vmem:[#allocation3 + $0xd8] sm:$0xff] %v11369_v48 }
 0x4b3   : > { %v4186_v0 = vpop.f32.mrf.mxu1 }
 0x4b4   : > { %v4234_v15 = vmul.f32 %v4186_v0, %v11375_v42  ;;  %v11393_v0 = vld [vmem:[%s12560_s3 + $0xf0] sm:$0xff]  ;;  %v9803_v42 = vld [vmem:[#allocation3 + $0xf0] sm:$0xff] }
 0x4b5   : > { %12689 = vst [vmem:[#allocation39_spill] sm:$0xff] %v11393_v0 }
 0x4b6   : > { %v11378_v12 = vadd.f32 %v9801_v11, %v4234_v15 }
 0x4b8   : > { %4306 = vst [vmem:[#allocation3 + $0xe0] sm:$0xff] %v11378_v12 }
 0x4bb   : > { %v4188_v57 = vpop.f32.mrf.mxu1 }
 0x4bc   : > { %v4235_v62 = vmul.f32 %v4188_v57, %v11384_v29  ;;  %v9804_v29 = vld [vmem:[#allocation3 + $0xf8] sm:$0xff] }
 0x4be   : > { %v11387_v56 = vadd.f32 %v9802_v60, %v4235_v62  ;;  %v11402_v60 = vld [vmem:[%s12560_s3 + $0xf8] sm:$0xff] }
 0x4bf   : > { %12690 = vst [vmem:[#allocation40_spill] sm:$0xff] %v11402_v60 }
 0x4c0   : > { %4307 = vst [vmem:[#allocation3 + $0xe8] sm:$0xff] %v11387_v56 }
 0x4c3   : > { %v4191_v15 = vpop.f32.mrf.mxu1 }
 0x4c4   : > { %v4236_v11 = vmul.f32 %v4191_v15, %v11393_v0  ;;  %v9805_v0 = vld [vmem:[#allocation3 + $0x100] sm:$0xff] }
 0x4c6   : > { %v11396_v20 = vadd.f32 %v9803_v42, %v4236_v11  ;;  %v11411_v42 = vld [vmem:[%s12560_s3 + $0x100] sm:$0xff] }
 0x4c7   : > { %12691 = vst [vmem:[#allocation41_spill] sm:$0xff] %v11411_v42 }
 0x4c8   : > { %4308 = vst [vmem:[#allocation3 + $0xf0] sm:$0xff] %v11396_v20 }
 0x4cb   : > { %v4193_v57 = vpop.f32.mrf.mxu1 }
 0x4cc   : > { %v4237_v62 = vmul.f32 %v4193_v57, %v11402_v60  ;;  %v9806_v60 = vld [vmem:[#allocation3 + $0x108] sm:$0xff] }
 0x4ce   : > { %v11405_v44 = vadd.f32 %v9804_v29, %v4237_v62  ;;  %v11420_v29 = vld [vmem:[%s12560_s3 + $0x108] sm:$0xff] }
 0x4cf   : > { %12692 = vst [vmem:[#allocation42_spill] sm:$0xff] %v11420_v29 }
 0x4d0   : > { %4309 = vst [vmem:[#allocation3 + $0xf8] sm:$0xff] %v11405_v44 }
 0x4d3   : > { %v4196_v15 = vpop.f32.mrf.mxu1 }
 0x4d4   : > { %v4238_v11 = vmul.f32 %v4196_v15, %v11411_v42  ;;  %v9807_v42 = vld [vmem:[#allocation3 + $0x110] sm:$0xff] }
 0x4d6   : > { %v11414_v1 = vadd.f32 %v9805_v0, %v4238_v11  ;;  %v11429_v0 = vld [vmem:[%s12560_s3 + $0x110] sm:$0xff] }
 0x4d7   : > { %12693 = vst [vmem:[#allocation43_spill] sm:$0xff] %v11429_v0 }
 0x4d8   : > { %4310 = vst [vmem:[#allocation3 + $0x100] sm:$0xff] %v11414_v1 }
 0x4db   : > { %v4198_v57 = vpop.f32.mrf.mxu1 }
 0x4dc   : > { %v4239_v62 = vmul.f32 %v4198_v57, %v11420_v29  ;;  %v9808_v29 = vld [vmem:[#allocation3 + $0x118] sm:$0xff] }
 0x4de   : > { %v11423_v5 = vadd.f32 %v9806_v60, %v4239_v62  ;;  %v11438_v60 = vld [vmem:[%s12560_s3 + $0x118] sm:$0xff] }
 0x4df   : > { %12694 = vst [vmem:[#allocation44_spill] sm:$0xff] %v11438_v60 }
 0x4e0   : > { %4311 = vst [vmem:[#allocation3 + $0x108] sm:$0xff] %v11423_v5 }
 0x4e3   : > { %v4201_v15 = vpop.f32.mrf.mxu1 }
 0x4e4   : > { %v4240_v11 = vmul.f32 %v4201_v15, %v11429_v0 }
 0x4e6   : > { %v11432_v50 = vadd.f32 %v9807_v42, %v4240_v11 }
 0x4e8   : > { %4312 = vst [vmem:[#allocation3 + $0x110] sm:$0xff] %v11432_v50 }
 0x4eb   : > { %v4203_v57 = vpop.f32.mrf.mxu1 }
 0x4ec   : > { %v4241_v62 = vmul.f32 %v4203_v57, %v11438_v60  ;;  %4317 = sbr.rel (%p8926_p6) target bundleno = 1303 (0x517), region = 44 }
 0x4ee   : > { %v11441_v2 = vadd.f32 %v9808_v29, %v4241_v62 }
 0x4f0   : > { %4313 = vst [vmem:[#allocation3 + $0x118] sm:$0xff] %v11441_v2 }
 0x4f1   : > { %v4318_v42 = vmax.f32 %v11085_v35, 0.0  ;;  %v4319_v15 = vmax.f32 %v11099_v61, 0.0  ;;  %v4320_v11 = vmax.f32 %v11108_v6, 0.0  ;;  %v4321_v0 = vmax.f32 %v11123_v24, 0.0 }
 0x4f2   : > { %v4322_v57 = vmax.f32 %v11132_v25, 0.0  ;;  %v4323_v29 = vmax.f32 %v11146_v49, 0.0  ;;  %v4324_v62 = vmax.f32 %v11155_v13, 0.0  ;;  %v4325_v60 = vmax.f32 %v11168_v39, 0.0 }
 0x4f3   : > { %4354 = vst [vmem:[#allocation3] sm:$0xff] %v4318_v42  ;;  %v4326_v35 = vmax.f32 %v11177_v10, 0.0  ;;  %v4327_v61 = vmax.f32 %v11190_v55, 0.0  ;;  %v4328_v6 = vmax.f32 %v11199_v21, 0.0  ;;  %v4329_v24 = vmax.f32 %v11212_v46, 0.0 }
 0x4f4   : > { %4355 = vst [vmem:[#allocation3 + $0x8] sm:$0xff] %v4319_v15  ;;  %v4330_v25 = vmax.f32 %v11221_v58, 0.0  ;;  %v4331_v49 = vmax.f32 %v11234_v45, 0.0  ;;  %v4332_v13 = vmax.f32 %v11243_v22, 0.0  ;;  %v4333_v39 = vmax.f32 %v11256_v43, 0.0 }
 0x4f5   : > { %4356 = vst [vmem:[#allocation3 + $0x10] sm:$0xff] %v4320_v11  ;;  %v4334_v10 = vmax.f32 %v11265_v17, 0.0  ;;  %v4335_v55 = vmax.f32 %v11278_v36, 0.0  ;;  %v4336_v21 = vmax.f32 %v11287_v4, 0.0  ;;  %v4337_v46 = vmax.f32 %v11297_v34, 0.0 }
 0x4f6   : > { %4357 = vst [vmem:[#allocation3 + $0x18] sm:$0xff] %v4321_v0  ;;  %v4338_v58 = vmax.f32 %v11306_v63, 0.0  ;;  %v4339_v45 = vmax.f32 %v11315_v54, 0.0  ;;  %v4340_v22 = vmax.f32 %v11324_v37, 0.0  ;;  %v4341_v43 = vmax.f32 %v11333_v9, 0.0 }
 0x4f7   : > { %4358 = vst [vmem:[#allocation3 + $0x20] sm:$0xff] %v4322_v57  ;;  %v4342_v17 = vmax.f32 %v11342_v31, 0.0  ;;  %v4343_v36 = vmax.f32 %v11351_v27, 0.0  ;;  %v4344_v4 = vmax.f32 %v11360_v23, 0.0  ;;  %v4345_v34 = vmax.f32 %v11369_v48, 0.0 }
 0x4f8   : > { %4359 = vst [vmem:[#allocation3 + $0x28] sm:$0xff] %v4323_v29  ;;  %v4346_v63 = vmax.f32 %v11378_v12, 0.0  ;;  %v4347_v54 = vmax.f32 %v11387_v56, 0.0  ;;  %v4348_v37 = vmax.f32 %v11396_v20, 0.0  ;;  %v4349_v9 = vmax.f32 %v11405_v44, 0.0 }
 0x4f9   : > { %4360 = vst [vmem:[#allocation3 + $0x30] sm:$0xff] %v4324_v62  ;;  %v4350_v31 = vmax.f32 %v11414_v1, 0.0  ;;  %v4351_v27 = vmax.f32 %v11423_v5, 0.0  ;;  %v4352_v23 = vmax.f32 %v11432_v50, 0.0  ;;  %v4353_v48 = vmax.f32 %v11441_v2, 0.0 }
 0x4fa   : > { %4361 = vst [vmem:[#allocation3 + $0x38] sm:$0xff] %v4325_v60 }
 0x4fb   : > { %4362 = vst [vmem:[#allocation3 + $0x40] sm:$0xff] %v4326_v35 }
 0x4fc   : > { %4363 = vst [vmem:[#allocation3 + $0x48] sm:$0xff] %v4327_v61 }
 0x4fd   : > { %4364 = vst [vmem:[#allocation3 + $0x50] sm:$0xff] %v4328_v6 }
 0x4fe   : > { %4365 = vst [vmem:[#allocation3 + $0x58] sm:$0xff] %v4329_v24 }
 0x4ff   : > { %4366 = vst [vmem:[#allocation3 + $0x60] sm:$0xff] %v4330_v25 }
 0x500   : > { %4367 = vst [vmem:[#allocation3 + $0x68] sm:$0xff] %v4331_v49 }
 0x501   : > { %4368 = vst [vmem:[#allocation3 + $0x70] sm:$0xff] %v4332_v13 }
 0x502   : > { %4369 = vst [vmem:[#allocation3 + $0x78] sm:$0xff] %v4333_v39 }
 0x503   : > { %4370 = vst [vmem:[#allocation3 + $0x80] sm:$0xff] %v4334_v10 }
 0x504   : > { %4371 = vst [vmem:[#allocation3 + $0x88] sm:$0xff] %v4335_v55 }
 0x505   : > { %4372 = vst [vmem:[#allocation3 + $0x90] sm:$0xff] %v4336_v21 }
 0x506   : > { %4373 = vst [vmem:[#allocation3 + $0x98] sm:$0xff] %v4337_v46 }
 0x507   : > { %4374 = vst [vmem:[#allocation3 + $0xa0] sm:$0xff] %v4338_v58 }
 0x508   : > { %4375 = vst [vmem:[#allocation3 + $0xa8] sm:$0xff] %v4339_v45 }
 0x509   : > { %4376 = vst [vmem:[#allocation3 + $0xb0] sm:$0xff] %v4340_v22 }
 0x50a   : > { %4377 = vst [vmem:[#allocation3 + $0xb8] sm:$0xff] %v4341_v43 }
 0x50b   : > { %4378 = vst [vmem:[#allocation3 + $0xc0] sm:$0xff] %v4342_v17 }
 0x50c   : > { %4379 = vst [vmem:[#allocation3 + $0xc8] sm:$0xff] %v4343_v36 }
 0x50d   : > { %4380 = vst [vmem:[#allocation3 + $0xd0] sm:$0xff] %v4344_v4 }
 0x50e   : > { %4381 = vst [vmem:[#allocation3 + $0xd8] sm:$0xff] %v4345_v34 }
 0x50f   : > { %4382 = vst [vmem:[#allocation3 + $0xe0] sm:$0xff] %v4346_v63 }
 0x510   : > { %4383 = vst [vmem:[#allocation3 + $0xe8] sm:$0xff] %v4347_v54 }
 0x511   : > { %4384 = vst [vmem:[#allocation3 + $0xf0] sm:$0xff] %v4348_v37 }
 0x512   : > { %4385 = vst [vmem:[#allocation3 + $0xf8] sm:$0xff] %v4349_v9 }
 0x513   : > { %4386 = vst [vmem:[#allocation3 + $0x100] sm:$0xff] %v4350_v31 }
 0x514   : > { %4387 = vst [vmem:[#allocation3 + $0x108] sm:$0xff] %v4351_v27 }
 0x515   : > { %4388 = vst [vmem:[#allocation3 + $0x110] sm:$0xff] %v4352_v23 }
 0x516   : > { %4389 = vst [vmem:[#allocation3 + $0x118] sm:$0xff] %v4353_v48 }
 0x517 PF: > { %v9608_v5 = vld [vmem:[%s9984_s28 + $0x78] sm:$0xff]  ;;  %v9607_v1 = vld [vmem:[%s9984_s28 + $0x70] sm:$0xff]  ;;  %v9606_v0 = vld [vmem:[%s9984_s28 + $0x68] sm:$0xff] }
 0x518   : > { %v9600_v50 = vld [vmem:[%s9984_s28 + $0x38] sm:$0xff]  ;;  %5313 = vmatpush.bf16.msra.mxu2 %v9608_v5  ;;  %v9599_v2 = vld [vmem:[%s9984_s28 + $0x30] sm:$0xff]  ;;  %v9598_v60 = vld [vmem:[%s9984_s28 + $0x28] sm:$0xff] }
 0x519   : > { %5478 = vmatpush.bf16.msra.mxu3 %v9600_v50  ;;  %v9616_v44 = vld [vmem:[%s9984_s28 + $0xb8] sm:$0xff]  ;;  %v9615_v56 = vld [vmem:[%s9984_s28 + $0xb0] sm:$0xff]  ;;  %v9614_v42 = vld [vmem:[%s9984_s28 + $0xa8] sm:$0xff] }
 0x51a   : > { %v9641_v20 = vld [vmem:[%s9984_s28 + $0xf8] sm:$0xff]  ;;  %5700 = vmatpush.bf16.msrb.mxu0 %v9616_v44  ;;  %v9640_v12 = vld [vmem:[%s9984_s28 + $0xf0] sm:$0xff]  ;;  %v9639_v15 = vld [vmem:[%s9984_s28 + $0xe8] sm:$0xff] }
 0x51b   : > { %6084 = vmatpush.bf16.msrb.mxu1 %v9641_v20  ;;  %v4391_v11 = vld [vmem:[#allocation3 + $0x120] sm:$0xff]  ;;  %v4392_v57 = vld [vmem:[#allocation3 + $0x128] sm:$0xff]  ;;  %v9605_v29 = vld [vmem:[%s9984_s28 + $0x60] sm:$0xff] }
 0x51c   : > { %5314 = vmatpush.bf16.msra.mxu2 %v9607_v1  ;;  %v9597_v62 = vld [vmem:[%s9984_s28 + $0x20] sm:$0xff]  ;;  %v4427_v35 = vmax.f32 %v4391_v11, 0.0  ;;  %v4428_v61 = vmax.f32 %v4392_v57, 0.0  ;;  %v9604_v13 = vld [vmem:[%s9984_s28 + $0x58] sm:$0xff]  ;;  %v4394_v10 = vld [vmem:[#allocation3 + $0x138] sm:$0xff] }
 0x51d   : > { %5479 = vmatpush.bf16.msra.mxu3 %v9599_v2  ;;  %v9613_v6 = vld [vmem:[%s9984_s28 + $0xa0] sm:$0xff]  ;;  %v9596_v55 = vld [vmem:[%s9984_s28 + $0x18] sm:$0xff]  ;;  %v4395_v22 = vld [vmem:[#allocation3 + $0x140] sm:$0xff]  ;;  %v4430_v36 = vmax.f32 %v4394_v10, 0.0 }
 0x51e   : > { %5701 = vmatpush.bf16.msrb.mxu0 %v9615_v56  ;;  %v9638_v24 = vld [vmem:[%s9984_s28 + $0xe0] sm:$0xff]  ;;  %v4463_v25 = vpack.c.bf16 %v4427_v35, %v4427_v35  ;;  %v4464_v49 = vpack.c.bf16 %v4428_v61, %v4428_v61  ;;  %v11501_v43 = vld [vmem:[#allocation2 + $0xa8] sm:$0xff]   ;;  %v4396_v4 = vld [vmem:[#allocation3 + $0x148] sm:$0xff]  ;;  %v4431_v5 = vmax.f32 %v4395_v22, 0.0 }
 0x51f   : > { %6085 = vmatpush.bf16.msrb.mxu1 %v9640_v12  ;;  %v4393_v39 = vld [vmem:[#allocation3 + $0x130] sm:$0xff]  ;;  %v9612_v34 = vld [vmem:[%s9984_s28 + $0x98] sm:$0xff]  ;;  %v4896_v27 = vld [vmem:[#allocation2 + $0xb0] sm:$0xe]  ;;  %v4466_v48 = vpack.c.bf16 %v4430_v36, %v4430_v36  ;;  %v5102_v20 = vshll.u32 %v11501_v43, 16  ;;  %v4432_v56 = vmax.f32 %v4396_v4, 0.0 }
 0x520   : > { %5315 = vmatpush.bf16.msra.mxu2 %v9606_v0  ;;  %v4500_v21 = vshrl.u32 %v4463_v25, 16  ;;  %v4503_v46 = vshll.u32 %v4463_v25, 16  ;;  %v4509_v58 = vshrl.u32 %v4464_v49, 16  ;;  %v4512_v45 = vshll.u32 %v4464_v49, 16  ;;  %v9637_v63 = vld [vmem:[%s9984_s28 + $0xd8] sm:$0xff]  ;;  %v9603_v50 = vld [vmem:[%s9984_s28 + $0x50] sm:$0xff] }
 0x521   : > { %5480 = vmatpush.bf16.msra.mxu3 %v9598_v60  ;;  %v4429_v17 = vmax.f32 %v4393_v39, 0.0  ;;  %v9595_v1 = vld [vmem:[%s9984_s28 + $0x10] sm:$0xff]  ;;  %v4532_v11 = vshll.u32 %v4466_v48, 16  ;;  %v11512_v35 = vld [vmem:[#allocation2 + $0xa8] sm:$0xf0] }
 0x522   : > { %5702 = vmatpush.bf16.msrb.mxu0 %v9614_v42  ;;  %v4502_v54 = vrot.slane %v4500_v21, 6  ;;  %v4505_v37 = vrot.slane %v4503_v46, 7  ;;  %v4511_v9 = vrot.slane %v4509_v58, 6  ;;  %v4514_v31 = vrot.slane %v4512_v45, 7  ;;  %v9611_v12 = vld [vmem:[%s9984_s28 + $0x90] sm:$0xff]  ;;  %v9602_v10 = vld [vmem:[%s9984_s28 + $0x48] sm:$0xff] }
 0x523   : > { %6086 = vmatpush.bf16.msrb.mxu1 %v9639_v15  ;;  %v4465_v23 = vpack.c.bf16 %v4429_v17, %v4429_v17  ;;  %v9636_v0 = vld [vmem:[%s9984_s28 + $0xd0] sm:$0xff]  ;;  %v4529_v15 = vshrl.u32 %v4466_v48, 16  ;;  %v11514_v61 = vld [vmem:[#allocation2 + $0xa8] sm:$0xe]  ;;  %v4534_v39 = vrot.slane %v4532_v11, 7  ;;  %v4468_v58 = vpack.c.bf16 %v4432_v56, %v4432_v56  ;;  %v4397_v17 = vld [vmem:[#allocation3 + $0x150] sm:$0xff] }
 0x524   : > { %5316 = vmatpush.bf16.msra.mxu2 %v9605_v29  ;;  %v4506_v2 = vor.u32 %v4505_v37, %v4502_v54  ;;  %v4515_v44 = vor.u32 %v4514_v31, %v4511_v9  ;;  %v9714_v36 = vor.u32 %v11514_v61, %v11512_v35  ;;  %v4433_v54 = vmax.f32 %v4397_v17, 0.0  ;;  %v9610_v37 = vld [vmem:[%s9984_s28 + $0x88] sm:$0xff]  ;;  %v9593_v56 = vld [vmem:[%s9984_s28] sm:$0xff] }
 0x525   : > { %5481 = vmatpush.bf16.msra.mxu3 %v9597_v62  ;;  %v4519_v60 = vshrl.u32 %v4465_v23, 16  ;;  %v4522_v42 = vshll.u32 %v4465_v23, 16  ;;  %v9635_v9 = vld [vmem:[%s9984_s28 + $0xc8] sm:$0xff]  ;;  %v4549_v23 = vshrl.u32 %v4468_v58, 16  ;;  %v4552_v48 = vshll.u32 %v4468_v58, 16  ;;  %v9609_v29 = vld [vmem:[%s9984_s28 + $0x80] sm:$0xff] }
 0x526   : > { %5703 = vmatpush.bf16.msrb.mxu0 %v9613_v6  ;;  %v4507_v57 = vrot.slane %v4506_v2, 4  ;;  %v4897_v62 = vsel %vm10245_vm10, %v4506_v2, %v4896_v27  ;;  %v4517_v6 = vrot.slane %v4515_v44, 4  ;;  %v5104_v11 = vrot.slane %v5102_v20, 1 }
 0x527   : > { %6087 = vmatpush.bf16.msrb.mxu1 %v9638_v24  ;;  %v4467_v24 = vpack.c.bf16 %v4431_v5, %v4431_v5  ;;  %4898 = vst [vmem:[#allocation2 + $0xb0] sm:$0xe] %v4897_v62  ;;  %v4521_v25 = vrot.slane %v4519_v60, 6  ;;  %v4524_v49 = vrot.slane %v4522_v42, 7  ;;  %v4554_v60 = vrot.slane %v4552_v48, 7  ;;  %v9634_v62 = vld [vmem:[%s9984_s28 + $0xc0] sm:$0xff] }
 0x528   : > { %5317 = vmatpush.bf16.msra.mxu2 %v9604_v13  ;;  %v4531_v13 = vrot.slane %v4529_v15, 6  ;;  %v4516_v46 = vsel %vm10253_vm11, %v4507_v57, %v4515_v44  ;;  %v9601_v44 = vld [vmem:[%s9984_s28 + $0x40] sm:$0xff]  ;;  %v4469_v42 = vpack.c.bf16 %v4433_v54, %v4433_v54  ;;  %v5100_v15 = vshrl.u32 %v11501_v43, 16  ;;  %v9649_v57 = vld [vmem:[%s9984_s28 + $0x138] sm:$0xff] }
 0x529   : > { %5482 = vmatpush.bf16.msra.mxu3 %v9596_v55  ;;  %v9594_v55 = vld [vmem:[%s9984_s28 + $0x8] sm:$0xff]  ;;  %v4539_v45 = vshrl.u32 %v4467_v24, 16  ;;  %v4542_v22 = vshll.u32 %v4467_v24, 16  ;;  %4899 = vst [vmem:[#allocation2 + $0xb4] sm:$0xf] %v4516_v46  ;;  %v4525_v4 = vor.u32 %v4524_v49, %v4521_v25  ;;  %v5597_v58 = vrot.slane %v9714_v36, 1 }
 0x52a   : > { %5704 = vmatpush.bf16.msrb.mxu0 %v9612_v34  ;;  %v4535_v34 = vor.u32 %v4534_v39, %v4531_v13  ;;  %v4559_v13 = vshrl.u32 %v4469_v42, 16  ;;  %v4562_v20 = vshll.u32 %v4469_v42, 16 }
 0x52b   : > { %6088 = vmatpush.bf16.msrb.mxu1 %v9637_v63  ;;  %v4398_v63 = vld [vmem:[#allocation3 + $0x158] sm:$0xff]  ;;  %v4541_v31 = vrot.slane %v4539_v45, 6  ;;  %v4544_v27 = vrot.slane %v4542_v22, 7  ;;  %v4526_v5 = vsel %vm10253_vm11, %v4517_v6, %v4525_v4 }
 0x52c   : > { %5318 = vmatpush.bf16.msra.mxu2 %v9603_v50  ;;  %v4527_v50 = vrot.slane %v4525_v4, 4  ;;  %v4434_v2 = vmax.f32 %v4398_v63, 0.0  ;;  %4900 = vst [vmem:[#allocation2 + $0xb8] sm:$0xf] %v4526_v5  ;;  %v4561_v17 = vrot.slane %v4559_v13, 6 }
 0x52d   : > { %5483 = vmatpush.bf16.msra.mxu3 %v9595_v1  ;;  %v4537_v1 = vrot.slane %v4535_v34, 4 }
 0x52e   : > { %5705 = vmatpush.bf16.msrb.mxu0 %v9611_v12  ;;  %v4545_v12 = vor.u32 %v4544_v27, %v4541_v31  ;;  %v4536_v35 = vsel %vm10253_vm11, %v4527_v50, %v4535_v34  ;;  %v4470_v61 = vpack.c.bf16 %v4434_v2, %v4434_v2  ;;  %v5835_v6 = vld [vmem:[#allocation2 + $0xb0] sm:$0xe]  ;;  %v4564_v34 = vrot.slane %v4562_v20, 7 }
 0x52f   : > { %6089 = vmatpush.bf16.msrb.mxu1 %v9636_v0  ;;  %v4551_v0 = vrot.slane %v4549_v23, 6  ;;  %4901 = vst [vmem:[#allocation2 + $0xbc] sm:$0xf] %v4536_v35  ;;  %v5925_v39 = vunpack.c.l.b16 %v5835_v6 }
 0x530   : > { %5319 = vmatpush.bf16.msra.mxu2 %v9602_v10  ;;  %v4546_v24 = vsel %vm10253_vm11, %v4537_v1, %v4545_v12  ;;  %v4547_v25 = vrot.slane %v4545_v12, 4  ;;  %v4569_v10 = vshrl.u32 %v4470_v61, 16  ;;  %v9576_v46 = vld [vmem:[#allocation2 + $0xb0] sm:$0xff]  ;;  %v4565_v23 = vor.u32 %v4564_v34, %v4561_v17 }
 0x531   : > { %5484 = vmatpush.bf16.msra.mxu3 %v9594_v55  ;;  %v4555_v49 = vor.u32 %v4554_v60, %v4551_v0  ;;  %4902 = vst [vmem:[#allocation2 + $0xc0] sm:$0xf] %v4546_v24  ;;  %v4572_v55 = vshll.u32 %v4470_v61, 16  ;;  %v11536_v45 = vld [vmem:[#allocation2 + $0xb4] sm:$0xf]  ;;  %v5598_v31 = vrot.slane %v9576_v46, 1 }
 0x532   : > { %5706 = vmatpush.bf16.msrb.mxu0 %v9610_v37  ;;  %v12592_v4 = vunpack.c.l.b16 %v11536_v45  ;;  %v4571_v63 = vrot.slane %v4569_v10, 6  ;;  %v5105_v37 = vor.u32 %v5104_v11, %v5100_v15  ;;  %v9648_v0 = vld [vmem:[%s9984_s28 + $0x130] sm:$0xff]  ;;  %v5111_v61 = vshrl.u32 %v9576_v46, 16 }
 0x533   : > { %6090 = vmatpush.bf16.msrb.mxu1 %v9635_v9  ;;  %v4556_v22 = vsel %vm10253_vm11, %v4547_v25, %v4555_v49  ;;  %v4574_v54 = vrot.slane %v4572_v55, 7  ;;  %v5107_v9 = vshll.u32 %v9576_v46, 16  ;;  %v4557_v27 = vrot.slane %v4555_v49, 4  ;;  %v4399_v60 = vld [vmem:[#allocation3 + $0x160] sm:$0xff] }
 0x534   : > { %5320 = vmatpush.bf16.msra.mxu2 %v9601_v44  ;;  %4903 = vst [vmem:[#allocation2 + $0xc4] sm:$0xf] %v4556_v22  ;;  %v11544_v36 = vpack.c.b16 %v12592_v4, %v5925_v39  ;;  %v5599_v5 = vsel %vm1673_vm12, %v5597_v58, %v5598_v31  ;;  %v4435_v11 = vmax.f32 %v4399_v60, 0.0 }
 0x535   : > { %5485 = vmatpush.bf16.msra.mxu3 %v9593_v56  ;;  %v5109_v48 = vrot.slane %v5107_v9, 1  ;;  %v4575_v50 = vor.u32 %v4574_v54, %v4571_v63  ;;  %v4566_v44 = vsel %vm10253_vm11, %v4557_v27, %v4565_v23  ;;  %v4567_v56 = vrot.slane %v4565_v23, 4 }
 0x536   : > { %5707 = vmatpush.bf16.msrb.mxu0 %v9609_v29  ;;  %v9617_v1 = vld [vmem:[#allocation2 + $0xb8] sm:$0xff]  ;;  %v5981_v2 = vrot.slane %v11544_v36, 1  ;;  %4904 = vst [vmem:[#allocation2 + $0xc8] sm:$0xf] %v4566_v44  ;;  %v4471_v35 = vpack.c.bf16 %v4435_v11, %v4435_v11 }
 0x537   : > { %6091 = vmatpush.bf16.msrb.mxu1 %v9634_v62  ;;  %v5110_v12 = vsel %vm1174_vm13, %v5105_v37, %v5109_v48  ;;  %v11552_v42 = vld [vmem:[#allocation2 + $0xb8] sm:$0xff]  ;;  %v4576_v15 = vsel %vm10253_vm11, %v4567_v56, %v4575_v50  ;;  %v5113_v22 = vor.u32 %v5111_v61, %v5109_v48  ;;  %v4577_v9 = vrot.slane %v4575_v50, 4  ;;  %v4402_v56 = vld [vmem:[#allocation3 + $0x178] sm:$0xff] }
 0x538   : > { %6475 = vmatpush.bf16.msrb.mxu2 %v9649_v57  ;;  %5486 = vmatmul.bf16.vlgmr.msra.gmra.mxu3 %v11501_v43  ;;  %v5982_v43 = vrot.slane %v9617_v1, 1  ;;  %4905 = vst [vmem:[#allocation2 + $0xcc] sm:$0xf] %v4576_v15  ;;  %v4400_v29 = vld [vmem:[#allocation3 + $0x168] sm:$0xff]  ;;  %v5115_v6 = vshll.u32 %v11552_v42, 16  ;;  %v4579_v25 = vshrl.u32 %v4471_v35, 16 }
 0x539   : > { %5708 = vmatmul.bf16.vlgmr.msrb.gmra.mxu0 %v5599_v5  ;;  %5321 = vmatmul.bf16.vlgmr.msra.gmra.mxu2 %v5110_v12  ;;  %v4436_v62 = vmax.f32 %v4400_v29, 0.0  ;;  %v4582_v49 = vshll.u32 %v4471_v35, 16  ;;  %v5600_v13 = vrot.slane %v11552_v42, 1  ;;  %v4438_v12 = vmax.f32 %v4402_v56, 0.0 }
 0x53a   : > { %v5983_v57 = vsel %vm1673_vm12, %v5981_v2, %v5982_v43  ;;  %v4581_v20 = vrot.slane %v4579_v25, 6  ;;  %v5117_v17 = vrot.slane %v5115_v6, 1  ;;  %v5119_v60 = vshrl.u32 %v11552_v42, 16 }
 0x53b   : > { %6092 = vmatmul.bf16.vlgmr.msrb.gmra.mxu1 %v5983_v57  ;;  %v4472_v24 = vpack.c.bf16 %v4436_v62, %v4436_v62  ;;  %v9618_v39 = vld [vmem:[#allocation2 + $0xc0] sm:$0xff]  ;;  %v4584_v10 = vrot.slane %v4582_v49, 7  ;;  %v5601_v37 = vsel %vm1673_vm12, %v5598_v31, %v5600_v13  ;;  %v4474_v11 = vpack.c.bf16 %v4438_v12, %v4438_v12 }
 0x53c   : > { %6476 = vmatpush.bf16.msrb.mxu2 %v9648_v0  ;;  %v5984_v27 = vrot.slane %v9618_v39, 1  ;;  %v5118_v1 = vsel %vm1174_vm13, %v5113_v22, %v5117_v17  ;;  %v4401_v31 = vld [vmem:[#allocation3 + $0x170] sm:$0xff] }
 0x53d   : > { %v4589_v55 = vshrl.u32 %v4472_v24, 16  ;;  %v4592_v58 = vshll.u32 %v4472_v24, 16  ;;  %v4585_v34 = vor.u32 %v4584_v10, %v4581_v20  ;;  %v11566_v50 = vld [vmem:[#allocation2 + $0xc0] sm:$0xff]  ;;  %v4612_v6 = vshll.u32 %v4474_v11, 16 }
 0x53e   : > { %v5985_v44 = vsel %vm1673_vm12, %v5982_v43, %v5984_v27  ;;  %v5123_v15 = vshll.u32 %v11566_v50, 16  ;;  %v5602_v62 = vrot.slane %v11566_v50, 1  ;;  %v4609_v43 = vshrl.u32 %v4474_v11, 16 }
 0x53f   : > { %v4591_v63 = vrot.slane %v4589_v55, 6  ;;  %v4594_v54 = vrot.slane %v4592_v58, 7  ;;  %v4587_v23 = vrot.slane %v4585_v34, 4  ;;  %v4586_v2 = vsel %vm10253_vm11, %v4577_v9, %v4585_v34  ;;  %v9619_v25 = vld [vmem:[#allocation2 + $0xc8] sm:$0xff] }
 0x540   : > { %4906 = vst [vmem:[#allocation2 + $0xd0] sm:$0xf] %v4586_v2  ;;  %v5121_v24 = vor.u32 %v5119_v60, %v5117_v17  ;;  %v5125_v49 = vrot.slane %v5123_v15, 1  ;;  %v4611_v20 = vrot.slane %v4609_v43, 6  ;;  %v4614_v10 = vrot.slane %v4612_v6, 7  ;;  %v9647_v9 = vld [vmem:[%s9984_s28 + $0x128] sm:$0xff] }
 0x541   : > { %v4595_v5 = vor.u32 %v4594_v54, %v4591_v63  ;;  %v5603_v55 = vsel %vm1673_vm12, %v5600_v13, %v5602_v62  ;;  %v5986_v63 = vrot.slane %v9619_v25, 1  ;;  %6477 = vmatpush.bf16.msrb.mxu2 %v9647_v9 }
 0x542   : > { %v4615_v34 = vor.u32 %v4614_v10, %v4611_v20  ;;  %v5126_v54 = vsel %vm1174_vm13, %v5121_v24, %v5125_v49 }
 0x543   : > { %v4596_v48 = vsel %vm10253_vm11, %v4587_v23, %v4595_v5  ;;  %v4597_v58 = vrot.slane %v4595_v5, 4  ;;  %v5987_v13 = vsel %vm1673_vm12, %v5984_v27, %v5986_v63  ;;  %v4403_v23 = vld [vmem:[#allocation3 + $0x180] sm:$0xff]  ;;  %v11580_v5 = vld [vmem:[#allocation2 + $0xc8] sm:$0xff] }
 0x544   : > { %4907 = vst [vmem:[#allocation2 + $0xd4] sm:$0xf] %v4596_v48  ;;  %v4617_v25 = vrot.slane %v4615_v34, 4 }
 0x548   : > { %5491 = vmatmul.bf16.gmra.mxu3 %v9576_v46  ;;  %v4437_v46 = vmax.f32 %v4401_v31, 0.0  ;;  %v5131_v31 = vshll.u32 %v11580_v5, 16 }
 0x549   : > { %5713 = vmatmul.bf16.gmra.mxu0 %v5601_v37  ;;  %5326 = vmatmul.bf16.gmra.mxu2 %v5118_v1  ;;  %v4404_v1 = vld [vmem:[#allocation3 + $0x188] sm:$0xff] }
 0x54a   : > { %v4473_v0 = vpack.c.bf16 %v4437_v46, %v4437_v46  ;;  %v4440_v2 = vmax.f32 %v4404_v1, 0.0 }
 0x54b   : > { %6097 = vmatmul.bf16.gmra.mxu1 %v5985_v44  ;;  %v5127_v44 = vshrl.u32 %v11566_v50, 16 }
 0x54c   : > { %v4599_v57 = vshrl.u32 %v4473_v0, 16  ;;  %v4602_v29 = vshll.u32 %v4473_v0, 16  ;;  %v4476_v46 = vpack.c.bf16 %v4440_v2, %v4440_v2  ;;  %v5604_v0 = vrot.slane %v11580_v5, 1 }
 0x54e   : > { %v4601_v35 = vrot.slane %v4599_v57, 6  ;;  %v4604_v61 = vrot.slane %v4602_v29, 7  ;;  %v4629_v15 = vshrl.u32 %v4476_v46, 16  ;;  %v4632_v11 = vshll.u32 %v4476_v46, 16  ;;  %v9620_v29 = vld [vmem:[#allocation2 + $0xd0] sm:$0xff] }
 0x54f   : > { %v5129_v57 = vor.u32 %v5127_v44, %v5125_v49  ;;  %v5605_v24 = vsel %vm1673_vm12, %v5602_v62, %v5604_v0  ;;  %v5988_v10 = vrot.slane %v9620_v29, 1 }
 0x550   : > { %v4605_v39 = vor.u32 %v4604_v61, %v4601_v35  ;;  %v5133_v35 = vrot.slane %v5131_v31, 1  ;;  %v4631_v43 = vrot.slane %v4629_v15, 6  ;;  %v4634_v6 = vrot.slane %v4632_v11, 7 }
 0x551   : > { %v5989_v62 = vsel %vm1673_vm12, %v5986_v63, %v5988_v10 }
 0x552   : > { %v4607_v22 = vrot.slane %v4605_v39, 4  ;;  %v4606_v37 = vsel %vm10253_vm11, %v4597_v58, %v4605_v39  ;;  %v4635_v20 = vor.u32 %v4634_v6, %v4631_v43 }
 0x553   : > { %4908 = vst [vmem:[#allocation2 + $0xd8] sm:$0xf] %v4606_v37 }
 0x554   : > { %v4616_v17 = vsel %vm10253_vm11, %v4607_v22, %v4615_v34  ;;  %v4405_v22 = vld [vmem:[#allocation3 + $0x190] sm:$0xff]  ;;  %v11593_v34 = vld [vmem:[#allocation2 + $0xd0] sm:$0xff] }
 0x555   : > { %4909 = vst [vmem:[#allocation2 + $0xdc] sm:$0xf] %v4616_v17  ;;  %v5139_v9 = vshll.u32 %v11593_v34, 16  ;;  %v5606_v2 = vrot.slane %v11593_v34, 1 }
 0x557   : > { %v5607_v11 = vsel %vm1673_vm12, %v5604_v0, %v5606_v2 }
 0x558   : > { %5496 = vmatmul.bf16.gmra.mxu3 %v11552_v42  ;;  %v4439_v42 = vmax.f32 %v4403_v23, 0.0 }
 0x559   : > { %5718 = vmatmul.bf16.gmra.mxu0 %v5603_v55  ;;  %5331 = vmatmul.bf16.gmra.mxu2 %v5126_v54  ;;  %v5134_v55 = vsel %vm1174_vm13, %v5129_v57, %v5133_v35  ;;  %v4441_v54 = vmax.f32 %v4405_v22, 0.0  ;;  %v4637_v57 = vrot.slane %v4635_v20, 4 }
 0x55a   : > { %v4475_v48 = vpack.c.bf16 %v4439_v42, %v4439_v42 }
 0x55b   : > { %6102 = vmatmul.bf16.gmra.mxu1 %v5987_v13  ;;  %v4477_v17 = vpack.c.bf16 %v4441_v54, %v4441_v54  ;;  %v5135_v13 = vshrl.u32 %v11580_v5, 16 }
 0x55c   : > { %v4619_v56 = vshrl.u32 %v4475_v48, 16  ;;  %v4622_v12 = vshll.u32 %v4475_v48, 16 }
 0x55d   : > { %v4639_v42 = vshrl.u32 %v4477_v17, 16  ;;  %v4642_v1 = vshll.u32 %v4477_v17, 16  ;;  %v5137_v46 = vor.u32 %v5135_v13, %v5133_v35 }
 0x55e   : > { %v4621_v27 = vrot.slane %v4619_v56, 6  ;;  %v4624_v60 = vrot.slane %v4622_v12, 7  ;;  %v9621_v56 = vld [vmem:[#allocation2 + $0xd8] sm:$0xff]  ;;  %v5141_v12 = vrot.slane %v5139_v9, 1 }
 0x55f   : > { %v4641_v48 = vrot.slane %v4639_v42, 6  ;;  %v4644_v44 = vrot.slane %v4642_v1, 7  ;;  %v5990_v43 = vrot.slane %v9621_v56, 1 }
 0x560   : > { %v4625_v61 = vor.u32 %v4624_v60, %v4621_v27  ;;  %v5142_v6 = vsel %vm1174_vm13, %v5137_v46, %v5141_v12 }
 0x561   : > { %v4645_v27 = vor.u32 %v4644_v44, %v4641_v48  ;;  %v5991_v0 = vsel %vm1673_vm12, %v5988_v10, %v5990_v43 }
 0x562   : > { %v4627_v39 = vrot.slane %v4625_v61, 4  ;;  %v4626_v58 = vsel %vm10253_vm11, %v4617_v25, %v4625_v61  ;;  %v4407_v25 = vld [vmem:[#allocation3 + $0x1a0] sm:$0xff] }
 0x563   : > { %4910 = vst [vmem:[#allocation2 + $0xe0] sm:$0xf] %v4626_v58  ;;  %v4647_v29 = vrot.slane %v4645_v27, 4 }
 0x564   : > { %v4636_v49 = vsel %vm10253_vm11, %v4627_v39, %v4635_v20  ;;  %v11606_v39 = vld [vmem:[#allocation2 + $0xd8] sm:$0xff]  ;;  %v4443_v20 = vmax.f32 %v4407_v25, 0.0 }
 0x565   : > { %4911 = vst [vmem:[#allocation2 + $0xe4] sm:$0xf] %v4636_v49  ;;  %v5147_v22 = vshll.u32 %v11606_v39, 16  ;;  %v5608_v17 = vrot.slane %v11606_v39, 1 }
 0x566   : > { %v4479_v49 = vpack.c.bf16 %v4443_v20, %v4443_v20 }
 0x567   : > { %v5149_v48 = vrot.slane %v5147_v22, 1  ;;  %v5609_v46 = vsel %vm1673_vm12, %v5606_v2, %v5608_v17 }
 0x568   : > { %5501 = vmatmul.bf16.gmra.mxu3 %v11566_v50  ;;  %v4406_v50 = vld [vmem:[#allocation3 + $0x198] sm:$0xff] }
 0x569   : > { %5723 = vmatmul.bf16.gmra.mxu0 %v5605_v24  ;;  %5336 = vmatmul.bf16.gmra.mxu2 %v5134_v55  ;;  %v4442_v37 = vmax.f32 %v4406_v50, 0.0  ;;  %v4646_v24 = vsel %vm10253_vm11, %v4637_v57, %v4645_v27  ;;  %v9646_v55 = vld [vmem:[%s9984_s28 + $0x120] sm:$0xff]  ;;  %v4659_v50 = vshrl.u32 %v4479_v49, 16 }
 0x56a   : > { %4912 = vst [vmem:[#allocation2 + $0xe8] sm:$0xf] %v4646_v24  ;;  %6478 = vmatpush.bf16.msrb.mxu2 %v9646_v55  ;;  %v4410_v24 = vld [vmem:[#allocation3 + $0x1b8] sm:$0xff] }
 0x56b   : > { %6107 = vmatmul.bf16.gmra.mxu1 %v5989_v62  ;;  %v4478_v23 = vpack.c.bf16 %v4442_v37, %v4442_v37  ;;  %v5143_v62 = vshrl.u32 %v11593_v34, 16  ;;  %v4662_v37 = vshll.u32 %v4479_v49, 16  ;;  %v4661_v10 = vrot.slane %v4659_v50, 6 }
 0x56c   : > { %v9622_v1 = vld [vmem:[#allocation2 + $0xe0] sm:$0xff] }
 0x56d   : > { %v4649_v63 = vshrl.u32 %v4478_v23, 16  ;;  %v4652_v31 = vshll.u32 %v4478_v23, 16  ;;  %v4664_v13 = vrot.slane %v4662_v37, 7  ;;  %v5145_v42 = vor.u32 %v5143_v62, %v5141_v12 }
 0x56f   : > { %v4651_v60 = vrot.slane %v4649_v63, 6  ;;  %v4654_v15 = vrot.slane %v4652_v31, 7  ;;  %v4665_v44 = vor.u32 %v4664_v13, %v4661_v10 }
 0x571   : > { %v4655_v61 = vor.u32 %v4654_v15, %v4651_v60  ;;  %v4667_v27 = vrot.slane %v4665_v44, 4  ;;  %v5992_v15 = vrot.slane %v9622_v1, 1 }
 0x573   : > { %v4656_v35 = vsel %vm10253_vm11, %v4647_v29, %v4655_v61  ;;  %v4657_v56 = vrot.slane %v4655_v61, 4  ;;  %v5993_v2 = vsel %vm1673_vm12, %v5990_v43, %v5992_v15  ;;  %v4409_v29 = vld [vmem:[#allocation3 + $0x1b0] sm:$0xff] }
 0x574   : > { %4913 = vst [vmem:[#allocation2 + $0xec] sm:$0xf] %v4656_v35  ;;  %v9582_v61 = vld [vmem:[#allocation2 + $0xe0] sm:$0xff] }
 0x575   : > { %v4666_v57 = vsel %vm10253_vm11, %v4657_v56, %v4665_v44  ;;  %v5155_v25 = vshll.u32 %v9582_v61, 16  ;;  %v4411_v56 = vld [vmem:[#allocation3 + $0x1c0] sm:$0xff] }
 0x576   : > { %4914 = vst [vmem:[#allocation2 + $0xf0] sm:$0xf] %v4666_v57 }
 0x577   : > { %v5157_v37 = vrot.slane %v5155_v25, 1 }
 0x578   : > { %5506 = vmatmul.bf16.gmra.mxu3 %v11580_v5  ;;  %v4408_v5 = vld [vmem:[#allocation3 + $0x1a8] sm:$0xff] }
 0x579   : > { %5728 = vmatmul.bf16.gmra.mxu0 %v5607_v11  ;;  %5341 = vmatmul.bf16.gmra.mxu2 %v5142_v6  ;;  %v4444_v58 = vmax.f32 %v4408_v5, 0.0  ;;  %v5150_v11 = vsel %vm1174_vm13, %v5145_v42, %v5149_v48  ;;  %v4445_v6 = vmax.f32 %v4409_v29, 0.0 }
 0x57b   : > { %6112 = vmatmul.bf16.gmra.mxu1 %v5991_v0  ;;  %v4480_v54 = vpack.c.bf16 %v4444_v58, %v4444_v58  ;;  %v4481_v35 = vpack.c.bf16 %v4445_v6, %v4445_v6  ;;  %v5151_v0 = vshrl.u32 %v11606_v39, 16  ;;  %v5610_v58 = vrot.slane %v9582_v61, 1  ;;  %v9623_v43 = vld [vmem:[#allocation2 + $0xe8] sm:$0xff] }
 0x57d   : > { %v4669_v9 = vshrl.u32 %v4480_v54, 16  ;;  %v4672_v23 = vshll.u32 %v4480_v54, 16  ;;  %v4679_v5 = vshrl.u32 %v4481_v35, 16  ;;  %v4682_v55 = vshll.u32 %v4481_v35, 16 }
 0x57e   : > { %v5153_v50 = vor.u32 %v5151_v0, %v5149_v48 }
 0x57f   : > { %v4671_v63 = vrot.slane %v4669_v9, 6  ;;  %v4674_v31 = vrot.slane %v4672_v23, 7  ;;  %v4681_v49 = vrot.slane %v4679_v5, 6  ;;  %v4684_v62 = vrot.slane %v4682_v55, 7 }
 0x580   : > { %v5611_v23 = vsel %vm1673_vm12, %v5608_v17, %v5610_v58 }
 0x581   : > { %v4675_v60 = vor.u32 %v4674_v31, %v4671_v63  ;;  %v4685_v10 = vor.u32 %v4684_v62, %v4681_v49  ;;  %v5994_v63 = vrot.slane %v9623_v43, 1  ;;  %v5158_v31 = vsel %vm1174_vm13, %v5153_v50, %v5157_v37 }
 0x583   : > { %v4676_v12 = vsel %vm10253_vm11, %v4667_v27, %v4675_v60  ;;  %v4677_v42 = vrot.slane %v4675_v60, 4  ;;  %v4687_v1 = vrot.slane %v4685_v10, 4  ;;  %v5995_v17 = vsel %vm1673_vm12, %v5992_v15, %v5994_v63  ;;  %v11629_v27 = vld [vmem:[#allocation2 + $0xe8] sm:$0xff] }
 0x584   : > { %4915 = vst [vmem:[#allocation2 + $0xf4] sm:$0xf] %v4676_v12  ;;  %v4447_v60 = vmax.f32 %v4411_v56, 0.0  ;;  %v5159_v12 = vshrl.u32 %v9582_v61, 16  ;;  %v5167_v56 = vshrl.u32 %v11629_v27, 16 }
 0x586   : > { %v4483_v57 = vpack.c.bf16 %v4447_v60, %v4447_v60  ;;  %v5161_v5 = vor.u32 %v5159_v12, %v5157_v37 }
 0x588   : > { %5511 = vmatmul.bf16.gmra.mxu3 %v11593_v34  ;;  %v4446_v34 = vmax.f32 %v4410_v24, 0.0  ;;  %v4699_v6 = vshrl.u32 %v4483_v57, 16  ;;  %v4702_v24 = vshll.u32 %v4483_v57, 16 }
 0x589   : > { %5733 = vmatmul.bf16.gmra.mxu0 %v5609_v46  ;;  %5346 = vmatmul.bf16.gmra.mxu2 %v5150_v11  ;;  %v4686_v46 = vsel %vm10253_vm11, %v4677_v42, %v4685_v10  ;;  %v9645_v42 = vld [vmem:[%s9984_s28 + $0x118] sm:$0xff] }
 0x58a   : > { %v4482_v20 = vpack.c.bf16 %v4446_v34, %v4446_v34  ;;  %4916 = vst [vmem:[#allocation2 + $0xf8] sm:$0xf] %v4686_v46  ;;  %v5612_v34 = vrot.slane %v11629_v27, 1  ;;  %v4701_v35 = vrot.slane %v4699_v6, 6  ;;  %v4704_v0 = vrot.slane %v4702_v24, 7  ;;  %6479 = vmatpush.bf16.msrb.mxu2 %v9645_v42  ;;  %v4414_v46 = vld [vmem:[#allocation3 + $0x1d8] sm:$0xff] }
 0x58b   : > { %6117 = vmatmul.bf16.gmra.mxu1 %v5993_v2  ;;  %v5163_v2 = vshll.u32 %v11629_v27, 16  ;;  %v11633_v15 = vld [vmem:[#allocation2 + $0xf0] sm:$0xff]  ;;  %v4416_v42 = vld [vmem:[#allocation3 + $0x1e8] sm:$0xff] }
 0x58c   : > { %v4689_v22 = vshrl.u32 %v4482_v20, 16  ;;  %v4692_v54 = vshll.u32 %v4482_v20, 16  ;;  %v4705_v49 = vor.u32 %v4704_v0, %v4701_v35  ;;  %v5996_v10 = vrot.slane %v11633_v15, 1 }
 0x58d   : > { %v5165_v55 = vrot.slane %v5163_v2, 1 }
 0x58e   : > { %v4691_v13 = vrot.slane %v4689_v22, 6  ;;  %v4694_v9 = vrot.slane %v4692_v54, 7  ;;  %v5613_v54 = vsel %vm1673_vm12, %v5610_v58, %v5612_v34  ;;  %v4707_v43 = vrot.slane %v4705_v49, 4 }
 0x58f   : > { %v5997_v58 = vsel %vm1673_vm12, %v5994_v63, %v5996_v10  ;;  %v5169_v35 = vor.u32 %v5167_v56, %v5165_v55 }
 0x590   : > { %v4695_v44 = vor.u32 %v4694_v9, %v4691_v13  ;;  %v5166_v9 = vsel %vm1174_vm13, %v5161_v5, %v5165_v55 }
 0x592   : > { %v4696_v48 = vsel %vm10253_vm11, %v4687_v1, %v4695_v44  ;;  %v4697_v50 = vrot.slane %v4695_v44, 4  ;;  %v9657_v1 = vld [vmem:[%s9984_s28 + $0x178] sm:$0xff]  ;;  %v11645_v44 = vld [vmem:[#allocation2 + $0xf0] sm:$0xff] }
 0x593   : > { %4917 = vst [vmem:[#allocation2 + $0xfc] sm:$0xf] %v4696_v48  ;;  %6733 = vmatpush.bf16.msrb.mxu3 %v9657_v1  ;;  %v4450_v48 = vmax.f32 %v4414_v46, 0.0  ;;  %v5171_v60 = vshll.u32 %v11645_v44, 16  ;;  %v5614_v63 = vrot.slane %v11645_v44, 1 }
 0x595   : > { %v5173_v0 = vrot.slane %v5171_v60, 1 }
 0x598   : > { %5516 = vmatmul.bf16.gmra.mxu3 %v11606_v39  ;;  %v4412_v39 = vld [vmem:[#allocation3 + $0x1c8] sm:$0xff] }
 0x599   : > { %5738 = vmatmul.bf16.gmra.mxu0 %v5611_v23  ;;  %5351 = vmatmul.bf16.gmra.mxu2 %v5158_v31  ;;  %v4448_v11 = vmax.f32 %v4412_v39, 0.0  ;;  %v4706_v23 = vsel %vm10253_vm11, %v4697_v50, %v4705_v49  ;;  %v4486_v39 = vpack.c.bf16 %v4450_v48, %v4450_v48  ;;  %v5615_v49 = vsel %vm1673_vm12, %v5612_v34, %v5614_v63 }
 0x59a   : > { %4918 = vst [vmem:[#allocation2 + $0x100] sm:$0xf] %v4706_v23  ;;  %v11650_v6 = vld [vmem:[#allocation2 + $0xf8] sm:$0xff] }
 0x59b   : > { %6122 = vmatmul.bf16.gmra.mxu1 %v5995_v17  ;;  %v4484_v29 = vpack.c.bf16 %v4448_v11, %v4448_v11  ;;  %v4732_v24 = vshll.u32 %v4486_v39, 16 }
 0x59d   : > { %v4709_v25 = vshrl.u32 %v4484_v29, 16  ;;  %v4712_v20 = vshll.u32 %v4484_v29, 16  ;;  %v4729_v29 = vshrl.u32 %v4486_v39, 16 }
 0x59f   : > { %v4711_v62 = vrot.slane %v4709_v25, 6  ;;  %v4714_v22 = vrot.slane %v4712_v20, 7  ;;  %v4731_v15 = vrot.slane %v4729_v29, 6  ;;  %v4734_v20 = vrot.slane %v4732_v24, 7 }
 0x5a1   : > { %v4715_v13 = vor.u32 %v4714_v22, %v4711_v62  ;;  %v4735_v50 = vor.u32 %v4734_v20, %v4731_v15 }
 0x5a3   : > { %v4716_v37 = vsel %vm10253_vm11, %v4707_v43, %v4715_v13  ;;  %v4717_v62 = vrot.slane %v4715_v13, 4  ;;  %v5174_v43 = vsel %vm1174_vm13, %v5169_v35, %v5173_v0  ;;  %v4415_v13 = vld [vmem:[#allocation3 + $0x1e0] sm:$0xff] }
 0x5a4   : > { %4919 = vst [vmem:[#allocation2 + $0x104] sm:$0xf] %v4716_v37  ;;  %v11663_v37 = vld [vmem:[#allocation2 + $0xf8] sm:$0xff] }
 0x5a5   : > { %v5179_v56 = vshll.u32 %v11663_v37, 16 }
 0x5a8   : > { %5521 = vmatmul.bf16.gmra.mxu3 %v9582_v61  ;;  %v4413_v61 = vld [vmem:[#allocation3 + $0x1d0] sm:$0xff] }
 0x5a9   : > { %5743 = vmatmul.bf16.gmra.mxu0 %v5613_v54  ;;  %5356 = vmatmul.bf16.gmra.mxu2 %v5166_v9  ;;  %v4449_v31 = vmax.f32 %v4413_v61, 0.0  ;;  %v5998_v54 = vrot.slane %v11650_v6, 1 }
 0x5ab   : > { %6127 = vmatmul.bf16.gmra.mxu1 %v5997_v58  ;;  %v4485_v17 = vpack.c.bf16 %v4449_v31, %v4449_v31  ;;  %v4451_v58 = vmax.f32 %v4415_v13, 0.0  ;;  %v4452_v31 = vmax.f32 %v4416_v42, 0.0  ;;  %v11670_v15 = vld [vmem:[#allocation2 + $0x100] sm:$0xff] }
 0x5ad   : > { %v4719_v11 = vshrl.u32 %v4485_v17, 16  ;;  %v4722_v57 = vshll.u32 %v4485_v17, 16  ;;  %v4487_v46 = vpack.c.bf16 %v4451_v58, %v4451_v58  ;;  %v5175_v17 = vshrl.u32 %v11645_v44, 16 }
 0x5ae   : > { %v4488_v60 = vpack.c.bf16 %v4452_v31, %v4452_v31 }
 0x5af   : > { %v4721_v12 = vrot.slane %v4719_v11, 6  ;;  %v4724_v2 = vrot.slane %v4722_v57, 7  ;;  %v4739_v39 = vshrl.u32 %v4487_v46, 16  ;;  %v4742_v11 = vshll.u32 %v4487_v46, 16 }
 0x5b0   : > { %v4749_v24 = vshrl.u32 %v4488_v60, 16  ;;  %v4752_v20 = vshll.u32 %v4488_v60, 16  ;;  %v4418_v60 = vld [vmem:[#allocation3 + $0x1f8] sm:$0xff] }
 0x5b1   : > { %v4725_v25 = vor.u32 %v4724_v2, %v4721_v12  ;;  %v5616_v12 = vrot.slane %v11663_v37, 1  ;;  %v4741_v2 = vrot.slane %v4739_v39, 6  ;;  %v4744_v29 = vrot.slane %v4742_v11, 7 }
 0x5b3   : > { %v4727_v22 = vrot.slane %v4725_v25, 4  ;;  %v4726_v9 = vsel %vm10253_vm11, %v4717_v62, %v4725_v25  ;;  %v5181_v62 = vrot.slane %v5179_v56, 1 }
 0x5b4   : > { %4920 = vst [vmem:[#allocation2 + $0x108] sm:$0xf] %v4726_v9  ;;  %v4754_v9 = vrot.slane %v4752_v20, 7 }
 0x5b5   : > { %v4736_v55 = vsel %vm10253_vm11, %v4727_v22, %v4735_v50  ;;  %v4745_v22 = vor.u32 %v4744_v29, %v4741_v2  ;;  %v5183_v29 = vshrl.u32 %v11663_v37, 16 }
 0x5b6   : > { %v5709_v5 = vpop.f32.mrf.mxu0  ;;  %4921 = vst [vmem:[#allocation2 + $0x10c] sm:$0xf] %v4736_v55 }
 0x5b7   : > { %v4747_v13 = vrot.slane %v4745_v22, 4 }
 0x5b8   : > { %5526 = vmatmul.bf16.gmra.mxu3 %v11629_v27  ;;  %v6093_v34 = vpop.f32.mrf.mxu1  ;;  %v5999_v27 = vsel %vm1673_vm12, %v5996_v10, %v5998_v54 }
 0x5b9   : > { %5748 = vmatmul.bf16.gmra.mxu0 %v5615_v49  ;;  %5361 = vmatmul.bf16.gmra.mxu2 %v5174_v43  ;;  %v5177_v49 = vor.u32 %v5175_v17, %v5173_v0  ;;  %v4751_v43 = vrot.slane %v4749_v24, 6  ;;  %v4417_v17 = vld [vmem:[#allocation3 + $0x1f0] sm:$0xff]  ;;  %v9644_v24 = vld [vmem:[%s9984_s28 + $0x110] sm:$0xff] }
 0x5ba   : > { %v4453_v56 = vmax.f32 %v4417_v17, 0.0  ;;  %6480 = vmatpush.bf16.msrb.mxu2 %v9644_v24 }
 0x5bb   : > { %v5487_v23 = vpop.f32.mrf.mxu3  ;;  %6132 = vmatmul.bf16.gmra.mxu1 %v5999_v27  ;;  %v4737_v27 = vrot.slane %v4735_v50, 4  ;;  %v4755_v42 = vor.u32 %v4754_v9, %v4751_v43  ;;  %v5182_v0 = vsel %vm1174_vm13, %v5177_v49, %v5181_v62 }
 0x5bc   : > { %v5322_v1 = vpop.f32.mrf.mxu2 }
 0x5bd   : > { %v5488_v48 = vadd.f32 %v5487_v23, %v5322_v1  ;;  %v4746_v1 = vsel %vm10253_vm11, %v4737_v27, %v4745_v22  ;;  %v4756_v46 = vsel %vm10253_vm11, %v4747_v13, %v4755_v42  ;;  %v9656_v22 = vld [vmem:[%s9984_s28 + $0x170] sm:$0xff] }
 0x5be   : > { %v5711_v61 = vpop.f32.mrf.mxu0  ;;  %4922 = vst [vmem:[#allocation2 + $0x110] sm:$0xf] %v4746_v1  ;;  %6734 = vmatpush.bf16.msrb.mxu3 %v9656_v22 }
 0x5bf   : > { %v5799_v57 = vadd.f32 %v5709_v5, %v5488_v48  ;;  %v5617_v5 = vsel %vm1673_vm12, %v5614_v63, %v5616_v12  ;;  %4923 = vst [vmem:[#allocation2 + $0x114] sm:$0xf] %v4756_v46 }
 0x5c0   : > { %v6095_v25 = vpop.f32.mrf.mxu1 }
 0x5c1   : > { %v11668_v35 = vadd.f32 %v6093_v34, %v5799_v57  ;;  %v6000_v34 = vrot.slane %v11670_v15, 1  ;;  %v4454_v57 = vmax.f32 %v4418_v60, 0.0 }
 0x5c3   : > { %v5489_v10 = vpop.f32.mrf.mxu3  ;;  %v6001_v48 = vsel %vm1673_vm12, %v5998_v54, %v6000_v34  ;;  %v4490_v6 = vpack.c.bf16 %v4454_v57, %v4454_v57 }
 0x5c4   : > { %v5324_v55 = vpop.f32.mrf.mxu2 }
 0x5c5   : > { %v5490_v58 = vadd.f32 %v5489_v10, %v5324_v55  ;;  %v4489_v10 = vpack.c.bf16 %v4453_v56, %v4453_v56  ;;  %v4769_v27 = vshrl.u32 %v4490_v6, 16  ;;  %v4772_v1 = vshll.u32 %v4490_v6, 16 }
 0x5c6   : > { %v5714_v23 = vpop.f32.mrf.mxu0 }
 0x5c7   : > { %v5800_v31 = vadd.f32 %v5711_v61, %v5490_v58  ;;  %v11689_v61 = vld [vmem:[#allocation2 + $0x100] sm:$0xff]  ;;  %v4759_v20 = vshrl.u32 %v4489_v10, 16  ;;  %v4762_v54 = vshll.u32 %v4489_v10, 16 }
 0x5c8   : > { %5531 = vmatmul.bf16.gmra.mxu3 %v11645_v44  ;;  %v6098_v44 = vpop.f32.mrf.mxu1  ;;  %v5618_v9 = vrot.slane %v11689_v61, 1 }
 0x5c9   : > { %5753 = vmatmul.bf16.gmra.mxu0 %v5617_v5  ;;  %v11682_v50 = vadd.f32 %v6095_v25, %v5800_v31  ;;  %5366 = vmatmul.bf16.gmra.mxu2 %v5182_v0  ;;  %v5187_v25 = vshll.u32 %v11689_v61, 16  ;;  %v4761_v55 = vrot.slane %v4759_v20, 6  ;;  %v4764_v5 = vrot.slane %v4762_v54, 7  ;;  %v11698_v0 = vld [vmem:[#allocation2 + $0x108] sm:$0xff]  ;;  %v4419_v20 = vld [vmem:[#allocation3 + $0x200] sm:$0xff] }
 0x5ca   : > { %v5185_v31 = vor.u32 %v5183_v29, %v5181_v62  ;;  %v5619_v60 = vsel %vm1673_vm12, %v5616_v12, %v5618_v9  ;;  %v6002_v10 = vrot.slane %v11698_v0, 1  ;;  %v11719_v54 = vld [vmem:[#allocation2 + $0x108] sm:$0xff] }
 0x5cb   : > { %v5492_v63 = vpop.f32.mrf.mxu3  ;;  %6137 = vmatmul.bf16.gmra.mxu1 %v6001_v48  ;;  %v5189_v46 = vrot.slane %v5187_v25, 1  ;;  %v4771_v48 = vrot.slane %v4769_v27, 6 }
 0x5cc   : > { %v5327_v39 = vpop.f32.mrf.mxu2  ;;  %v6003_v6 = vsel %vm1673_vm12, %v6000_v34, %v6002_v10 }
 0x5cd   : > { %v5493_v2 = vadd.f32 %v5492_v63, %v5327_v39  ;;  %v4765_v63 = vor.u32 %v4764_v5, %v4761_v55 }
 0x5ce   : > { %v5716_v11 = vpop.f32.mrf.mxu0 }
 0x5cf   : > { %v5801_v49 = vadd.f32 %v5714_v23, %v5493_v2  ;;  %v4774_v23 = vrot.slane %v4772_v1, 7  ;;  %v4767_v39 = vrot.slane %v4765_v63, 4  ;;  %v5190_v2 = vsel %vm1174_vm13, %v5185_v31, %v5189_v46 }
 0x5d0   : > { %v6100_v58 = vpop.f32.mrf.mxu1  ;;  %v5195_v1 = vshll.u32 %v11719_v54, 16 }
 0x5d1   : > { %v11696_v13 = vadd.f32 %v6098_v44, %v5801_v49  ;;  %v4757_v44 = vrot.slane %v4755_v42, 4  ;;  %v4775_v62 = vor.u32 %v4774_v23, %v4771_v48  ;;  %v4420_v49 = vld [vmem:[#allocation3 + $0x208] sm:$0xff]  ;;  %v5620_v23 = vrot.slane %v11719_v54, 1 }
 0x5d2   : > { %v4456_v55 = vmax.f32 %v4420_v49, 0.0 }
 0x5d3   : > { %v5494_v43 = vpop.f32.mrf.mxu3  ;;  %v4766_v29 = vsel %vm10253_vm11, %v4757_v44, %v4765_v63  ;;  %v4776_v25 = vsel %vm10253_vm11, %v4767_v39, %v4775_v62 }
 0x5d4   : > { %v5329_v17 = vpop.f32.mrf.mxu2  ;;  %4924 = vst [vmem:[#allocation2 + $0x118] sm:$0xf] %v4766_v29  ;;  %v4492_v31 = vpack.c.bf16 %v4456_v55, %v4456_v55 }
 0x5d5   : > { %v5495_v57 = vadd.f32 %v5494_v43, %v5329_v17  ;;  %4925 = vst [vmem:[#allocation2 + $0x11c] sm:$0xf] %v4776_v25  ;;  %v5197_v25 = vrot.slane %v5195_v1, 1 }
 0x5d6   : > { %v5719_v56 = vpop.f32.mrf.mxu0  ;;  %v4789_v44 = vshrl.u32 %v4492_v31, 16  ;;  %v4792_v29 = vshll.u32 %v4492_v31, 16 }
 0x5d7   : > { %v5802_v24 = vadd.f32 %v5716_v11, %v5495_v57  ;;  %v4455_v11 = vmax.f32 %v4419_v20, 0.0 }
 0x5d8   : > { %5536 = vmatmul.bf16.gmra.mxu3 %v11663_v37  ;;  %v6103_v37 = vpop.f32.mrf.mxu1  ;;  %v4794_v20 = vrot.slane %v4792_v29, 7 }
 0x5d9   : > { %5758 = vmatmul.bf16.gmra.mxu0 %v5619_v60  ;;  %v11712_v42 = vadd.f32 %v6100_v58, %v5802_v24  ;;  %5371 = vmatmul.bf16.gmra.mxu2 %v5190_v2  ;;  %v4491_v5 = vpack.c.bf16 %v4455_v11, %v4455_v11  ;;  %v5191_v58 = vshrl.u32 %v11689_v61, 16  ;;  %v11726_v2 = vld [vmem:[#allocation2 + $0x110] sm:$0xff] }
 0x5db   : > { %v5497_v12 = vpop.f32.mrf.mxu3  ;;  %6142 = vmatmul.bf16.gmra.mxu1 %v6003_v6  ;;  %v4779_v63 = vshrl.u32 %v4491_v5, 16  ;;  %v4782_v15 = vshll.u32 %v4491_v5, 16  ;;  %v5193_v24 = vor.u32 %v5191_v58, %v5189_v46  ;;  %v4791_v6 = vrot.slane %v4789_v44, 6 }
 0x5dc   : > { %v5332_v22 = vpop.f32.mrf.mxu2  ;;  %v6004_v5 = vrot.slane %v11726_v2, 1 }
 0x5dd   : > { %v5498_v27 = vadd.f32 %v5497_v12, %v5332_v22  ;;  %v4781_v17 = vrot.slane %v4779_v63, 6  ;;  %v4784_v60 = vrot.slane %v4782_v15, 7  ;;  %v4777_v22 = vrot.slane %v4775_v62, 4  ;;  %v4421_v15 = vld [vmem:[#allocation3 + $0x210] sm:$0xff] }
 0x5de   : > { %v5721_v43 = vpop.f32.mrf.mxu0  ;;  %v4795_v46 = vor.u32 %v4794_v20, %v4791_v6  ;;  %v6005_v63 = vsel %vm1673_vm12, %v6002_v10, %v6004_v5 }
 0x5df   : > { %v5803_v48 = vadd.f32 %v5719_v56, %v5498_v27  ;;  %v4785_v12 = vor.u32 %v4784_v60, %v4781_v17  ;;  %v5621_v56 = vsel %vm1673_vm12, %v5618_v9, %v5620_v23  ;;  %v5198_v27 = vsel %vm1174_vm13, %v5193_v24, %v5197_v25 }
 0x5e0   : > { %v6105_v57 = vpop.f32.mrf.mxu1  ;;  %v5199_v24 = vshrl.u32 %v11719_v54, 16 }
 0x5e1   : > { %v11724_v39 = vadd.f32 %v6103_v37, %v5803_v48  ;;  %v4787_v37 = vrot.slane %v4785_v12, 4  ;;  %v4786_v58 = vsel %vm10253_vm11, %v4777_v22, %v4785_v12  ;;  %v11747_v48 = vld [vmem:[#allocation2 + $0x110] sm:$0xff] }
 0x5e2   : > { %4926 = vst [vmem:[#allocation2 + $0x120] sm:$0xf] %v4786_v58  ;;  %v5203_v12 = vshll.u32 %v11747_v48, 16 }
 0x5e3   : > { %v5499_v34 = vpop.f32.mrf.mxu3  ;;  %v4796_v31 = vsel %vm10253_vm11, %v4787_v37, %v4795_v46 }
 0x5e4   : > { %v5334_v11 = vpop.f32.mrf.mxu2  ;;  %4927 = vst [vmem:[#allocation2 + $0x124] sm:$0xf] %v4796_v31  ;;  %v9643_v31 = vld [vmem:[%s9984_s28 + $0x108] sm:$0xff] }
 0x5e5   : > { %v5500_v55 = vadd.f32 %v5499_v34, %v5334_v11  ;;  %v4422_v34 = vld [vmem:[#allocation3 + $0x218] sm:$0xff]  ;;  %6481 = vmatpush.bf16.msrb.mxu2 %v9643_v31  ;;  %v4424_v31 = vld [vmem:[#allocation3 + $0x228] sm:$0xff] }
 0x5e6   : > { %v5724_v49 = vpop.f32.mrf.mxu0  ;;  %v4458_v44 = vmax.f32 %v4422_v34, 0.0 }
 0x5e7   : > { %v5804_v1 = vadd.f32 %v5721_v43, %v5500_v55  ;;  %v4457_v43 = vmax.f32 %v4421_v15, 0.0  ;;  %v5201_v15 = vor.u32 %v5199_v24, %v5197_v25 }
 0x5e8   : > { %5541 = vmatmul.bf16.gmra.mxu3 %v11689_v61  ;;  %v6108_v61 = vpop.f32.mrf.mxu1  ;;  %v4494_v0 = vpack.c.bf16 %v4458_v44, %v4458_v44 }
 0x5e9   : > { %5763 = vmatmul.bf16.gmra.mxu0 %v5621_v56  ;;  %v11740_v62 = vadd.f32 %v6105_v57, %v5804_v1  ;;  %5376 = vmatmul.bf16.gmra.mxu2 %v5198_v27  ;;  %v4493_v29 = vpack.c.bf16 %v4457_v43, %v4457_v43  ;;  %v5622_v56 = vrot.slane %v11747_v48, 1  ;;  %v11754_v1 = vld [vmem:[#allocation2 + $0x118] sm:$0xff]  ;;  %v5205_v43 = vrot.slane %v5203_v12, 1 }
 0x5ea   : > { %v4809_v55 = vshrl.u32 %v4494_v0, 16  ;;  %v6006_v25 = vrot.slane %v11754_v1, 1 }
 0x5eb   : > { %v5502_v9 = vpop.f32.mrf.mxu3  ;;  %6147 = vmatmul.bf16.gmra.mxu1 %v6005_v63  ;;  %v4799_v6 = vshrl.u32 %v4493_v29, 16  ;;  %v4802_v10 = vshll.u32 %v4493_v29, 16  ;;  %v4812_v63 = vshll.u32 %v4494_v0, 16  ;;  %v5206_v12 = vsel %vm1174_vm13, %v5201_v15, %v5205_v43 }
 0x5ec   : > { %v5337_v17 = vpop.f32.mrf.mxu2  ;;  %v4460_v15 = vmax.f32 %v4424_v31, 0.0 }
 0x5ed   : > { %v5503_v57 = vadd.f32 %v5502_v9, %v5337_v17  ;;  %v4801_v22 = vrot.slane %v4799_v6, 6  ;;  %v4804_v37 = vrot.slane %v4802_v10, 7  ;;  %v9655_v9 = vld [vmem:[%s9984_s28 + $0x168] sm:$0xff]  ;;  %v4811_v17 = vrot.slane %v4809_v55, 6  ;;  %v11777_v55 = vld [vmem:[#allocation2 + $0x118] sm:$0xff] }
 0x5ee   : > { %v5726_v60 = vpop.f32.mrf.mxu0  ;;  %6735 = vmatpush.bf16.msrb.mxu3 %v9655_v9 }
 0x5ef   : > { %v5805_v20 = vadd.f32 %v5724_v49, %v5503_v57  ;;  %v4805_v34 = vor.u32 %v4804_v37, %v4801_v22  ;;  %v4814_v49 = vrot.slane %v4812_v63, 7  ;;  %v4797_v57 = vrot.slane %v4795_v46, 4  ;;  %v4423_v37 = vld [vmem:[#allocation3 + $0x220] sm:$0xff] }
 0x5f0   : > { %v6110_v58 = vpop.f32.mrf.mxu1 }
 0x5f1   : > { %v11752_v27 = vadd.f32 %v6108_v61, %v5805_v20  ;;  %v5623_v61 = vsel %vm1673_vm12, %v5620_v23, %v5622_v56  ;;  %v4807_v6 = vrot.slane %v4805_v34, 4  ;;  %v4815_v24 = vor.u32 %v4814_v49, %v4811_v17 }
 0x5f2   : > { %v4806_v0 = vsel %vm10253_vm11, %v4797_v57, %v4805_v34  ;;  %v5207_v17 = vshrl.u32 %v11747_v48, 16  ;;  %v5211_v49 = vshll.u32 %v11777_v55, 16 }
 0x5f3   : > { %v5504_v11 = vpop.f32.mrf.mxu3  ;;  %v4816_v22 = vsel %vm10253_vm11, %v4807_v6, %v4815_v24  ;;  %4928 = vst [vmem:[#allocation2 + $0x128] sm:$0xf] %v4806_v0  ;;  %v5624_v6 = vrot.slane %v11777_v55, 1 }
 0x5f4   : > { %v5339_v44 = vpop.f32.mrf.mxu2  ;;  %4929 = vst [vmem:[#allocation2 + $0x12c] sm:$0xf] %v4816_v22 }
 0x5f5   : > { %v5505_v10 = vadd.f32 %v5504_v11, %v5339_v44  ;;  %v6007_v11 = vsel %vm1673_vm12, %v6004_v5, %v6006_v25  ;;  %v4496_v44 = vpack.c.bf16 %v4460_v15, %v4460_v15 }
 0x5f6   : > { %v5729_v29 = vpop.f32.mrf.mxu0 }
 0x5f7   : > { %v5806_v20 = vadd.f32 %v5726_v60, %v5505_v10  ;;  %v4459_v60 = vmax.f32 %v4423_v37, 0.0  ;;  %v4829_v0 = vshrl.u32 %v4496_v44, 16  ;;  %v5209_v37 = vor.u32 %v5207_v17, %v5205_v43 }
 0x5f8   : > { %5546 = vmatmul.bf16.gmra.mxu3 %v11719_v54  ;;  %v6113_v54 = vpop.f32.mrf.mxu1 }
 0x5f9   : > { %5768 = vmatmul.bf16.gmra.mxu0 %v5623_v61  ;;  %v11770_v46 = vadd.f32 %v6110_v58, %v5806_v20  ;;  %5381 = vmatmul.bf16.gmra.mxu2 %v5206_v12  ;;  %v4495_v34 = vpack.c.bf16 %v4459_v60, %v4459_v60  ;;  %v5213_v60 = vrot.slane %v5211_v49, 1 }
 0x5fb   : > { %v5507_v23 = vpop.f32.mrf.mxu3  ;;  %6152 = vmatmul.bf16.gmra.mxu1 %v6007_v11  ;;  %v4819_v61 = vshrl.u32 %v4495_v34, 16  ;;  %v4822_v2 = vshll.u32 %v4495_v34, 16  ;;  %v11784_v11 = vld [vmem:[#allocation2 + $0x120] sm:$0xff]  ;;  %v5214_v17 = vsel %vm1174_vm13, %v5209_v37, %v5213_v60 }
 0x5fc   : > { %v5342_v9 = vpop.f32.mrf.mxu2 }
 0x5fd   : > { %v5508_v58 = vadd.f32 %v5507_v23, %v5342_v9  ;;  %v4821_v10 = vrot.slane %v4819_v61, 6  ;;  %v4824_v12 = vrot.slane %v4822_v2, 7  ;;  %v4832_v23 = vshll.u32 %v4496_v44, 16 }
 0x5fe   : > { %v5731_v63 = vpop.f32.mrf.mxu0  ;;  %v4831_v9 = vrot.slane %v4829_v0, 6  ;;  %v12593_v44 = vrot.slane %v11784_v11, 1 }
 0x5ff   : > { %v5807_v57 = vadd.f32 %v5729_v29, %v5508_v58  ;;  %v4825_v31 = vor.u32 %v4824_v12, %v4821_v10  ;;  %v4834_v15 = vrot.slane %v4832_v23, 7  ;;  %v5625_v29 = vsel %vm1673_vm12, %v5622_v56, %v5624_v6  ;;  %v11805_v10 = vld [vmem:[#allocation2 + $0x120] sm:$0xff]  ;;  %v4426_v12 = vld [vmem:[#allocation3 + $0x238] sm:$0xff] }
 0x600   : > { %v6115_v22 = vpop.f32.mrf.mxu1  ;;  %v4817_v58 = vrot.slane %v4815_v24, 4  ;;  %v4462_v37 = vmax.f32 %v4426_v12, 0.0 }
 0x601   : > { %v11782_v20 = vadd.f32 %v6113_v54, %v5807_v57  ;;  %v4827_v54 = vrot.slane %v4825_v31, 4  ;;  %v4835_v43 = vor.u32 %v4834_v15, %v4831_v9  ;;  %v5215_v9 = vshrl.u32 %v11777_v55, 16 }
 0x602   : > { %v4826_v49 = vsel %vm10253_vm11, %v4817_v58, %v4825_v31  ;;  %v5219_v15 = vshll.u32 %v11805_v10, 16 }
 0x603   : > { %v5509_v5 = vpop.f32.mrf.mxu3  ;;  %v4836_v57 = vsel %vm10253_vm11, %v4827_v54, %v4835_v43  ;;  %4930 = vst [vmem:[#allocation2 + $0x130] sm:$0xf] %v4826_v49 }
 0x604   : > { %v5344_v4 = vpop.f32.mrf.mxu2  ;;  %4931 = vst [vmem:[#allocation2 + $0x134] sm:$0xf] %v4836_v57  ;;  %v5221_v12 = vrot.slane %v5219_v15, 1 }
 0x605   : > { %v5510_v61 = vadd.f32 %v5509_v5, %v5344_v4  ;;  %v4425_v5 = vld [vmem:[#allocation3 + $0x230] sm:$0xff] }
 0x606   : > { %v5734_v34 = vpop.f32.mrf.mxu0 }
 0x607   : > { %v5808_v2 = vadd.f32 %v5731_v63, %v5510_v61  ;;  %v4461_v63 = vmax.f32 %v4425_v5, 0.0  ;;  %v5626_v61 = vrot.slane %v11805_v10, 1  ;;  %v11812_v5 = vld [vmem:[#allocation2 + $0x128] sm:$0xff] }
 0x608   : > { %5551 = vmatmul.bf16.gmra.mxu3 %v11747_v48  ;;  %v6118_v4 = vpop.f32.mrf.mxu1  ;;  %v6009_v48 = vsel %vm1673_vm12, %v6006_v25, %v12593_v44 }
 0x609   : > { %5773 = vmatmul.bf16.gmra.mxu0 %v5625_v29  ;;  %v11798_v24 = vadd.f32 %v6115_v22, %v5808_v2  ;;  %5386 = vmatmul.bf16.gmra.mxu2 %v5214_v17  ;;  %v4497_v31 = vpack.c.bf16 %v4461_v63, %v4461_v63  ;;  %v4498_v29 = vpack.c.bf16 %v4462_v37, %v4462_v37 }
 0x60a   : > { %v5217_v63 = vor.u32 %v5215_v9, %v5213_v60 }
 0x60b   : > { %v5512_v56 = vpop.f32.mrf.mxu3  ;;  %6157 = vmatmul.bf16.gmra.mxu1 %v6009_v48  ;;  %v4839_v58 = vshrl.u32 %v4497_v31, 16  ;;  %v4842_v1 = vshll.u32 %v4497_v31, 16  ;;  %v4849_v2 = vshrl.u32 %v4498_v29, 16 }
 0x60c   : > { %v5347_v0 = vpop.f32.mrf.mxu2  ;;  %v5222_v9 = vsel %vm1174_vm13, %v5217_v63, %v5221_v12  ;;  %v5223_v63 = vshrl.u32 %v11805_v10, 16 }
 0x60d   : > { %v5513_v22 = vadd.f32 %v5512_v56, %v5347_v0  ;;  %v4841_v17 = vrot.slane %v4839_v58, 6  ;;  %v4844_v49 = vrot.slane %v4842_v1, 7  ;;  %v4852_v56 = vshll.u32 %v4498_v29, 16  ;;  %v9642_v29 = vld [vmem:[%s9984_s28 + $0x100] sm:$0xff] }
 0x60e   : > { %v5736_v23 = vpop.f32.mrf.mxu0  ;;  %v4851_v37 = vrot.slane %v4849_v2, 6  ;;  %v4837_v58 = vrot.slane %v4835_v43, 4  ;;  %6482 = vmatpush.bf16.msrb.mxu2 %v9642_v29 }
 0x60f   : > { %v5809_v54 = vadd.f32 %v5734_v34, %v5513_v22  ;;  %v4845_v0 = vor.u32 %v4844_v49, %v4841_v17  ;;  %v4854_v44 = vrot.slane %v4852_v56, 7  ;;  %v5627_v22 = vsel %vm1673_vm12, %v5624_v6, %v5626_v61  ;;  %v9654_v49 = vld [vmem:[%s9984_s28 + $0x160] sm:$0xff] }
 0x610   : > { %v6120_v48 = vpop.f32.mrf.mxu1  ;;  %6736 = vmatpush.bf16.msrb.mxu3 %v9654_v49 }
 0x611   : > { %v11810_v57 = vadd.f32 %v6118_v4, %v5809_v54  ;;  %v4847_v4 = vrot.slane %v4845_v0, 4  ;;  %v6010_v54 = vrot.slane %v11812_v5, 1  ;;  %v4855_v60 = vor.u32 %v4854_v44, %v4851_v37  ;;  %v11831_v5 = vld [vmem:[#allocation2 + $0x128] sm:$0xff] }
 0x612   : > { %v4846_v15 = vsel %vm10253_vm11, %v4837_v58, %v4845_v0  ;;  %v12697_v44 = vrot.slane %v11784_v11, 1  ;;  %v5227_v0 = vshll.u32 %v11831_v5, 16  ;;  %v11838_v58 = vld [vmem:[#allocation2 + $0x130] sm:$0xff] }
 0x613   : > { %v5514_v25 = vpop.f32.mrf.mxu3  ;;  %v4856_v6 = vsel %vm10253_vm11, %v4847_v4, %v4855_v60  ;;  %4932 = vst [vmem:[#allocation2 + $0x138] sm:$0xf] %v4846_v15  ;;  %v4857_v4 = vrot.slane %v4855_v60, 4  ;;  %v4934_v15 = vld [vmem:[#allocation2 + $0x140] sm:$0x3] }
 0x614   : > { %v5349_v34 = vpop.f32.mrf.mxu2  ;;  %4933 = vst [vmem:[#allocation2 + $0x13c] sm:$0xf] %v4856_v6  ;;  %v6011_v2 = vsel %vm1673_vm12, %v12697_v44, %v6010_v54  ;;  %v5229_v29 = vrot.slane %v5227_v0, 1 }
 0x615   : > { %v5515_v1 = vadd.f32 %v5514_v25, %v5349_v34  ;;  %v5628_v34 = vrot.slane %v11831_v5, 1  ;;  %v4935_v49 = vsel %vm10589_vm15, %v4857_v4, %v4934_v15  ;;  %v5231_v15 = vshrl.u32 %v11831_v5, 16 }
 0x616   : > { %v5739_v31 = vpop.f32.mrf.mxu0  ;;  %4936 = vst [vmem:[#allocation2 + $0x140] sm:$0x3] %v4935_v49  ;;  %v9679_v49 = vld [vmem:[%s9984_s28 + $0x1a0] sm:$0xff] }
 0x617   : > { %v5810_v17 = vadd.f32 %v5736_v23, %v5515_v1  ;;  %v5225_v1 = vor.u32 %v5223_v63, %v5221_v12  ;;  %v6012_v12 = vrot.slane %v11838_v58, 1 }
 0x618   : > { %5556 = vmatmul.bf16.gmra.mxu3 %v11777_v55  ;;  %v6123_v25 = vpop.f32.mrf.mxu1 }
 0x619   : > { %5778 = vmatmul.bf16.gmra.mxu0 %v5627_v22  ;;  %v11826_v55 = vadd.f32 %v6120_v48, %v5810_v17  ;;  %5391 = vmatmul.bf16.gmra.mxu2 %v5222_v9  ;;  %v9682_v9 = vld [vmem:[%s9984_s28 + $0x1b8] sm:$0xff]  ;;  %v5230_v60 = vsel %vm1174_vm13, %v5225_v1, %v5229_v29 }
 0x61a   : > { %7117 = vmatpush.bf16.msra.mxu0 %v9682_v9 }
 0x61b   : > { %v5517_v43 = vpop.f32.mrf.mxu3  ;;  %6162 = vmatmul.bf16.gmra.mxu1 %v6011_v2  ;;  %v9681_v2 = vld [vmem:[%s9984_s28 + $0x1b0] sm:$0xff] }
 0x61c   : > { %v5352_v23 = vpop.f32.mrf.mxu2 }
 0x61d   : > { %v5518_v21 = vadd.f32 %v5517_v43, %v5352_v23  ;;  %v5629_v43 = vsel %vm1673_vm12, %v5626_v61, %v5628_v34  ;;  %v9689_v61 = vld [vmem:[%s9984_s28 + $0x1f0] sm:$0xff] }
 0x61e   : > { %v5741_v56 = vpop.f32.mrf.mxu0  ;;  %7118 = vmatpush.bf16.msra.mxu0 %v9681_v2 }
 0x61f   : > { %v5811_v48 = vadd.f32 %v5739_v31, %v5518_v21 }
 0x620   : > { %v6125_v22 = vpop.f32.mrf.mxu1 }
 0x621   : > { %v11836_v11 = vadd.f32 %v6123_v25, %v5811_v48  ;;  %v9690_v25 = vld [vmem:[%s9984_s28 + $0x1f8] sm:$0xff]  ;;  %v11857_v48 = vld [vmem:[#allocation2 + $0x130] sm:$0xff] }
 0x622   : > { %7508 = vmatpush.bf16.msra.mxu1 %v9690_v25  ;;  %v5235_v17 = vshll.u32 %v11857_v48, 16  ;;  %v12595_v25 = vrot.slane %v11857_v48, 1  ;;  %v5239_v58 = vshrl.u32 %v11857_v48, 16 }
 0x623   : > { %v5519_v37 = vpop.f32.mrf.mxu3 }
 0x624   : > { %v5354_v6 = vpop.f32.mrf.mxu2 }
 0x625   : > { %v5520_v44 = vadd.f32 %v5519_v37, %v5354_v6  ;;  %v9653_v37 = vld [vmem:[%s9984_s28 + $0x158] sm:$0xff] }
 0x626   : > { %v5744_v31 = vpop.f32.mrf.mxu0  ;;  %7509 = vmatpush.bf16.msra.mxu1 %v9689_v61  ;;  %6737 = vmatpush.bf16.msrb.mxu3 %v9653_v37  ;;  %v5237_v61 = vrot.slane %v5235_v17, 1  ;;  %v9678_v37 = vld [vmem:[%s9984_s28 + $0x198] sm:$0xff] }
 0x627   : > { %v5812_v23 = vadd.f32 %v5741_v56, %v5520_v44  ;;  %v9680_v56 = vld [vmem:[%s9984_s28 + $0x1a8] sm:$0xff]  ;;  %v9687_v44 = vld [vmem:[%s9984_s28 + $0x1e0] sm:$0xff] }
 0x628   : > { %5561 = vmatmul.bf16.gmra.mxu3 %v11805_v10  ;;  %v6128_v0 = vpop.f32.mrf.mxu1  ;;  %v6013_v10 = vsel %vm1673_vm12, %v6010_v54, %v6012_v12  ;;  %7119 = vmatpush.bf16.msra.mxu0 %v9680_v56  ;;  %v9652_v54 = vld [vmem:[%s9984_s28 + $0x150] sm:$0xff] }
 0x629   : > { %5783 = vmatmul.bf16.gmra.mxu0 %v5629_v43  ;;  %v11852_v63 = vadd.f32 %v6125_v22, %v5812_v23  ;;  %5396 = vmatmul.bf16.gmra.mxu2 %v5230_v60  ;;  %v9688_v22 = vld [vmem:[%s9984_s28 + $0x1e8] sm:$0xff]  ;;  %v11870_v23 = vld [vmem:[#allocation2 + $0x138] sm:$0xff] }
 0x62a   : > { %7510 = vmatpush.bf16.msra.mxu1 %v9688_v22  ;;  %6738 = vmatpush.bf16.msrb.mxu3 %v9652_v54  ;;  %v9686_v22 = vld [vmem:[%s9984_s28 + $0x1d8] sm:$0xff]  ;;  %v9650_v54 = vld [vmem:[%s9984_s28 + $0x140] sm:$0xff] }
 0x62b   : > { %v5522_v21 = vpop.f32.mrf.mxu3  ;;  %6167 = vmatmul.bf16.gmra.mxu1 %v6013_v10  ;;  %v9651_v10 = vld [vmem:[%s9984_s28 + $0x148] sm:$0xff] }
 0x62c   : > { %v5357_v4 = vpop.f32.mrf.mxu2  ;;  %7120 = vmatpush.bf16.msra.mxu0 %v9679_v49  ;;  %v9677_v49 = vld [vmem:[%s9984_s28 + $0x190] sm:$0xff] }
 0x62d   : > { %v5523_v9 = vadd.f32 %v5522_v21, %v5357_v4  ;;  %v5233_v21 = vor.u32 %v5231_v15, %v5229_v29  ;;  %v12594_v29 = vrot.slane %v11870_v23, 1 }
 0x62e   : > { %v5746_v1 = vpop.f32.mrf.mxu0  ;;  %7511 = vmatpush.bf16.msra.mxu1 %v9687_v44  ;;  %6739 = vmatpush.bf16.msrb.mxu3 %v9651_v10  ;;  %v9685_v44 = vld [vmem:[%s9984_s28 + $0x1d0] sm:$0xff]  ;;  %v9698_v10 = vld [vmem:[%s9984_s28 + $0x238] sm:$0xff] }
 0x62f   : > { %v5813_v6 = vadd.f32 %v5744_v31, %v5523_v9  ;;  %v4989_v31 = vld [vmem:[#allocation2 + $0x138] sm:$0x1]  ;;  %v5238_v15 = vsel %vm1174_vm13, %v5233_v21, %v5237_v61  ;;  %v6015_v21 = vsel %vm1673_vm12, %v6012_v12, %v12594_v29  ;;  %7766 = vmatpush.bf16.msra.mxu2 %v9698_v10  ;;  %v9675_v12 = vld [vmem:[%s9984_s28 + $0x180] sm:$0xff] }
 0x630   : > { %v6130_v2 = vpop.f32.mrf.mxu1  ;;  %7121 = vmatpush.bf16.msra.mxu0 %v9678_v37  ;;  %v5079_v17 = vunpack.c.l.b16 %v4989_v31  ;;  %v9676_v31 = vld [vmem:[%s9984_s28 + $0x188] sm:$0xff] }
 0x631   : > { %v11868_v60 = vadd.f32 %v6128_v0, %v5813_v6  ;;  %v5631_v0 = vsel %vm1673_vm12, %v5628_v34, %v12595_v25  ;;  %v11901_v25 = vld [vmem:[#allocation2 + $0xbc] sm:$0xf] }
 0x632   : > { %7512 = vmatpush.bf16.msra.mxu1 %v9686_v22  ;;  %6740 = vmatpush.bf16.msrb.mxu3 %v9650_v54  ;;  %v5098_v37 = vpack.c.b16 %v5079_v17, %v5079_v17 }
 0x633   : > { %v5524_v43 = vpop.f32.mrf.mxu3 }
 0x634   : > { %v5359_v56 = vpop.f32.mrf.mxu2  ;;  %7122 = vmatpush.bf16.msra.mxu0 %v9677_v49  ;;  %v5632_v17 = vrot.slane %v5098_v37, 1 }
 0x635   : > { %v5525_v9 = vadd.f32 %v5524_v43, %v5359_v56 }
 0x636   : > { %v5749_v4 = vpop.f32.mrf.mxu0  ;;  %7513 = vmatpush.bf16.msra.mxu1 %v9685_v44 }
 0x637   : > { %v5814_v6 = vadd.f32 %v5746_v1, %v5525_v9  ;;  %v5871_v1 = vld [vmem:[#allocation2 + $0x140] sm:$0x1] }
 0x638   : > { %5566 = vmatmul.bf16.gmra.mxu3 %v11831_v5  ;;  %v6133_v5 = vpop.f32.mrf.mxu1  ;;  %v5961_v9 = vunpack.c.l.b16 %v5871_v1  ;;  %7123 = vmatpush.bf16.msra.mxu0 %v9676_v31  ;;  %v6610_v31 = vld [vmem:[#allocation2 + $0xb0] sm:$0xc] }
 0x639   : > { %5788 = vmatmul.bf16.gmra.mxu0 %v5631_v0  ;;  %v11886_v43 = vadd.f32 %v6130_v2, %v5814_v6  ;;  %5401 = vmatmul.bf16.gmra.mxu2 %v5238_v15  ;;  %v9684_v0 = vld [vmem:[%s9984_s28 + $0x1c8] sm:$0xff]  ;;  %v5243_v15 = vshll.u32 %v5098_v37, 16  ;;  %v9683_v6 = vld [vmem:[%s9984_s28 + $0x1c0] sm:$0xff] }
 0x63a   : > { %7514 = vmatpush.bf16.msra.mxu1 %v9684_v0  ;;  %v5980_v10 = vpack.c.b16 %v5961_v9, %v5961_v9  ;;  %v12699_v0 = vrot.slane %v11857_v48, 1 }
 0x63b   : > { %v5527_v34 = vpop.f32.mrf.mxu3  ;;  %6172 = vmatmul.bf16.gmra.mxu1 %v6015_v21  ;;  %v6868_v21 = vld [vmem:[#allocation2 + $0xb8] sm:$0xc]  ;;  %v5245_v1 = vrot.slane %v5243_v15, 1  ;;  %v6240_v15 = vshrl.u32 %v11544_v36, 16 }
 0x63c   : > { %v5362_v56 = vpop.f32.mrf.mxu2  ;;  %7124 = vmatpush.bf16.msra.mxu0 %v9675_v12  ;;  %v6958_v37 = vunpack.c.l.b16 %v6868_v21  ;;  %v6016_v9 = vrot.slane %v5980_v10, 1 }
 0x63d   : > { %v5528_v22 = vadd.f32 %v5527_v34, %v5362_v56  ;;  %v5241_v34 = vor.u32 %v5239_v58, %v5237_v61 }
 0x63e   : > { %v5751_v2 = vpop.f32.mrf.mxu0  ;;  %7515 = vmatpush.bf16.msra.mxu1 %v9683_v6  ;;  %v6243_v6 = vshll.u32 %v11544_v36, 16  ;;  %v12701_v36 = vunpack.c.l.b16 %v11536_v45 }
 0x63f   : > { %v5815_v54 = vadd.f32 %v5749_v4, %v5528_v22  ;;  %v5633_v4 = vsel %vm1673_vm12, %v12699_v0, %v5632_v17  ;;  %v5246_v12 = vsel %vm1174_vm13, %v5241_v34, %v5245_v1  ;;  %v11918_v34 = vld [vmem:[#allocation2 + $0xc0] sm:$0xff] }
 0x640   : > { %v6135_v29 = vpop.f32.mrf.mxu1 }
 0x641   : > { %v11899_v44 = vadd.f32 %v6133_v5, %v5815_v54  ;;  %v12597_v5 = vunpack.c.l.b16 %v11901_v25  ;;  %v6628_v54 = vunpack.c.l.b16 %v6610_v31 }
 0x643   : > { %v5529_v49 = vpop.f32.mrf.mxu3  ;;  %v6995_v17 = vpack.c.b16 %v12597_v5, %v6958_v37  ;;  %v6245_v37 = vrot.slane %v6243_v6, 2 }
 0x644   : > { %v5364_v56 = vpop.f32.mrf.mxu2 }
 0x645   : > { %v5530_v22 = vadd.f32 %v5529_v49, %v5364_v56  ;;  %v6629_v56 = vpack.c.b16 %v12701_v36, %v6628_v54  ;;  %v7014_v54 = vrot.slane %v6995_v17, 2 }
 0x646   : > { %v5754_v51 = vpop.f32.mrf.mxu0 }
 0x647   : > { %v5816_v61 = vadd.f32 %v5751_v2, %v5530_v22  ;;  %v11920_v2 = vld [vmem:[#allocation2 + $0xb8] sm:$0xff]  ;;  %v7273_v22 = vshrl.u32 %v6995_v17, 16  ;;  %v6630_v52 = vrot.slane %v6629_v56, 2 }
 0x648   : > { %5571 = vmatmul.bf16.gmra.mxu3 %v11857_v48  ;;  %v6138_v49 = vpop.f32.mrf.mxu1  ;;  %v12700_v48 = vrot.slane %v11870_v23, 1  ;;  %v6248_v1 = vshrl.u32 %v11920_v2, 16  ;;  %v6251_v31 = vshll.u32 %v11920_v2, 16  ;;  %v6631_v59 = vrot.slane %v11920_v2, 2 }
 0x649   : > { %5793 = vmatmul.bf16.gmra.mxu0 %v5633_v4  ;;  %v11913_v21 = vadd.f32 %v6135_v29, %v5816_v61  ;;  %5406 = vmatmul.bf16.gmra.mxu2 %v5246_v12  ;;  %v6242_v4 = vrot.slane %v6240_v15, 1  ;;  %v7276_v12 = vshll.u32 %v6995_v17, 16  ;;  %v7284_v61 = vshll.u32 %v11918_v34, 16 }
 0x64a   : > { %v6017_v10 = vsel %vm1673_vm12, %v12700_v48, %v6016_v9  ;;  %v7281_v9 = vshrl.u32 %v11918_v34, 16  ;;  %v6250_v48 = vrot.slane %v6248_v1, 1  ;;  %v6253_v5 = vrot.slane %v6251_v31, 2 }
 0x64b   : > { %v5532_v58 = vpop.f32.mrf.mxu3  ;;  %6177 = vmatmul.bf16.gmra.mxu1 %v6017_v10  ;;  %v7015_v10 = vrot.slane %v11918_v34, 2  ;;  %v7275_v36 = vrot.slane %v7273_v22, 2  ;;  %v7286_v14 = vrot.slane %v7284_v61, 3  ;;  %v6246_v16 = vor.u32 %v6245_v37, %v6242_v4  ;;  %v11938_v4 = vld [vmem:[#allocation2 + $0xc8] sm:$0xff]  ;;  %v9810_v37 = vld [vmem:[#allocation2 + $0xc0] sm:$0xff] }
 0x64c   : > { %v5367_v0 = vpop.f32.mrf.mxu2  ;;  %v6254_v32 = vor.u32 %v6253_v5, %v6250_v48  ;;  %v6632_v1 = vsel %vm2708_vm0, %v6630_v52, %v6631_v59 }
 0x64d   : > { %v5533_v23 = vadd.f32 %v5532_v58, %v5367_v0  ;;  %v7278_v58 = vrot.slane %v7276_v12, 3  ;;  %v7283_v0 = vrot.slane %v7281_v9, 2  ;;  %v7016_v2 = vsel %vm2708_vm0, %v7014_v54, %v7015_v10 }
 0x64e   : > { %v5756_v29 = vpop.f32.mrf.mxu0  ;;  %v6255_v34 = vsel %vm2316_vm1, %v6246_v16, %v6254_v32  ;;  %v6257_v12 = vshrl.u32 %v9810_v37, 16  ;;  %v6260_v9 = vshll.u32 %v9810_v37, 16  ;;  %v7290_v16 = vshrl.u32 %v11938_v4, 16 }
 0x64f   : > { %v5817_v3 = vadd.f32 %v5754_v51, %v5533_v23  ;;  %v7279_v17 = vor.u32 %v7278_v58, %v7275_v36  ;;  %v7287_v23 = vor.u32 %v7286_v14, %v7283_v0 }
 0x650   : > { %v6140_v6 = vpop.f32.mrf.mxu1  ;;  %v6259_v54 = vrot.slane %v6257_v12, 1  ;;  %v6262_v36 = vrot.slane %v6260_v9, 2 }
 0x651   : > { %v11930_v15 = vadd.f32 %v6138_v49, %v5817_v3  ;;  %v7288_v52 = vsel %vm3351_vm2, %v7279_v17, %v7287_v23 }
 0x653   : > { %v5534_v45 = vpop.f32.mrf.mxu3 }
 0x654   : > { %v5369_v31 = vpop.f32.mrf.mxu2 }
 0x655   : > { %v5535_v51 = vadd.f32 %v5534_v45, %v5369_v31  ;;  %v9697_v45 = vld [vmem:[%s9984_s28 + $0x230] sm:$0xff] }
 0x656   : > { %v5759_v56 = vpop.f32.mrf.mxu0  ;;  %7767 = vmatpush.bf16.msra.mxu2 %v9697_v45 }
 0x657   : > { %v5818_v3 = vadd.f32 %v5756_v29, %v5535_v51  ;;  %v7293_v29 = vshll.u32 %v11938_v4, 16  ;;  %v7292_v51 = vrot.slane %v7290_v16, 2 }
 0x658   : > { %6741 = vmatmul.bf16.vlgmr.msrb.gmra.mxu3 %v6632_v1  ;;  %v6143_v5 = vpop.f32.mrf.mxu1  ;;  %v7017_v1 = vrot.slane %v11938_v4, 2 }
 0x659   : > { %7125 = vmatmul.bf16.vlgmr.msra.gmra.mxu0 %v7016_v2  ;;  %v11935_v22 = vadd.f32 %v6140_v6, %v5818_v3  ;;  %6483 = vmatmul.bf16.vlgmr.msrb.gmra.mxu2 %v6255_v34  ;;  %v6633_v6 = vrot.slane %v9810_v37, 2  ;;  %v7295_v17 = vrot.slane %v7293_v29, 3  ;;  %v6263_v34 = vor.u32 %v6262_v36, %v6259_v54  ;;  %v11952_v29 = vld [vmem:[#allocation2 + $0xd0] sm:$0xff] }
 0x65b   : > { %v5537_v49 = vpop.f32.mrf.mxu3  ;;  %7516 = vmatmul.bf16.vlgmr.msra.gmra.mxu1 %v7288_v52  ;;  %v6634_v3 = vsel %vm2708_vm0, %v6631_v59, %v6633_v6  ;;  %v7296_v37 = vor.u32 %v7295_v17, %v7292_v51  ;;  %v9811_v59 = vld [vmem:[#allocation2 + $0xc8] sm:$0xff] }
 0x65c   : > { %v5372_v61 = vpop.f32.mrf.mxu2  ;;  %v6266_v45 = vshrl.u32 %v9811_v59, 16  ;;  %v6269_v54 = vshll.u32 %v9811_v59, 16  ;;  %v6635_v51 = vrot.slane %v9811_v59, 2 }
 0x65d   : > { %v5538_v48 = vadd.f32 %v5537_v49, %v5372_v61  ;;  %v7018_v61 = vsel %vm2708_vm0, %v7015_v10, %v7017_v1  ;;  %v7297_v16 = vsel %vm3351_vm2, %v7287_v23, %v7296_v37  ;;  %v7019_v23 = vrot.slane %v11952_v29, 2 }
 0x65e   : > { %v5761_v14 = vpop.f32.mrf.mxu0 }
 0x65f   : > { %v5819_v58 = vadd.f32 %v5759_v56, %v5538_v48  ;;  %v6264_v56 = vsel %vm2316_vm1, %v6254_v32, %v6263_v34  ;;  %v7299_v32 = vshrl.u32 %v11952_v29, 16  ;;  %v7020_v18 = vsel %vm2708_vm0, %v7017_v1, %v7019_v23 }
 0x660   : > { %v6145_v2 = vpop.f32.mrf.mxu1 }
 0x661   : > { %v11944_v31 = vadd.f32 %v6143_v5, %v5819_v58 }
 0x663   : > { %v5539_v0 = vpop.f32.mrf.mxu3 }
 0x664   : > { %v5374_v49 = vpop.f32.mrf.mxu2 }
 0x665   : > { %v5540_v12 = vadd.f32 %v5539_v0, %v5374_v49  ;;  %v6268_v0 = vrot.slane %v6266_v45, 1 }
 0x666   : > { %v5764_v52 = vpop.f32.mrf.mxu0 }
 0x667   : > { %v5820_v9 = vadd.f32 %v5761_v14, %v5540_v12  ;;  %v7302_v14 = vshll.u32 %v11952_v29, 16  ;;  %v7301_v12 = vrot.slane %v7299_v32, 2  ;;  %v11965_v32 = vld [vmem:[#allocation2 + $0xd8] sm:$0xff] }
 0x668   : > { %6746 = vmatmul.bf16.gmra.mxu3 %v6634_v3  ;;  %v6148_v48 = vpop.f32.mrf.mxu1 }
 0x669   : > { %7130 = vmatmul.bf16.gmra.mxu0 %v7018_v61  ;;  %v11949_v5 = vadd.f32 %v6145_v2, %v5820_v9  ;;  %6488 = vmatmul.bf16.gmra.mxu2 %v6264_v56  ;;  %v6271_v2 = vrot.slane %v6269_v54, 2  ;;  %v7304_v56 = vrot.slane %v7302_v14, 3 }
 0x66b   : > { %v5542_v4 = vpop.f32.mrf.mxu3  ;;  %7521 = vmatmul.bf16.gmra.mxu1 %v7297_v16  ;;  %v6272_v9 = vor.u32 %v6271_v2, %v6268_v0  ;;  %v6636_v16 = vsel %vm2708_vm0, %v6633_v6, %v6635_v51  ;;  %v7305_v45 = vor.u32 %v7304_v56, %v7301_v12  ;;  %v9812_v6 = vld [vmem:[#allocation2 + $0xd0] sm:$0xff] }
 0x66c   : > { %v5377_v10 = vpop.f32.mrf.mxu2  ;;  %v6275_v14 = vshrl.u32 %v9812_v6, 16  ;;  %v6278_v0 = vshll.u32 %v9812_v6, 16 }
 0x66d   : > { %v5543_v58 = vadd.f32 %v5542_v4, %v5377_v10 }
 0x66e   : > { %v5766_v36 = vpop.f32.mrf.mxu0 }
 0x66f   : > { %v5821_v17 = vadd.f32 %v5764_v52, %v5543_v58  ;;  %v6273_v52 = vsel %vm2316_vm1, %v6263_v34, %v6272_v9  ;;  %v7306_v58 = vsel %vm3351_vm2, %v7296_v37, %v7305_v45  ;;  %v6277_v34 = vrot.slane %v6275_v14, 1 }
 0x670   : > { %v6150_v61 = vpop.f32.mrf.mxu1  ;;  %v7021_v37 = vrot.slane %v11965_v32, 2 }
 0x671   : > { %v11957_v49 = vadd.f32 %v6148_v48, %v5821_v17 }
 0x672   : > { %v7022_v14 = vsel %vm2708_vm0, %v7019_v23, %v7021_v37 }
 0x673   : > { %v5544_v3 = vpop.f32.mrf.mxu3 }
 0x674   : > { %v5379_v4 = vpop.f32.mrf.mxu2 }
 0x675   : > { %v5545_v33 = vadd.f32 %v5544_v3, %v5379_v4  ;;  %v6637_v3 = vrot.slane %v9812_v6, 2 }
 0x676   : > { %v5769_v10 = vpop.f32.mrf.mxu0 }
 0x677   : > { %v5822_v59 = vadd.f32 %v5766_v36, %v5545_v33  ;;  %v7308_v33 = vshrl.u32 %v11965_v32, 16  ;;  %v6280_v36 = vrot.slane %v6278_v0, 2 }
 0x678   : > { %6751 = vmatmul.bf16.gmra.mxu3 %v6636_v16  ;;  %v6153_v54 = vpop.f32.mrf.mxu1 }
 0x679   : > { %7135 = vmatmul.bf16.gmra.mxu0 %v7020_v18  ;;  %v11962_v48 = vadd.f32 %v6150_v61, %v5822_v59  ;;  %6493 = vmatmul.bf16.gmra.mxu2 %v6273_v52  ;;  %v7311_v18 = vshll.u32 %v11965_v32, 16  ;;  %v7310_v4 = vrot.slane %v7308_v33, 2  ;;  %v9696_v59 = vld [vmem:[%s9984_s28 + $0x228] sm:$0xff] }
 0x67a   : > { %7768 = vmatpush.bf16.msra.mxu2 %v9696_v59 }
 0x67b   : > { %v5547_v29 = vpop.f32.mrf.mxu3  ;;  %7526 = vmatmul.bf16.gmra.mxu1 %v7306_v58  ;;  %v7313_v52 = vrot.slane %v7311_v18, 3  ;;  %v6281_v58 = vor.u32 %v6280_v36, %v6277_v34  ;;  %v9813_v34 = vld [vmem:[#allocation2 + $0xd8] sm:$0xff] }
 0x67c   : > { %v5382_v1 = vpop.f32.mrf.mxu2  ;;  %v6284_v36 = vshrl.u32 %v9813_v34, 16 }
 0x67d   : > { %v5548_v17 = vadd.f32 %v5547_v29, %v5382_v1  ;;  %v6638_v29 = vsel %vm2708_vm0, %v6635_v51, %v6637_v3  ;;  %v6282_v6 = vsel %vm2316_vm1, %v6272_v9, %v6281_v58  ;;  %v9662_v51 = vld [vmem:[#allocation2 + $0xe0] sm:$0xff] }
 0x67e   : > { %v5771_v2 = vpop.f32.mrf.mxu0  ;;  %v6286_v9 = vrot.slane %v6284_v36, 1 }
 0x67f   : > { %v5823_v61 = vadd.f32 %v5769_v10, %v5548_v17  ;;  %v7314_v10 = vor.u32 %v7313_v52, %v7310_v4  ;;  %v7317_v4 = vshrl.u32 %v9662_v51, 16  ;;  %v7320_v52 = vshll.u32 %v9662_v51, 16 }
 0x680   : > { %v6155_v16 = vpop.f32.mrf.mxu1 }
 0x681   : > { %v11970_v56 = vadd.f32 %v6153_v54, %v5823_v61  ;;  %v7315_v18 = vsel %vm3351_vm2, %v7305_v45, %v7314_v10  ;;  %v6287_v61 = vshll.u32 %v9813_v34, 16  ;;  %v7319_v45 = vrot.slane %v7317_v4, 2  ;;  %v11987_v4 = vld [vmem:[#allocation2 + $0xe8] sm:$0xff] }
 0x683   : > { %v5549_v12 = vpop.f32.mrf.mxu3 }
 0x684   : > { %v5384_v1 = vpop.f32.mrf.mxu2 }
 0x685   : > { %v5550_v0 = vadd.f32 %v5549_v12, %v5384_v1 }
 0x686   : > { %v5774_v8 = vpop.f32.mrf.mxu0 }
 0x687   : > { %v5824_v32 = vadd.f32 %v5771_v2, %v5550_v0  ;;  %v6289_v2 = vrot.slane %v6287_v61, 2 }
 0x688   : > { %6756 = vmatmul.bf16.gmra.mxu3 %v6638_v29  ;;  %v6158_v33 = vpop.f32.mrf.mxu1  ;;  %v6639_v29 = vrot.slane %v9813_v34, 2 }
 0x689   : > { %7140 = vmatmul.bf16.gmra.mxu0 %v7022_v14  ;;  %v11976_v17 = vadd.f32 %v6155_v16, %v5824_v32  ;;  %6498 = vmatmul.bf16.gmra.mxu2 %v6282_v6  ;;  %v7023_v14 = vrot.slane %v9662_v51, 2  ;;  %v7322_v32 = vrot.slane %v7320_v52, 3  ;;  %v6290_v53 = vor.u32 %v6289_v2, %v6286_v9 }
 0x68a   : > { %v6640_v40 = vsel %vm2708_vm0, %v6637_v3, %v6639_v29  ;;  %v9814_v3 = vld [vmem:[#allocation2 + $0xe0] sm:$0xff] }
 0x68b   : > { %v5552_v54 = vpop.f32.mrf.mxu3  ;;  %7531 = vmatmul.bf16.gmra.mxu1 %v7315_v18  ;;  %v7323_v36 = vor.u32 %v7322_v32, %v7319_v45  ;;  %v6291_v34 = vsel %vm2316_vm1, %v6281_v58, %v6290_v53  ;;  %v6293_v52 = vshrl.u32 %v9814_v3, 16  ;;  %v6296_v9 = vshll.u32 %v9814_v3, 16 }
 0x68c   : > { %v5387_v59 = vpop.f32.mrf.mxu2  ;;  %v7326_v58 = vshrl.u32 %v11987_v4, 16 }
 0x68d   : > { %v5553_v12 = vadd.f32 %v5552_v54, %v5387_v59  ;;  %v7024_v54 = vsel %vm2708_vm0, %v7021_v37, %v7023_v14  ;;  %v6295_v2 = vrot.slane %v6293_v52, 1 }
 0x68e   : > { %v5776_v23 = vpop.f32.mrf.mxu0 }
 0x68f   : > { %v5825_v1 = vadd.f32 %v5774_v8, %v5553_v12  ;;  %v7324_v12 = vsel %vm3351_vm2, %v7314_v10, %v7323_v36  ;;  %v7025_v10 = vrot.slane %v11987_v4, 2 }
 0x690   : > { %v6160_v6 = vpop.f32.mrf.mxu1 }
 0x691   : > { %v11979_v0 = vadd.f32 %v6158_v33, %v5825_v1  ;;  %v6298_v1 = vrot.slane %v6296_v9, 2  ;;  %v7026_v7 = vsel %vm2708_vm0, %v7023_v14, %v7025_v10  ;;  %v9695_v9 = vld [vmem:[%s9984_s28 + $0x220] sm:$0xff] }
 0x692   : > { %7769 = vmatpush.bf16.msra.mxu2 %v9695_v9 }
 0x693   : > { %v5554_v16 = vpop.f32.mrf.mxu3 }
 0x694   : > { %v5389_v30 = vpop.f32.mrf.mxu2 }
 0x695   : > { %v5555_v59 = vadd.f32 %v5554_v16, %v5389_v30  ;;  %v6641_v16 = vrot.slane %v9814_v3, 2 }
 0x696   : > { %v5779_v18 = vpop.f32.mrf.mxu0 }
 0x697   : > { %v5826_v8 = vadd.f32 %v5776_v23, %v5555_v59  ;;  %v7329_v23 = vshll.u32 %v11987_v4, 16  ;;  %v7328_v59 = vrot.slane %v7326_v58, 2 }
 0x698   : > { %6761 = vmatmul.bf16.gmra.mxu3 %v6640_v40  ;;  %v6163_v61 = vpop.f32.mrf.mxu1 }
 0x699   : > { %7145 = vmatmul.bf16.gmra.mxu0 %v7024_v54  ;;  %v11984_v33 = vadd.f32 %v6160_v6, %v5826_v8  ;;  %6503 = vmatmul.bf16.gmra.mxu2 %v6291_v34  ;;  %v7331_v34 = vrot.slane %v7329_v23, 3  ;;  %v6299_v8 = vor.u32 %v6298_v1, %v6295_v2  ;;  %v12001_v23 = vld [vmem:[#allocation2 + $0xf0] sm:$0xff]  ;;  %v9815_v2 = vld [vmem:[#allocation2 + $0xe8] sm:$0xff] }
 0x69a   : > { %v6302_v14 = vshrl.u32 %v9815_v2, 16  ;;  %v6305_v1 = vshll.u32 %v9815_v2, 16 }
 0x69b   : > { %v5557_v51 = vpop.f32.mrf.mxu3  ;;  %7536 = vmatmul.bf16.gmra.mxu1 %v7324_v12  ;;  %v7332_v3 = vor.u32 %v7331_v34, %v7328_v59  ;;  %v6643_v34 = vrot.slane %v9815_v2, 2 }
 0x69c   : > { %v5392_v37 = vpop.f32.mrf.mxu2 }
 0x69d   : > { %v5558_v40 = vadd.f32 %v5557_v51, %v5392_v37  ;;  %v6642_v51 = vsel %vm2708_vm0, %v6639_v29, %v6641_v16  ;;  %v7333_v29 = vsel %vm3351_vm2, %v7323_v36, %v7332_v3  ;;  %v7027_v36 = vrot.slane %v12001_v23, 2 }
 0x69e   : > { %v5781_v30 = vpop.f32.mrf.mxu0 }
 0x69f   : > { %v5827_v6 = vadd.f32 %v5779_v18, %v5558_v40  ;;  %v6300_v18 = vsel %vm2316_vm1, %v6290_v53, %v6299_v8  ;;  %v7335_v53 = vshrl.u32 %v12001_v23, 16  ;;  %v7028_v38 = vsel %vm2708_vm0, %v7025_v10, %v7027_v36 }
 0x6a0   : > { %v6165_v54 = vpop.f32.mrf.mxu1 }
 0x6a1   : > { %v11992_v32 = vadd.f32 %v6163_v61, %v5827_v6 }
 0x6a3   : > { %v5559_v45 = vpop.f32.mrf.mxu3 }
 0x6a4   : > { %v5394_v12 = vpop.f32.mrf.mxu2 }
 0x6a5   : > { %v5560_v52 = vadd.f32 %v5559_v45, %v5394_v12 }
 0x6a6   : > { %v5784_v37 = vpop.f32.mrf.mxu0 }
 0x6a7   : > { %v5828_v40 = vadd.f32 %v5781_v30, %v5560_v52  ;;  %v6304_v30 = vrot.slane %v6302_v14, 1 }
 0x6a8   : > { %6766 = vmatmul.bf16.gmra.mxu3 %v6642_v51  ;;  %v6168_v58 = vpop.f32.mrf.mxu1 }
 0x6a9   : > { %7150 = vmatmul.bf16.gmra.mxu0 %v7026_v7  ;;  %v11998_v4 = vadd.f32 %v6165_v54, %v5828_v40  ;;  %6508 = vmatmul.bf16.gmra.mxu2 %v6300_v18  ;;  %v7338_v7 = vshll.u32 %v12001_v23, 16  ;;  %v6307_v54 = vrot.slane %v6305_v1, 2  ;;  %v7337_v18 = vrot.slane %v7335_v53, 2 }
 0x6ab   : > { %v5562_v61 = vpop.f32.mrf.mxu3  ;;  %7541 = vmatmul.bf16.gmra.mxu1 %v7333_v29  ;;  %v7340_v40 = vrot.slane %v7338_v7, 3  ;;  %v6308_v19 = vor.u32 %v6307_v54, %v6304_v30  ;;  %v6644_v29 = vsel %vm2708_vm0, %v6641_v16, %v6643_v34  ;;  %v12014_v7 = vld [vmem:[#allocation2 + $0xf8] sm:$0xff]  ;;  %v9816_v16 = vld [vmem:[#allocation2 + $0xf0] sm:$0xff] }
 0x6ac   : > { %v5397_v6 = vpop.f32.mrf.mxu2  ;;  %12702 = vst [vmem:[#allocation6_spill] sm:$0xff] %v12014_v7  ;;  %v6311_v30 = vshrl.u32 %v9816_v16, 16  ;;  %v6314_v54 = vshll.u32 %v9816_v16, 16 }
 0x6ad   : > { %v5563_v59 = vadd.f32 %v5562_v61, %v5397_v6  ;;  %v7341_v14 = vor.u32 %v7340_v40, %v7337_v18 }
 0x6ae   : > { %v5786_v45 = vpop.f32.mrf.mxu0 }
 0x6af   : > { %v5829_v51 = vadd.f32 %v5784_v37, %v5563_v59  ;;  %v6309_v37 = vsel %vm2316_vm1, %v6299_v8, %v6308_v19  ;;  %v7342_v53 = vsel %vm3351_vm2, %v7332_v3, %v7341_v14  ;;  %v7344_v8 = vshrl.u32 %v12014_v7, 16 }
 0x6b0   : > { %v6170_v9 = vpop.f32.mrf.mxu1  ;;  %v7029_v3 = vrot.slane %v12014_v7, 2 }
 0x6b1   : > { %v12006_v52 = vadd.f32 %v6168_v58, %v5829_v51 }
 0x6b2   : > { %v7030_v28 = vsel %vm2708_vm0, %v7027_v36, %v7029_v3 }
 0x6b3   : > { %v5564_v12 = vpop.f32.mrf.mxu3 }
 0x6b4   : > { %v5399_v61 = vpop.f32.mrf.mxu2 }
 0x6b5   : > { %v5565_v47 = vadd.f32 %v5564_v12, %v5399_v61 }
 0x6b6   : > { %v5789_v6 = vpop.f32.mrf.mxu0 }
 0x6b7   : > { %v5830_v2 = vadd.f32 %v5786_v45, %v5565_v47  ;;  %v7347_v47 = vshll.u32 %v12014_v7, 16  ;;  %v6316_v45 = vrot.slane %v6314_v54, 2 }
 0x6b8   : > { %6771 = vmatmul.bf16.gmra.mxu3 %v6644_v29  ;;  %v6173_v59 = vpop.f32.mrf.mxu1 }
 0x6b9   : > { %7155 = vmatmul.bf16.gmra.mxu0 %v7028_v38  ;;  %v12011_v58 = vadd.f32 %v6170_v9, %v5830_v2  ;;  %6513 = vmatmul.bf16.gmra.mxu2 %v6309_v37  ;;  %v6313_v38 = vrot.slane %v6311_v30, 1  ;;  %v6645_v9 = vrot.slane %v9816_v16, 2  ;;  %v7346_v37 = vrot.slane %v7344_v8, 2 }
 0x6ba   : > { %v7349_v2 = vrot.slane %v7347_v47, 3  ;;  %v12027_v47 = vld [vmem:[#allocation2 + $0x100] sm:$0xff] }
 0x6bb   : > { %v5567_v1 = vpop.f32.mrf.mxu3  ;;  %7546 = vmatmul.bf16.gmra.mxu1 %v7342_v53  ;;  %v6317_v26 = vor.u32 %v6316_v45, %v6313_v38  ;;  %v6646_v53 = vsel %vm2708_vm0, %v6643_v34, %v6645_v9  ;;  %12705 = vst [vmem:[#allocation45_spill] sm:$0xff] %v12027_v47  ;;  %v9694_v38 = vld [vmem:[%s9984_s28 + $0x218] sm:$0xff] }
 0x6bc   : > { %v5402_v10 = vpop.f32.mrf.mxu2  ;;  %v9817_v45 = vld [vmem:[#allocation2 + $0xf8] sm:$0xff]  ;;  %7770 = vmatpush.bf16.msra.mxu2 %v9694_v38 }
 0x6bd   : > { %v5568_v12 = vadd.f32 %v5567_v1, %v5402_v10  ;;  %v6318_v16 = vsel %vm2316_vm1, %v6308_v19, %v6317_v26  ;;  %v6320_v36 = vshrl.u32 %v9817_v45, 16 }
 0x6be   : > { %v5791_v51 = vpop.f32.mrf.mxu0 }
 0x6bf   : > { %v5831_v18 = vadd.f32 %v5789_v6, %v5568_v12  ;;  %v7350_v6 = vor.u32 %v7349_v2, %v7346_v37  ;;  %v6322_v2 = vrot.slane %v6320_v36, 1 }
 0x6c0   : > { %v6175_v61 = vpop.f32.mrf.mxu1 }
 0x6c1   : > { %v12019_v29 = vadd.f32 %v6173_v59, %v5831_v18  ;;  %v7351_v34 = vsel %vm3351_vm2, %v7341_v14, %v7350_v6  ;;  %v6323_v18 = vshll.u32 %v9817_v45, 16  ;;  %v6647_v14 = vrot.slane %v9817_v45, 2 }
 0x6c3   : > { %v5569_v40 = vpop.f32.mrf.mxu3  ;;  %12703 = vst [vmem:[#allocation7_spill] sm:$0xff] %v12019_v29 }
 0x6c4   : > { %v5404_v1 = vpop.f32.mrf.mxu2 }
 0x6c5   : > { %v5570_v30 = vadd.f32 %v5569_v40, %v5404_v1  ;;  %v9700_v40 = vld [vmem:[%s9979_s25 + $0x8] sm:$0xff] }
 0x6c6   : > { %v5794_v10 = vpop.f32.mrf.mxu0  ;;  %8031 = vmatpush.bf16.msra.mxu3 %v9700_v40 }
 0x6c7   : > { %v5832_v54 = vadd.f32 %v5791_v51, %v5570_v30 }
 0x6c8   : > { %6776 = vmatmul.bf16.gmra.mxu3 %v6646_v53  ;;  %v6178_v8 = vpop.f32.mrf.mxu1  ;;  %v6325_v53 = vrot.slane %v6323_v18, 2 }
 0x6c9   : > { %7160 = vmatmul.bf16.gmra.mxu0 %v7030_v28  ;;  %v12024_v12 = vadd.f32 %v6175_v61, %v5832_v54  ;;  %6518 = vmatmul.bf16.gmra.mxu2 %v6318_v16  ;;  %v7353_v28 = vshrl.u32 %v12027_v47, 16  ;;  %v7356_v61 = vshll.u32 %v12027_v47, 16  ;;  %v7031_v16 = vrot.slane %v12027_v47, 2 }
 0x6cb   : > { %v5572_v59 = vpop.f32.mrf.mxu3  ;;  %12704 = vst [vmem:[#allocation8_spill] sm:$0xff] %v12024_v12  ;;  %7551 = vmatmul.bf16.gmra.mxu1 %v7351_v34  ;;  %v7355_v41 = vrot.slane %v7353_v28, 2  ;;  %v7358_v12 = vrot.slane %v7356_v61, 3  ;;  %v6326_v34 = vor.u32 %v6325_v53, %v6322_v2  ;;  %v7032_v29 = vsel %vm2708_vm0, %v7029_v3, %v7031_v16  ;;  %v12042_v61 = vld [vmem:[#allocation2 + $0x108] sm:$0xff] }
 0x6cc   : > { %v5407_v37 = vpop.f32.mrf.mxu2 }
 0x6cd   : > { %v5573_v51 = vadd.f32 %v5572_v59, %v5407_v37  ;;  %v6648_v59 = vsel %vm2708_vm0, %v6645_v9, %v6647_v14  ;;  %v7359_v36 = vor.u32 %v7358_v12, %v7355_v41  ;;  %v9818_v9 = vld [vmem:[#allocation2 + $0x100] sm:$0xff] }
 0x6ce   : > { %v5796_v19 = vpop.f32.mrf.mxu0  ;;  %v6329_v2 = vshrl.u32 %v9818_v9, 16  ;;  %v6332_v53 = vshll.u32 %v9818_v9, 16 }
 0x6cf   : > { %v5833_v1 = vadd.f32 %v5794_v10, %v5573_v51  ;;  %v6327_v10 = vsel %vm2316_vm1, %v6317_v26, %v6326_v34  ;;  %v7360_v28 = vsel %vm3351_vm2, %v7350_v6, %v7359_v36  ;;  %v7362_v26 = vshrl.u32 %v12042_v61, 16 }
 0x6d0   : > { %v6180_v38 = vpop.f32.mrf.mxu1  ;;  %v6331_v12 = vrot.slane %v6329_v2, 1  ;;  %v7033_v6 = vrot.slane %v12042_v61, 2 }
 0x6d1   : > { %v12034_v54 = vadd.f32 %v6178_v8, %v5833_v1 }
 0x6d3   : > { %v5574_v30 = vpop.f32.mrf.mxu3  ;;  %12706 = vst [vmem:[#allocation46_spill] sm:$0xff] %v12034_v54  ;;  %v7034_v54 = vsel %vm2708_vm0, %v7031_v16, %v7033_v6 }
 0x6d4   : > { %v5409_v37 = vpop.f32.mrf.mxu2 }
 0x6d5   : > { %v5575_v40 = vadd.f32 %v5574_v30, %v5409_v37  ;;  %v6649_v30 = vrot.slane %v9818_v9, 2 }
 0x6d6   : > { %v7126_v7 = vpop.f32.mrf.mxu0 }
 0x6d7   : > { %v5834_v45 = vadd.f32 %v5796_v19, %v5575_v40  ;;  %v6334_v19 = vrot.slane %v6332_v53, 2 }
 0x6d8   : > { %6781 = vmatmul.bf16.gmra.mxu3 %v6648_v59  ;;  %v7517_v51 = vpop.f32.mrf.mxu1 }
 0x6d9   : > { %7165 = vmatmul.bf16.gmra.mxu0 %v7032_v29  ;;  %v12039_v8 = vadd.f32 %v6180_v38, %v5834_v45  ;;  %6523 = vmatmul.bf16.gmra.mxu2 %v6327_v10  ;;  %v7365_v29 = vshll.u32 %v12042_v61, 16  ;;  %v7364_v10 = vrot.slane %v7362_v26, 2 }
 0x6db   : > { %v6742_v18 = vpop.f32.mrf.mxu3  ;;  %12707 = vst [vmem:[#allocation47_spill] sm:$0xff] %v12039_v8  ;;  %7556 = vmatmul.bf16.gmra.mxu1 %v7360_v28  ;;  %v7367_v45 = vrot.slane %v7365_v29, 3  ;;  %v6335_v8 = vor.u32 %v6334_v19, %v6331_v12  ;;  %v6650_v28 = vsel %vm2708_vm0, %v6647_v14, %v6649_v30  ;;  %v12057_v29 = vld [vmem:[#allocation2 + $0x108] sm:$0xff] }
 0x6dc   : > { %v6484_v3 = vpop.f32.mrf.mxu2  ;;  %v6338_v16 = vshrl.u32 %v12057_v29, 16 }
 0x6dd   : > { %v6574_v41 = vadd.f32 %v6484_v3, %v11668_v35  ;;  %v6336_v9 = vsel %vm2316_vm1, %v6326_v34, %v6335_v8 }
 0x6de   : > { %v7128_v1 = vpop.f32.mrf.mxu0 }
 0x6df   : > { %v6832_v38 = vadd.f32 %v6742_v18, %v6574_v41  ;;  %v7368_v18 = vor.u32 %v7367_v45, %v7364_v10  ;;  %v6651_v10 = vrot.slane %v12057_v29, 2 }
 0x6e0   : > { %v7519_v40 = vpop.f32.mrf.mxu1 }
 0x6e1   : > { %v7216_v37 = vadd.f32 %v7126_v7, %v6832_v38  ;;  %v7369_v14 = vsel %vm3351_vm2, %v7359_v36, %v7368_v18  ;;  %v9693_v36 = vld [vmem:[%s9984_s28 + $0x210] sm:$0xff] }
 0x6e2   : > { %7771 = vmatpush.bf16.msra.mxu2 %v9693_v36  ;;  %v9820_v36 = vld [vmem:[#allocation2 + $0x110] sm:$0xff] }
 0x6e3   : > { %v6744_v59 = vpop.f32.mrf.mxu3  ;;  %v12049_v47 = vadd.f32 %v7517_v51, %v7216_v37  ;;  %v12055_v51 = vld [vmem:[#allocation2 + $0x110] sm:$0xff] }
 0x6e4   : > { %v6486_v35 = vpop.f32.mrf.mxu2  ;;  %v7374_v38 = vshll.u32 %v12055_v51, 16 }
 0x6e5   : > { %v6575_v2 = vadd.f32 %v6486_v35, %v11682_v50  ;;  %v6341_v50 = vshll.u32 %v12057_v29, 16 }
 0x6e6   : > { %v7131_v3 = vpop.f32.mrf.mxu0 }
 0x6e7   : > { %v6833_v53 = vadd.f32 %v6744_v59, %v6575_v2  ;;  %v6340_v59 = vrot.slane %v6338_v16, 1  ;;  %v6343_v37 = vrot.slane %v6341_v50, 2 }
 0x6e8   : > { %6786 = vmatmul.bf16.gmra.mxu3 %v6650_v28  ;;  %v7522_v26 = vpop.f32.mrf.mxu1 }
 0x6e9   : > { %7170 = vmatmul.bf16.gmra.mxu0 %v7034_v54  ;;  %v7217_v41 = vadd.f32 %v7128_v1, %v6833_v53  ;;  %6528 = vmatmul.bf16.gmra.mxu2 %v6336_v9  ;;  %v7371_v1 = vshrl.u32 %v12055_v51, 16  ;;  %v7376_v53 = vrot.slane %v7374_v38, 3 }
 0x6eb   : > { %v6747_v7 = vpop.f32.mrf.mxu3  ;;  %v12061_v12 = vadd.f32 %v7519_v40, %v7217_v41  ;;  %7561 = vmatmul.bf16.gmra.mxu1 %v7369_v14  ;;  %v7035_v40 = vrot.slane %v12055_v51, 2  ;;  %v7373_v9 = vrot.slane %v7371_v1, 2  ;;  %v6344_v41 = vor.u32 %v6343_v37, %v6340_v59 }
 0x6ec   : > { %v6489_v34 = vpop.f32.mrf.mxu2  ;;  %v6347_v59 = vshrl.u32 %v9820_v36, 16  ;;  %v6350_v37 = vshll.u32 %v9820_v36, 16 }
 0x6ed   : > { %12708 = vst [vmem:[#allocation48_spill] sm:$0xff] %v12061_v12  ;;  %v6576_v19 = vadd.f32 %v6489_v34, %v11696_v13  ;;  %v6652_v13 = vsel %vm2708_vm0, %v6649_v30, %v6651_v10  ;;  %v7036_v16 = vsel %vm2708_vm0, %v7033_v6, %v7035_v40  ;;  %v6345_v50 = vsel %vm2316_vm1, %v6335_v8, %v6344_v41 }
 0x6ee   : > { %v7133_v54 = vpop.f32.mrf.mxu0 }
 0x6ef   : > { %v6834_v45 = vadd.f32 %v6747_v7, %v6576_v19  ;;  %v7377_v7 = vor.u32 %v7376_v53, %v7373_v9  ;;  %v6352_v9 = vrot.slane %v6350_v37, 2  ;;  %v6653_v53 = vrot.slane %v9820_v36, 2 }
 0x6f0   : > { %v7524_v2 = vpop.f32.mrf.mxu1 }
 0x6f1   : > { %v7218_v35 = vadd.f32 %v7131_v3, %v6834_v45  ;;  %v7378_v30 = vsel %vm3351_vm2, %v7368_v18, %v7377_v7 }
 0x6f3   : > { %v6749_v28 = vpop.f32.mrf.mxu3  ;;  %v12070_v14 = vadd.f32 %v7522_v26, %v7218_v35  ;;  %v12076_v26 = vld [vmem:[#allocation2 + $0x118] sm:$0xff]  ;;  %v6349_v35 = vrot.slane %v6347_v59, 1 }
 0x6f4   : > { %v6491_v34 = vpop.f32.mrf.mxu2 }
 0x6f5   : > { %v6577_v29 = vadd.f32 %v6491_v34, %v11712_v42  ;;  %v7037_v34 = vrot.slane %v12076_v26, 2 }
 0x6f6   : > { %v7136_v12 = vpop.f32.mrf.mxu0 }
 0x6f7   : > { %v6835_v19 = vadd.f32 %v6749_v28, %v6577_v29  ;;  %v7380_v28 = vshrl.u32 %v12076_v26, 16 }
 0x6f8   : > { %6791 = vmatmul.bf16.gmra.mxu3 %v6652_v13  ;;  %v7527_v38 = vpop.f32.mrf.mxu1 }
 0x6f9   : > { %7175 = vmatmul.bf16.gmra.mxu0 %v7036_v16  ;;  %v7219_v1 = vadd.f32 %v7133_v54, %v6835_v19  ;;  %6533 = vmatmul.bf16.gmra.mxu2 %v6345_v50  ;;  %v7383_v54 = vshll.u32 %v12076_v26, 16  ;;  %v6353_v19 = vor.u32 %v6352_v9, %v6349_v35 }
 0x6fb   : > { %v6752_v3 = vpop.f32.mrf.mxu3  ;;  %v12078_v6 = vadd.f32 %v7524_v2, %v7219_v1  ;;  %7566 = vmatmul.bf16.gmra.mxu1 %v7378_v30  ;;  %v7382_v2 = vrot.slane %v7380_v28, 2  ;;  %v7385_v50 = vrot.slane %v7383_v54, 3  ;;  %v6654_v1 = vsel %vm2708_vm0, %v6651_v10, %v6653_v53  ;;  %v9821_v54 = vld [vmem:[#allocation2 + $0x118] sm:$0xff] }
 0x6fc   : > { %v6494_v42 = vpop.f32.mrf.mxu2  ;;  %v6354_v36 = vsel %vm2316_vm1, %v6344_v41, %v6353_v19  ;;  %v6356_v35 = vshrl.u32 %v9821_v54, 16  ;;  %v6359_v9 = vshll.u32 %v9821_v54, 16 }
 0x6fd   : > { %12709 = vst [vmem:[#allocation49_spill] sm:$0xff] %v12078_v6  ;;  %v6578_v8 = vadd.f32 %v6494_v42, %v11724_v39  ;;  %v7038_v6 = vsel %vm2708_vm0, %v7035_v40, %v7037_v34 }
 0x6fe   : > { %v7138_v45 = vpop.f32.mrf.mxu0 }
 0x6ff   : > { %v6836_v18 = vadd.f32 %v6752_v3, %v6578_v8  ;;  %v7386_v3 = vor.u32 %v7385_v50, %v7382_v2 }
 0x700   : > { %v7529_v29 = vpop.f32.mrf.mxu1 }
 0x701   : > { %v7220_v16 = vadd.f32 %v7136_v12, %v6836_v18  ;;  %v7387_v10 = vsel %vm3351_vm2, %v7377_v7, %v7386_v3  ;;  %v6655_v7 = vrot.slane %v9821_v54, 2 }
 0x703   : > { %v6754_v13 = vpop.f32.mrf.mxu3  ;;  %v12085_v30 = vadd.f32 %v7527_v38, %v7220_v16  ;;  %v12091_v38 = vld [vmem:[#allocation2 + $0x120] sm:$0xff]  ;;  %v6361_v16 = vrot.slane %v6359_v9, 2 }
 0x704   : > { %v6496_v39 = vpop.f32.mrf.mxu2 }
 0x705   : > { %v6579_v59 = vadd.f32 %v6496_v39, %v11740_v62 }
 0x706   : > { %v7141_v42 = vpop.f32.mrf.mxu0 }
 0x707   : > { %v6837_v37 = vadd.f32 %v6754_v13, %v6579_v59  ;;  %v6358_v13 = vrot.slane %v6356_v35, 1 }
 0x708   : > { %6796 = vmatmul.bf16.gmra.mxu3 %v6654_v1  ;;  %v7532_v28 = vpop.f32.mrf.mxu1  ;;  %v7039_v1 = vrot.slane %v12091_v38, 2 }
 0x709   : > { %7180 = vmatmul.bf16.gmra.mxu0 %v7038_v6  ;;  %v7221_v8 = vadd.f32 %v7138_v45, %v6837_v37  ;;  %6538 = vmatmul.bf16.gmra.mxu2 %v6354_v36  ;;  %v7389_v6 = vshrl.u32 %v12091_v38, 16  ;;  %v7392_v45 = vshll.u32 %v12091_v38, 16  ;;  %v9692_v37 = vld [vmem:[%s9984_s28 + $0x208] sm:$0xff] }
 0x70a   : > { %7772 = vmatpush.bf16.msra.mxu2 %v9692_v37  ;;  %v7040_v35 = vsel %vm2708_vm0, %v7037_v34, %v7039_v1 }
 0x70b   : > { %v6757_v12 = vpop.f32.mrf.mxu3  ;;  %v12093_v40 = vadd.f32 %v7529_v29, %v7221_v8  ;;  %7571 = vmatmul.bf16.gmra.mxu1 %v7387_v10  ;;  %v7391_v59 = vrot.slane %v7389_v6, 2  ;;  %v7394_v36 = vrot.slane %v7392_v45, 3  ;;  %v6362_v8 = vor.u32 %v6361_v16, %v6358_v13  ;;  %v9822_v16 = vld [vmem:[#allocation2 + $0x120] sm:$0xff] }
 0x70c   : > { %v6499_v62 = vpop.f32.mrf.mxu2  ;;  %v6368_v34 = vshll.u32 %v9822_v16, 16  ;;  %v6657_v37 = vrot.slane %v9822_v16, 2 }
 0x70d   : > { %v6580_v41 = vadd.f32 %v6499_v62, %v11752_v27  ;;  %v6656_v27 = vsel %vm2708_vm0, %v6653_v53, %v6655_v7  ;;  %v6363_v9 = vsel %vm2316_vm1, %v6353_v19, %v6362_v8 }
 0x70e   : > { %v7143_v18 = vpop.f32.mrf.mxu0 }
 0x70f   : > { %v6838_v2 = vadd.f32 %v6757_v12, %v6580_v41  ;;  %v7395_v12 = vor.u32 %v7394_v36, %v7391_v59  ;;  %v6370_v36 = vrot.slane %v6368_v34, 2 }
 0x710   : > { %v7534_v29 = vpop.f32.mrf.mxu1 }
 0x711   : > { %v7222_v39 = vadd.f32 %v7141_v42, %v6838_v2  ;;  %v7396_v53 = vsel %vm3351_vm2, %v7386_v3, %v7395_v12  ;;  %v6365_v2 = vshrl.u32 %v9822_v16, 16 }
 0x713   : > { %v6759_v50 = vpop.f32.mrf.mxu3  ;;  %v12101_v10 = vadd.f32 %v7532_v28, %v7222_v39  ;;  %v12107_v28 = vld [vmem:[#allocation2 + $0x128] sm:$0xff] }
 0x714   : > { %v6501_v62 = vpop.f32.mrf.mxu2  ;;  %v7401_v59 = vshll.u32 %v12107_v28, 16 }
 0x715   : > { %v6581_v54 = vadd.f32 %v6501_v62, %v11770_v46  ;;  %v7041_v62 = vrot.slane %v12107_v28, 2 }
 0x716   : > { %v7146_v6 = vpop.f32.mrf.mxu0 }
 0x717   : > { %v6839_v42 = vadd.f32 %v6759_v50, %v6581_v54  ;;  %v7398_v50 = vshrl.u32 %v12107_v28, 16 }
 0x718   : > { %6801 = vmatmul.bf16.gmra.mxu3 %v6656_v27  ;;  %v7537_v13 = vpop.f32.mrf.mxu1 }
 0x719   : > { %7185 = vmatmul.bf16.gmra.mxu0 %v7040_v35  ;;  %v7223_v45 = vadd.f32 %v7143_v18, %v6839_v42  ;;  %6543 = vmatmul.bf16.gmra.mxu2 %v6363_v9  ;;  %v6367_v18 = vrot.slane %v6365_v2, 1  ;;  %v7400_v54 = vrot.slane %v7398_v50, 2  ;;  %v7403_v9 = vrot.slane %v7401_v59, 3 }
 0x71b   : > { %v6762_v41 = vpop.f32.mrf.mxu3  ;;  %v12109_v39 = vadd.f32 %v7534_v29, %v7223_v45  ;;  %7576 = vmatmul.bf16.gmra.mxu1 %v7396_v53  ;;  %v6371_v42 = vor.u32 %v6370_v36, %v6367_v18  ;;  %v6658_v45 = vsel %vm2708_vm0, %v6655_v7, %v6657_v37  ;;  %v12122_v7 = vld [vmem:[#allocation2 + $0x130] sm:$0xff] }
 0x71c   : > { %v6504_v46 = vpop.f32.mrf.mxu2 }
 0x71d   : > { %12710 = vst [vmem:[#allocation50_spill] sm:$0xff] %v12109_v39  ;;  %v6582_v19 = vadd.f32 %v6504_v46, %v11782_v20  ;;  %v7042_v39 = vsel %vm2708_vm0, %v7039_v1, %v7041_v62  ;;  %v6372_v16 = vsel %vm2316_vm1, %v6362_v8, %v6371_v42  ;;  %v7407_v8 = vshrl.u32 %v12122_v7, 16 }
 0x71e   : > { %v7148_v29 = vpop.f32.mrf.mxu0 }
 0x71f   : > { %v6840_v3 = vadd.f32 %v6762_v41, %v6582_v19  ;;  %v7404_v41 = vor.u32 %v7403_v9, %v7400_v54 }
 0x720   : > { %v7539_v46 = vpop.f32.mrf.mxu1 }
 0x721   : > { %v7224_v35 = vadd.f32 %v7146_v6, %v6840_v3  ;;  %v7405_v50 = vsel %vm3351_vm2, %v7395_v12, %v7404_v41 }
 0x723   : > { %v6764_v27 = vpop.f32.mrf.mxu3  ;;  %v12116_v53 = vadd.f32 %v7537_v13, %v7224_v35  ;;  %v9823_v13 = vld [vmem:[#allocation2 + $0x128] sm:$0xff] }
 0x724   : > { %v6506_v20 = vpop.f32.mrf.mxu2  ;;  %v6374_v59 = vshrl.u32 %v9823_v13, 16  ;;  %v6377_v18 = vshll.u32 %v9823_v13, 16  ;;  %v6659_v12 = vrot.slane %v9823_v13, 2  ;;  %v9691_v13 = vld [vmem:[%s9984_s28 + $0x200] sm:$0xff] }
 0x725   : > { %v6583_v2 = vadd.f32 %v6506_v20, %v11798_v24  ;;  %7773 = vmatpush.bf16.msra.mxu2 %v9691_v13 }
 0x726   : > { %v7151_v24 = vpop.f32.mrf.mxu0  ;;  %v6376_v35 = vrot.slane %v6374_v59, 1  ;;  %v6379_v54 = vrot.slane %v6377_v18, 2 }
 0x727   : > { %v6841_v34 = vadd.f32 %v6764_v27, %v6583_v2 }
 0x728   : > { %6806 = vmatmul.bf16.gmra.mxu3 %v6658_v45  ;;  %v7542_v27 = vpop.f32.mrf.mxu1  ;;  %v7043_v45 = vrot.slane %v12122_v7, 2 }
 0x729   : > { %7190 = vmatmul.bf16.gmra.mxu0 %v7042_v39  ;;  %v7225_v19 = vadd.f32 %v7148_v29, %v6841_v34  ;;  %6548 = vmatmul.bf16.gmra.mxu2 %v6372_v16  ;;  %v7410_v39 = vshll.u32 %v12122_v7, 16  ;;  %v6380_v16 = vor.u32 %v6379_v54, %v6376_v35  ;;  %v6660_v34 = vsel %vm2708_vm0, %v6657_v37, %v6659_v12 }
 0x72b   : > { %v6767_v6 = vpop.f32.mrf.mxu3  ;;  %v12124_v36 = vadd.f32 %v7539_v46, %v7225_v19  ;;  %7581 = vmatmul.bf16.gmra.mxu1 %v7405_v50  ;;  %v7409_v46 = vrot.slane %v7407_v8, 2  ;;  %v7412_v2 = vrot.slane %v7410_v39, 3  ;;  %v7044_v50 = vsel %vm2708_vm0, %v7041_v62, %v7043_v45  ;;  %v9824_v62 = vld [vmem:[#allocation2 + $0x130] sm:$0xff] }
 0x72c   : > { %v6509_v1 = vpop.f32.mrf.mxu2  ;;  %v6383_v35 = vshrl.u32 %v9824_v62, 16 }
 0x72d   : > { %v6584_v3 = vadd.f32 %v6509_v1, %v11810_v57  ;;  %v7413_v18 = vor.u32 %v7412_v2, %v7409_v46  ;;  %v6381_v1 = vsel %vm2316_vm1, %v6371_v42, %v6380_v16 }
 0x72e   : > { %v6385_v46 = vrot.slane %v6383_v35, 1  ;;  %v12157_v35 = vld [vmem:[#allocation2 + $0x140] sm:$0xff] }
 0x72f   : > { %v6842_v9 = vadd.f32 %v6767_v6, %v6584_v3  ;;  %v7153_v6 = vpop.f32.mrf.mxu0  ;;  %v7414_v37 = vsel %vm3351_vm2, %v7404_v41, %v7413_v18  ;;  %12712 = vst [vmem:[#allocation52_spill] sm:$0xff] %v12157_v35 }
 0x731   : > { %v7226_v20 = vadd.f32 %v7151_v24, %v6842_v9  ;;  %v7544_v24 = vpop.f32.mrf.mxu1 }
 0x733   : > { %v6769_v29 = vpop.f32.mrf.mxu3  ;;  %v12131_v57 = vadd.f32 %v7542_v27, %v7226_v20  ;;  %v12138_v27 = vld [vmem:[#allocation2 + $0x138] sm:$0xff] }
 0x734   : > { %v6511_v19 = vpop.f32.mrf.mxu2  ;;  %12711 = vst [vmem:[#allocation51_spill] sm:$0xff] %v12138_v27  ;;  %v7419_v20 = vshll.u32 %v12138_v27, 16 }
 0x735   : > { %v6585_v59 = vadd.f32 %v6511_v19, %v11826_v55  ;;  %v6386_v55 = vshll.u32 %v9824_v62, 16 }
 0x736   : > { %v7421_v13 = vrot.slane %v7419_v20, 3 }
 0x737   : > { %v6843_v3 = vadd.f32 %v6769_v29, %v6585_v59  ;;  %v7416_v29 = vshrl.u32 %v12138_v27, 16  ;;  %v6388_v2 = vrot.slane %v6386_v55, 2  ;;  %v9825_v55 = vld [vmem:[#allocation2 + $0x138] sm:$0xff] }
 0x738   : > { %6811 = vmatmul.bf16.gmra.mxu3 %v6660_v34  ;;  %v6661_v34 = vrot.slane %v9824_v62, 2 }
 0x739   : > { %7195 = vmatmul.bf16.gmra.mxu0 %v7044_v50  ;;  %v7227_v39 = vadd.f32 %v7153_v6, %v6843_v3  ;;  %6553 = vmatmul.bf16.gmra.mxu2 %v6381_v1  ;;  %v7045_v50 = vrot.slane %v12138_v27, 2  ;;  %v7418_v59 = vrot.slane %v7416_v29, 2  ;;  %v6389_v6 = vor.u32 %v6388_v2, %v6385_v46 }
 0x73a   : > { %v6662_v1 = vsel %vm2708_vm0, %v6659_v12, %v6661_v34  ;;  %v6395_v12 = vshll.u32 %v9825_v55, 16  ;;  %v7428_v29 = vshll.u32 %v12157_v35, 16  ;;  %v6663_v46 = vrot.slane %v9825_v55, 2 }
 0x73b   : > { %v6772_v8 = vpop.f32.mrf.mxu3  ;;  %v12140_v54 = vadd.f32 %v7544_v24, %v7227_v39  ;;  %7586 = vmatmul.bf16.gmra.mxu1 %v7414_v37  ;;  %v7422_v39 = vor.u32 %v7421_v13, %v7418_v59  ;;  %v6219_v59 = vld [vmem:[#allocation2 + $0x140] sm:$0x3]  ;;  %v7047_v13 = vrot.slane %v12157_v35, 2 }
 0x73c   : > { %v6514_v9 = vpop.f32.mrf.mxu2 }
 0x73d   : > { %v6586_v42 = vadd.f32 %v6514_v9, %v11836_v11  ;;  %v7046_v11 = vsel %vm2708_vm0, %v7043_v45, %v7045_v50  ;;  %v7423_v62 = vsel %vm3351_vm2, %v7413_v18, %v7422_v39  ;;  %v6392_v9 = vshrl.u32 %v9825_v55, 16 }
 0x73e   : > { %v7048_v27 = vsel %vm2708_vm0, %v7045_v50, %v7047_v13 }
 0x73f   : > { %v12145_v19 = vadd.f32 %v6772_v8, %v6586_v42  ;;  %v6390_v8 = vsel %vm2316_vm1, %v6380_v16, %v6389_v6  ;;  %v6394_v20 = vrot.slane %v6392_v9, 1  ;;  %v6397_v16 = vrot.slane %v6395_v12, 2  ;;  %v6904_v9 = vld [vmem:[#allocation2 + $0x148] sm:$0x3] }
 0x743   : > { %v12147_v41 = vpop.f32.mrf.mxu3 }
 0x744   : > { %v6516_v3 = vpop.f32.mrf.mxu2 }
 0x745   : > { %v12153_v24 = vadd.f32 %v6516_v3, %v11852_v63  ;;  %v7425_v63 = vshrl.u32 %v12157_v35, 16  ;;  %v7430_v3 = vrot.slane %v7428_v29, 3  ;;  %v9699_v35 = vld [vmem:[%s9979_s25] sm:$0xff] }
 0x746   : > { %8032 = vmatpush.bf16.msra.mxu3 %v9699_v35 }
 0x748   : > { %6816 = vmatmul.bf16.gmra.mxu3 %v6662_v1  ;;  %v7427_v1 = vrot.slane %v7425_v63, 2 }
 0x749   : > { %7200 = vmatmul.bf16.gmra.mxu0 %v7046_v11  ;;  %6558 = vmatmul.bf16.gmra.mxu2 %v6390_v8  ;;  %v6398_v11 = vor.u32 %v6397_v16, %v6394_v20  ;;  %v6664_v8 = vsel %vm2708_vm0, %v6661_v34, %v6663_v46  ;;  %v6994_v20 = vunpack.c.l.b16 %v6904_v9 }
 0x74b   : > { %v6777_v37 = vpop.f32.mrf.mxu3  ;;  %7591 = vmatmul.bf16.gmra.mxu1 %v7423_v62  ;;  %v7252_v62 = vld [vmem:[#allocation2 + $0x148] sm:$0x7] }
 0x74c   : > { %v6519_v42 = vpop.f32.mrf.mxu2  ;;  %v7270_v12 = vunpack.c.l.b16 %v7252_v62 }
 0x74d   : > { %v6588_v45 = vadd.f32 %v6519_v42, %v11868_v60  ;;  %v6237_v60 = vunpack.c.l.b16 %v6219_v59 }
 0x74e   : > { %v12174_v16 = vpack.c.b16 %v7270_v12, %v7270_v12 }
 0x74f   : > { %v12162_v2 = vadd.f32 %v6777_v37, %v6588_v45  ;;  %v7431_v37 = vor.u32 %v7430_v3, %v7427_v1  ;;  %v6399_v45 = vsel %vm2316_vm1, %v6389_v6, %v6398_v11  ;;  %v6238_v63 = vpack.c.b16 %v6237_v60, %v6237_v60 }
 0x750   : > { %v7434_v3 = vshrl.u32 %v12174_v16, 16  ;;  %v7437_v6 = vshll.u32 %v12174_v16, 16 }
 0x751   : > { %12713 = vst [vmem:[#allocation53_spill] sm:$0xff] %v12162_v2  ;;  %v7432_v34 = vsel %vm3351_vm2, %v7422_v39, %v7431_v37  ;;  %v6401_v50 = vshrl.u32 %v6238_v63, 16  ;;  %v6404_v59 = vshll.u32 %v6238_v63, 16  ;;  %v6665_v62 = vrot.slane %v6238_v63, 2 }
 0x752   : > { %v7436_v12 = vrot.slane %v7434_v3, 2 }
 0x753   : > { %v12164_v18 = vpop.f32.mrf.mxu3  ;;  %v6406_v60 = vrot.slane %v6404_v59, 2 }
 0x754   : > { %v6521_v42 = vpop.f32.mrf.mxu2 }
 0x755   : > { %v12170_v55 = vadd.f32 %v6521_v42, %v11886_v43 }
 0x758   : > { %6821 = vmatmul.bf16.gmra.mxu3 %v6664_v8  ;;  %v7013_v8 = vpack.c.b16 %v6994_v20, %v6994_v20  ;;  %v6666_v20 = vsel %vm2708_vm0, %v6663_v46, %v6665_v62 }
 0x759   : > { %7205 = vmatmul.bf16.gmra.mxu0 %v7048_v27  ;;  %6563 = vmatmul.bf16.gmra.mxu2 %v6399_v45  ;;  %v6403_v27 = vrot.slane %v6401_v50, 1  ;;  %v7439_v45 = vrot.slane %v7437_v6, 3 }
 0x75a   : > { %v7049_v9 = vrot.slane %v7013_v8, 2 }
 0x75b   : > { %v6782_v29 = vpop.f32.mrf.mxu3  ;;  %7596 = vmatmul.bf16.gmra.mxu1 %v7432_v34  ;;  %v6407_v2 = vor.u32 %v6406_v60, %v6403_v27  ;;  %v7440_v35 = vor.u32 %v7439_v45, %v7436_v12 }
 0x75c   : > { %v6524_v43 = vpop.f32.mrf.mxu2 }
 0x75d   : > { %v6590_v1 = vadd.f32 %v6524_v43, %v11899_v44  ;;  %v7050_v44 = vsel %vm2708_vm0, %v7047_v13, %v7049_v9  ;;  %v6408_v63 = vsel %vm2316_vm1, %v6398_v11, %v6407_v2  ;;  %v7441_v59 = vsel %vm3351_vm2, %v7431_v37, %v7440_v35  ;;  %v9826_v2 = vld [vmem:[#allocation2 + $0xc0] sm:$0xff] }
 0x75e   : > { %v12714_v13 = vunpack.c.l.b16 %v11901_v25  ;;  %v7664_v11 = vrot.slane %v9826_v2, 3 }
 0x75f   : > { %v12180_v42 = vadd.f32 %v6782_v29, %v6590_v1  ;;  %v7643_v29 = vld [vmem:[#allocation2 + $0xb8] sm:$0x8] }
 0x760   : > { %v7661_v8 = vunpack.c.l.b16 %v7643_v29 }
 0x762   : > { %v7662_v3 = vpack.c.b16 %v12714_v13, %v7661_v8  ;;  %v9828_v8 = vld [vmem:[#allocation2 + $0xd0] sm:$0xff] }
 0x763   : > { %v12182_v39 = vpop.f32.mrf.mxu3 }
 0x764   : > { %v6526_v34 = vpop.f32.mrf.mxu2  ;;  %v7663_v27 = vrot.slane %v7662_v3, 3 }
 0x765   : > { %v12187_v43 = vadd.f32 %v6526_v34, %v11913_v21 }
 0x766   : > { %v7665_v37 = vsel %vm3743_vm3, %v7663_v27, %v7664_v11 }
 0x768   : > { %6826 = vmatmul.bf16.gmra.mxu3 %v6666_v20  ;;  %v9827_v20 = vld [vmem:[#allocation2 + $0xc8] sm:$0xff] }
 0x769   : > { %7210 = vmatmul.bf16.gmra.mxu0 %v7050_v44  ;;  %6568 = vmatmul.bf16.gmra.mxu2 %v6408_v63  ;;  %v7666_v34 = vrot.slane %v9827_v20, 3 }
 0x76b   : > { %v6787_v50 = vpop.f32.mrf.mxu3  ;;  %7601 = vmatmul.bf16.gmra.mxu1 %v7441_v59 }
 0x76c   : > { %v6529_v1 = vpop.f32.mrf.mxu2 }
 0x76d   : > { %v6592_v46 = vadd.f32 %v6529_v1, %v11930_v15  ;;  %v7668_v1 = vrot.slane %v9828_v8, 3 }
 0x76f   : > { %v12194_v21 = vadd.f32 %v6787_v50, %v6592_v46 }
 0x773   : > { %v12196_v6 = vpop.f32.mrf.mxu3 }
 0x774   : > { %v6531_v60 = vpop.f32.mrf.mxu2 }
 0x775   : > { %v12199_v62 = vadd.f32 %v6531_v60, %v11935_v22  ;;  %v7667_v22 = vsel %vm3743_vm3, %v7664_v11, %v7666_v34  ;;  %v9829_v60 = vld [vmem:[#allocation2 + $0xd8] sm:$0xff] }
 0x779   : > { %7774 = vmatmul.bf16.vlgmr.msra.gmra.mxu2 %v7665_v37  ;;  %v7670_v37 = vrot.slane %v9829_v60, 3 }
 0x77b   : > { %v6792_v9 = vpop.f32.mrf.mxu3 }
 0x77c   : > { %v6534_v12 = vpop.f32.mrf.mxu2 }
 0x77d   : > { %v6594_v15 = vadd.f32 %v6534_v12, %v11944_v31 }
 0x77f   : > { %v12203_v25 = vadd.f32 %v6792_v9, %v6594_v15 }
 0x783   : > { %v12205_v45 = vpop.f32.mrf.mxu3 }
 0x784   : > { %v6536_v44 = vpop.f32.mrf.mxu2 }
 0x785   : > { %v12208_v35 = vadd.f32 %v6536_v44, %v11949_v5  ;;  %v7669_v5 = vsel %vm3743_vm3, %v7666_v34, %v7668_v1 }
 0x789   : > { %7779 = vmatmul.bf16.gmra.mxu2 %v7667_v22  ;;  %v9830_v22 = vld [vmem:[#allocation2 + $0xe0] sm:$0xff] }
 0x78b   : > { %v6797_v63 = vpop.f32.mrf.mxu3 }
 0x78c   : > { %v6539_v29 = vpop.f32.mrf.mxu2 }
 0x78d   : > { %v6596_v50 = vadd.f32 %v6539_v29, %v11957_v49 }
 0x78f   : > { %v12212_v59 = vadd.f32 %v6797_v63, %v6596_v50  ;;  %v7672_v63 = vrot.slane %v9830_v22, 3 }
 0x793   : > { %v12214_v31 = vpop.f32.mrf.mxu3 }
 0x794   : > { %v6541_v46 = vpop.f32.mrf.mxu2 }
 0x795   : > { %v12217_v13 = vadd.f32 %v6541_v46, %v11962_v48  ;;  %v7671_v48 = vsel %vm3743_vm3, %v7668_v1, %v7670_v37 }
 0x799   : > { %7784 = vmatmul.bf16.gmra.mxu2 %v7669_v5 }
 0x79b   : > { %v6802_v3 = vpop.f32.mrf.mxu3 }
 0x79c   : > { %v6544_v27 = vpop.f32.mrf.mxu2 }
 0x79d   : > { %v6598_v2 = vadd.f32 %v6544_v27, %v11970_v56 }
 0x79f   : > { %v12221_v11 = vadd.f32 %v6802_v3, %v6598_v2  ;;  %v9831_v3 = vld [vmem:[#allocation2 + $0xe8] sm:$0xff] }
 0x7a0   : > { %v7674_v27 = vrot.slane %v9831_v3, 3 }
 0x7a3   : > { %v12223_v49 = vpop.f32.mrf.mxu3 }
 0x7a4   : > { %v6546_v9 = vpop.f32.mrf.mxu2 }
 0x7a5   : > { %v12226_v12 = vadd.f32 %v6546_v9, %v11976_v17  ;;  %v7673_v17 = vsel %vm3743_vm3, %v7670_v37, %v7672_v63 }
 0x7a9   : > { %7789 = vmatmul.bf16.gmra.mxu2 %v7671_v48 }
 0x7ab   : > { %v6807_v15 = vpop.f32.mrf.mxu3 }
 0x7ac   : > { %v6549_v20 = vpop.f32.mrf.mxu2 }
 0x7ad   : > { %v6600_v34 = vadd.f32 %v6549_v20, %v11979_v0  ;;  %v7676_v20 = vrot.slane %v12001_v23, 3 }
 0x7af   : > { %v12230_v44 = vadd.f32 %v6807_v15, %v6600_v34 }
 0x7b3   : > { %v12232_v56 = vpop.f32.mrf.mxu3 }
 0x7b4   : > { %v6551_v29 = vpop.f32.mrf.mxu2 }
 0x7b5   : > { %v12235_v50 = vadd.f32 %v6551_v29, %v11984_v33  ;;  %v7675_v33 = vsel %vm3743_vm3, %v7672_v63, %v7674_v27 }
 0x7b9   : > { %7794 = vmatmul.bf16.gmra.mxu2 %v7673_v17  ;;  %v12715_v17 = vld [vmem:[#allocation7_spill] sm:$0xff] }
 0x7bb   : > { %v6812_v8 = vpop.f32.mrf.mxu3 }
 0x7bc   : > { %v6554_v1 = vpop.f32.mrf.mxu2 }
 0x7bd   : > { %v6602_v46 = vadd.f32 %v6554_v1, %v11992_v32 }
 0x7bf   : > { %v12239_v5 = vadd.f32 %v6812_v8, %v6602_v46  ;;  %v12718_v46 = vld [vmem:[#allocation6_spill] sm:$0xff] }
 0x7c0   : > { %v7678_v3 = vrot.slane %v12718_v46, 3 }
 0x7c3   : > { %v12241_v0 = vpop.f32.mrf.mxu3 }
 0x7c4   : > { %v6556_v2 = vpop.f32.mrf.mxu2 }
 0x7c5   : > { %v12244_v60 = vadd.f32 %v6556_v2, %v11998_v4  ;;  %v7677_v4 = vsel %vm3743_vm3, %v7674_v27, %v7676_v20 }
 0x7c9   : > { %7799 = vmatmul.bf16.gmra.mxu2 %v7675_v33  ;;  %v12719_v33 = vld [vmem:[#allocation8_spill] sm:$0xff] }
 0x7cb   : > { %v6817_v9 = vpop.f32.mrf.mxu3 }
 0x7cc   : > { %v6559_v37 = vpop.f32.mrf.mxu2 }
 0x7cd   : > { %v6604_v48 = vadd.f32 %v6559_v37, %v12006_v52  ;;  %v12720_v37 = vld [vmem:[#allocation46_spill] sm:$0xff] }
 0x7cf   : > { %v12248_v15 = vadd.f32 %v6817_v9, %v6604_v48 }
 0x7d3   : > { %v12250_v32 = vpop.f32.mrf.mxu3 }
 0x7d4   : > { %v6561_v34 = vpop.f32.mrf.mxu2 }
 0x7d5   : > { %v12254_v22 = vadd.f32 %v6561_v34, %v12011_v58  ;;  %v7679_v58 = vsel %vm3743_vm3, %v7676_v20, %v7678_v3 }
 0x7d9   : > { %7804 = vmatmul.bf16.gmra.mxu2 %v7677_v4  ;;  %v12721_v4 = vld [vmem:[#allocation45_spill] sm:$0xff] }
 0x7db   : > { %v6822_v29 = vpop.f32.mrf.mxu3 }
 0x7dc   : > { %v6564_v63 = vpop.f32.mrf.mxu2 }
 0x7dd   : > { %v6606_v8 = vadd.f32 %v6564_v63, %v12715_v17  ;;  %v12722_v17 = vld [vmem:[#allocation47_spill] sm:$0xff] }
 0x7df   : > { %v12258_v1 = vadd.f32 %v6822_v29, %v6606_v8  ;;  %v7680_v29 = vrot.slane %v12721_v4, 3 }
 0x7e1   : > { %12716 = vst [vmem:[#allocation7_spill] sm:$0xff] %v12258_v1  ;;  %v7681_v46 = vsel %vm3743_vm3, %v7678_v3, %v7680_v29  ;;  %v12723_v1 = vld [vmem:[#allocation48_spill] sm:$0xff]  ;;  %v7684_v3 = vrot.slane %v12055_v51, 3 }
 0x7e3   : > { %v12260_v52 = vpop.f32.mrf.mxu3 }
 0x7e4   : > { %12717 = vst [vmem:[#allocation54_spill] sm:$0xff] %v12260_v52  ;;  %v6566_v2 = vpop.f32.mrf.mxu2 }
 0x7e5   : > { %v12264_v23 = vadd.f32 %v6566_v2, %v12719_v33  ;;  %v7682_v33 = vrot.slane %v12042_v61, 3  ;;  %v12724_v61 = vld [vmem:[#allocation49_spill] sm:$0xff] }
 0x7e9   : > { %7809 = vmatmul.bf16.gmra.mxu2 %v7679_v58 }
 0x7eb   : > { %v6827_v27 = vpop.f32.mrf.mxu3 }
 0x7ec   : > { %v6569_v9 = vpop.f32.mrf.mxu2 }
 0x7ed   : > { %v6608_v48 = vadd.f32 %v6569_v9, %v12720_v37  ;;  %v7683_v9 = vsel %vm3743_vm3, %v7680_v29, %v7682_v33 }
 0x7ef   : > { %v12268_v34 = vadd.f32 %v6827_v27, %v6608_v48 }
 0x7f4   : > { %v6571_v63 = vpop.f32.mrf.mxu2 }
 0x7f5   : > { %v12272_v8 = vadd.f32 %v6571_v63, %v12722_v17 }
 0x7f9   : > { %7814 = vmatmul.bf16.gmra.mxu2 %v7681_v46 }
 0x7fc   : > { %v7775_v2 = vpop.f32.mrf.mxu2 }
 0x7fd   : > { %v7865_v20 = vadd.f32 %v7775_v2, %v12049_v47  ;;  %v7685_v47 = vsel %vm3743_vm3, %v7682_v33, %v7684_v3 }
 0x7ff   : > { %v7901_v27 = vmax.f32 %v7865_v20, 0.0  ;;  %v7686_v20 = vrot.slane %v12076_v26, 3 }
 0x804   : > { %v7777_v58 = vpop.f32.mrf.mxu2 }
 0x805   : > { %v7866_v52 = vadd.f32 %v7777_v58, %v12723_v1 }
 0x807   : > { %v7902_v37 = vmax.f32 %v7866_v52, 0.0 }
 0x809   : > { %v7937_v48 = vpack.c.bf16 %v7902_v37, %v7901_v27  ;;  %7819 = vmatmul.bf16.gmra.mxu2 %v7683_v9  ;;  %v7687_v27 = vsel %vm3743_vm3, %v7684_v3, %v7686_v20 }
 0x80b   : > { %9427 = vmatmul.msk.bf16.vlgmr.msra.gmra.mxu3 %vm4052_vm4, %v7937_v48 }
 0x80c   : > { %v7780_v4 = vpop.f32.mrf.mxu2 }
 0x80d   : > { %v7867_v63 = vadd.f32 %v7780_v4, %v12070_v14  ;;  %v7156_v14 = vpop.f32.mrf.mxu0  ;;  %v7547_v4 = vpop.f32.mrf.mxu1 }
 0x80f   : > { %v7903_v2 = vmax.f32 %v7867_v63, 0.0 }
 0x814   : > { %v7782_v17 = vpop.f32.mrf.mxu2 }
 0x815   : > { %v7868_v46 = vadd.f32 %v7782_v17, %v12724_v61  ;;  %v7158_v17 = vpop.f32.mrf.mxu0  ;;  %v7688_v61 = vrot.slane %v12091_v38, 3 }
 0x817   : > { %v7904_v1 = vmax.f32 %v7868_v46, 0.0 }
 0x819   : > { %7824 = vmatmul.bf16.gmra.mxu2 %v7685_v47  ;;  %v7938_v29 = vpack.c.bf16 %v7904_v1, %v7903_v2  ;;  %v12725_v47 = vld [vmem:[#allocation50_spill] sm:$0xff]  ;;  %v7689_v2 = vsel %vm3743_vm3, %v7686_v20, %v7688_v61 }
 0x81b   : > { %9428 = vmatmul.msk.bf16.gmra.mxu3 %vm4052_vm4, %v7938_v29 }
 0x81c   : > { %v7785_v52 = vpop.f32.mrf.mxu2 }
 0x81d   : > { %v7869_v58 = vadd.f32 %v7785_v52, %v12085_v30  ;;  %v7549_v30 = vpop.f32.mrf.mxu1  ;;  %v7161_v52 = vpop.f32.mrf.mxu0 }
 0x81f   : > { %v7905_v37 = vmax.f32 %v7869_v58, 0.0 }
 0x824   : > { %v7787_v9 = vpop.f32.mrf.mxu2 }
 0x825   : > { %v7870_v51 = vadd.f32 %v7787_v9, %v12093_v40  ;;  %v7552_v9 = vpop.f32.mrf.mxu1 }
 0x827   : > { %v7906_v48 = vmax.f32 %v7870_v51, 0.0  ;;  %v7690_v51 = vrot.slane %v12107_v28, 3  ;;  %v7692_v28 = vrot.slane %v12122_v7, 3  ;;  %v7228_v7 = vadd.f32 %v7156_v14, %v12145_v19 }
 0x829   : > { %7829 = vmatmul.bf16.gmra.mxu2 %v7687_v27  ;;  %v7939_v33 = vpack.c.bf16 %v7906_v48, %v7905_v37  ;;  %v7691_v48 = vsel %vm3743_vm3, %v7688_v61, %v7690_v51 }
 0x82b   : > { %9429 = vmatmul.msk.bf16.gmra.mxu3 %vm4052_vm4, %v7939_v33 }
 0x82c   : > { %v7790_v63 = vpop.f32.mrf.mxu2 }
 0x82d   : > { %v7871_v26 = vadd.f32 %v7790_v63, %v12101_v10  ;;  %v7163_v10 = vpop.f32.mrf.mxu0  ;;  %v7554_v63 = vpop.f32.mrf.mxu1 }
 0x82f   : > { %v7907_v3 = vmax.f32 %v7871_v26, 0.0 }
 0x834   : > { %v7792_v46 = vpop.f32.mrf.mxu2 }
 0x835   : > { %v7872_v40 = vadd.f32 %v7792_v46, %v12725_v47  ;;  %v7166_v47 = vpop.f32.mrf.mxu0 }
 0x837   : > { %v7908_v1 = vmax.f32 %v7872_v40, 0.0  ;;  %v7557_v40 = vpop.f32.mrf.mxu1 }
 0x839   : > { %7834 = vmatmul.bf16.gmra.mxu2 %v7689_v2  ;;  %v7940_v29 = vpack.c.bf16 %v7908_v1, %v7907_v3 }
 0x83b   : > { %9430 = vmatmul.msk.bf16.gmra.mxu3 %vm4052_vm4, %v7940_v29 }
 0x83c   : > { %v7795_v58 = vpop.f32.mrf.mxu2 }
 0x83d   : > { %v7873_v38 = vadd.f32 %v7795_v58, %v12116_v53  ;;  %v7168_v29 = vpop.f32.mrf.mxu0 }
 0x83f   : > { %v7909_v20 = vmax.f32 %v7873_v38, 0.0  ;;  %v6845_v38 = vadd.f32 %v12147_v41, %v12153_v24 }
 0x844   : > { %v7797_v27 = vpop.f32.mrf.mxu2 }
 0x845   : > { %v7874_v37 = vadd.f32 %v7797_v27, %v12124_v36  ;;  %v7693_v36 = vsel %vm3743_vm3, %v7690_v51, %v7692_v28  ;;  %v7559_v27 = vpop.f32.mrf.mxu1 }
 0x847   : > { %v7910_v33 = vmax.f32 %v7874_v37, 0.0 }
 0x849   : > { %7839 = vmatmul.bf16.gmra.mxu2 %v7691_v48  ;;  %v7941_v26 = vpack.c.bf16 %v7910_v33, %v7909_v20  ;;  %v7619_v48 = vadd.f32 %v7547_v4, %v7228_v7  ;;  %v7171_v20 = vpop.f32.mrf.mxu0  ;;  %v12727_v4 = vld [vmem:[#allocation53_spill] sm:$0xff] }
 0x84b   : > { %9431 = vmatmul.msk.bf16.gmra.mxu3 %vm4052_vm4, %v7941_v26 }
 0x84c   : > { %v7800_v46 = vpop.f32.mrf.mxu2 }
 0x84d   : > { %v7875_v53 = vadd.f32 %v7800_v46, %v12131_v57  ;;  %v7229_v57 = vadd.f32 %v7158_v17, %v6845_v38  ;;  %v7230_v17 = vadd.f32 %v7161_v52, %v12727_v4  ;;  %v12728_v38 = vld [vmem:[#allocation52_spill] sm:$0xff]  ;;  %v6849_v52 = vadd.f32 %v12182_v39, %v12187_v43  ;;  %v12321_v4 = vpop.f32.mrf.mxu3 }
 0x84f   : > { %v7911_v61 = vmax.f32 %v7875_v53, 0.0  ;;  %v7620_v51 = vadd.f32 %v7549_v30, %v7229_v57 }
 0x851   : > { %v7173_v19 = vpop.f32.mrf.mxu0 }
 0x854   : > { %v7802_v2 = vpop.f32.mrf.mxu2 }
 0x855   : > { %v7876_v3 = vadd.f32 %v7802_v2, %v12140_v54  ;;  %v12726_v54 = vld [vmem:[#allocation51_spill] sm:$0xff]  ;;  %v7562_v2 = vpop.f32.mrf.mxu1 }
 0x856   : > { %v7694_v33 = vrot.slane %v12726_v54, 3 }
 0x857   : > { %v7912_v1 = vmax.f32 %v7876_v3, 0.0 }
 0x858   : > { %v7695_v3 = vsel %vm3743_vm3, %v7692_v28, %v7694_v33 }
 0x859   : > { %7844 = vmatmul.bf16.gmra.mxu2 %v7693_v36  ;;  %v7942_v58 = vpack.c.bf16 %v7912_v1, %v7911_v61  ;;  %v6847_v61 = vadd.f32 %v12164_v18, %v12170_v55  ;;  %v7176_v54 = vpop.f32.mrf.mxu0 }
 0x85b   : > { %9432 = vmatmul.msk.bf16.gmra.mxu3 %vm4052_vm4, %v7942_v58  ;;  %v7231_v30 = vadd.f32 %v7163_v10, %v6847_v61  ;;  %v7621_v58 = vadd.f32 %v7552_v9, %v7230_v17  ;;  %v7232_v10 = vadd.f32 %v7166_v47, %v12180_v42  ;;  %v6851_v42 = vadd.f32 %v12196_v6, %v12199_v62 }
 0x85c   : > { %v7805_v37 = vpop.f32.mrf.mxu2  ;;  %v7234_v47 = vadd.f32 %v7171_v20, %v12194_v21  ;;  %v12730_v21 = vld [vmem:[#allocation9_spill] sm:$0xff] }
 0x85d   : > { %v7877_v26 = vadd.f32 %v7805_v37, %v7619_v48  ;;  %v7564_v1 = vpop.f32.mrf.mxu1  ;;  %v7696_v37 = vrot.slane %v12728_v38, 3  ;;  %v7622_v7 = vadd.f32 %v7554_v63, %v7231_v30  ;;  %v7233_v63 = vadd.f32 %v7168_v29, %v6849_v52  ;;  %v12729_v38 = vld [vmem:[#allocation10_spill] sm:$0xff] }
 0x85f   : > { %v7913_v36 = vmax.f32 %v7877_v26, 0.0 }
 0x864   : > { %v7807_v46 = vpop.f32.mrf.mxu2 }
 0x865   : > { %v7878_v53 = vadd.f32 %v7807_v46, %v7620_v51  ;;  %v7697_v51 = vsel %vm3743_vm3, %v7694_v33, %v7696_v37  ;;  %v7567_v46 = vpop.f32.mrf.mxu1 }
 0x867   : > { %v7914_v41 = vmax.f32 %v7878_v53, 0.0  ;;  %v7178_v53 = vpop.f32.mrf.mxu0 }
 0x869   : > { %v7943_v24 = vpack.c.bf16 %v7914_v41, %v7913_v36  ;;  %7849 = vmatmul.bf16.gmra.mxu2 %v7695_v3  ;;  %v7623_v3 = vadd.f32 %v7557_v40, %v7232_v10  ;;  %v7698_v36 = vrot.slane %v12174_v16, 3  ;;  %v7624_v41 = vadd.f32 %v7559_v27, %v7233_v63  ;;  %v9833_v10 = vld [vmem:[#allocation3 + $0x128] sm:$0xff] }
 0x86a   : > { %v7235_v27 = vadd.f32 %v7173_v19, %v6851_v42 }
 0x86b   : > { %9433 = vmatmul.msk.bf16.gmra.mxu3 %vm4052_vm4, %v7943_v24  ;;  %v7699_v17 = vsel %vm3743_vm3, %v7696_v37, %v7698_v36  ;;  %v9832_v37 = vld [vmem:[#allocation3 + $0x120] sm:$0xff] }
 0x86c   : > { %v7810_v14 = vpop.f32.mrf.mxu2 }
 0x86d   : > { %v7879_v28 = vadd.f32 %v7810_v14, %v7621_v58  ;;  %v7569_v24 = vpop.f32.mrf.mxu1 }
 0x86f   : > { %v7915_v26 = vmax.f32 %v7879_v28, 0.0  ;;  %v7181_v58 = vpop.f32.mrf.mxu0  ;;  %v7625_v28 = vadd.f32 %v7562_v2, %v7234_v47  ;;  %v6853_v2 = vadd.f32 %v12205_v45, %v12208_v35 }
 0x874   : > { %v7812_v57 = vpop.f32.mrf.mxu2 }
 0x875   : > { %v7880_v48 = vadd.f32 %v7812_v57, %v7622_v7  ;;  %v7572_v40 = vpop.f32.mrf.mxu1 }
 0x877   : > { %v7916_v18 = vmax.f32 %v7880_v48, 0.0  ;;  %v7626_v48 = vadd.f32 %v7564_v1, %v7235_v27 }
 0x879   : > { %v7944_v55 = vpack.c.bf16 %v7916_v18, %v7915_v26  ;;  %7854 = vmatmul.bf16.gmra.mxu2 %v7697_v51  ;;  %v7183_v26 = vpop.f32.mrf.mxu0 }
 0x87b   : > { %9434 = vmatmul.msk.bf16.gmra.mxu3 %vm4052_vm4, %v7944_v55 }
 0x87c   : > { %v7815_v9 = vpop.f32.mrf.mxu2 }
 0x87d   : > { %v7881_v33 = vadd.f32 %v7815_v9, %v7623_v3  ;;  %v7574_v9 = vpop.f32.mrf.mxu1  ;;  %v7236_v3 = vadd.f32 %v7176_v54, %v12203_v25  ;;  %v12732_v25 = vld [vmem:[#allocation11_spill] sm:$0xff] }
 0x87f   : > { %v7917_v39 = vmax.f32 %v7881_v33, 0.0  ;;  %v7237_v33 = vadd.f32 %v7178_v53, %v6853_v2 }
 0x881   : > { %v7186_v36 = vpop.f32.mrf.mxu0  ;;  %v7628_v42 = vadd.f32 %v7569_v24, %v7237_v33  ;;  %v9837_v33 = vld [vmem:[#allocation3 + $0x148] sm:$0xff] }
 0x884   : > { %v7817_v61 = vpop.f32.mrf.mxu2 }
 0x885   : > { %v7882_v14 = vadd.f32 %v7817_v61, %v7624_v41  ;;  %v12731_v61 = vld [vmem:[#allocation12_spill] sm:$0xff] }
 0x887   : > { %v7918_v43 = vmax.f32 %v7882_v14, 0.0 }
 0x889   : > { %v7945_v30 = vpack.c.bf16 %v7918_v43, %v7917_v39  ;;  %7859 = vmatmul.bf16.gmra.mxu2 %v7699_v17  ;;  %v7627_v17 = vadd.f32 %v7567_v46, %v7236_v3  ;;  %v9834_v39 = vld [vmem:[#allocation3 + $0x130] sm:$0xff]  ;;  %v6855_v46 = vadd.f32 %v12214_v31, %v12217_v13 }
 0x88b   : > { %9435 = vmatmul.msk.bf16.gmra.mxu3 %vm4052_vm4, %v7945_v30  ;;  %v7577_v30 = vpop.f32.mrf.mxu1 }
 0x88c   : > { %v7820_v16 = vpop.f32.mrf.mxu2 }
 0x88d   : > { %v7883_v51 = vadd.f32 %v7820_v16, %v7625_v28 }
 0x88e   : > { %v8034_v29 = vpop.f32.mrf.mxu3 }
 0x88f   : > { %v8124_v7 = vmul.f32 %v8034_v29, %v12729_v38  ;;  %v7919_v55 = vmax.f32 %v7883_v51, 0.0  ;;  %v7188_v38 = vpop.f32.mrf.mxu0 }
 0x891   : > { %v12329_v57 = vadd.f32 %v9832_v37, %v8124_v7  ;;  %v9835_v7 = vld [vmem:[#allocation3 + $0x138] sm:$0xff] }
 0x893   : > { %8196 = vst [vmem:[#allocation3 + $0x120] sm:$0xff] %v12329_v57  ;;  %v7579_v24 = vpop.f32.mrf.mxu1 }
 0x894   : > { %v7822_v6 = vpop.f32.mrf.mxu2 }
 0x895   : > { %v7884_v62 = vadd.f32 %v7822_v6, %v7626_v48  ;;  %v7238_v48 = vadd.f32 %v7181_v58, %v12212_v59  ;;  %v7239_v6 = vadd.f32 %v7183_v26, %v6855_v46  ;;  %v12734_v59 = vld [vmem:[#allocation14_spill] sm:$0xff] }
 0x896   : > { %v8036_v18 = vpop.f32.mrf.mxu3 }
 0x897   : > { %v7920_v52 = vmax.f32 %v7884_v62, 0.0  ;;  %v8125_v20 = vmul.f32 %v8036_v18, %v12730_v21  ;;  %v12733_v62 = vld [vmem:[#allocation13_spill] sm:$0xff] }
 0x899   : > { %v7946_v19 = vpack.c.bf16 %v7920_v52, %v7919_v55  ;;  %v12333_v63 = vadd.f32 %v9833_v10, %v8125_v20  ;;  %v7629_v55 = vadd.f32 %v7572_v40, %v7238_v48  ;;  %v9836_v52 = vld [vmem:[#allocation3 + $0x140] sm:$0xff]  ;;  %v7191_v20 = vpop.f32.mrf.mxu0  ;;  %v6857_v40 = vadd.f32 %v12223_v49, %v12226_v12  ;;  %v9839_v48 = vld [vmem:[#allocation3 + $0x158] sm:$0xff] }
 0x89b   : > { %8197 = vst [vmem:[#allocation3 + $0x128] sm:$0xff] %v12333_v63  ;;  %9436 = vmatmul.msk.bf16.gmra.mxu3 %vm4052_vm4, %v7946_v19  ;;  %v7630_v19 = vadd.f32 %v7574_v9, %v7239_v6  ;;  %v7582_v2 = vpop.f32.mrf.mxu1  ;;  %v6859_v6 = vadd.f32 %v12232_v56, %v12235_v50 }
 0x89c   : > { %v7825_v1 = vpop.f32.mrf.mxu2 }
 0x89d   : > { %v7885_v16 = vadd.f32 %v7825_v1, %v7627_v17  ;;  %v7240_v17 = vadd.f32 %v7186_v36, %v12221_v11  ;;  %v12736_v11 = vld [vmem:[#allocation16_spill] sm:$0xff] }
 0x89e   : > { %v8039_v41 = vpop.f32.mrf.mxu3 }
 0x89f   : > { %v8126_v14 = vmul.f32 %v8039_v41, %v12731_v61  ;;  %v7921_v29 = vmax.f32 %v7885_v16, 0.0  ;;  %v12735_v16 = vld [vmem:[#allocation15_spill] sm:$0xff] }
 0x8a1   : > { %v12341_v43 = vadd.f32 %v9834_v39, %v8126_v14  ;;  %v7193_v9 = vpop.f32.mrf.mxu0 }
 0x8a3   : > { %8198 = vst [vmem:[#allocation3 + $0x130] sm:$0xff] %v12341_v43 }
 0x8a4   : > { %v7827_v45 = vpop.f32.mrf.mxu2 }
 0x8a5   : > { %v7886_v35 = vadd.f32 %v7827_v45, %v7628_v42  ;;  %v7241_v42 = vadd.f32 %v7188_v38, %v6857_v40 }
 0x8a6   : > { %v8041_v47 = vpop.f32.mrf.mxu3 }
 0x8a7   : > { %v7922_v27 = vmax.f32 %v7886_v35, 0.0  ;;  %v8127_v54 = vmul.f32 %v8041_v47, %v12732_v25  ;;  %v7584_v35 = vpop.f32.mrf.mxu1  ;;  %v7631_v47 = vadd.f32 %v7577_v30, %v7240_v17  ;;  %v7632_v25 = vadd.f32 %v7579_v24, %v7241_v42 }
 0x8a8   : > { %v6861_v17 = vadd.f32 %v12241_v0, %v12244_v60 }
 0x8a9   : > { %v7947_v53 = vpack.c.bf16 %v7922_v27, %v7921_v29  ;;  %v12345_v28 = vadd.f32 %v9835_v7, %v8127_v54  ;;  %v9838_v29 = vld [vmem:[#allocation3 + $0x150] sm:$0xff] }
 0x8ab   : > { %8199 = vst [vmem:[#allocation3 + $0x138] sm:$0xff] %v12345_v28  ;;  %9437 = vmatmul.msk.bf16.gmra.mxu3 %vm4052_vm4, %v7947_v53  ;;  %v7196_v53 = vpop.f32.mrf.mxu0 }
 0x8ac   : > { %v7830_v37 = vpop.f32.mrf.mxu2  ;;  %v7244_v42 = vadd.f32 %v7196_v53, %v12239_v5  ;;  %v12740_v5 = vld [vmem:[#allocation18_spill] sm:$0xff] }
 0x8ad   : > { %v7887_v10 = vadd.f32 %v7830_v37, %v7629_v55  ;;  %v7243_v55 = vadd.f32 %v7193_v9, %v6859_v6  ;;  %v9841_v9 = vld [vmem:[#allocation3 + $0x168] sm:$0xff]  ;;  %v9843_v6 = vld [vmem:[#allocation3 + $0x178] sm:$0xff] }
 0x8ae   : > { %v8044_v51 = vpop.f32.mrf.mxu3 }
 0x8af   : > { %v8128_v18 = vmul.f32 %v8044_v51, %v12733_v62  ;;  %v7923_v3 = vmax.f32 %v7887_v10, 0.0  ;;  %v7587_v30 = vpop.f32.mrf.mxu1  ;;  %v7242_v62 = vadd.f32 %v7191_v20, %v12230_v44  ;;  %v12738_v44 = vld [vmem:[#allocation19_spill] sm:$0xff] }
 0x8b1   : > { %v12353_v21 = vadd.f32 %v9836_v52, %v8128_v18  ;;  %v12737_v52 = vld [vmem:[#allocation17_spill] sm:$0xff] }
 0x8b3   : > { %8200 = vst [vmem:[#allocation3 + $0x140] sm:$0xff] %v12353_v21  ;;  %v7198_v10 = vpop.f32.mrf.mxu0 }
 0x8b4   : > { %v7832_v31 = vpop.f32.mrf.mxu2 }
 0x8b5   : > { %v7888_v13 = vadd.f32 %v7832_v31, %v7630_v19  ;;  %v7633_v31 = vadd.f32 %v7582_v2, %v7242_v62 }
 0x8b6   : > { %v8046_v1 = vpop.f32.mrf.mxu3 }
 0x8b7   : > { %v7924_v41 = vmax.f32 %v7888_v13, 0.0  ;;  %v8129_v58 = vmul.f32 %v8046_v1, %v12734_v59  ;;  %v9840_v13 = vld [vmem:[#allocation3 + $0x160] sm:$0xff]  ;;  %v7589_v56 = vpop.f32.mrf.mxu1 }
 0x8b9   : > { %v7948_v26 = vpack.c.bf16 %v7924_v41, %v7923_v3  ;;  %v12357_v61 = vadd.f32 %v9837_v33, %v8129_v58  ;;  %v7634_v3 = vadd.f32 %v7584_v35, %v7243_v55  ;;  %v7245_v35 = vadd.f32 %v7198_v10, %v6861_v17  ;;  %v12741_v10 = vld [vmem:[#allocation21_spill] sm:$0xff]  ;;  %v12743_v17 = vld [vmem:[#allocation54_spill] sm:$0xff] }
 0x8bb   : > { %8201 = vst [vmem:[#allocation3 + $0x148] sm:$0xff] %v12357_v61  ;;  %9438 = vmatmul.msk.bf16.gmra.mxu3 %vm4052_vm4, %v7948_v26  ;;  %v7201_v2 = vpop.f32.mrf.mxu0 }
 0x8bc   : > { %v7835_v14 = vpop.f32.mrf.mxu2 }
 0x8bd   : > { %v7889_v54 = vadd.f32 %v7835_v14, %v7631_v47  ;;  %v12739_v47 = vld [vmem:[#allocation20_spill] sm:$0xff] }
 0x8be   : > { %v8049_v39 = vpop.f32.mrf.mxu3 }
 0x8bf   : > { %v8130_v45 = vmul.f32 %v8049_v39, %v12735_v16  ;;  %v7925_v46 = vmax.f32 %v7889_v54, 0.0  ;;  %v7592_v16 = vpop.f32.mrf.mxu1  ;;  %v9842_v54 = vld [vmem:[#allocation3 + $0x170] sm:$0xff] }
 0x8c1   : > { %v12365_v27 = vadd.f32 %v9838_v29, %v8130_v45 }
 0x8c3   : > { %8202 = vst [vmem:[#allocation3 + $0x150] sm:$0xff] %v12365_v27  ;;  %v7203_v0 = vpop.f32.mrf.mxu0 }
 0x8c4   : > { %v7837_v49 = vpop.f32.mrf.mxu2 }
 0x8c5   : > { %v7890_v12 = vadd.f32 %v7837_v49, %v7632_v25  ;;  %v7635_v25 = vadd.f32 %v7587_v30, %v7244_v42  ;;  %v6863_v30 = vadd.f32 %v12250_v32, %v12254_v22 }
 0x8c6   : > { %v8051_v7 = vpop.f32.mrf.mxu3 }
 0x8c7   : > { %v7926_v37 = vmax.f32 %v7890_v12, 0.0  ;;  %v8131_v36 = vmul.f32 %v8051_v7, %v12736_v11  ;;  %v7636_v12 = vadd.f32 %v7589_v56, %v7245_v35 }
 0x8c9   : > { %v7949_v38 = vpack.c.bf16 %v7926_v37, %v7925_v46  ;;  %v12369_v51 = vadd.f32 %v9839_v48, %v8131_v36 }
 0x8cb   : > { %8203 = vst [vmem:[#allocation3 + $0x158] sm:$0xff] %v12369_v51  ;;  %9439 = vmatmul.msk.bf16.gmra.mxu3 %vm4052_vm4, %v7949_v38  ;;  %v7594_v38 = vpop.f32.mrf.mxu1  ;;  %v7206_v55 = vpop.f32.mrf.mxu0 }
 0x8cc   : > { %v7840_v24 = vpop.f32.mrf.mxu2 }
 0x8cd   : > { %v7891_v41 = vadd.f32 %v7840_v24, %v7633_v31 }
 0x8ce   : > { %v8054_v18 = vpop.f32.mrf.mxu3 }
 0x8cf   : > { %v8132_v19 = vmul.f32 %v8054_v18, %v12737_v52  ;;  %v7927_v26 = vmax.f32 %v7891_v41, 0.0  ;;  %v7246_v18 = vadd.f32 %v7201_v2, %v12248_v15  ;;  %v12742_v15 = vld [vmem:[#allocation22_spill] sm:$0xff] }
 0x8d1   : > { %v12377_v1 = vadd.f32 %v9840_v13, %v8132_v19  ;;  %v7247_v19 = vadd.f32 %v7203_v0, %v6863_v30  ;;  %v7637_v13 = vadd.f32 %v7592_v16, %v7246_v18 }
 0x8d3   : > { %8204 = vst [vmem:[#allocation3 + $0x160] sm:$0xff] %v12377_v1  ;;  %v7597_v56 = vpop.f32.mrf.mxu1 }
 0x8d4   : > { %v7842_v50 = vpop.f32.mrf.mxu2 }
 0x8d5   : > { %v7892_v59 = vadd.f32 %v7842_v50, %v7634_v3  ;;  %v9844_v3 = vld [vmem:[#allocation3 + $0x180] sm:$0xff]  ;;  %v7638_v50 = vadd.f32 %v7594_v38, %v7247_v19 }
 0x8d6   : > { %v8056_v58 = vpop.f32.mrf.mxu3 }
 0x8d7   : > { %v7928_v33 = vmax.f32 %v7892_v59, 0.0  ;;  %v8133_v20 = vmul.f32 %v8056_v58, %v12738_v44 }
 0x8d9   : > { %v7950_v40 = vpack.c.bf16 %v7928_v33, %v7927_v26  ;;  %v12381_v14 = vadd.f32 %v9841_v9, %v8133_v20  ;;  %v7208_v20 = vpop.f32.mrf.mxu0  ;;  %v9845_v9 = vld [vmem:[#allocation3 + $0x188] sm:$0xff] }
 0x8db   : > { %8205 = vst [vmem:[#allocation3 + $0x168] sm:$0xff] %v12381_v14  ;;  %9440 = vmatmul.msk.bf16.gmra.mxu3 %vm4052_vm4, %v7950_v40  ;;  %v7599_v42 = vpop.f32.mrf.mxu1 }
 0x8dc   : > { %v7845_v39 = vpop.f32.mrf.mxu2 }
 0x8dd   : > { %v7893_v7 = vadd.f32 %v7845_v39, %v7635_v25  ;;  %v6865_v39 = vadd.f32 %v12743_v17, %v12264_v23  ;;  %v12745_v25 = vld [vmem:[#allocation23_spill] sm:$0xff] }
 0x8de   : > { %v8059_v45 = vpop.f32.mrf.mxu3 }
 0x8df   : > { %v8134_v29 = vmul.f32 %v8059_v45, %v12739_v47  ;;  %v7929_v11 = vmax.f32 %v7893_v7, 0.0  ;;  %v12744_v45 = vld [vmem:[#allocation7_spill] sm:$0xff]  ;;  %v9846_v7 = vld [vmem:[#allocation3 + $0x190] sm:$0xff] }
 0x8e0   : > { %v7248_v35 = vadd.f32 %v7206_v55, %v12744_v45  ;;  %v6867_v55 = vadd.f32 %v12321_v4, %v12272_v8  ;;  %v9850_v45 = vld [vmem:[#allocation3 + $0x1b0] sm:$0xff] }
 0x8e1   : > { %v12389_v49 = vadd.f32 %v9842_v54, %v8134_v29  ;;  %v7249_v29 = vadd.f32 %v7208_v20, %v6865_v39  ;;  %v12748_v20 = vld [vmem:[#allocation26_spill] sm:$0xff] }
 0x8e3   : > { %8206 = vst [vmem:[#allocation3 + $0x170] sm:$0xff] %v12389_v49 }
 0x8e4   : > { %v7847_v60 = vpop.f32.mrf.mxu2 }
 0x8e5   : > { %v7894_v46 = vadd.f32 %v7847_v60, %v7636_v12  ;;  %v7639_v12 = vadd.f32 %v7597_v56, %v7248_v35  ;;  %v7211_v60 = vpop.f32.mrf.mxu0 }
 0x8e6   : > { %v8061_v37 = vpop.f32.mrf.mxu3 }
 0x8e7   : > { %v7930_v36 = vmax.f32 %v7894_v46, 0.0  ;;  %v8135_v53 = vmul.f32 %v8061_v37, %v12740_v5  ;;  %v7640_v46 = vadd.f32 %v7599_v42, %v7249_v29  ;;  %v12749_v42 = vld [vmem:[#allocation27_spill] sm:$0xff]  ;;  %v12750_v29 = vld [vmem:[#allocation28_spill] sm:$0xff] }
 0x8e9   : > { %v7951_v48 = vpack.c.bf16 %v7930_v36, %v7929_v11  ;;  %v12393_v24 = vadd.f32 %v9843_v6, %v8135_v53  ;;  %v7602_v36 = vpop.f32.mrf.mxu1 }
 0x8eb   : > { %8207 = vst [vmem:[#allocation3 + $0x178] sm:$0xff] %v12393_v24  ;;  %9441 = vmatmul.msk.bf16.gmra.mxu3 %vm4052_vm4, %v7951_v48  ;;  %v12746_v48 = vld [vmem:[#allocation24_spill] sm:$0xff] }
 0x8ec   : > { %v7850_v62 = vpop.f32.mrf.mxu2 }
 0x8ed   : > { %v7895_v59 = vadd.f32 %v7850_v62, %v7637_v13  ;;  %v9847_v62 = vld [vmem:[#allocation3 + $0x198] sm:$0xff] }
 0x8ee   : > { %v8064_v52 = vpop.f32.mrf.mxu3 }
 0x8ef   : > { %v8136_v31 = vmul.f32 %v8064_v52, %v12741_v10  ;;  %v7931_v26 = vmax.f32 %v7895_v59, 0.0  ;;  %v7213_v52 = vpop.f32.mrf.mxu0  ;;  %v7250_v10 = vadd.f32 %v7211_v60, %v12268_v34  ;;  %v12751_v60 = vld [vmem:[#allocation29_spill] sm:$0xff] }
 0x8f0   : > { %v7251_v13 = vadd.f32 %v7213_v52, %v6867_v55 }
 0x8f1   : > { %v12401_v41 = vadd.f32 %v9844_v3, %v8136_v31  ;;  %v12747_v3 = vld [vmem:[#allocation25_spill] sm:$0xff]  ;;  %v7641_v59 = vadd.f32 %v7602_v36, %v7250_v10  ;;  %v12752_v36 = vld [vmem:[#allocation30_spill] sm:$0xff] }
 0x8f3   : > { %8208 = vst [vmem:[#allocation3 + $0x180] sm:$0xff] %v12401_v41 }
 0x8f4   : > { %v7852_v32 = vpop.f32.mrf.mxu2 }
 0x8f5   : > { %v7896_v22 = vadd.f32 %v7852_v32, %v7638_v50  ;;  %v7604_v50 = vpop.f32.mrf.mxu1  ;;  %v9848_v32 = vld [vmem:[#allocation3 + $0x1a0] sm:$0xff] }
 0x8f6   : > { %v8066_v58 = vpop.f32.mrf.mxu3 }
 0x8f7   : > { %v7932_v33 = vmax.f32 %v7896_v22, 0.0  ;;  %v8137_v44 = vmul.f32 %v8066_v58, %v12742_v15  ;;  %v7642_v58 = vadd.f32 %v7604_v50, %v7251_v13 }
 0x8f9   : > { %v7952_v40 = vpack.c.bf16 %v7932_v33, %v7931_v26  ;;  %v12405_v2 = vadd.f32 %v9845_v9, %v8137_v44  ;;  %v9849_v9 = vld [vmem:[#allocation3 + $0x1a8] sm:$0xff] }
 0x8fb   : > { %8209 = vst [vmem:[#allocation3 + $0x188] sm:$0xff] %v12405_v2  ;;  %9442 = vmatmul.msk.bf16.gmra.mxu3 %vm4052_vm4, %v7952_v40 }
 0x8fc   : > { %v7855_v16 = vpop.f32.mrf.mxu2 }
 0x8fd   : > { %v7897_v37 = vadd.f32 %v7855_v16, %v7639_v12 }
 0x8fe   : > { %v8069_v47 = vpop.f32.mrf.mxu3 }
 0x8ff   : > { %v8138_v54 = vmul.f32 %v8069_v47, %v12745_v25  ;;  %v7933_v53 = vmax.f32 %v7897_v37, 0.0  ;;  %v9852_v37 = vld [vmem:[#allocation3 + $0x1c0] sm:$0xff] }
 0x901   : > { %v12413_v0 = vadd.f32 %v9846_v7, %v8138_v54  ;;  %v9851_v54 = vld [vmem:[#allocation3 + $0x1b8] sm:$0xff] }
 0x903   : > { %8210 = vst [vmem:[#allocation3 + $0x190] sm:$0xff] %v12413_v0 }
 0x904   : > { %v7857_v23 = vpop.f32.mrf.mxu2 }
 0x905   : > { %v7898_v11 = vadd.f32 %v7857_v23, %v7640_v46 }
 0x906   : > { %v8071_v5 = vpop.f32.mrf.mxu3 }
 0x907   : > { %v7934_v38 = vmax.f32 %v7898_v11, 0.0  ;;  %v8139_v6 = vmul.f32 %v8071_v5, %v12746_v48 }
 0x909   : > { %v7953_v30 = vpack.c.bf16 %v7934_v38, %v7933_v53  ;;  %v12417_v18 = vadd.f32 %v9847_v62, %v8139_v6  ;;  %v9853_v53 = vld [vmem:[#allocation3 + $0x1c8] sm:$0xff]  ;;  %v9854_v62 = vld [vmem:[#allocation3 + $0x1d0] sm:$0xff] }
 0x90a   : > { %v12753_v6 = vld [vmem:[#allocation31_spill] sm:$0xff] }
 0x90b   : > { %8211 = vst [vmem:[#allocation3 + $0x198] sm:$0xff] %v12417_v18  ;;  %9443 = vmatmul.msk.bf16.gmra.mxu3 %vm4052_vm4, %v7953_v30 }
 0x90c   : > { %v7860_v19 = vpop.f32.mrf.mxu2 }
 0x90d   : > { %v7899_v26 = vadd.f32 %v7860_v19, %v7641_v59  ;;  %v12754_v19 = vld [vmem:[#allocation32_spill] sm:$0xff]  ;;  %v9856_v59 = vld [vmem:[#allocation3 + $0x1e0] sm:$0xff] }
 0x90e   : > { %v8074_v31 = vpop.f32.mrf.mxu3 }
 0x90f   : > { %v8140_v56 = vmul.f32 %v8074_v31, %v12747_v3  ;;  %v7935_v15 = vmax.f32 %v7899_v26, 0.0  ;;  %v9855_v31 = vld [vmem:[#allocation3 + $0x1d8] sm:$0xff]  ;;  %v12756_v26 = vld [vmem:[#allocation34_spill] sm:$0xff] }
 0x911   : > { %v12425_v22 = vadd.f32 %v9848_v32, %v8140_v56  ;;  %v12755_v56 = vld [vmem:[#allocation33_spill] sm:$0xff] }
 0x913   : > { %8212 = vst [vmem:[#allocation3 + $0x1a0] sm:$0xff] %v12425_v22 }
 0x914   : > { %v7862_v8 = vpop.f32.mrf.mxu2 }
 0x915   : > { %v7900_v4 = vadd.f32 %v7862_v8, %v7642_v58 }
 0x916   : > { %v8076_v33 = vpop.f32.mrf.mxu3 }
 0x917   : > { %v7936_v44 = vmax.f32 %v7900_v4, 0.0  ;;  %v8141_v34 = vmul.f32 %v8076_v33, %v12748_v20  ;;  %v9857_v4 = vld [vmem:[#allocation3 + $0x1e8] sm:$0xff] }
 0x919   : > { %v7954_v40 = vpack.c.bf16 %v7936_v44, %v7935_v15  ;;  %v12429_v17 = vadd.f32 %v9849_v9, %v8141_v34  ;;  %v12757_v44 = vld [vmem:[#allocation35_spill] sm:$0xff]  ;;  %v9858_v34 = vld [vmem:[#allocation3 + $0x1f0] sm:$0xff] }
 0x91b   : > { %8213 = vst [vmem:[#allocation3 + $0x1a8] sm:$0xff] %v12429_v17  ;;  %9444 = vmatmul.msk.bf16.gmra.mxu3 %vm4052_vm4, %v7954_v40 }
 0x91e   : > { %v8079_v39 = vpop.f32.mrf.mxu3 }
 0x91f   : > { %v8142_v16 = vmul.f32 %v8079_v39, %v12749_v42  ;;  %v12758_v39 = vld [vmem:[#allocation36_spill] sm:$0xff] }
 0x921   : > { %v12434_v35 = vadd.f32 %v9850_v45, %v8142_v16  ;;  %v9859_v16 = vld [vmem:[#allocation3 + $0x1f8] sm:$0xff] }
 0x923   : > { %8214 = vst [vmem:[#allocation3 + $0x1b0] sm:$0xff] %v12434_v35 }
 0x926   : > { %v8081_v47 = vpop.f32.mrf.mxu3 }
 0x927   : > { %v8143_v25 = vmul.f32 %v8081_v47, %v12750_v29  ;;  %v12759_v29 = vld [vmem:[#allocation37_spill] sm:$0xff] }
 0x929   : > { %v12438_v12 = vadd.f32 %v9851_v54, %v8143_v25  ;;  %v9860_v54 = vld [vmem:[#allocation3 + $0x200] sm:$0xff] }
 0x92b   : > { %8215 = vst [vmem:[#allocation3 + $0x1b8] sm:$0xff] %v12438_v12 }
 0x92e   : > { %v8084_v7 = vpop.f32.mrf.mxu3 }
 0x92f   : > { %v8144_v46 = vmul.f32 %v8084_v7, %v12751_v60 }
 0x931   : > { %v12442_v23 = vadd.f32 %v9852_v37, %v8144_v46  ;;  %v12760_v46 = vld [vmem:[#allocation38_spill] sm:$0xff] }
 0x933   : > { %8216 = vst [vmem:[#allocation3 + $0x1c0] sm:$0xff] %v12442_v23 }
 0x936   : > { %v8086_v11 = vpop.f32.mrf.mxu3 }
 0x937   : > { %v8145_v5 = vmul.f32 %v8086_v11, %v12752_v36  ;;  %v9861_v11 = vld [vmem:[#allocation3 + $0x208] sm:$0xff] }
 0x939   : > { %v12446_v38 = vadd.f32 %v9853_v53, %v8145_v5  ;;  %v12761_v53 = vld [vmem:[#allocation39_spill] sm:$0xff] }
 0x93b   : > { %8217 = vst [vmem:[#allocation3 + $0x1c8] sm:$0xff] %v12446_v38 }
 0x93e   : > { %v8089_v48 = vpop.f32.mrf.mxu3 }
 0x93f   : > { %v8146_v30 = vmul.f32 %v8089_v48, %v12753_v6  ;;  %v9862_v6 = vld [vmem:[#allocation3 + $0x210] sm:$0xff] }
 0x941   : > { %v12450_v55 = vadd.f32 %v9854_v62, %v8146_v30 }
 0x943   : > { %8218 = vst [vmem:[#allocation3 + $0x1d0] sm:$0xff] %v12450_v55 }
 0x946   : > { %v8091_v52 = vpop.f32.mrf.mxu3 }
 0x947   : > { %v8147_v10 = vmul.f32 %v8091_v52, %v12754_v19  ;;  %v12762_v52 = vld [vmem:[#allocation40_spill] sm:$0xff] }
 0x949   : > { %v12454_v13 = vadd.f32 %v9855_v31, %v8147_v10  ;;  %v9863_v10 = vld [vmem:[#allocation3 + $0x218] sm:$0xff] }
 0x94b   : > { %8219 = vst [vmem:[#allocation3 + $0x1d8] sm:$0xff] %v12454_v13 }
 0x94e   : > { %v8094_v3 = vpop.f32.mrf.mxu3 }
 0x94f   : > { %v8148_v50 = vmul.f32 %v8094_v3, %v12755_v56  ;;  %v12763_v56 = vld [vmem:[#allocation41_spill] sm:$0xff] }
 0x951   : > { %v12458_v32 = vadd.f32 %v9856_v59, %v8148_v50  ;;  %v9864_v59 = vld [vmem:[#allocation3 + $0x220] sm:$0xff] }
 0x953   : > { %8220 = vst [vmem:[#allocation3 + $0x1e0] sm:$0xff] %v12458_v32 }
 0x956   : > { %v8096_v58 = vpop.f32.mrf.mxu3 }
 0x957   : > { %v8149_v8 = vmul.f32 %v8096_v58, %v12756_v26 }
 0x959   : > { %v12462_v33 = vadd.f32 %v9857_v4, %v8149_v8  ;;  %v12764_v8 = vld [vmem:[#allocation42_spill] sm:$0xff] }
 0x95b   : > { %8221 = vst [vmem:[#allocation3 + $0x1e8] sm:$0xff] %v12462_v33 }
 0x95e   : > { %v8099_v15 = vpop.f32.mrf.mxu3 }
 0x95f   : > { %v8150_v20 = vmul.f32 %v8099_v15, %v12757_v44  ;;  %v9865_v15 = vld [vmem:[#allocation3 + $0x228] sm:$0xff] }
 0x961   : > { %v12466_v40 = vadd.f32 %v9858_v34, %v8150_v20  ;;  %v12765_v34 = vld [vmem:[#allocation43_spill] sm:$0xff] }
 0x963   : > { %8222 = vst [vmem:[#allocation3 + $0x1f0] sm:$0xff] %v12466_v40 }
 0x966   : > { %v8101_v9 = vpop.f32.mrf.mxu3 }
 0x967   : > { %v8151_v42 = vmul.f32 %v8101_v9, %v12758_v39  ;;  %v9866_v39 = vld [vmem:[#allocation3 + $0x230] sm:$0xff] }
 0x969   : > { %v12470_v45 = vadd.f32 %v9859_v16, %v8151_v42 }
 0x96b   : > { %8223 = vst [vmem:[#allocation3 + $0x1f8] sm:$0xff] %v12470_v45 }
 0x96e   : > { %v8104_v47 = vpop.f32.mrf.mxu3 }
 0x96f   : > { %v8152_v25 = vmul.f32 %v8104_v47, %v12759_v29  ;;  %v12766_v47 = vld [vmem:[#allocation44_spill] sm:$0xff] }
 0x971   : > { %v12474_v7 = vadd.f32 %v9860_v54, %v8152_v25  ;;  %v9867_v25 = vld [vmem:[#allocation3 + $0x238] sm:$0xff] }
 0x973   : > { %8224 = vst [vmem:[#allocation3 + $0x200] sm:$0xff] %v12474_v7 }
 0x976   : > { %v8106_v60 = vpop.f32.mrf.mxu3 }
 0x977   : > { %v8153_v37 = vmul.f32 %v8106_v60, %v12760_v46 }
 0x979   : > { %v12478_v36 = vadd.f32 %v9861_v11, %v8153_v37 }
 0x97b   : > { %8225 = vst [vmem:[#allocation3 + $0x208] sm:$0xff] %v12478_v36 }
 0x97e   : > { %v8109_v5 = vpop.f32.mrf.mxu3 }
 0x97f   : > { %v8154_v48 = vmul.f32 %v8109_v5, %v12761_v53 }
 0x981   : > { %v12482_v30 = vadd.f32 %v9862_v6, %v8154_v48 }
 0x983   : > { %8226 = vst [vmem:[#allocation3 + $0x210] sm:$0xff] %v12482_v30 }
 0x986   : > { %v8111_v62 = vpop.f32.mrf.mxu3 }
 0x987   : > { %v8155_v19 = vmul.f32 %v8111_v62, %v12762_v52 }
 0x989   : > { %v12486_v31 = vadd.f32 %v9863_v10, %v8155_v19 }
 0x98b   : > { %8227 = vst [vmem:[#allocation3 + $0x218] sm:$0xff] %v12486_v31 }
 0x98e   : > { %v8114_v3 = vpop.f32.mrf.mxu3 }
 0x98f   : > { %v8156_v50 = vmul.f32 %v8114_v3, %v12763_v56 }
 0x991   : > { %v12490_v58 = vadd.f32 %v9864_v59, %v8156_v50 }
 0x993   : > { %8228 = vst [vmem:[#allocation3 + $0x220] sm:$0xff] %v12490_v58 }
 0x996   : > { %v8116_v26 = vpop.f32.mrf.mxu3 }
 0x997   : > { %v8157_v4 = vmul.f32 %v8116_v26, %v12764_v8 }
 0x999   : > { %v12494_v44 = vadd.f32 %v9865_v15, %v8157_v4 }
 0x99b   : > { %8229 = vst [vmem:[#allocation3 + $0x228] sm:$0xff] %v12494_v44 }
 0x99e   : > { %v8119_v20 = vpop.f32.mrf.mxu3 }
 0x99f   : > { %v8158_v9 = vmul.f32 %v8119_v20, %v12765_v34 }
 0x9a1   : > { %v12498_v42 = vadd.f32 %v9866_v39, %v8158_v9 }
 0x9a3   : > { %8230 = vst [vmem:[#allocation3 + $0x230] sm:$0xff] %v12498_v42 }
 0x9a6   : > { %v8121_v16 = vpop.f32.mrf.mxu3 }
 0x9a7   : > { %v8159_v29 = vmul.f32 %v8121_v16, %v12766_v47  ;;  %8234 = sbr.rel (%p8926_p6) target bundleno = 2514 (0x9d2), region = 48 }
 0x9a9   : > { %v12502_v54 = vadd.f32 %v9867_v25, %v8159_v29 }
 0x9ab   : > { %8231 = vst [vmem:[#allocation3 + $0x238] sm:$0xff] %v12502_v54 }
 0x9ac   : > { %v8235_v60 = vmax.f32 %v12329_v57, 0.0  ;;  %v8236_v46 = vmax.f32 %v12333_v63, 0.0  ;;  %v8237_v37 = vmax.f32 %v12341_v43, 0.0  ;;  %v8238_v11 = vmax.f32 %v12345_v28, 0.0 }
 0x9ad   : > { %v8239_v5 = vmax.f32 %v12353_v21, 0.0  ;;  %v8240_v53 = vmax.f32 %v12357_v61, 0.0  ;;  %v8241_v48 = vmax.f32 %v12365_v27, 0.0  ;;  %v8242_v6 = vmax.f32 %v12369_v51, 0.0 }
 0x9ae   : > { %8271 = vst [vmem:[#allocation3 + $0x120] sm:$0xff] %v8235_v60  ;;  %v8243_v57 = vmax.f32 %v12377_v1, 0.0  ;;  %v8244_v63 = vmax.f32 %v12381_v14, 0.0  ;;  %v8245_v43 = vmax.f32 %v12389_v49, 0.0  ;;  %v8246_v28 = vmax.f32 %v12393_v24, 0.0 }
 0x9af   : > { %8272 = vst [vmem:[#allocation3 + $0x128] sm:$0xff] %v8236_v46  ;;  %v8247_v21 = vmax.f32 %v12401_v41, 0.0  ;;  %v8248_v61 = vmax.f32 %v12405_v2, 0.0  ;;  %v8249_v27 = vmax.f32 %v12413_v0, 0.0  ;;  %v8250_v51 = vmax.f32 %v12417_v18, 0.0 }
 0x9b0   : > { %8273 = vst [vmem:[#allocation3 + $0x130] sm:$0xff] %v8237_v37  ;;  %v8251_v1 = vmax.f32 %v12425_v22, 0.0  ;;  %v8252_v14 = vmax.f32 %v12429_v17, 0.0  ;;  %v8253_v49 = vmax.f32 %v12434_v35, 0.0  ;;  %v8254_v24 = vmax.f32 %v12438_v12, 0.0 }
 0x9b1   : > { %8274 = vst [vmem:[#allocation3 + $0x138] sm:$0xff] %v8238_v11  ;;  %v8255_v41 = vmax.f32 %v12442_v23, 0.0  ;;  %v8256_v2 = vmax.f32 %v12446_v38, 0.0  ;;  %v8257_v0 = vmax.f32 %v12450_v55, 0.0  ;;  %v8258_v18 = vmax.f32 %v12454_v13, 0.0 }
 0x9b2   : > { %8275 = vst [vmem:[#allocation3 + $0x140] sm:$0xff] %v8239_v5  ;;  %v8259_v22 = vmax.f32 %v12458_v32, 0.0  ;;  %v8260_v17 = vmax.f32 %v12462_v33, 0.0  ;;  %v8261_v35 = vmax.f32 %v12466_v40, 0.0  ;;  %v8262_v12 = vmax.f32 %v12470_v45, 0.0 }
 0x9b3   : > { %8276 = vst [vmem:[#allocation3 + $0x148] sm:$0xff] %v8240_v53  ;;  %v8263_v23 = vmax.f32 %v12474_v7, 0.0  ;;  %v8264_v38 = vmax.f32 %v12478_v36, 0.0  ;;  %v8265_v55 = vmax.f32 %v12482_v30, 0.0  ;;  %v8266_v13 = vmax.f32 %v12486_v31, 0.0 }
 0x9b4   : > { %8277 = vst [vmem:[#allocation3 + $0x150] sm:$0xff] %v8241_v48  ;;  %v8267_v32 = vmax.f32 %v12490_v58, 0.0  ;;  %v8268_v33 = vmax.f32 %v12494_v44, 0.0  ;;  %v8269_v40 = vmax.f32 %v12498_v42, 0.0  ;;  %v8270_v45 = vmax.f32 %v12502_v54, 0.0 }
 0x9b5   : > { %8278 = vst [vmem:[#allocation3 + $0x158] sm:$0xff] %v8242_v6 }
 0x9b6   : > { %8279 = vst [vmem:[#allocation3 + $0x160] sm:$0xff] %v8243_v57 }
 0x9b7   : > { %8280 = vst [vmem:[#allocation3 + $0x168] sm:$0xff] %v8244_v63 }
 0x9b8   : > { %8281 = vst [vmem:[#allocation3 + $0x170] sm:$0xff] %v8245_v43 }
 0x9b9   : > { %8282 = vst [vmem:[#allocation3 + $0x178] sm:$0xff] %v8246_v28 }
 0x9ba   : > { %8283 = vst [vmem:[#allocation3 + $0x180] sm:$0xff] %v8247_v21 }
 0x9bb   : > { %8284 = vst [vmem:[#allocation3 + $0x188] sm:$0xff] %v8248_v61 }
 0x9bc   : > { %8285 = vst [vmem:[#allocation3 + $0x190] sm:$0xff] %v8249_v27 }
 0x9bd   : > { %8286 = vst [vmem:[#allocation3 + $0x198] sm:$0xff] %v8250_v51 }
 0x9be   : > { %8287 = vst [vmem:[#allocation3 + $0x1a0] sm:$0xff] %v8251_v1 }
 0x9bf   : > { %8288 = vst [vmem:[#allocation3 + $0x1a8] sm:$0xff] %v8252_v14 }
 0x9c0   : > { %8289 = vst [vmem:[#allocation3 + $0x1b0] sm:$0xff] %v8253_v49 }
 0x9c1   : > { %8290 = vst [vmem:[#allocation3 + $0x1b8] sm:$0xff] %v8254_v24 }
 0x9c2   : > { %8291 = vst [vmem:[#allocation3 + $0x1c0] sm:$0xff] %v8255_v41 }
 0x9c3   : > { %8292 = vst [vmem:[#allocation3 + $0x1c8] sm:$0xff] %v8256_v2 }
 0x9c4   : > { %8293 = vst [vmem:[#allocation3 + $0x1d0] sm:$0xff] %v8257_v0 }
 0x9c5   : > { %8294 = vst [vmem:[#allocation3 + $0x1d8] sm:$0xff] %v8258_v18 }
 0x9c6   : > { %8295 = vst [vmem:[#allocation3 + $0x1e0] sm:$0xff] %v8259_v22 }
 0x9c7   : > { %8296 = vst [vmem:[#allocation3 + $0x1e8] sm:$0xff] %v8260_v17 }
 0x9c8   : > { %8297 = vst [vmem:[#allocation3 + $0x1f0] sm:$0xff] %v8261_v35 }
 0x9c9   : > { %8298 = vst [vmem:[#allocation3 + $0x1f8] sm:$0xff] %v8262_v12 }
 0x9ca   : > { %8299 = vst [vmem:[#allocation3 + $0x200] sm:$0xff] %v8263_v23 }
 0x9cb   : > { %8300 = vst [vmem:[#allocation3 + $0x208] sm:$0xff] %v8264_v38 }
 0x9cc   : > { %8301 = vst [vmem:[#allocation3 + $0x210] sm:$0xff] %v8265_v55 }
 0x9cd   : > { %8302 = vst [vmem:[#allocation3 + $0x218] sm:$0xff] %v8266_v13 }
 0x9ce   : > { %8303 = vst [vmem:[#allocation3 + $0x220] sm:$0xff] %v8267_v32 }
 0x9cf   : > { %8304 = vst [vmem:[#allocation3 + $0x228] sm:$0xff] %v8268_v33 }
 0x9d0   : > { %8305 = vst [vmem:[#allocation3 + $0x230] sm:$0xff] %v8269_v40 }
 0x9d1   : > { %8306 = vst [vmem:[#allocation3 + $0x238] sm:$0xff] %v8270_v45 }
 0x9d2 PF: > { %p9720_p7 = scmp.eq.s32.totalorder %s8399_s18, 1  ;;  %s8318_s28 = sshll.u32 %s12561_s4, 4  ;;  %s8319_s28 = int_to_ptr.hbm [resolvable:$true] %s8318_s28 }
 0x9d3   : > { %s9925_s10 = smov [#allocation3]   ;;  %s9926_s12 = smov 128  }
 0x9d4   : > { %s8316_s11 = sshll.u32 %s9925_s10, 4  ;;  %s9927_s13 = smov 8   ;;  %s8317_s11 = int_to_ptr.vmem [resolvable:$true] %s8316_s11 }
 0x9d5   : > { %9717 = dma.vmem_to_hbm [thread:$0]  (%p9720_p7), %s8317_s11, 9216, %s8319_s28, [#allocation4], %s9926_s12, %s9926_s12, %s9927_s13  }
 0x9d6   : > { %9909 = dma.done.wait (%p9720_p7), [#allocation4], 9216  }
 0x9d7   : > { %9911 = vsyncadd (%p9720_p7), [#allocation4], 4294958080 }
 0x9d8 PF: > { %s15_s17 = sadd.s32 1, %s9922_s17   ;;  %s12767_s15 = smov %s9918_s16 }
 0x9d9   : > { %p12_p8 = scmp.ge.s32.totalorder %s15_s17, 4   ;;  %s12768_s16 = smov %s12770_s19 }
 0x9db   :  { %14 = sbr.rel (!%p12_p8) target bundleno = 2 (0x2), region = 85 }
 0x9e0   :  { %8335 = vsyncpa [#allocation4], 1 }
 0x9e1   :  { %8337 = vsyncpa [#allocation4 + $0x1], 1 }

</bundles_post_ra>
